<compile_context>
chip_gen: v5e
topology: v5e:2x2
jax: 0.10.0
libtpu: 0.0.40
codegen_flags: <defaults>
</compile_context>

<pallas_src>
import functools

import jax
import jax.numpy as jnp
from jax.experimental import pallas as pl
from jax.experimental.pallas import tpu as pltpu

# ----------------------------------------------------------------------------
# Geometry implied by the module (fc1 expects 9216 = 64*12*12 -> 28x28 input).
# ----------------------------------------------------------------------------
H_IN, W_IN = 28, 28
C1, C2 = 32, 64
H1 = H_IN - 2            # 26: conv1 'valid' output height/width
H2 = H1 - 2              # 24: conv2 'valid' output height/width
HP = WP = H2 // 2        # 12: after 2x2 max pool
PITCH = 32               # wide-row pitch (padded conv1 width): keeps every conv2 slab
                         # read and pool read 8/16-sublane aligned (cols 26..31 junk)
A1_ROWS = H1 * PITCH     # 832 packed conv1 activation rows (row = oh*PITCH + ow)
C1G = 3 * C1             # 96: conv1 activations packed with the 3 kj column shifts
PH_CHUNK = 2             # pooled rows produced per conv2 chunk
CHUNK = PH_CHUNK * 2 * PITCH   # 128 conv2 wide rows per chunk
N_CHUNK = HP // PH_CHUNK       # 6 chunks per image
WHALF = PITCH // 2             # 16 ow-pooled columns per wide row (12 valid)
FC_K = HP * WP * C2      # 9216
FC_H = 128
FC_NPAD = 128            # fc2 output padded to a full 128-lane tile
NB = 4                   # images per conv/pool grid step (statically unrolled)

# Geometry invariants tying PITCH / A1_ROWS / chunking / pool bounds together.
# (Valid pooled outputs only ever read valid conv1 columns: max col = 2*WP-1+2 = 25.)
assert N_CHUNK * CHUNK + 2 * PITCH == A1_ROWS
assert PH_CHUNK * N_CHUNK == HP and 2 * WP == H2 and H2 + 2 == H1 and H1 + 2 == H_IN
assert 2 * WP + 1 <= H1 <= PITCH
assert CHUNK % 8 == 0 and PITCH % 16 == 0 and A1_ROWS % 8 == 0

_CONV_COMPILER_PARAMS = pltpu.CompilerParams(
    dimension_semantics=("parallel",),
    vmem_limit_bytes=32 * 1024 * 1024,
)
_FC_COMPILER_PARAMS = pltpu.CompilerParams(
    dimension_semantics=("parallel",),
    vmem_limit_bytes=48 * 1024 * 1024,
)


def _round_up(x, m):
    return (x + m - 1) // m * m


# ----------------------------------------------------------------------------
# Kernel 1: fused conv1 + ReLU + conv2 + ReLU + 2x2 maxpool, NB images per step.
# conv1 is produced directly in the "kj-shift packed" layout:
#   a1p[oh*PITCH + ow, 32*kj + c] = ReLU(conv1)[oh, ow + kj, c]
# so conv2 is 3 contiguous [CHUNK, 96] x [96, 64] matmuls (one per ki) per chunk,
# accumulated in registers (no scratch read-modify-write).
# ----------------------------------------------------------------------------
def _conv_pool_kernel(p1_ref, w1_ref, b1_ref, w2_ref, b2_ref, out_ref,
                      a1_ref, c2_ref, om_ref, *, nb):
    for n in range(nb):                                            # static unroll
        # conv1 (kj-packed): [A1_ROWS, 27*Cin] x [27*Cin, 96] -> bias -> ReLU -> bf16
        a1 = jnp.dot(p1_ref[n], w1_ref[...], preferred_element_type=jnp.float32)
        a1_ref[...] = jnp.maximum(a1 + b1_ref[...], 0.0).astype(jnp.bfloat16)

        # conv2 + pool, chunk = 128 wide rows = 4 conv2 output rows = 2 pooled rows.
        for ck in range(N_CHUNK):
            base = ck * CHUNK
            acc = None
            for ki in range(3):                                    # register accumulation
                slab = a1_ref[pl.ds(base + ki * PITCH, CHUNK), :]  # [128, 96] bf16, aligned
                part = jnp.dot(slab, w2_ref[ki], preferred_element_type=jnp.float32)
                acc = part if acc is None else acc + part
            c2_ref[...] = acc                                      # single write pass

            # ow-direction pool: two full-chunk stride-2 reads (even vs odd columns).
            om_ref[...] = jnp.maximum(
                c2_ref[pl.ds(0, CHUNK // 2, stride=2), :],
                c2_ref[pl.ds(1, CHUNK // 2, stride=2), :])         # [64, 64] f32

            # oh-direction pool: contiguous aligned 12-row reads, then bias + ReLU
            # (per-channel bias + monotone ReLU commute with the max) -> bf16 store.
            for pr in range(PH_CHUNK):
                top = om_ref[pl.ds(pr * 2 * WHALF, WP), :]
                bot = om_ref[pl.ds(pr * 2 * WHALF + WHALF, WP), :]
                m = jnp.maximum(top, bot)                          # [12, 64] f32
                res = jnp.maximum(m + b2_ref[...], 0.0).astype(out_ref.dtype)
                out_ref[n, pl.ds((ck * PH_CHUNK + pr) * WP, WP), :] = res


def conv_pool_stage(p1, w1, b1, w2, b2, nb):
    B = p1.shape[0]                      # already padded to a multiple of nb
    k27 = p1.shape[2]
    kernel = functools.partial(_conv_pool_kernel, nb=nb)
    return pl.pallas_call(
        kernel,
        out_shape=jax.ShapeDtypeStruct((B, HP * WP, C2), jnp.bfloat16),
        grid=(B // nb,),
        in_specs=[
            pl.BlockSpec((nb, A1_ROWS, k27), lambda b: (b, 0, 0)),
            pl.BlockSpec((k27, C1G), lambda b: (0, 0)),
            pl.BlockSpec((1, C1G), lambda b: (0, 0)),
            pl.BlockSpec((3, C1G, C2), lambda b: (0, 0, 0)),
            pl.BlockSpec((1, C2), lambda b: (0, 0)),
        ],
        out_specs=pl.BlockSpec((nb, HP * WP, C2), lambda b: (b, 0, 0)),
        scratch_shapes=[
            pltpu.VMEM((A1_ROWS, C1G), jnp.bfloat16),   # packed conv1 activation
            pltpu.VMEM((CHUNK, C2), jnp.float32),       # conv2 chunk (pool staging)
            pltpu.VMEM((CHUNK // 2, C2), jnp.float32),  # ow-pooled chunk
        ],
        compiler_params=_CONV_COMPILER_PARAMS,
    )(p1, w1, b1, w2, b2)


# ----------------------------------------------------------------------------
# Kernel 2: fused flatten-consumer FC1 + ReLU + FC2 (fc2 N padded to 128 lanes).
# ----------------------------------------------------------------------------
def _fc_kernel(x_ref, w1_ref, b1_ref, w2_ref, b2_ref, o_ref):
    h = jnp.dot(x_ref[...], w1_ref[...], preferred_element_type=jnp.float32)
    h = jnp.maximum(h + b1_ref[...], 0.0).astype(jnp.bfloat16)
    o = jnp.dot(h, w2_ref[...], preferred_element_type=jnp.float32)
    o_ref[...] = o + b2_ref[...]


def fc_stage(feats, w1, b1, w2, b2):
    B, K = feats.shape
    N = w2.shape[1]
    # >=2 M-tiles when B > 8 (lets "parallel" shard across v7x's two TensorCores),
    # growing to 512-row tiles for large B (HBM-bound stage on v5e/v6e).
    if B <= 8:
        tile_m = B
    else:
        tile_m = min(512, _round_up(pl.cdiv(B, 2), 8))
    grid_m = pl.cdiv(B, tile_m)
    # NOTE: a partial last M-block computes on padded/undefined rows; those rows are
    # discarded on writeback and never reduced over, so this is correct.
    return pl.pallas_call(
        _fc_kernel,
        out_shape=jax.ShapeDtypeStruct((B, N), jnp.float32),
        grid=(grid_m,),
        in_specs=[
            pl.BlockSpec((tile_m, K), lambda i: (i, 0)),
            pl.BlockSpec((K, FC_H), lambda i: (0, 0)),
            pl.BlockSpec((1, FC_H), lambda i: (0, 0)),
            pl.BlockSpec((FC_H, N), lambda i: (0, 0)),
            pl.BlockSpec((1, N), lambda i: (0, 0)),
        ],
        out_specs=pl.BlockSpec((tile_m, N), lambda i: (i, 0)),
        compiler_params=_FC_COMPILER_PARAMS,
    )(feats, w1, b1, w2, b2)


# ----------------------------------------------------------------------------
# Parameters: PyTorch-style init + one-time offline layout prep.
# ----------------------------------------------------------------------------
def init_params(key, in_dim, out_dim):
    """Deterministic PyTorch-default-style uniform(-1/sqrt(fan_in), 1/sqrt(fan_in))."""
    keys = jax.random.split(key, 8)

    def u(k, shape, fan_in):
        bound = 1.0 / jnp.sqrt(jnp.float32(fan_in))
        return jax.random.uniform(k, shape, jnp.float32, -bound, bound)

    return {
        "conv1_w": u(keys[0], (C1, in_dim, 3, 3), in_dim * 9),
        "conv1_b": u(keys[1], (C1,), in_dim * 9),
        "conv2_w": u(keys[2], (C2, C1, 3, 3), C1 * 9),
        "conv2_b": u(keys[3], (C2,), C1 * 9),
        "fc1_w":   u(keys[4], (FC_H, FC_K), FC_K),   # PyTorch Linear: [out, in]
        "fc1_b":   u(keys[5], (FC_H,), FC_K),
        "fc2_w":   u(keys[6], (out_dim, FC_H), FC_H),
        "fc2_b":   u(keys[7], (out_dim,), FC_H),
    }


def prep_params(params):
    """One-time layout prep: no transposes/reshapes/casts inside the traced forward."""
    cin = params["conv1_w"].shape[1]
    out_dim = params["fc2_w"].shape[0]
    # conv1 taps in im2col (ki, kj, ci) order, then block-diagonal over the 3 kj-shift
    # groups so one matmul produces the kj-packed [*, 96] activation.
    w1m = jnp.transpose(params["conv1_w"], (2, 3, 1, 0)).reshape(9 * cin, C1)
    w1p = jnp.zeros((3 * 9 * cin, C1G), jnp.float32)
    for g in range(3):
        w1p = w1p.at[g * 9 * cin:(g + 1) * 9 * cin, g * C1:(g + 1) * C1].set(w1m)
    b1p = jnp.tile(params["conv1_b"], 3).reshape(1, C1G)
    # conv2: [ki, (kj, cin)=96, cout] so each ki is a K=96 matmul against packed a1.
    w2 = jnp.transpose(params["conv2_w"], (2, 3, 1, 0)).reshape(3, 3 * C1, C2)
    # fc1: fold the NCHW channel-major flatten into the K ordering -> (h, w, c).
    wf1 = params["fc1_w"].reshape(FC_H, C2, HP, WP)
    wf1 = jnp.transpose(wf1, (2, 3, 1, 0)).reshape(FC_K, FC_H)
    # fc2: [out, in] -> [in, out], N padded to a full 128-lane tile.
    wf2 = jnp.zeros((FC_H, FC_NPAD), jnp.float32).at[:, :out_dim].set(params["fc2_w"].T)
    bf2 = jnp.zeros((1, FC_NPAD), jnp.float32).at[0, :out_dim].set(params["fc2_b"])
    return {
        "w1": w1p.astype(jnp.bfloat16),
        "b1": b1p.astype(jnp.float32),
        "w2": w2.astype(jnp.bfloat16),
        "b2": params["conv2_b"].reshape(1, C2).astype(jnp.float32),
        "wf1": wf1.astype(jnp.bfloat16),
        "bf1": params["fc1_b"].reshape(1, FC_H).astype(jnp.float32),
        "wf2": wf2.astype(jnp.bfloat16),
        "bf2": bf2,
    }


# ----------------------------------------------------------------------------
# Forward
# ----------------------------------------------------------------------------
def _conv1_packed_patches(x_nhwc):
    """conv1 im2col in the wide row layout (row = oh*PITCH + ow), with the three kj
    column shifts packed along the feature axis (27*Cin features, order (g, ki, kj, ci))
    so the kernel's conv2 consumes K=96-packed activations via contiguous reads."""
    B, H, W, Cin = x_nhwc.shape
    assert H == H_IN and W == W_IN, "fc1 geometry requires 28x28 inputs"
    xp = jnp.pad(x_nhwc, ((0, 0), (0, 0), (0, PITCH + 4 - W), (0, 0)))   # [B,28,36,Cin]
    cols = []
    for g in range(3):
        for ki in range(3):
            for kj in range(3):
                cols.append(xp[:, ki:ki + H1, g + kj:g + kj + PITCH, :])  # [B,26,32,Cin]
    p = jnp.stack(cols, axis=3).reshape(B, A1_ROWS, 27 * Cin)
    return p.astype(jnp.bfloat16)


@functools.partial(jax.jit, static_argnames=("out_dim",))
def convnet_forward(prepped, x_nchw, out_dim):
    B = x_nchw.shape[0]
    x = jnp.transpose(x_nchw, (0, 2, 3, 1))                               # NCHW -> NHWC
    p1 = _conv1_packed_patches(x)                                         # [B,832,27*Cin]
    nb = min(NB, B)
    b_pad = _round_up(B, nb)
    if b_pad != B:                                                        # zero-pad batch
        p1 = jnp.pad(p1, ((0, b_pad - B), (0, 0), (0, 0)))
    pooled = conv_pool_stage(p1, prepped["w1"], prepped["b1"],
                             prepped["w2"], prepped["b2"], nb)            # [Bp,144,64] bf16
    feats = pooled.reshape(b_pad, FC_K)                                   # free (contiguous)
    logits = fc_stage(feats, prepped["wf1"], prepped["bf1"],
                      prepped["wf2"], prepped["bf2"])                     # [Bp,128] f32
    return logits[:B, :out_dim]


# ----------------------------------------------------------------------------
# Pure-JAX f32 reference (PyTorch semantics) for a sanity check.
# ----------------------------------------------------------------------------
def _reference_forward(params, x_nchw):
    x = jnp.transpose(x_nchw, (0, 2, 3, 1))

    def conv(a, w, b):
        Cout, Cin, kh, kw = w.shape
        B, H, W, C = a.shape
        OH, OW = H - kh + 1, W - kw + 1
        cols = [a[:, i:i + OH, j:j + OW, :] for i in range(kh) for j in range(kw)]
        p = jnp.stack(cols, axis=3).reshape(B, OH, OW, kh * kw * C)
        wm = jnp.transpose(w, (2, 3, 1, 0)).reshape(kh * kw * Cin, Cout)
        return jnp.einsum("bhwk,kc->bhwc", p, wm) + b

    a = jax.nn.relu(conv(x, params["conv1_w"], params["conv1_b"]))
    a = jax.nn.relu(conv(a, params["conv2_w"], params["conv2_b"]))
    B, H, W, C = a.shape
    a = a.reshape(B, H // 2, 2, W // 2, 2, C).max(axis=(2, 4))
    a = jnp.transpose(a, (0, 3, 1, 2)).reshape(B, -1)                      # torch.flatten
    a = jax.nn.relu(a @ params["fc1_w"].T + params["fc1_b"])
    return a @ params["fc2_w"].T + params["fc2_b"]


if __name__ == "__main__":
    in_dim, out_dim, batch = 1, 10, 2
    key = jax.random.PRNGKey(0)
    pkey, xkey = jax.random.split(key)

    params = init_params(pkey, in_dim, out_dim)
    prepped = prep_params(params)
    # fc1 expects 9216 = 64*12*12 features => input spatial must be 28x28
    x = jax.random.normal(xkey, (batch, in_dim, H_IN, W_IN), dtype=jnp.float32)

    out = convnet_forward(prepped, x, out_dim)
    out = jax.block_until_ready(out)

    assert out.shape == (batch, out_dim), out.shape
    assert bool(jnp.all(jnp.isfinite(out)))
    ref = _reference_forward(params, x)
    assert bool(jnp.allclose(out, ref, atol=5e-2, rtol=5e-2)), (
        float(jnp.max(jnp.abs(out - ref))))
    print("KERNEL_OK")
</pallas_src>

<mosaic_0001>
module attributes {stable_mosaic.version = 11 : i64} {
  func.func @_conv_pool_kernel(%arg0: i32, %arg1: memref<2x832x27xbf16, #tpu.memory_space<vmem>>, %arg2: memref<27x96xbf16, #tpu.memory_space<vmem>>, %arg3: memref<1x96xf32, #tpu.memory_space<vmem>>, %arg4: memref<3x96x64xbf16, #tpu.memory_space<vmem>>, %arg5: memref<1x64xf32, #tpu.memory_space<vmem>>, %arg6: memref<2x144x64xbf16, #tpu.memory_space<vmem>>, %arg7: memref<832x96xbf16, #tpu.memory_space<vmem>>, %arg8: memref<128x64xf32, #tpu.memory_space<vmem>>, %arg9: memref<64x64xf32, #tpu.memory_space<vmem>>) attributes {dimension_semantics = [#tpu.dimension_semantics<parallel>], iteration_bounds = array<i64: 1>, scalar_prefetch = 0 : i64, scratch_operands = 3 : i64, tpu.core_type = #tpu.core_type<tc>, window_params = [{transform_indices = @transform_0, window_bounds = array<i64: 2, 832, 27>}, {pipeline_mode = #tpu.pipeline_mode<synchronous>, transform_indices = @transform_1, window_bounds = array<i64: 27, 96>}, {pipeline_mode = #tpu.pipeline_mode<synchronous>, transform_indices = @transform_2, window_bounds = array<i64: 1, 96>}, {pipeline_mode = #tpu.pipeline_mode<synchronous>, transform_indices = @transform_3, window_bounds = array<i64: 3, 96, 64>}, {pipeline_mode = #tpu.pipeline_mode<synchronous>, transform_indices = @transform_4, window_bounds = array<i64: 1, 64>}, {transform_indices = @transform_5, window_bounds = array<i64: 2, 144, 64>}]} {
    %c0 = arith.constant 0 : index
    %c0_0 = arith.constant 0 : index
    %c0_1 = arith.constant 0 : index
    %0 = vector.load %arg1[%c0, %c0_0, %c0_1] : memref<2x832x27xbf16, #tpu.memory_space<vmem>>, vector<1x832x27xbf16>
    %1 = vector.shape_cast %0 : vector<1x832x27xbf16> to vector<832x27xbf16>
    %c0_2 = arith.constant 0 : index
    %c0_3 = arith.constant 0 : index
    %2 = vector.load %arg2[%c0_2, %c0_3] : memref<27x96xbf16, #tpu.memory_space<vmem>>, vector<27x96xbf16>
    %cst = arith.constant dense<0.000000e+00> : vector<832x96xf32>
    %3 = tpu.matmul %1, %2, %cst {dimension_numbers = #tpu.dot_dimension_numbers<[1], [0], [0], [1], [0, 0, 1, 1], [], []>} : vector<832x27xbf16>, vector<27x96xbf16>, vector<832x96xf32> -> vector<832x96xf32>
    %c0_4 = arith.constant 0 : index
    %c0_5 = arith.constant 0 : index
    %4 = vector.load %arg3[%c0_4, %c0_5] : memref<1x96xf32, #tpu.memory_space<vmem>>, vector<1x96xf32>
    %5 = vector.broadcast %4 : vector<1x96xf32> to vector<832x96xf32>
    %6 = arith.addf %3, %5 : vector<832x96xf32>
    %cst_6 = arith.constant 0.000000e+00 : f32
    %7 = vector.broadcast %cst_6 : f32 to vector<832x96xf32>
    %8 = arith.maximumf %6, %7 : vector<832x96xf32>
    %9 = arith.truncf %8 : vector<832x96xf32> to vector<832x96xbf16>
    %c0_7 = arith.constant 0 : index
    %c0_8 = arith.constant 0 : index
    %10 = vector.load %arg7[%c0_7, %c0_8] : memref<832x96xbf16, #tpu.memory_space<vmem>>, vector<832x96xbf16>
    tpu.vector_store %arg7[%c0_7, %c0_8], %9 {strides = array<i32>} : memref<832x96xbf16, #tpu.memory_space<vmem>>, vector<832x96xbf16>,
    %c0_9 = arith.constant 0 : index
    %c0_10 = arith.constant 0 : index
    %11 = vector.load %arg7[%c0_9, %c0_10] : memref<832x96xbf16, #tpu.memory_space<vmem>>, vector<128x96xbf16>
    %c0_11 = arith.constant 0 : index
    %c0_12 = arith.constant 0 : index
    %c0_13 = arith.constant 0 : index
    %12 = vector.load %arg4[%c0_11, %c0_12, %c0_13] : memref<3x96x64xbf16, #tpu.memory_space<vmem>>, vector<1x96x64xbf16>
    %13 = vector.shape_cast %12 : vector<1x96x64xbf16> to vector<96x64xbf16>
    %cst_14 = arith.constant dense<0.000000e+00> : vector<128x64xf32>
    %14 = tpu.matmul %11, %13, %cst_14 {dimension_numbers = #tpu.dot_dimension_numbers<[1], [0], [0], [1], [0, 0, 1, 1], [], []>} : vector<128x96xbf16>, vector<96x64xbf16>, vector<128x64xf32> -> vector<128x64xf32>
    %c32 = arith.constant 32 : index
    %c0_15 = arith.constant 0 : index
    %15 = vector.load %arg7[%c32, %c0_15] : memref<832x96xbf16, #tpu.memory_space<vmem>>, vector<128x96xbf16>
    %c1 = arith.constant 1 : index
    %c0_16 = arith.constant 0 : index
    %c0_17 = arith.constant 0 : index
    %16 = vector.load %arg4[%c1, %c0_16, %c0_17] : memref<3x96x64xbf16, #tpu.memory_space<vmem>>, vector<1x96x64xbf16>
    %17 = vector.shape_cast %16 : vector<1x96x64xbf16> to vector<96x64xbf16>
    %cst_18 = arith.constant dense<0.000000e+00> : vector<128x64xf32>
    %18 = tpu.matmul %15, %17, %cst_18 {dimension_numbers = #tpu.dot_dimension_numbers<[1], [0], [0], [1], [0, 0, 1, 1], [], []>} : vector<128x96xbf16>, vector<96x64xbf16>, vector<128x64xf32> -> vector<128x64xf32>
    %19 = arith.addf %14, %18 : vector<128x64xf32>
    %c64 = arith.constant 64 : index
    %c0_19 = arith.constant 0 : index
    %20 = vector.load %arg7[%c64, %c0_19] : memref<832x96xbf16, #tpu.memory_space<vmem>>, vector<128x96xbf16>
    %c2 = arith.constant 2 : index
    %c0_20 = arith.constant 0 : index
    %c0_21 = arith.constant 0 : index
    %21 = vector.load %arg4[%c2, %c0_20, %c0_21] : memref<3x96x64xbf16, #tpu.memory_space<vmem>>, vector<1x96x64xbf16>
    %22 = vector.shape_cast %21 : vector<1x96x64xbf16> to vector<96x64xbf16>
    %cst_22 = arith.constant dense<0.000000e+00> : vector<128x64xf32>
    %23 = tpu.matmul %20, %22, %cst_22 {dimension_numbers = #tpu.dot_dimension_numbers<[1], [0], [0], [1], [0, 0, 1, 1], [], []>} : vector<128x96xbf16>, vector<96x64xbf16>, vector<128x64xf32> -> vector<128x64xf32>
    %24 = arith.addf %19, %23 : vector<128x64xf32>
    %c0_23 = arith.constant 0 : index
    %c0_24 = arith.constant 0 : index
    %25 = vector.load %arg8[%c0_23, %c0_24] : memref<128x64xf32, #tpu.memory_space<vmem>>, vector<128x64xf32>
    tpu.vector_store %arg8[%c0_23, %c0_24], %24 {strides = array<i32>} : memref<128x64xf32, #tpu.memory_space<vmem>>, vector<128x64xf32>,
    %c0_25 = arith.constant 0 : index
    %c0_26 = arith.constant 0 : index
    %26 = tpu.strided_load %arg8[%c0_25, %c0_26] {strides = array<i32: 2, 1>} : memref<128x64xf32, #tpu.memory_space<vmem>>, vector<64x64xf32>
    %c1_27 = arith.constant 1 : index
    %c0_28 = arith.constant 0 : index
    %27 = tpu.strided_load %arg8[%c1_27, %c0_28] {strides = array<i32: 2, 1>} : memref<128x64xf32, #tpu.memory_space<vmem>>, vector<64x64xf32>
    %28 = arith.maximumf %26, %27 : vector<64x64xf32>
    %c0_29 = arith.constant 0 : index
    %c0_30 = arith.constant 0 : index
    %29 = vector.load %arg9[%c0_29, %c0_30] : memref<64x64xf32, #tpu.memory_space<vmem>>, vector<64x64xf32>
    tpu.vector_store %arg9[%c0_29, %c0_30], %28 {strides = array<i32>} : memref<64x64xf32, #tpu.memory_space<vmem>>, vector<64x64xf32>,
    %c0_31 = arith.constant 0 : index
    %c0_32 = arith.constant 0 : index
    %30 = vector.load %arg9[%c0_31, %c0_32] : memref<64x64xf32, #tpu.memory_space<vmem>>, vector<12x64xf32>
    %c16 = arith.constant 16 : index
    %c0_33 = arith.constant 0 : index
    %31 = vector.load %arg9[%c16, %c0_33] : memref<64x64xf32, #tpu.memory_space<vmem>>, vector<12x64xf32>
    %32 = arith.maximumf %30, %31 : vector<12x64xf32>
    %c0_34 = arith.constant 0 : index
    %c0_35 = arith.constant 0 : index
    %33 = vector.load %arg5[%c0_34, %c0_35] : memref<1x64xf32, #tpu.memory_space<vmem>>, vector<1x64xf32>
    %34 = vector.broadcast %33 : vector<1x64xf32> to vector<12x64xf32>
    %35 = arith.addf %32, %34 : vector<12x64xf32>
    %cst_36 = arith.constant 0.000000e+00 : f32
    %36 = vector.broadcast %cst_36 : f32 to vector<12x64xf32>
    %37 = arith.maximumf %35, %36 : vector<12x64xf32>
    %38 = arith.truncf %37 : vector<12x64xf32> to vector<12x64xbf16>
    %c0_37 = arith.constant 0 : index
    %c0_38 = arith.constant 0 : index
    %c0_39 = arith.constant 0 : index
    %39 = vector.load %arg6[%c0_37, %c0_38, %c0_39] : memref<2x144x64xbf16, #tpu.memory_space<vmem>>, vector<1x12x64xbf16>
    %40 = vector.shape_cast %39 : vector<1x12x64xbf16> to vector<12x64xbf16>
    %41 = vector.shape_cast %38 : vector<12x64xbf16> to vector<1x12x64xbf16>
    tpu.vector_store %arg6[%c0_37, %c0_38, %c0_39], %41 {strides = array<i32>} : memref<2x144x64xbf16, #tpu.memory_space<vmem>>, vector<1x12x64xbf16>,
    %c32_40 = arith.constant 32 : index
    %c0_41 = arith.constant 0 : index
    %42 = vector.load %arg9[%c32_40, %c0_41] : memref<64x64xf32, #tpu.memory_space<vmem>>, vector<12x64xf32>
    %c48 = arith.constant 48 : index
    %c0_42 = arith.constant 0 : index
    %43 = vector.load %arg9[%c48, %c0_42] : memref<64x64xf32, #tpu.memory_space<vmem>>, vector<12x64xf32>
    %44 = arith.maximumf %42, %43 : vector<12x64xf32>
    %c0_43 = arith.constant 0 : index
    %c0_44 = arith.constant 0 : index
    %45 = vector.load %arg5[%c0_43, %c0_44] : memref<1x64xf32, #tpu.memory_space<vmem>>, vector<1x64xf32>
    %46 = vector.broadcast %45 : vector<1x64xf32> to vector<12x64xf32>
    %47 = arith.addf %44, %46 : vector<12x64xf32>
    %cst_45 = arith.constant 0.000000e+00 : f32
    %48 = vector.broadcast %cst_45 : f32 to vector<12x64xf32>
    %49 = arith.maximumf %47, %48 : vector<12x64xf32>
    %50 = arith.truncf %49 : vector<12x64xf32> to vector<12x64xbf16>
    %c0_46 = arith.constant 0 : index
    %c12 = arith.constant 12 : index
    %c0_47 = arith.constant 0 : index
    %51 = vector.load %arg6[%c0_46, %c12, %c0_47] : memref<2x144x64xbf16, #tpu.memory_space<vmem>>, vector<1x12x64xbf16>
    %52 = vector.shape_cast %51 : vector<1x12x64xbf16> to vector<12x64xbf16>
    %53 = vector.shape_cast %50 : vector<12x64xbf16> to vector<1x12x64xbf16>
    tpu.vector_store %arg6[%c0_46, %c12, %c0_47], %53 {strides = array<i32>} : memref<2x144x64xbf16, #tpu.memory_space<vmem>>, vector<1x12x64xbf16>,
    %c128 = arith.constant 128 : index
    %c0_48 = arith.constant 0 : index
    %54 = vector.load %arg7[%c128, %c0_48] : memref<832x96xbf16, #tpu.memory_space<vmem>>, vector<128x96xbf16>
    %c0_49 = arith.constant 0 : index
    %c0_50 = arith.constant 0 : index
    %c0_51 = arith.constant 0 : index
    %55 = vector.load %arg4[%c0_49, %c0_50, %c0_51] : memref<3x96x64xbf16, #tpu.memory_space<vmem>>, vector<1x96x64xbf16>
    %56 = vector.shape_cast %55 : vector<1x96x64xbf16> to vector<96x64xbf16>
    %cst_52 = arith.constant dense<0.000000e+00> : vector<128x64xf32>
    %57 = tpu.matmul %54, %56, %cst_52 {dimension_numbers = #tpu.dot_dimension_numbers<[1], [0], [0], [1], [0, 0, 1, 1], [], []>} : vector<128x96xbf16>, vector<96x64xbf16>, vector<128x64xf32> -> vector<128x64xf32>
    %c160 = arith.constant 160 : index
    %c0_53 = arith.constant 0 : index
    %58 = vector.load %arg7[%c160, %c0_53] : memref<832x96xbf16, #tpu.memory_space<vmem>>, vector<128x96xbf16>
    %c1_54 = arith.constant 1 : index
    %c0_55 = arith.constant 0 : index
    %c0_56 = arith.constant 0 : index
    %59 = vector.load %arg4[%c1_54, %c0_55, %c0_56] : memref<3x96x64xbf16, #tpu.memory_space<vmem>>, vector<1x96x64xbf16>
    %60 = vector.shape_cast %59 : vector<1x96x64xbf16> to vector<96x64xbf16>
    %cst_57 = arith.constant dense<0.000000e+00> : vector<128x64xf32>
    %61 = tpu.matmul %58, %60, %cst_57 {dimension_numbers = #tpu.dot_dimension_numbers<[1], [0], [0], [1], [0, 0, 1, 1], [], []>} : vector<128x96xbf16>, vector<96x64xbf16>, vector<128x64xf32> -> vector<128x64xf32>
    %62 = arith.addf %57, %61 : vector<128x64xf32>
    %c192 = arith.constant 192 : index
    %c0_58 = arith.constant 0 : index
    %63 = vector.load %arg7[%c192, %c0_58] : memref<832x96xbf16, #tpu.memory_space<vmem>>, vector<128x96xbf16>
    %c2_59 = arith.constant 2 : index
    %c0_60 = arith.constant 0 : index
    %c0_61 = arith.constant 0 : index
    %64 = vector.load %arg4[%c2_59, %c0_60, %c0_61] : memref<3x96x64xbf16, #tpu.memory_space<vmem>>, vector<1x96x64xbf16>
    %65 = vector.shape_cast %64 : vector<1x96x64xbf16> to vector<96x64xbf16>
    %cst_62 = arith.constant dense<0.000000e+00> : vector<128x64xf32>
    %66 = tpu.matmul %63, %65, %cst_62 {dimension_numbers = #tpu.dot_dimension_numbers<[1], [0], [0], [1], [0, 0, 1, 1], [], []>} : vector<128x96xbf16>, vector<96x64xbf16>, vector<128x64xf32> -> vector<128x64xf32>
    %67 = arith.addf %62, %66 : vector<128x64xf32>
    %c0_63 = arith.constant 0 : index
    %c0_64 = arith.constant 0 : index
    %68 = vector.load %arg8[%c0_63, %c0_64] : memref<128x64xf32, #tpu.memory_space<vmem>>, vector<128x64xf32>
    tpu.vector_store %arg8[%c0_63, %c0_64], %67 {strides = array<i32>} : memref<128x64xf32, #tpu.memory_space<vmem>>, vector<128x64xf32>,
    %c0_65 = arith.constant 0 : index
    %c0_66 = arith.constant 0 : index
    %69 = tpu.strided_load %arg8[%c0_65, %c0_66] {strides = array<i32: 2, 1>} : memref<128x64xf32, #tpu.memory_space<vmem>>, vector<64x64xf32>
    %c1_67 = arith.constant 1 : index
    %c0_68 = arith.constant 0 : index
    %70 = tpu.strided_load %arg8[%c1_67, %c0_68] {strides = array<i32: 2, 1>} : memref<128x64xf32, #tpu.memory_space<vmem>>, vector<64x64xf32>
    %71 = arith.maximumf %69, %70 : vector<64x64xf32>
    %c0_69 = arith.constant 0 : index
    %c0_70 = arith.constant 0 : index
    %72 = vector.load %arg9[%c0_69, %c0_70] : memref<64x64xf32, #tpu.memory_space<vmem>>, vector<64x64xf32>
    tpu.vector_store %arg9[%c0_69, %c0_70], %71 {strides = array<i32>} : memref<64x64xf32, #tpu.memory_space<vmem>>, vector<64x64xf32>,
    %c0_71 = arith.constant 0 : index
    %c0_72 = arith.constant 0 : index
    %73 = vector.load %arg9[%c0_71, %c0_72] : memref<64x64xf32, #tpu.memory_space<vmem>>, vector<12x64xf32>
    %c16_73 = arith.constant 16 : index
    %c0_74 = arith.constant 0 : index
    %74 = vector.load %arg9[%c16_73, %c0_74] : memref<64x64xf32, #tpu.memory_space<vmem>>, vector<12x64xf32>
    %75 = arith.maximumf %73, %74 : vector<12x64xf32>
    %c0_75 = arith.constant 0 : index
    %c0_76 = arith.constant 0 : index
    %76 = vector.load %arg5[%c0_75, %c0_76] : memref<1x64xf32, #tpu.memory_space<vmem>>, vector<1x64xf32>
    %77 = vector.broadcast %76 : vector<1x64xf32> to vector<12x64xf32>
    %78 = arith.addf %75, %77 : vector<12x64xf32>
    %cst_77 = arith.constant 0.000000e+00 : f32
    %79 = vector.broadcast %cst_77 : f32 to vector<12x64xf32>
    %80 = arith.maximumf %78, %79 : vector<12x64xf32>
    %81 = arith.truncf %80 : vector<12x64xf32> to vector<12x64xbf16>
    %c0_78 = arith.constant 0 : index
    %c24 = arith.constant 24 : index
    %c0_79 = arith.constant 0 : index
    %82 = vector.load %arg6[%c0_78, %c24, %c0_79] : memref<2x144x64xbf16, #tpu.memory_space<vmem>>, vector<1x12x64xbf16>
    %83 = vector.shape_cast %82 : vector<1x12x64xbf16> to vector<12x64xbf16>
    %84 = vector.shape_cast %81 : vector<12x64xbf16> to vector<1x12x64xbf16>
    tpu.vector_store %arg6[%c0_78, %c24, %c0_79], %84 {strides = array<i32>} : memref<2x144x64xbf16, #tpu.memory_space<vmem>>, vector<1x12x64xbf16>,
    %c32_80 = arith.constant 32 : index
    %c0_81 = arith.constant 0 : index
    %85 = vector.load %arg9[%c32_80, %c0_81] : memref<64x64xf32, #tpu.memory_space<vmem>>, vector<12x64xf32>
    %c48_82 = arith.constant 48 : index
    %c0_83 = arith.constant 0 : index
    %86 = vector.load %arg9[%c48_82, %c0_83] : memref<64x64xf32, #tpu.memory_space<vmem>>, vector<12x64xf32>
    %87 = arith.maximumf %85, %86 : vector<12x64xf32>
    %c0_84 = arith.constant 0 : index
    %c0_85 = arith.constant 0 : index
    %88 = vector.load %arg5[%c0_84, %c0_85] : memref<1x64xf32, #tpu.memory_space<vmem>>, vector<1x64xf32>
    %89 = vector.broadcast %88 : vector<1x64xf32> to vector<12x64xf32>
    %90 = arith.addf %87, %89 : vector<12x64xf32>
    %cst_86 = arith.constant 0.000000e+00 : f32
    %91 = vector.broadcast %cst_86 : f32 to vector<12x64xf32>
    %92 = arith.maximumf %90, %91 : vector<12x64xf32>
    %93 = arith.truncf %92 : vector<12x64xf32> to vector<12x64xbf16>
    %c0_87 = arith.constant 0 : index
    %c36 = arith.constant 36 : index
    %c0_88 = arith.constant 0 : index
    %94 = vector.load %arg6[%c0_87, %c36, %c0_88] : memref<2x144x64xbf16, #tpu.memory_space<vmem>>, vector<1x12x64xbf16>
    %95 = vector.shape_cast %94 : vector<1x12x64xbf16> to vector<12x64xbf16>
    %96 = vector.shape_cast %93 : vector<12x64xbf16> to vector<1x12x64xbf16>
    tpu.vector_store %arg6[%c0_87, %c36, %c0_88], %96 {strides = array<i32>} : memref<2x144x64xbf16, #tpu.memory_space<vmem>>, vector<1x12x64xbf16>,
    %c256 = arith.constant 256 : index
    %c0_89 = arith.constant 0 : index
    %97 = vector.load %arg7[%c256, %c0_89] : memref<832x96xbf16, #tpu.memory_space<vmem>>, vector<128x96xbf16>
    %c0_90 = arith.constant 0 : index
    %c0_91 = arith.constant 0 : index
    %c0_92 = arith.constant 0 : index
    %98 = vector.load %arg4[%c0_90, %c0_91, %c0_92] : memref<3x96x64xbf16, #tpu.memory_space<vmem>>, vector<1x96x64xbf16>
    %99 = vector.shape_cast %98 : vector<1x96x64xbf16> to vector<96x64xbf16>
    %cst_93 = arith.constant dense<0.000000e+00> : vector<128x64xf32>
    %100 = tpu.matmul %97, %99, %cst_93 {dimension_numbers = #tpu.dot_dimension_numbers<[1], [0], [0], [1], [0, 0, 1, 1], [], []>} : vector<128x96xbf16>, vector<96x64xbf16>, vector<128x64xf32> -> vector<128x64xf32>
    %c288 = arith.constant 288 : index
    %c0_94 = arith.constant 0 : index
    %101 = vector.load %arg7[%c288, %c0_94] : memref<832x96xbf16, #tpu.memory_space<vmem>>, vector<128x96xbf16>
    %c1_95 = arith.constant 1 : index
    %c0_96 = arith.constant 0 : index
    %c0_97 = arith.constant 0 : index
    %102 = vector.load %arg4[%c1_95, %c0_96, %c0_97] : memref<3x96x64xbf16, #tpu.memory_space<vmem>>, vector<1x96x64xbf16>
    %103 = vector.shape_cast %102 : vector<1x96x64xbf16> to vector<96x64xbf16>
    %cst_98 = arith.constant dense<0.000000e+00> : vector<128x64xf32>
    %104 = tpu.matmul %101, %103, %cst_98 {dimension_numbers = #tpu.dot_dimension_numbers<[1], [0], [0], [1], [0, 0, 1, 1], [], []>} : vector<128x96xbf16>, vector<96x64xbf16>, vector<128x64xf32> -> vector<128x64xf32>
    %105 = arith.addf %100, %104 : vector<128x64xf32>
    %c320 = arith.constant 320 : index
    %c0_99 = arith.constant 0 : index
    %106 = vector.load %arg7[%c320, %c0_99] : memref<832x96xbf16, #tpu.memory_space<vmem>>, vector<128x96xbf16>
    %c2_100 = arith.constant 2 : index
    %c0_101 = arith.constant 0 : index
    %c0_102 = arith.constant 0 : index
    %107 = vector.load %arg4[%c2_100, %c0_101, %c0_102] : memref<3x96x64xbf16, #tpu.memory_space<vmem>>, vector<1x96x64xbf16>
    %108 = vector.shape_cast %107 : vector<1x96x64xbf16> to vector<96x64xbf16>
    %cst_103 = arith.constant dense<0.000000e+00> : vector<128x64xf32>
    %109 = tpu.matmul %106, %108, %cst_103 {dimension_numbers = #tpu.dot_dimension_numbers<[1], [0], [0], [1], [0, 0, 1, 1], [], []>} : vector<128x96xbf16>, vector<96x64xbf16>, vector<128x64xf32> -> vector<128x64xf32>
    %110 = arith.addf %105, %109 : vector<128x64xf32>
    %c0_104 = arith.constant 0 : index
    %c0_105 = arith.constant 0 : index
    %111 = vector.load %arg8[%c0_104, %c0_105] : memref<128x64xf32, #tpu.memory_space<vmem>>, vector<128x64xf32>
    tpu.vector_store %arg8[%c0_104, %c0_105], %110 {strides = array<i32>} : memref<128x64xf32, #tpu.memory_space<vmem>>, vector<128x64xf32>,
    %c0_106 = arith.constant 0 : index
    %c0_107 = arith.constant 0 : index
    %112 = tpu.strided_load %arg8[%c0_106, %c0_107] {strides = array<i32: 2, 1>} : memref<128x64xf32, #tpu.memory_space<vmem>>, vector<64x64xf32>
    %c1_108 = arith.constant 1 : index
    %c0_109 = arith.constant 0 : index
    %113 = tpu.strided_load %arg8[%c1_108, %c0_109] {strides = array<i32: 2, 1>} : memref<128x64xf32, #tpu.memory_space<vmem>>, vector<64x64xf32>
    %114 = arith.maximumf %112, %113 : vector<64x64xf32>
    %c0_110 = arith.constant 0 : index
    %c0_111 = arith.constant 0 : index
    %115 = vector.load %arg9[%c0_110, %c0_111] : memref<64x64xf32, #tpu.memory_space<vmem>>, vector<64x64xf32>
    tpu.vector_store %arg9[%c0_110, %c0_111], %114 {strides = array<i32>} : memref<64x64xf32, #tpu.memory_space<vmem>>, vector<64x64xf32>,
    %c0_112 = arith.constant 0 : index
    %c0_113 = arith.constant 0 : index
    %116 = vector.load %arg9[%c0_112, %c0_113] : memref<64x64xf32, #tpu.memory_space<vmem>>, vector<12x64xf32>
    %c16_114 = arith.constant 16 : index
    %c0_115 = arith.constant 0 : index
    %117 = vector.load %arg9[%c16_114, %c0_115] : memref<64x64xf32, #tpu.memory_space<vmem>>, vector<12x64xf32>
    %118 = arith.maximumf %116, %117 : vector<12x64xf32>
    %c0_116 = arith.constant 0 : index
    %c0_117 = arith.constant 0 : index
    %119 = vector.load %arg5[%c0_116, %c0_117] : memref<1x64xf32, #tpu.memory_space<vmem>>, vector<1x64xf32>
    %120 = vector.broadcast %119 : vector<1x64xf32> to vector<12x64xf32>
    %121 = arith.addf %118, %120 : vector<12x64xf32>
    %cst_118 = arith.constant 0.000000e+00 : f32
    %122 = vector.broadcast %cst_118 : f32 to vector<12x64xf32>
    %123 = arith.maximumf %121, %122 : vector<12x64xf32>
    %124 = arith.truncf %123 : vector<12x64xf32> to vector<12x64xbf16>
    %c0_119 = arith.constant 0 : index
    %c48_120 = arith.constant 48 : index
    %c0_121 = arith.constant 0 : index
    %125 = vector.load %arg6[%c0_119, %c48_120, %c0_121] : memref<2x144x64xbf16, #tpu.memory_space<vmem>>, vector<1x12x64xbf16>
    %126 = vector.shape_cast %125 : vector<1x12x64xbf16> to vector<12x64xbf16>
    %127 = vector.shape_cast %124 : vector<12x64xbf16> to vector<1x12x64xbf16>
    tpu.vector_store %arg6[%c0_119, %c48_120, %c0_121], %127 {strides = array<i32>} : memref<2x144x64xbf16, #tpu.memory_space<vmem>>, vector<1x12x64xbf16>,
    %c32_122 = arith.constant 32 : index
    %c0_123 = arith.constant 0 : index
    %128 = vector.load %arg9[%c32_122, %c0_123] : memref<64x64xf32, #tpu.memory_space<vmem>>, vector<12x64xf32>
    %c48_124 = arith.constant 48 : index
    %c0_125 = arith.constant 0 : index
    %129 = vector.load %arg9[%c48_124, %c0_125] : memref<64x64xf32, #tpu.memory_space<vmem>>, vector<12x64xf32>
    %130 = arith.maximumf %128, %129 : vector<12x64xf32>
    %c0_126 = arith.constant 0 : index
    %c0_127 = arith.constant 0 : index
    %131 = vector.load %arg5[%c0_126, %c0_127] : memref<1x64xf32, #tpu.memory_space<vmem>>, vector<1x64xf32>
    %132 = vector.broadcast %131 : vector<1x64xf32> to vector<12x64xf32>
    %133 = arith.addf %130, %132 : vector<12x64xf32>
    %cst_128 = arith.constant 0.000000e+00 : f32
    %134 = vector.broadcast %cst_128 : f32 to vector<12x64xf32>
    %135 = arith.maximumf %133, %134 : vector<12x64xf32>
    %136 = arith.truncf %135 : vector<12x64xf32> to vector<12x64xbf16>
    %c0_129 = arith.constant 0 : index
    %c60 = arith.constant 60 : index
    %c0_130 = arith.constant 0 : index
    %137 = vector.load %arg6[%c0_129, %c60, %c0_130] : memref<2x144x64xbf16, #tpu.memory_space<vmem>>, vector<1x12x64xbf16>
    %138 = vector.shape_cast %137 : vector<1x12x64xbf16> to vector<12x64xbf16>
    %139 = vector.shape_cast %136 : vector<12x64xbf16> to vector<1x12x64xbf16>
    tpu.vector_store %arg6[%c0_129, %c60, %c0_130], %139 {strides = array<i32>} : memref<2x144x64xbf16, #tpu.memory_space<vmem>>, vector<1x12x64xbf16>,
    %c384 = arith.constant 384 : index
    %c0_131 = arith.constant 0 : index
    %140 = vector.load %arg7[%c384, %c0_131] : memref<832x96xbf16, #tpu.memory_space<vmem>>, vector<128x96xbf16>
    %c0_132 = arith.constant 0 : index
    %c0_133 = arith.constant 0 : index
    %c0_134 = arith.constant 0 : index
    %141 = vector.load %arg4[%c0_132, %c0_133, %c0_134] : memref<3x96x64xbf16, #tpu.memory_space<vmem>>, vector<1x96x64xbf16>
    %142 = vector.shape_cast %141 : vector<1x96x64xbf16> to vector<96x64xbf16>
    %cst_135 = arith.constant dense<0.000000e+00> : vector<128x64xf32>
    %143 = tpu.matmul %140, %142, %cst_135 {dimension_numbers = #tpu.dot_dimension_numbers<[1], [0], [0], [1], [0, 0, 1, 1], [], []>} : vector<128x96xbf16>, vector<96x64xbf16>, vector<128x64xf32> -> vector<128x64xf32>
    %c416 = arith.constant 416 : index
    %c0_136 = arith.constant 0 : index
    %144 = vector.load %arg7[%c416, %c0_136] : memref<832x96xbf16, #tpu.memory_space<vmem>>, vector<128x96xbf16>
    %c1_137 = arith.constant 1 : index
    %c0_138 = arith.constant 0 : index
    %c0_139 = arith.constant 0 : index
    %145 = vector.load %arg4[%c1_137, %c0_138, %c0_139] : memref<3x96x64xbf16, #tpu.memory_space<vmem>>, vector<1x96x64xbf16>
    %146 = vector.shape_cast %145 : vector<1x96x64xbf16> to vector<96x64xbf16>
    %cst_140 = arith.constant dense<0.000000e+00> : vector<128x64xf32>
    %147 = tpu.matmul %144, %146, %cst_140 {dimension_numbers = #tpu.dot_dimension_numbers<[1], [0], [0], [1], [0, 0, 1, 1], [], []>} : vector<128x96xbf16>, vector<96x64xbf16>, vector<128x64xf32> -> vector<128x64xf32>
    %148 = arith.addf %143, %147 : vector<128x64xf32>
    %c448 = arith.constant 448 : index
    %c0_141 = arith.constant 0 : index
    %149 = vector.load %arg7[%c448, %c0_141] : memref<832x96xbf16, #tpu.memory_space<vmem>>, vector<128x96xbf16>
    %c2_142 = arith.constant 2 : index
    %c0_143 = arith.constant 0 : index
    %c0_144 = arith.constant 0 : index
    %150 = vector.load %arg4[%c2_142, %c0_143, %c0_144] : memref<3x96x64xbf16, #tpu.memory_space<vmem>>, vector<1x96x64xbf16>
    %151 = vector.shape_cast %150 : vector<1x96x64xbf16> to vector<96x64xbf16>
    %cst_145 = arith.constant dense<0.000000e+00> : vector<128x64xf32>
    %152 = tpu.matmul %149, %151, %cst_145 {dimension_numbers = #tpu.dot_dimension_numbers<[1], [0], [0], [1], [0, 0, 1, 1], [], []>} : vector<128x96xbf16>, vector<96x64xbf16>, vector<128x64xf32> -> vector<128x64xf32>
    %153 = arith.addf %148, %152 : vector<128x64xf32>
    %c0_146 = arith.constant 0 : index
    %c0_147 = arith.constant 0 : index
    %154 = vector.load %arg8[%c0_146, %c0_147] : memref<128x64xf32, #tpu.memory_space<vmem>>, vector<128x64xf32>
    tpu.vector_store %arg8[%c0_146, %c0_147], %153 {strides = array<i32>} : memref<128x64xf32, #tpu.memory_space<vmem>>, vector<128x64xf32>,
    %c0_148 = arith.constant 0 : index
    %c0_149 = arith.constant 0 : index
    %155 = tpu.strided_load %arg8[%c0_148, %c0_149] {strides = array<i32: 2, 1>} : memref<128x64xf32, #tpu.memory_space<vmem>>, vector<64x64xf32>
    %c1_150 = arith.constant 1 : index
    %c0_151 = arith.constant 0 : index
    %156 = tpu.strided_load %arg8[%c1_150, %c0_151] {strides = array<i32: 2, 1>} : memref<128x64xf32, #tpu.memory_space<vmem>>, vector<64x64xf32>
    %157 = arith.maximumf %155, %156 : vector<64x64xf32>
    %c0_152 = arith.constant 0 : index
    %c0_153 = arith.constant 0 : index
    %158 = vector.load %arg9[%c0_152, %c0_153] : memref<64x64xf32, #tpu.memory_space<vmem>>, vector<64x64xf32>
    tpu.vector_store %arg9[%c0_152, %c0_153], %157 {strides = array<i32>} : memref<64x64xf32, #tpu.memory_space<vmem>>, vector<64x64xf32>,
    %c0_154 = arith.constant 0 : index
    %c0_155 = arith.constant 0 : index
    %159 = vector.load %arg9[%c0_154, %c0_155] : memref<64x64xf32, #tpu.memory_space<vmem>>, vector<12x64xf32>
    %c16_156 = arith.constant 16 : index
    %c0_157 = arith.constant 0 : index
    %160 = vector.load %arg9[%c16_156, %c0_157] : memref<64x64xf32, #tpu.memory_space<vmem>>, vector<12x64xf32>
    %161 = arith.maximumf %159, %160 : vector<12x64xf32>
    %c0_158 = arith.constant 0 : index
    %c0_159 = arith.constant 0 : index
    %162 = vector.load %arg5[%c0_158, %c0_159] : memref<1x64xf32, #tpu.memory_space<vmem>>, vector<1x64xf32>
    %163 = vector.broadcast %162 : vector<1x64xf32> to vector<12x64xf32>
    %164 = arith.addf %161, %163 : vector<12x64xf32>
    %cst_160 = arith.constant 0.000000e+00 : f32
    %165 = vector.broadcast %cst_160 : f32 to vector<12x64xf32>
    %166 = arith.maximumf %164, %165 : vector<12x64xf32>
    %167 = arith.truncf %166 : vector<12x64xf32> to vector<12x64xbf16>
    %c0_161 = arith.constant 0 : index
    %c72 = arith.constant 72 : index
    %c0_162 = arith.constant 0 : index
    %168 = vector.load %arg6[%c0_161, %c72, %c0_162] : memref<2x144x64xbf16, #tpu.memory_space<vmem>>, vector<1x12x64xbf16>
    %169 = vector.shape_cast %168 : vector<1x12x64xbf16> to vector<12x64xbf16>
    %170 = vector.shape_cast %167 : vector<12x64xbf16> to vector<1x12x64xbf16>
    tpu.vector_store %arg6[%c0_161, %c72, %c0_162], %170 {strides = array<i32>} : memref<2x144x64xbf16, #tpu.memory_space<vmem>>, vector<1x12x64xbf16>,
    %c32_163 = arith.constant 32 : index
    %c0_164 = arith.constant 0 : index
    %171 = vector.load %arg9[%c32_163, %c0_164] : memref<64x64xf32, #tpu.memory_space<vmem>>, vector<12x64xf32>
    %c48_165 = arith.constant 48 : index
    %c0_166 = arith.constant 0 : index
    %172 = vector.load %arg9[%c48_165, %c0_166] : memref<64x64xf32, #tpu.memory_space<vmem>>, vector<12x64xf32>
    %173 = arith.maximumf %171, %172 : vector<12x64xf32>
    %c0_167 = arith.constant 0 : index
    %c0_168 = arith.constant 0 : index
    %174 = vector.load %arg5[%c0_167, %c0_168] : memref<1x64xf32, #tpu.memory_space<vmem>>, vector<1x64xf32>
    %175 = vector.broadcast %174 : vector<1x64xf32> to vector<12x64xf32>
    %176 = arith.addf %173, %175 : vector<12x64xf32>
    %cst_169 = arith.constant 0.000000e+00 : f32
    %177 = vector.broadcast %cst_169 : f32 to vector<12x64xf32>
    %178 = arith.maximumf %176, %177 : vector<12x64xf32>
    %179 = arith.truncf %178 : vector<12x64xf32> to vector<12x64xbf16>
    %c0_170 = arith.constant 0 : index
    %c84 = arith.constant 84 : index
    %c0_171 = arith.constant 0 : index
    %180 = vector.load %arg6[%c0_170, %c84, %c0_171] : memref<2x144x64xbf16, #tpu.memory_space<vmem>>, vector<1x12x64xbf16>
    %181 = vector.shape_cast %180 : vector<1x12x64xbf16> to vector<12x64xbf16>
    %182 = vector.shape_cast %179 : vector<12x64xbf16> to vector<1x12x64xbf16>
    tpu.vector_store %arg6[%c0_170, %c84, %c0_171], %182 {strides = array<i32>} : memref<2x144x64xbf16, #tpu.memory_space<vmem>>, vector<1x12x64xbf16>,
    %c512 = arith.constant 512 : index
    %c0_172 = arith.constant 0 : index
    %183 = vector.load %arg7[%c512, %c0_172] : memref<832x96xbf16, #tpu.memory_space<vmem>>, vector<128x96xbf16>
    %c0_173 = arith.constant 0 : index
    %c0_174 = arith.constant 0 : index
    %c0_175 = arith.constant 0 : index
    %184 = vector.load %arg4[%c0_173, %c0_174, %c0_175] : memref<3x96x64xbf16, #tpu.memory_space<vmem>>, vector<1x96x64xbf16>
    %185 = vector.shape_cast %184 : vector<1x96x64xbf16> to vector<96x64xbf16>
    %cst_176 = arith.constant dense<0.000000e+00> : vector<128x64xf32>
    %186 = tpu.matmul %183, %185, %cst_176 {dimension_numbers = #tpu.dot_dimension_numbers<[1], [0], [0], [1], [0, 0, 1, 1], [], []>} : vector<128x96xbf16>, vector<96x64xbf16>, vector<128x64xf32> -> vector<128x64xf32>
    %c544 = arith.constant 544 : index
    %c0_177 = arith.constant 0 : index
    %187 = vector.load %arg7[%c544, %c0_177] : memref<832x96xbf16, #tpu.memory_space<vmem>>, vector<128x96xbf16>
    %c1_178 = arith.constant 1 : index
    %c0_179 = arith.constant 0 : index
    %c0_180 = arith.constant 0 : index
    %188 = vector.load %arg4[%c1_178, %c0_179, %c0_180] : memref<3x96x64xbf16, #tpu.memory_space<vmem>>, vector<1x96x64xbf16>
    %189 = vector.shape_cast %188 : vector<1x96x64xbf16> to vector<96x64xbf16>
    %cst_181 = arith.constant dense<0.000000e+00> : vector<128x64xf32>
    %190 = tpu.matmul %187, %189, %cst_181 {dimension_numbers = #tpu.dot_dimension_numbers<[1], [0], [0], [1], [0, 0, 1, 1], [], []>} : vector<128x96xbf16>, vector<96x64xbf16>, vector<128x64xf32> -> vector<128x64xf32>
    %191 = arith.addf %186, %190 : vector<128x64xf32>
    %c576 = arith.constant 576 : index
    %c0_182 = arith.constant 0 : index
    %192 = vector.load %arg7[%c576, %c0_182] : memref<832x96xbf16, #tpu.memory_space<vmem>>, vector<128x96xbf16>
    %c2_183 = arith.constant 2 : index
    %c0_184 = arith.constant 0 : index
    %c0_185 = arith.constant 0 : index
    %193 = vector.load %arg4[%c2_183, %c0_184, %c0_185] : memref<3x96x64xbf16, #tpu.memory_space<vmem>>, vector<1x96x64xbf16>
    %194 = vector.shape_cast %193 : vector<1x96x64xbf16> to vector<96x64xbf16>
    %cst_186 = arith.constant dense<0.000000e+00> : vector<128x64xf32>
    %195 = tpu.matmul %192, %194, %cst_186 {dimension_numbers = #tpu.dot_dimension_numbers<[1], [0], [0], [1], [0, 0, 1, 1], [], []>} : vector<128x96xbf16>, vector<96x64xbf16>, vector<128x64xf32> -> vector<128x64xf32>
    %196 = arith.addf %191, %195 : vector<128x64xf32>
    %c0_187 = arith.constant 0 : index
    %c0_188 = arith.constant 0 : index
    %197 = vector.load %arg8[%c0_187, %c0_188] : memref<128x64xf32, #tpu.memory_space<vmem>>, vector<128x64xf32>
    tpu.vector_store %arg8[%c0_187, %c0_188], %196 {strides = array<i32>} : memref<128x64xf32, #tpu.memory_space<vmem>>, vector<128x64xf32>,
    %c0_189 = arith.constant 0 : index
    %c0_190 = arith.constant 0 : index
    %198 = tpu.strided_load %arg8[%c0_189, %c0_190] {strides = array<i32: 2, 1>} : memref<128x64xf32, #tpu.memory_space<vmem>>, vector<64x64xf32>
    %c1_191 = arith.constant 1 : index
    %c0_192 = arith.constant 0 : index
    %199 = tpu.strided_load %arg8[%c1_191, %c0_192] {strides = array<i32: 2, 1>} : memref<128x64xf32, #tpu.memory_space<vmem>>, vector<64x64xf32>
    %200 = arith.maximumf %198, %199 : vector<64x64xf32>
    %c0_193 = arith.constant 0 : index
    %c0_194 = arith.constant 0 : index
    %201 = vector.load %arg9[%c0_193, %c0_194] : memref<64x64xf32, #tpu.memory_space<vmem>>, vector<64x64xf32>
    tpu.vector_store %arg9[%c0_193, %c0_194], %200 {strides = array<i32>} : memref<64x64xf32, #tpu.memory_space<vmem>>, vector<64x64xf32>,
    %c0_195 = arith.constant 0 : index
    %c0_196 = arith.constant 0 : index
    %202 = vector.load %arg9[%c0_195, %c0_196] : memref<64x64xf32, #tpu.memory_space<vmem>>, vector<12x64xf32>
    %c16_197 = arith.constant 16 : index
    %c0_198 = arith.constant 0 : index
    %203 = vector.load %arg9[%c16_197, %c0_198] : memref<64x64xf32, #tpu.memory_space<vmem>>, vector<12x64xf32>
    %204 = arith.maximumf %202, %203 : vector<12x64xf32>
    %c0_199 = arith.constant 0 : index
    %c0_200 = arith.constant 0 : index
    %205 = vector.load %arg5[%c0_199, %c0_200] : memref<1x64xf32, #tpu.memory_space<vmem>>, vector<1x64xf32>
    %206 = vector.broadcast %205 : vector<1x64xf32> to vector<12x64xf32>
    %207 = arith.addf %204, %206 : vector<12x64xf32>
    %cst_201 = arith.constant 0.000000e+00 : f32
    %208 = vector.broadcast %cst_201 : f32 to vector<12x64xf32>
    %209 = arith.maximumf %207, %208 : vector<12x64xf32>
    %210 = arith.truncf %209 : vector<12x64xf32> to vector<12x64xbf16>
    %c0_202 = arith.constant 0 : index
    %c96 = arith.constant 96 : index
    %c0_203 = arith.constant 0 : index
    %211 = vector.load %arg6[%c0_202, %c96, %c0_203] : memref<2x144x64xbf16, #tpu.memory_space<vmem>>, vector<1x12x64xbf16>
    %212 = vector.shape_cast %211 : vector<1x12x64xbf16> to vector<12x64xbf16>
    %213 = vector.shape_cast %210 : vector<12x64xbf16> to vector<1x12x64xbf16>
    tpu.vector_store %arg6[%c0_202, %c96, %c0_203], %213 {strides = array<i32>} : memref<2x144x64xbf16, #tpu.memory_space<vmem>>, vector<1x12x64xbf16>,
    %c32_204 = arith.constant 32 : index
    %c0_205 = arith.constant 0 : index
    %214 = vector.load %arg9[%c32_204, %c0_205] : memref<64x64xf32, #tpu.memory_space<vmem>>, vector<12x64xf32>
    %c48_206 = arith.constant 48 : index
    %c0_207 = arith.constant 0 : index
    %215 = vector.load %arg9[%c48_206, %c0_207] : memref<64x64xf32, #tpu.memory_space<vmem>>, vector<12x64xf32>
    %216 = arith.maximumf %214, %215 : vector<12x64xf32>
    %c0_208 = arith.constant 0 : index
    %c0_209 = arith.constant 0 : index
    %217 = vector.load %arg5[%c0_208, %c0_209] : memref<1x64xf32, #tpu.memory_space<vmem>>, vector<1x64xf32>
    %218 = vector.broadcast %217 : vector<1x64xf32> to vector<12x64xf32>
    %219 = arith.addf %216, %218 : vector<12x64xf32>
    %cst_210 = arith.constant 0.000000e+00 : f32
    %220 = vector.broadcast %cst_210 : f32 to vector<12x64xf32>
    %221 = arith.maximumf %219, %220 : vector<12x64xf32>
    %222 = arith.truncf %221 : vector<12x64xf32> to vector<12x64xbf16>
    %c0_211 = arith.constant 0 : index
    %c108 = arith.constant 108 : index
    %c0_212 = arith.constant 0 : index
    %223 = vector.load %arg6[%c0_211, %c108, %c0_212] : memref<2x144x64xbf16, #tpu.memory_space<vmem>>, vector<1x12x64xbf16>
    %224 = vector.shape_cast %223 : vector<1x12x64xbf16> to vector<12x64xbf16>
    %225 = vector.shape_cast %222 : vector<12x64xbf16> to vector<1x12x64xbf16>
    tpu.vector_store %arg6[%c0_211, %c108, %c0_212], %225 {strides = array<i32>} : memref<2x144x64xbf16, #tpu.memory_space<vmem>>, vector<1x12x64xbf16>,
    %c640 = arith.constant 640 : index
    %c0_213 = arith.constant 0 : index
    %226 = vector.load %arg7[%c640, %c0_213] : memref<832x96xbf16, #tpu.memory_space<vmem>>, vector<128x96xbf16>
    %c0_214 = arith.constant 0 : index
    %c0_215 = arith.constant 0 : index
    %c0_216 = arith.constant 0 : index
    %227 = vector.load %arg4[%c0_214, %c0_215, %c0_216] : memref<3x96x64xbf16, #tpu.memory_space<vmem>>, vector<1x96x64xbf16>
    %228 = vector.shape_cast %227 : vector<1x96x64xbf16> to vector<96x64xbf16>
    %cst_217 = arith.constant dense<0.000000e+00> : vector<128x64xf32>
    %229 = tpu.matmul %226, %228, %cst_217 {dimension_numbers = #tpu.dot_dimension_numbers<[1], [0], [0], [1], [0, 0, 1, 1], [], []>} : vector<128x96xbf16>, vector<96x64xbf16>, vector<128x64xf32> -> vector<128x64xf32>
    %c672 = arith.constant 672 : index
    %c0_218 = arith.constant 0 : index
    %230 = vector.load %arg7[%c672, %c0_218] : memref<832x96xbf16, #tpu.memory_space<vmem>>, vector<128x96xbf16>
    %c1_219 = arith.constant 1 : index
    %c0_220 = arith.constant 0 : index
    %c0_221 = arith.constant 0 : index
    %231 = vector.load %arg4[%c1_219, %c0_220, %c0_221] : memref<3x96x64xbf16, #tpu.memory_space<vmem>>, vector<1x96x64xbf16>
    %232 = vector.shape_cast %231 : vector<1x96x64xbf16> to vector<96x64xbf16>
    %cst_222 = arith.constant dense<0.000000e+00> : vector<128x64xf32>
    %233 = tpu.matmul %230, %232, %cst_222 {dimension_numbers = #tpu.dot_dimension_numbers<[1], [0], [0], [1], [0, 0, 1, 1], [], []>} : vector<128x96xbf16>, vector<96x64xbf16>, vector<128x64xf32> -> vector<128x64xf32>
    %234 = arith.addf %229, %233 : vector<128x64xf32>
    %c704 = arith.constant 704 : index
    %c0_223 = arith.constant 0 : index
    %235 = vector.load %arg7[%c704, %c0_223] : memref<832x96xbf16, #tpu.memory_space<vmem>>, vector<128x96xbf16>
    %c2_224 = arith.constant 2 : index
    %c0_225 = arith.constant 0 : index
    %c0_226 = arith.constant 0 : index
    %236 = vector.load %arg4[%c2_224, %c0_225, %c0_226] : memref<3x96x64xbf16, #tpu.memory_space<vmem>>, vector<1x96x64xbf16>
    %237 = vector.shape_cast %236 : vector<1x96x64xbf16> to vector<96x64xbf16>
    %cst_227 = arith.constant dense<0.000000e+00> : vector<128x64xf32>
    %238 = tpu.matmul %235, %237, %cst_227 {dimension_numbers = #tpu.dot_dimension_numbers<[1], [0], [0], [1], [0, 0, 1, 1], [], []>} : vector<128x96xbf16>, vector<96x64xbf16>, vector<128x64xf32> -> vector<128x64xf32>
    %239 = arith.addf %234, %238 : vector<128x64xf32>
    %c0_228 = arith.constant 0 : index
    %c0_229 = arith.constant 0 : index
    %240 = vector.load %arg8[%c0_228, %c0_229] : memref<128x64xf32, #tpu.memory_space<vmem>>, vector<128x64xf32>
    tpu.vector_store %arg8[%c0_228, %c0_229], %239 {strides = array<i32>} : memref<128x64xf32, #tpu.memory_space<vmem>>, vector<128x64xf32>,
    %c0_230 = arith.constant 0 : index
    %c0_231 = arith.constant 0 : index
    %241 = tpu.strided_load %arg8[%c0_230, %c0_231] {strides = array<i32: 2, 1>} : memref<128x64xf32, #tpu.memory_space<vmem>>, vector<64x64xf32>
    %c1_232 = arith.constant 1 : index
    %c0_233 = arith.constant 0 : index
    %242 = tpu.strided_load %arg8[%c1_232, %c0_233] {strides = array<i32: 2, 1>} : memref<128x64xf32, #tpu.memory_space<vmem>>, vector<64x64xf32>
    %243 = arith.maximumf %241, %242 : vector<64x64xf32>
    %c0_234 = arith.constant 0 : index
    %c0_235 = arith.constant 0 : index
    %244 = vector.load %arg9[%c0_234, %c0_235] : memref<64x64xf32, #tpu.memory_space<vmem>>, vector<64x64xf32>
    tpu.vector_store %arg9[%c0_234, %c0_235], %243 {strides = array<i32>} : memref<64x64xf32, #tpu.memory_space<vmem>>, vector<64x64xf32>,
    %c0_236 = arith.constant 0 : index
    %c0_237 = arith.constant 0 : index
    %245 = vector.load %arg9[%c0_236, %c0_237] : memref<64x64xf32, #tpu.memory_space<vmem>>, vector<12x64xf32>
    %c16_238 = arith.constant 16 : index
    %c0_239 = arith.constant 0 : index
    %246 = vector.load %arg9[%c16_238, %c0_239] : memref<64x64xf32, #tpu.memory_space<vmem>>, vector<12x64xf32>
    %247 = arith.maximumf %245, %246 : vector<12x64xf32>
    %c0_240 = arith.constant 0 : index
    %c0_241 = arith.constant 0 : index
    %248 = vector.load %arg5[%c0_240, %c0_241] : memref<1x64xf32, #tpu.memory_space<vmem>>, vector<1x64xf32>
    %249 = vector.broadcast %248 : vector<1x64xf32> to vector<12x64xf32>
    %250 = arith.addf %247, %249 : vector<12x64xf32>
    %cst_242 = arith.constant 0.000000e+00 : f32
    %251 = vector.broadcast %cst_242 : f32 to vector<12x64xf32>
    %252 = arith.maximumf %250, %251 : vector<12x64xf32>
    %253 = arith.truncf %252 : vector<12x64xf32> to vector<12x64xbf16>
    %c0_243 = arith.constant 0 : index
    %c120 = arith.constant 120 : index
    %c0_244 = arith.constant 0 : index
    %254 = vector.load %arg6[%c0_243, %c120, %c0_244] : memref<2x144x64xbf16, #tpu.memory_space<vmem>>, vector<1x12x64xbf16>
    %255 = vector.shape_cast %254 : vector<1x12x64xbf16> to vector<12x64xbf16>
    %256 = vector.shape_cast %253 : vector<12x64xbf16> to vector<1x12x64xbf16>
    tpu.vector_store %arg6[%c0_243, %c120, %c0_244], %256 {strides = array<i32>} : memref<2x144x64xbf16, #tpu.memory_space<vmem>>, vector<1x12x64xbf16>,
    %c32_245 = arith.constant 32 : index
    %c0_246 = arith.constant 0 : index
    %257 = vector.load %arg9[%c32_245, %c0_246] : memref<64x64xf32, #tpu.memory_space<vmem>>, vector<12x64xf32>
    %c48_247 = arith.constant 48 : index
    %c0_248 = arith.constant 0 : index
    %258 = vector.load %arg9[%c48_247, %c0_248] : memref<64x64xf32, #tpu.memory_space<vmem>>, vector<12x64xf32>
    %259 = arith.maximumf %257, %258 : vector<12x64xf32>
    %c0_249 = arith.constant 0 : index
    %c0_250 = arith.constant 0 : index
    %260 = vector.load %arg5[%c0_249, %c0_250] : memref<1x64xf32, #tpu.memory_space<vmem>>, vector<1x64xf32>
    %261 = vector.broadcast %260 : vector<1x64xf32> to vector<12x64xf32>
    %262 = arith.addf %259, %261 : vector<12x64xf32>
    %cst_251 = arith.constant 0.000000e+00 : f32
    %263 = vector.broadcast %cst_251 : f32 to vector<12x64xf32>
    %264 = arith.maximumf %262, %263 : vector<12x64xf32>
    %265 = arith.truncf %264 : vector<12x64xf32> to vector<12x64xbf16>
    %c0_252 = arith.constant 0 : index
    %c132 = arith.constant 132 : index
    %c0_253 = arith.constant 0 : index
    %266 = vector.load %arg6[%c0_252, %c132, %c0_253] : memref<2x144x64xbf16, #tpu.memory_space<vmem>>, vector<1x12x64xbf16>
    %267 = vector.shape_cast %266 : vector<1x12x64xbf16> to vector<12x64xbf16>
    %268 = vector.shape_cast %265 : vector<12x64xbf16> to vector<1x12x64xbf16>
    tpu.vector_store %arg6[%c0_252, %c132, %c0_253], %268 {strides = array<i32>} : memref<2x144x64xbf16, #tpu.memory_space<vmem>>, vector<1x12x64xbf16>,
    %c1_254 = arith.constant 1 : index
    %c0_255 = arith.constant 0 : index
    %c0_256 = arith.constant 0 : index
    %269 = vector.load %arg1[%c1_254, %c0_255, %c0_256] : memref<2x832x27xbf16, #tpu.memory_space<vmem>>, vector<1x832x27xbf16>
    %270 = vector.shape_cast %269 : vector<1x832x27xbf16> to vector<832x27xbf16>
    %c0_257 = arith.constant 0 : index
    %c0_258 = arith.constant 0 : index
    %271 = vector.load %arg2[%c0_257, %c0_258] : memref<27x96xbf16, #tpu.memory_space<vmem>>, vector<27x96xbf16>
    %cst_259 = arith.constant dense<0.000000e+00> : vector<832x96xf32>
    %272 = tpu.matmul %270, %271, %cst_259 {dimension_numbers = #tpu.dot_dimension_numbers<[1], [0], [0], [1], [0, 0, 1, 1], [], []>} : vector<832x27xbf16>, vector<27x96xbf16>, vector<832x96xf32> -> vector<832x96xf32>
    %c0_260 = arith.constant 0 : index
    %c0_261 = arith.constant 0 : index
    %273 = vector.load %arg3[%c0_260, %c0_261] : memref<1x96xf32, #tpu.memory_space<vmem>>, vector<1x96xf32>
    %274 = vector.broadcast %273 : vector<1x96xf32> to vector<832x96xf32>
    %275 = arith.addf %272, %274 : vector<832x96xf32>
    %cst_262 = arith.constant 0.000000e+00 : f32
    %276 = vector.broadcast %cst_262 : f32 to vector<832x96xf32>
    %277 = arith.maximumf %275, %276 : vector<832x96xf32>
    %278 = arith.truncf %277 : vector<832x96xf32> to vector<832x96xbf16>
    %c0_263 = arith.constant 0 : index
    %c0_264 = arith.constant 0 : index
    %279 = vector.load %arg7[%c0_263, %c0_264] : memref<832x96xbf16, #tpu.memory_space<vmem>>, vector<832x96xbf16>
    tpu.vector_store %arg7[%c0_263, %c0_264], %278 {strides = array<i32>} : memref<832x96xbf16, #tpu.memory_space<vmem>>, vector<832x96xbf16>,
    %c0_265 = arith.constant 0 : index
    %c0_266 = arith.constant 0 : index
    %280 = vector.load %arg7[%c0_265, %c0_266] : memref<832x96xbf16, #tpu.memory_space<vmem>>, vector<128x96xbf16>
    %c0_267 = arith.constant 0 : index
    %c0_268 = arith.constant 0 : index
    %c0_269 = arith.constant 0 : index
    %281 = vector.load %arg4[%c0_267, %c0_268, %c0_269] : memref<3x96x64xbf16, #tpu.memory_space<vmem>>, vector<1x96x64xbf16>
    %282 = vector.shape_cast %281 : vector<1x96x64xbf16> to vector<96x64xbf16>
    %cst_270 = arith.constant dense<0.000000e+00> : vector<128x64xf32>
    %283 = tpu.matmul %280, %282, %cst_270 {dimension_numbers = #tpu.dot_dimension_numbers<[1], [0], [0], [1], [0, 0, 1, 1], [], []>} : vector<128x96xbf16>, vector<96x64xbf16>, vector<128x64xf32> -> vector<128x64xf32>
    %c32_271 = arith.constant 32 : index
    %c0_272 = arith.constant 0 : index
    %284 = vector.load %arg7[%c32_271, %c0_272] : memref<832x96xbf16, #tpu.memory_space<vmem>>, vector<128x96xbf16>
    %c1_273 = arith.constant 1 : index
    %c0_274 = arith.constant 0 : index
    %c0_275 = arith.constant 0 : index
    %285 = vector.load %arg4[%c1_273, %c0_274, %c0_275] : memref<3x96x64xbf16, #tpu.memory_space<vmem>>, vector<1x96x64xbf16>
    %286 = vector.shape_cast %285 : vector<1x96x64xbf16> to vector<96x64xbf16>
    %cst_276 = arith.constant dense<0.000000e+00> : vector<128x64xf32>
    %287 = tpu.matmul %284, %286, %cst_276 {dimension_numbers = #tpu.dot_dimension_numbers<[1], [0], [0], [1], [0, 0, 1, 1], [], []>} : vector<128x96xbf16>, vector<96x64xbf16>, vector<128x64xf32> -> vector<128x64xf32>
    %288 = arith.addf %283, %287 : vector<128x64xf32>
    %c64_277 = arith.constant 64 : index
    %c0_278 = arith.constant 0 : index
    %289 = vector.load %arg7[%c64_277, %c0_278] : memref<832x96xbf16, #tpu.memory_space<vmem>>, vector<128x96xbf16>
    %c2_279 = arith.constant 2 : index
    %c0_280 = arith.constant 0 : index
    %c0_281 = arith.constant 0 : index
    %290 = vector.load %arg4[%c2_279, %c0_280, %c0_281] : memref<3x96x64xbf16, #tpu.memory_space<vmem>>, vector<1x96x64xbf16>
    %291 = vector.shape_cast %290 : vector<1x96x64xbf16> to vector<96x64xbf16>
    %cst_282 = arith.constant dense<0.000000e+00> : vector<128x64xf32>
    %292 = tpu.matmul %289, %291, %cst_282 {dimension_numbers = #tpu.dot_dimension_numbers<[1], [0], [0], [1], [0, 0, 1, 1], [], []>} : vector<128x96xbf16>, vector<96x64xbf16>, vector<128x64xf32> -> vector<128x64xf32>
    %293 = arith.addf %288, %292 : vector<128x64xf32>
    %c0_283 = arith.constant 0 : index
    %c0_284 = arith.constant 0 : index
    %294 = vector.load %arg8[%c0_283, %c0_284] : memref<128x64xf32, #tpu.memory_space<vmem>>, vector<128x64xf32>
    tpu.vector_store %arg8[%c0_283, %c0_284], %293 {strides = array<i32>} : memref<128x64xf32, #tpu.memory_space<vmem>>, vector<128x64xf32>,
    %c0_285 = arith.constant 0 : index
    %c0_286 = arith.constant 0 : index
    %295 = tpu.strided_load %arg8[%c0_285, %c0_286] {strides = array<i32: 2, 1>} : memref<128x64xf32, #tpu.memory_space<vmem>>, vector<64x64xf32>
    %c1_287 = arith.constant 1 : index
    %c0_288 = arith.constant 0 : index
    %296 = tpu.strided_load %arg8[%c1_287, %c0_288] {strides = array<i32: 2, 1>} : memref<128x64xf32, #tpu.memory_space<vmem>>, vector<64x64xf32>
    %297 = arith.maximumf %295, %296 : vector<64x64xf32>
    %c0_289 = arith.constant 0 : index
    %c0_290 = arith.constant 0 : index
    %298 = vector.load %arg9[%c0_289, %c0_290] : memref<64x64xf32, #tpu.memory_space<vmem>>, vector<64x64xf32>
    tpu.vector_store %arg9[%c0_289, %c0_290], %297 {strides = array<i32>} : memref<64x64xf32, #tpu.memory_space<vmem>>, vector<64x64xf32>,
    %c0_291 = arith.constant 0 : index
    %c0_292 = arith.constant 0 : index
    %299 = vector.load %arg9[%c0_291, %c0_292] : memref<64x64xf32, #tpu.memory_space<vmem>>, vector<12x64xf32>
    %c16_293 = arith.constant 16 : index
    %c0_294 = arith.constant 0 : index
    %300 = vector.load %arg9[%c16_293, %c0_294] : memref<64x64xf32, #tpu.memory_space<vmem>>, vector<12x64xf32>
    %301 = arith.maximumf %299, %300 : vector<12x64xf32>
    %c0_295 = arith.constant 0 : index
    %c0_296 = arith.constant 0 : index
    %302 = vector.load %arg5[%c0_295, %c0_296] : memref<1x64xf32, #tpu.memory_space<vmem>>, vector<1x64xf32>
    %303 = vector.broadcast %302 : vector<1x64xf32> to vector<12x64xf32>
    %304 = arith.addf %301, %303 : vector<12x64xf32>
    %cst_297 = arith.constant 0.000000e+00 : f32
    %305 = vector.broadcast %cst_297 : f32 to vector<12x64xf32>
    %306 = arith.maximumf %304, %305 : vector<12x64xf32>
    %307 = arith.truncf %306 : vector<12x64xf32> to vector<12x64xbf16>
    %c1_298 = arith.constant 1 : index
    %c0_299 = arith.constant 0 : index
    %c0_300 = arith.constant 0 : index
    %308 = vector.load %arg6[%c1_298, %c0_299, %c0_300] : memref<2x144x64xbf16, #tpu.memory_space<vmem>>, vector<1x12x64xbf16>
    %309 = vector.shape_cast %308 : vector<1x12x64xbf16> to vector<12x64xbf16>
    %310 = vector.shape_cast %307 : vector<12x64xbf16> to vector<1x12x64xbf16>
    tpu.vector_store %arg6[%c1_298, %c0_299, %c0_300], %310 {strides = array<i32>} : memref<2x144x64xbf16, #tpu.memory_space<vmem>>, vector<1x12x64xbf16>,
    %c32_301 = arith.constant 32 : index
    %c0_302 = arith.constant 0 : index
    %311 = vector.load %arg9[%c32_301, %c0_302] : memref<64x64xf32, #tpu.memory_space<vmem>>, vector<12x64xf32>
    %c48_303 = arith.constant 48 : index
    %c0_304 = arith.constant 0 : index
    %312 = vector.load %arg9[%c48_303, %c0_304] : memref<64x64xf32, #tpu.memory_space<vmem>>, vector<12x64xf32>
    %313 = arith.maximumf %311, %312 : vector<12x64xf32>
    %c0_305 = arith.constant 0 : index
    %c0_306 = arith.constant 0 : index
    %314 = vector.load %arg5[%c0_305, %c0_306] : memref<1x64xf32, #tpu.memory_space<vmem>>, vector<1x64xf32>
    %315 = vector.broadcast %314 : vector<1x64xf32> to vector<12x64xf32>
    %316 = arith.addf %313, %315 : vector<12x64xf32>
    %cst_307 = arith.constant 0.000000e+00 : f32
    %317 = vector.broadcast %cst_307 : f32 to vector<12x64xf32>
    %318 = arith.maximumf %316, %317 : vector<12x64xf32>
    %319 = arith.truncf %318 : vector<12x64xf32> to vector<12x64xbf16>
    %c1_308 = arith.constant 1 : index
    %c12_309 = arith.constant 12 : index
    %c0_310 = arith.constant 0 : index
    %320 = vector.load %arg6[%c1_308, %c12_309, %c0_310] : memref<2x144x64xbf16, #tpu.memory_space<vmem>>, vector<1x12x64xbf16>
    %321 = vector.shape_cast %320 : vector<1x12x64xbf16> to vector<12x64xbf16>
    %322 = vector.shape_cast %319 : vector<12x64xbf16> to vector<1x12x64xbf16>
    tpu.vector_store %arg6[%c1_308, %c12_309, %c0_310], %322 {strides = array<i32>} : memref<2x144x64xbf16, #tpu.memory_space<vmem>>, vector<1x12x64xbf16>,
    %c128_311 = arith.constant 128 : index
    %c0_312 = arith.constant 0 : index
    %323 = vector.load %arg7[%c128_311, %c0_312] : memref<832x96xbf16, #tpu.memory_space<vmem>>, vector<128x96xbf16>
    %c0_313 = arith.constant 0 : index
    %c0_314 = arith.constant 0 : index
    %c0_315 = arith.constant 0 : index
    %324 = vector.load %arg4[%c0_313, %c0_314, %c0_315] : memref<3x96x64xbf16, #tpu.memory_space<vmem>>, vector<1x96x64xbf16>
    %325 = vector.shape_cast %324 : vector<1x96x64xbf16> to vector<96x64xbf16>
    %cst_316 = arith.constant dense<0.000000e+00> : vector<128x64xf32>
    %326 = tpu.matmul %323, %325, %cst_316 {dimension_numbers = #tpu.dot_dimension_numbers<[1], [0], [0], [1], [0, 0, 1, 1], [], []>} : vector<128x96xbf16>, vector<96x64xbf16>, vector<128x64xf32> -> vector<128x64xf32>
    %c160_317 = arith.constant 160 : index
    %c0_318 = arith.constant 0 : index
    %327 = vector.load %arg7[%c160_317, %c0_318] : memref<832x96xbf16, #tpu.memory_space<vmem>>, vector<128x96xbf16>
    %c1_319 = arith.constant 1 : index
    %c0_320 = arith.constant 0 : index
    %c0_321 = arith.constant 0 : index
    %328 = vector.load %arg4[%c1_319, %c0_320, %c0_321] : memref<3x96x64xbf16, #tpu.memory_space<vmem>>, vector<1x96x64xbf16>
    %329 = vector.shape_cast %328 : vector<1x96x64xbf16> to vector<96x64xbf16>
    %cst_322 = arith.constant dense<0.000000e+00> : vector<128x64xf32>
    %330 = tpu.matmul %327, %329, %cst_322 {dimension_numbers = #tpu.dot_dimension_numbers<[1], [0], [0], [1], [0, 0, 1, 1], [], []>} : vector<128x96xbf16>, vector<96x64xbf16>, vector<128x64xf32> -> vector<128x64xf32>
    %331 = arith.addf %326, %330 : vector<128x64xf32>
    %c192_323 = arith.constant 192 : index
    %c0_324 = arith.constant 0 : index
    %332 = vector.load %arg7[%c192_323, %c0_324] : memref<832x96xbf16, #tpu.memory_space<vmem>>, vector<128x96xbf16>
    %c2_325 = arith.constant 2 : index
    %c0_326 = arith.constant 0 : index
    %c0_327 = arith.constant 0 : index
    %333 = vector.load %arg4[%c2_325, %c0_326, %c0_327] : memref<3x96x64xbf16, #tpu.memory_space<vmem>>, vector<1x96x64xbf16>
    %334 = vector.shape_cast %333 : vector<1x96x64xbf16> to vector<96x64xbf16>
    %cst_328 = arith.constant dense<0.000000e+00> : vector<128x64xf32>
    %335 = tpu.matmul %332, %334, %cst_328 {dimension_numbers = #tpu.dot_dimension_numbers<[1], [0], [0], [1], [0, 0, 1, 1], [], []>} : vector<128x96xbf16>, vector<96x64xbf16>, vector<128x64xf32> -> vector<128x64xf32>
    %336 = arith.addf %331, %335 : vector<128x64xf32>
    %c0_329 = arith.constant 0 : index
    %c0_330 = arith.constant 0 : index
    %337 = vector.load %arg8[%c0_329, %c0_330] : memref<128x64xf32, #tpu.memory_space<vmem>>, vector<128x64xf32>
    tpu.vector_store %arg8[%c0_329, %c0_330], %336 {strides = array<i32>} : memref<128x64xf32, #tpu.memory_space<vmem>>, vector<128x64xf32>,
    %c0_331 = arith.constant 0 : index
    %c0_332 = arith.constant 0 : index
    %338 = tpu.strided_load %arg8[%c0_331, %c0_332] {strides = array<i32: 2, 1>} : memref<128x64xf32, #tpu.memory_space<vmem>>, vector<64x64xf32>
    %c1_333 = arith.constant 1 : index
    %c0_334 = arith.constant 0 : index
    %339 = tpu.strided_load %arg8[%c1_333, %c0_334] {strides = array<i32: 2, 1>} : memref<128x64xf32, #tpu.memory_space<vmem>>, vector<64x64xf32>
    %340 = arith.maximumf %338, %339 : vector<64x64xf32>
    %c0_335 = arith.constant 0 : index
    %c0_336 = arith.constant 0 : index
    %341 = vector.load %arg9[%c0_335, %c0_336] : memref<64x64xf32, #tpu.memory_space<vmem>>, vector<64x64xf32>
    tpu.vector_store %arg9[%c0_335, %c0_336], %340 {strides = array<i32>} : memref<64x64xf32, #tpu.memory_space<vmem>>, vector<64x64xf32>,
    %c0_337 = arith.constant 0 : index
    %c0_338 = arith.constant 0 : index
    %342 = vector.load %arg9[%c0_337, %c0_338] : memref<64x64xf32, #tpu.memory_space<vmem>>, vector<12x64xf32>
    %c16_339 = arith.constant 16 : index
    %c0_340 = arith.constant 0 : index
    %343 = vector.load %arg9[%c16_339, %c0_340] : memref<64x64xf32, #tpu.memory_space<vmem>>, vector<12x64xf32>
    %344 = arith.maximumf %342, %343 : vector<12x64xf32>
    %c0_341 = arith.constant 0 : index
    %c0_342 = arith.constant 0 : index
    %345 = vector.load %arg5[%c0_341, %c0_342] : memref<1x64xf32, #tpu.memory_space<vmem>>, vector<1x64xf32>
    %346 = vector.broadcast %345 : vector<1x64xf32> to vector<12x64xf32>
    %347 = arith.addf %344, %346 : vector<12x64xf32>
    %cst_343 = arith.constant 0.000000e+00 : f32
    %348 = vector.broadcast %cst_343 : f32 to vector<12x64xf32>
    %349 = arith.maximumf %347, %348 : vector<12x64xf32>
    %350 = arith.truncf %349 : vector<12x64xf32> to vector<12x64xbf16>
    %c1_344 = arith.constant 1 : index
    %c24_345 = arith.constant 24 : index
    %c0_346 = arith.constant 0 : index
    %351 = vector.load %arg6[%c1_344, %c24_345, %c0_346] : memref<2x144x64xbf16, #tpu.memory_space<vmem>>, vector<1x12x64xbf16>
    %352 = vector.shape_cast %351 : vector<1x12x64xbf16> to vector<12x64xbf16>
    %353 = vector.shape_cast %350 : vector<12x64xbf16> to vector<1x12x64xbf16>
    tpu.vector_store %arg6[%c1_344, %c24_345, %c0_346], %353 {strides = array<i32>} : memref<2x144x64xbf16, #tpu.memory_space<vmem>>, vector<1x12x64xbf16>,
    %c32_347 = arith.constant 32 : index
    %c0_348 = arith.constant 0 : index
    %354 = vector.load %arg9[%c32_347, %c0_348] : memref<64x64xf32, #tpu.memory_space<vmem>>, vector<12x64xf32>
    %c48_349 = arith.constant 48 : index
    %c0_350 = arith.constant 0 : index
    %355 = vector.load %arg9[%c48_349, %c0_350] : memref<64x64xf32, #tpu.memory_space<vmem>>, vector<12x64xf32>
    %356 = arith.maximumf %354, %355 : vector<12x64xf32>
    %c0_351 = arith.constant 0 : index
    %c0_352 = arith.constant 0 : index
    %357 = vector.load %arg5[%c0_351, %c0_352] : memref<1x64xf32, #tpu.memory_space<vmem>>, vector<1x64xf32>
    %358 = vector.broadcast %357 : vector<1x64xf32> to vector<12x64xf32>
    %359 = arith.addf %356, %358 : vector<12x64xf32>
    %cst_353 = arith.constant 0.000000e+00 : f32
    %360 = vector.broadcast %cst_353 : f32 to vector<12x64xf32>
    %361 = arith.maximumf %359, %360 : vector<12x64xf32>
    %362 = arith.truncf %361 : vector<12x64xf32> to vector<12x64xbf16>
    %c1_354 = arith.constant 1 : index
    %c36_355 = arith.constant 36 : index
    %c0_356 = arith.constant 0 : index
    %363 = vector.load %arg6[%c1_354, %c36_355, %c0_356] : memref<2x144x64xbf16, #tpu.memory_space<vmem>>, vector<1x12x64xbf16>
    %364 = vector.shape_cast %363 : vector<1x12x64xbf16> to vector<12x64xbf16>
    %365 = vector.shape_cast %362 : vector<12x64xbf16> to vector<1x12x64xbf16>
    tpu.vector_store %arg6[%c1_354, %c36_355, %c0_356], %365 {strides = array<i32>} : memref<2x144x64xbf16, #tpu.memory_space<vmem>>, vector<1x12x64xbf16>,
    %c256_357 = arith.constant 256 : index
    %c0_358 = arith.constant 0 : index
    %366 = vector.load %arg7[%c256_357, %c0_358] : memref<832x96xbf16, #tpu.memory_space<vmem>>, vector<128x96xbf16>
    %c0_359 = arith.constant 0 : index
    %c0_360 = arith.constant 0 : index
    %c0_361 = arith.constant 0 : index
    %367 = vector.load %arg4[%c0_359, %c0_360, %c0_361] : memref<3x96x64xbf16, #tpu.memory_space<vmem>>, vector<1x96x64xbf16>
    %368 = vector.shape_cast %367 : vector<1x96x64xbf16> to vector<96x64xbf16>
    %cst_362 = arith.constant dense<0.000000e+00> : vector<128x64xf32>
    %369 = tpu.matmul %366, %368, %cst_362 {dimension_numbers = #tpu.dot_dimension_numbers<[1], [0], [0], [1], [0, 0, 1, 1], [], []>} : vector<128x96xbf16>, vector<96x64xbf16>, vector<128x64xf32> -> vector<128x64xf32>
    %c288_363 = arith.constant 288 : index
    %c0_364 = arith.constant 0 : index
    %370 = vector.load %arg7[%c288_363, %c0_364] : memref<832x96xbf16, #tpu.memory_space<vmem>>, vector<128x96xbf16>
    %c1_365 = arith.constant 1 : index
    %c0_366 = arith.constant 0 : index
    %c0_367 = arith.constant 0 : index
    %371 = vector.load %arg4[%c1_365, %c0_366, %c0_367] : memref<3x96x64xbf16, #tpu.memory_space<vmem>>, vector<1x96x64xbf16>
    %372 = vector.shape_cast %371 : vector<1x96x64xbf16> to vector<96x64xbf16>
    %cst_368 = arith.constant dense<0.000000e+00> : vector<128x64xf32>
    %373 = tpu.matmul %370, %372, %cst_368 {dimension_numbers = #tpu.dot_dimension_numbers<[1], [0], [0], [1], [0, 0, 1, 1], [], []>} : vector<128x96xbf16>, vector<96x64xbf16>, vector<128x64xf32> -> vector<128x64xf32>
    %374 = arith.addf %369, %373 : vector<128x64xf32>
    %c320_369 = arith.constant 320 : index
    %c0_370 = arith.constant 0 : index
    %375 = vector.load %arg7[%c320_369, %c0_370] : memref<832x96xbf16, #tpu.memory_space<vmem>>, vector<128x96xbf16>
    %c2_371 = arith.constant 2 : index
    %c0_372 = arith.constant 0 : index
    %c0_373 = arith.constant 0 : index
    %376 = vector.load %arg4[%c2_371, %c0_372, %c0_373] : memref<3x96x64xbf16, #tpu.memory_space<vmem>>, vector<1x96x64xbf16>
    %377 = vector.shape_cast %376 : vector<1x96x64xbf16> to vector<96x64xbf16>
    %cst_374 = arith.constant dense<0.000000e+00> : vector<128x64xf32>
    %378 = tpu.matmul %375, %377, %cst_374 {dimension_numbers = #tpu.dot_dimension_numbers<[1], [0], [0], [1], [0, 0, 1, 1], [], []>} : vector<128x96xbf16>, vector<96x64xbf16>, vector<128x64xf32> -> vector<128x64xf32>
    %379 = arith.addf %374, %378 : vector<128x64xf32>
    %c0_375 = arith.constant 0 : index
    %c0_376 = arith.constant 0 : index
    %380 = vector.load %arg8[%c0_375, %c0_376] : memref<128x64xf32, #tpu.memory_space<vmem>>, vector<128x64xf32>
    tpu.vector_store %arg8[%c0_375, %c0_376], %379 {strides = array<i32>} : memref<128x64xf32, #tpu.memory_space<vmem>>, vector<128x64xf32>,
    %c0_377 = arith.constant 0 : index
    %c0_378 = arith.constant 0 : index
    %381 = tpu.strided_load %arg8[%c0_377, %c0_378] {strides = array<i32: 2, 1>} : memref<128x64xf32, #tpu.memory_space<vmem>>, vector<64x64xf32>
    %c1_379 = arith.constant 1 : index
    %c0_380 = arith.constant 0 : index
    %382 = tpu.strided_load %arg8[%c1_379, %c0_380] {strides = array<i32: 2, 1>} : memref<128x64xf32, #tpu.memory_space<vmem>>, vector<64x64xf32>
    %383 = arith.maximumf %381, %382 : vector<64x64xf32>
    %c0_381 = arith.constant 0 : index
    %c0_382 = arith.constant 0 : index
    %384 = vector.load %arg9[%c0_381, %c0_382] : memref<64x64xf32, #tpu.memory_space<vmem>>, vector<64x64xf32>
    tpu.vector_store %arg9[%c0_381, %c0_382], %383 {strides = array<i32>} : memref<64x64xf32, #tpu.memory_space<vmem>>, vector<64x64xf32>,
    %c0_383 = arith.constant 0 : index
    %c0_384 = arith.constant 0 : index
    %385 = vector.load %arg9[%c0_383, %c0_384] : memref<64x64xf32, #tpu.memory_space<vmem>>, vector<12x64xf32>
    %c16_385 = arith.constant 16 : index
    %c0_386 = arith.constant 0 : index
    %386 = vector.load %arg9[%c16_385, %c0_386] : memref<64x64xf32, #tpu.memory_space<vmem>>, vector<12x64xf32>
    %387 = arith.maximumf %385, %386 : vector<12x64xf32>
    %c0_387 = arith.constant 0 : index
    %c0_388 = arith.constant 0 : index
    %388 = vector.load %arg5[%c0_387, %c0_388] : memref<1x64xf32, #tpu.memory_space<vmem>>, vector<1x64xf32>
    %389 = vector.broadcast %388 : vector<1x64xf32> to vector<12x64xf32>
    %390 = arith.addf %387, %389 : vector<12x64xf32>
    %cst_389 = arith.constant 0.000000e+00 : f32
    %391 = vector.broadcast %cst_389 : f32 to vector<12x64xf32>
    %392 = arith.maximumf %390, %391 : vector<12x64xf32>
    %393 = arith.truncf %392 : vector<12x64xf32> to vector<12x64xbf16>
    %c1_390 = arith.constant 1 : index
    %c48_391 = arith.constant 48 : index
    %c0_392 = arith.constant 0 : index
    %394 = vector.load %arg6[%c1_390, %c48_391, %c0_392] : memref<2x144x64xbf16, #tpu.memory_space<vmem>>, vector<1x12x64xbf16>
    %395 = vector.shape_cast %394 : vector<1x12x64xbf16> to vector<12x64xbf16>
    %396 = vector.shape_cast %393 : vector<12x64xbf16> to vector<1x12x64xbf16>
    tpu.vector_store %arg6[%c1_390, %c48_391, %c0_392], %396 {strides = array<i32>} : memref<2x144x64xbf16, #tpu.memory_space<vmem>>, vector<1x12x64xbf16>,
    %c32_393 = arith.constant 32 : index
    %c0_394 = arith.constant 0 : index
    %397 = vector.load %arg9[%c32_393, %c0_394] : memref<64x64xf32, #tpu.memory_space<vmem>>, vector<12x64xf32>
    %c48_395 = arith.constant 48 : index
    %c0_396 = arith.constant 0 : index
    %398 = vector.load %arg9[%c48_395, %c0_396] : memref<64x64xf32, #tpu.memory_space<vmem>>, vector<12x64xf32>
    %399 = arith.maximumf %397, %398 : vector<12x64xf32>
    %c0_397 = arith.constant 0 : index
    %c0_398 = arith.constant 0 : index
    %400 = vector.load %arg5[%c0_397, %c0_398] : memref<1x64xf32, #tpu.memory_space<vmem>>, vector<1x64xf32>
    %401 = vector.broadcast %400 : vector<1x64xf32> to vector<12x64xf32>
    %402 = arith.addf %399, %401 : vector<12x64xf32>
    %cst_399 = arith.constant 0.000000e+00 : f32
    %403 = vector.broadcast %cst_399 : f32 to vector<12x64xf32>
    %404 = arith.maximumf %402, %403 : vector<12x64xf32>
    %405 = arith.truncf %404 : vector<12x64xf32> to vector<12x64xbf16>
    %c1_400 = arith.constant 1 : index
    %c60_401 = arith.constant 60 : index
    %c0_402 = arith.constant 0 : index
    %406 = vector.load %arg6[%c1_400, %c60_401, %c0_402] : memref<2x144x64xbf16, #tpu.memory_space<vmem>>, vector<1x12x64xbf16>
    %407 = vector.shape_cast %406 : vector<1x12x64xbf16> to vector<12x64xbf16>
    %408 = vector.shape_cast %405 : vector<12x64xbf16> to vector<1x12x64xbf16>
    tpu.vector_store %arg6[%c1_400, %c60_401, %c0_402], %408 {strides = array<i32>} : memref<2x144x64xbf16, #tpu.memory_space<vmem>>, vector<1x12x64xbf16>,
    %c384_403 = arith.constant 384 : index
    %c0_404 = arith.constant 0 : index
    %409 = vector.load %arg7[%c384_403, %c0_404] : memref<832x96xbf16, #tpu.memory_space<vmem>>, vector<128x96xbf16>
    %c0_405 = arith.constant 0 : index
    %c0_406 = arith.constant 0 : index
    %c0_407 = arith.constant 0 : index
    %410 = vector.load %arg4[%c0_405, %c0_406, %c0_407] : memref<3x96x64xbf16, #tpu.memory_space<vmem>>, vector<1x96x64xbf16>
    %411 = vector.shape_cast %410 : vector<1x96x64xbf16> to vector<96x64xbf16>
    %cst_408 = arith.constant dense<0.000000e+00> : vector<128x64xf32>
    %412 = tpu.matmul %409, %411, %cst_408 {dimension_numbers = #tpu.dot_dimension_numbers<[1], [0], [0], [1], [0, 0, 1, 1], [], []>} : vector<128x96xbf16>, vector<96x64xbf16>, vector<128x64xf32> -> vector<128x64xf32>
    %c416_409 = arith.constant 416 : index
    %c0_410 = arith.constant 0 : index
    %413 = vector.load %arg7[%c416_409, %c0_410] : memref<832x96xbf16, #tpu.memory_space<vmem>>, vector<128x96xbf16>
    %c1_411 = arith.constant 1 : index
    %c0_412 = arith.constant 0 : index
    %c0_413 = arith.constant 0 : index
    %414 = vector.load %arg4[%c1_411, %c0_412, %c0_413] : memref<3x96x64xbf16, #tpu.memory_space<vmem>>, vector<1x96x64xbf16>
    %415 = vector.shape_cast %414 : vector<1x96x64xbf16> to vector<96x64xbf16>
    %cst_414 = arith.constant dense<0.000000e+00> : vector<128x64xf32>
    %416 = tpu.matmul %413, %415, %cst_414 {dimension_numbers = #tpu.dot_dimension_numbers<[1], [0], [0], [1], [0, 0, 1, 1], [], []>} : vector<128x96xbf16>, vector<96x64xbf16>, vector<128x64xf32> -> vector<128x64xf32>
    %417 = arith.addf %412, %416 : vector<128x64xf32>
    %c448_415 = arith.constant 448 : index
    %c0_416 = arith.constant 0 : index
    %418 = vector.load %arg7[%c448_415, %c0_416] : memref<832x96xbf16, #tpu.memory_space<vmem>>, vector<128x96xbf16>
    %c2_417 = arith.constant 2 : index
    %c0_418 = arith.constant 0 : index
    %c0_419 = arith.constant 0 : index
    %419 = vector.load %arg4[%c2_417, %c0_418, %c0_419] : memref<3x96x64xbf16, #tpu.memory_space<vmem>>, vector<1x96x64xbf16>
    %420 = vector.shape_cast %419 : vector<1x96x64xbf16> to vector<96x64xbf16>
    %cst_420 = arith.constant dense<0.000000e+00> : vector<128x64xf32>
    %421 = tpu.matmul %418, %420, %cst_420 {dimension_numbers = #tpu.dot_dimension_numbers<[1], [0], [0], [1], [0, 0, 1, 1], [], []>} : vector<128x96xbf16>, vector<96x64xbf16>, vector<128x64xf32> -> vector<128x64xf32>
    %422 = arith.addf %417, %421 : vector<128x64xf32>
    %c0_421 = arith.constant 0 : index
    %c0_422 = arith.constant 0 : index
    %423 = vector.load %arg8[%c0_421, %c0_422] : memref<128x64xf32, #tpu.memory_space<vmem>>, vector<128x64xf32>
    tpu.vector_store %arg8[%c0_421, %c0_422], %422 {strides = array<i32>} : memref<128x64xf32, #tpu.memory_space<vmem>>, vector<128x64xf32>,
    %c0_423 = arith.constant 0 : index
    %c0_424 = arith.constant 0 : index
    %424 = tpu.strided_load %arg8[%c0_423, %c0_424] {strides = array<i32: 2, 1>} : memref<128x64xf32, #tpu.memory_space<vmem>>, vector<64x64xf32>
    %c1_425 = arith.constant 1 : index
    %c0_426 = arith.constant 0 : index
    %425 = tpu.strided_load %arg8[%c1_425, %c0_426] {strides = array<i32: 2, 1>} : memref<128x64xf32, #tpu.memory_space<vmem>>, vector<64x64xf32>
    %426 = arith.maximumf %424, %425 : vector<64x64xf32>
    %c0_427 = arith.constant 0 : index
    %c0_428 = arith.constant 0 : index
    %427 = vector.load %arg9[%c0_427, %c0_428] : memref<64x64xf32, #tpu.memory_space<vmem>>, vector<64x64xf32>
    tpu.vector_store %arg9[%c0_427, %c0_428], %426 {strides = array<i32>} : memref<64x64xf32, #tpu.memory_space<vmem>>, vector<64x64xf32>,
    %c0_429 = arith.constant 0 : index
    %c0_430 = arith.constant 0 : index
    %428 = vector.load %arg9[%c0_429, %c0_430] : memref<64x64xf32, #tpu.memory_space<vmem>>, vector<12x64xf32>
    %c16_431 = arith.constant 16 : index
    %c0_432 = arith.constant 0 : index
    %429 = vector.load %arg9[%c16_431, %c0_432] : memref<64x64xf32, #tpu.memory_space<vmem>>, vector<12x64xf32>
    %430 = arith.maximumf %428, %429 : vector<12x64xf32>
    %c0_433 = arith.constant 0 : index
    %c0_434 = arith.constant 0 : index
    %431 = vector.load %arg5[%c0_433, %c0_434] : memref<1x64xf32, #tpu.memory_space<vmem>>, vector<1x64xf32>
    %432 = vector.broadcast %431 : vector<1x64xf32> to vector<12x64xf32>
    %433 = arith.addf %430, %432 : vector<12x64xf32>
    %cst_435 = arith.constant 0.000000e+00 : f32
    %434 = vector.broadcast %cst_435 : f32 to vector<12x64xf32>
    %435 = arith.maximumf %433, %434 : vector<12x64xf32>
    %436 = arith.truncf %435 : vector<12x64xf32> to vector<12x64xbf16>
    %c1_436 = arith.constant 1 : index
    %c72_437 = arith.constant 72 : index
    %c0_438 = arith.constant 0 : index
    %437 = vector.load %arg6[%c1_436, %c72_437, %c0_438] : memref<2x144x64xbf16, #tpu.memory_space<vmem>>, vector<1x12x64xbf16>
    %438 = vector.shape_cast %437 : vector<1x12x64xbf16> to vector<12x64xbf16>
    %439 = vector.shape_cast %436 : vector<12x64xbf16> to vector<1x12x64xbf16>
    tpu.vector_store %arg6[%c1_436, %c72_437, %c0_438], %439 {strides = array<i32>} : memref<2x144x64xbf16, #tpu.memory_space<vmem>>, vector<1x12x64xbf16>,
    %c32_439 = arith.constant 32 : index
    %c0_440 = arith.constant 0 : index
    %440 = vector.load %arg9[%c32_439, %c0_440] : memref<64x64xf32, #tpu.memory_space<vmem>>, vector<12x64xf32>
    %c48_441 = arith.constant 48 : index
    %c0_442 = arith.constant 0 : index
    %441 = vector.load %arg9[%c48_441, %c0_442] : memref<64x64xf32, #tpu.memory_space<vmem>>, vector<12x64xf32>
    %442 = arith.maximumf %440, %441 : vector<12x64xf32>
    %c0_443 = arith.constant 0 : index
    %c0_444 = arith.constant 0 : index
    %443 = vector.load %arg5[%c0_443, %c0_444] : memref<1x64xf32, #tpu.memory_space<vmem>>, vector<1x64xf32>
    %444 = vector.broadcast %443 : vector<1x64xf32> to vector<12x64xf32>
    %445 = arith.addf %442, %444 : vector<12x64xf32>
    %cst_445 = arith.constant 0.000000e+00 : f32
    %446 = vector.broadcast %cst_445 : f32 to vector<12x64xf32>
    %447 = arith.maximumf %445, %446 : vector<12x64xf32>
    %448 = arith.truncf %447 : vector<12x64xf32> to vector<12x64xbf16>
    %c1_446 = arith.constant 1 : index
    %c84_447 = arith.constant 84 : index
    %c0_448 = arith.constant 0 : index
    %449 = vector.load %arg6[%c1_446, %c84_447, %c0_448] : memref<2x144x64xbf16, #tpu.memory_space<vmem>>, vector<1x12x64xbf16>
    %450 = vector.shape_cast %449 : vector<1x12x64xbf16> to vector<12x64xbf16>
    %451 = vector.shape_cast %448 : vector<12x64xbf16> to vector<1x12x64xbf16>
    tpu.vector_store %arg6[%c1_446, %c84_447, %c0_448], %451 {strides = array<i32>} : memref<2x144x64xbf16, #tpu.memory_space<vmem>>, vector<1x12x64xbf16>,
    %c512_449 = arith.constant 512 : index
    %c0_450 = arith.constant 0 : index
    %452 = vector.load %arg7[%c512_449, %c0_450] : memref<832x96xbf16, #tpu.memory_space<vmem>>, vector<128x96xbf16>
    %c0_451 = arith.constant 0 : index
    %c0_452 = arith.constant 0 : index
    %c0_453 = arith.constant 0 : index
    %453 = vector.load %arg4[%c0_451, %c0_452, %c0_453] : memref<3x96x64xbf16, #tpu.memory_space<vmem>>, vector<1x96x64xbf16>
    %454 = vector.shape_cast %453 : vector<1x96x64xbf16> to vector<96x64xbf16>
    %cst_454 = arith.constant dense<0.000000e+00> : vector<128x64xf32>
    %455 = tpu.matmul %452, %454, %cst_454 {dimension_numbers = #tpu.dot_dimension_numbers<[1], [0], [0], [1], [0, 0, 1, 1], [], []>} : vector<128x96xbf16>, vector<96x64xbf16>, vector<128x64xf32> -> vector<128x64xf32>
    %c544_455 = arith.constant 544 : index
    %c0_456 = arith.constant 0 : index
    %456 = vector.load %arg7[%c544_455, %c0_456] : memref<832x96xbf16, #tpu.memory_space<vmem>>, vector<128x96xbf16>
    %c1_457 = arith.constant 1 : index
    %c0_458 = arith.constant 0 : index
    %c0_459 = arith.constant 0 : index
    %457 = vector.load %arg4[%c1_457, %c0_458, %c0_459] : memref<3x96x64xbf16, #tpu.memory_space<vmem>>, vector<1x96x64xbf16>
    %458 = vector.shape_cast %457 : vector<1x96x64xbf16> to vector<96x64xbf16>
    %cst_460 = arith.constant dense<0.000000e+00> : vector<128x64xf32>
    %459 = tpu.matmul %456, %458, %cst_460 {dimension_numbers = #tpu.dot_dimension_numbers<[1], [0], [0], [1], [0, 0, 1, 1], [], []>} : vector<128x96xbf16>, vector<96x64xbf16>, vector<128x64xf32> -> vector<128x64xf32>
    %460 = arith.addf %455, %459 : vector<128x64xf32>
    %c576_461 = arith.constant 576 : index
    %c0_462 = arith.constant 0 : index
    %461 = vector.load %arg7[%c576_461, %c0_462] : memref<832x96xbf16, #tpu.memory_space<vmem>>, vector<128x96xbf16>
    %c2_463 = arith.constant 2 : index
    %c0_464 = arith.constant 0 : index
    %c0_465 = arith.constant 0 : index
    %462 = vector.load %arg4[%c2_463, %c0_464, %c0_465] : memref<3x96x64xbf16, #tpu.memory_space<vmem>>, vector<1x96x64xbf16>
    %463 = vector.shape_cast %462 : vector<1x96x64xbf16> to vector<96x64xbf16>
    %cst_466 = arith.constant dense<0.000000e+00> : vector<128x64xf32>
    %464 = tpu.matmul %461, %463, %cst_466 {dimension_numbers = #tpu.dot_dimension_numbers<[1], [0], [0], [1], [0, 0, 1, 1], [], []>} : vector<128x96xbf16>, vector<96x64xbf16>, vector<128x64xf32> -> vector<128x64xf32>
    %465 = arith.addf %460, %464 : vector<128x64xf32>
    %c0_467 = arith.constant 0 : index
    %c0_468 = arith.constant 0 : index
    %466 = vector.load %arg8[%c0_467, %c0_468] : memref<128x64xf32, #tpu.memory_space<vmem>>, vector<128x64xf32>
    tpu.vector_store %arg8[%c0_467, %c0_468], %465 {strides = array<i32>} : memref<128x64xf32, #tpu.memory_space<vmem>>, vector<128x64xf32>,
    %c0_469 = arith.constant 0 : index
    %c0_470 = arith.constant 0 : index
    %467 = tpu.strided_load %arg8[%c0_469, %c0_470] {strides = array<i32: 2, 1>} : memref<128x64xf32, #tpu.memory_space<vmem>>, vector<64x64xf32>
    %c1_471 = arith.constant 1 : index
    %c0_472 = arith.constant 0 : index
    %468 = tpu.strided_load %arg8[%c1_471, %c0_472] {strides = array<i32: 2, 1>} : memref<128x64xf32, #tpu.memory_space<vmem>>, vector<64x64xf32>
    %469 = arith.maximumf %467, %468 : vector<64x64xf32>
    %c0_473 = arith.constant 0 : index
    %c0_474 = arith.constant 0 : index
    %470 = vector.load %arg9[%c0_473, %c0_474] : memref<64x64xf32, #tpu.memory_space<vmem>>, vector<64x64xf32>
    tpu.vector_store %arg9[%c0_473, %c0_474], %469 {strides = array<i32>} : memref<64x64xf32, #tpu.memory_space<vmem>>, vector<64x64xf32>,
    %c0_475 = arith.constant 0 : index
    %c0_476 = arith.constant 0 : index
    %471 = vector.load %arg9[%c0_475, %c0_476] : memref<64x64xf32, #tpu.memory_space<vmem>>, vector<12x64xf32>
    %c16_477 = arith.constant 16 : index
    %c0_478 = arith.constant 0 : index
    %472 = vector.load %arg9[%c16_477, %c0_478] : memref<64x64xf32, #tpu.memory_space<vmem>>, vector<12x64xf32>
    %473 = arith.maximumf %471, %472 : vector<12x64xf32>
    %c0_479 = arith.constant 0 : index
    %c0_480 = arith.constant 0 : index
    %474 = vector.load %arg5[%c0_479, %c0_480] : memref<1x64xf32, #tpu.memory_space<vmem>>, vector<1x64xf32>
    %475 = vector.broadcast %474 : vector<1x64xf32> to vector<12x64xf32>
    %476 = arith.addf %473, %475 : vector<12x64xf32>
    %cst_481 = arith.constant 0.000000e+00 : f32
    %477 = vector.broadcast %cst_481 : f32 to vector<12x64xf32>
    %478 = arith.maximumf %476, %477 : vector<12x64xf32>
    %479 = arith.truncf %478 : vector<12x64xf32> to vector<12x64xbf16>
    %c1_482 = arith.constant 1 : index
    %c96_483 = arith.constant 96 : index
    %c0_484 = arith.constant 0 : index
    %480 = vector.load %arg6[%c1_482, %c96_483, %c0_484] : memref<2x144x64xbf16, #tpu.memory_space<vmem>>, vector<1x12x64xbf16>
    %481 = vector.shape_cast %480 : vector<1x12x64xbf16> to vector<12x64xbf16>
    %482 = vector.shape_cast %479 : vector<12x64xbf16> to vector<1x12x64xbf16>
    tpu.vector_store %arg6[%c1_482, %c96_483, %c0_484], %482 {strides = array<i32>} : memref<2x144x64xbf16, #tpu.memory_space<vmem>>, vector<1x12x64xbf16>,
    %c32_485 = arith.constant 32 : index
    %c0_486 = arith.constant 0 : index
    %483 = vector.load %arg9[%c32_485, %c0_486] : memref<64x64xf32, #tpu.memory_space<vmem>>, vector<12x64xf32>
    %c48_487 = arith.constant 48 : index
    %c0_488 = arith.constant 0 : index
    %484 = vector.load %arg9[%c48_487, %c0_488] : memref<64x64xf32, #tpu.memory_space<vmem>>, vector<12x64xf32>
    %485 = arith.maximumf %483, %484 : vector<12x64xf32>
    %c0_489 = arith.constant 0 : index
    %c0_490 = arith.constant 0 : index
    %486 = vector.load %arg5[%c0_489, %c0_490] : memref<1x64xf32, #tpu.memory_space<vmem>>, vector<1x64xf32>
    %487 = vector.broadcast %486 : vector<1x64xf32> to vector<12x64xf32>
    %488 = arith.addf %485, %487 : vector<12x64xf32>
    %cst_491 = arith.constant 0.000000e+00 : f32
    %489 = vector.broadcast %cst_491 : f32 to vector<12x64xf32>
    %490 = arith.maximumf %488, %489 : vector<12x64xf32>
    %491 = arith.truncf %490 : vector<12x64xf32> to vector<12x64xbf16>
    %c1_492 = arith.constant 1 : index
    %c108_493 = arith.constant 108 : index
    %c0_494 = arith.constant 0 : index
    %492 = vector.load %arg6[%c1_492, %c108_493, %c0_494] : memref<2x144x64xbf16, #tpu.memory_space<vmem>>, vector<1x12x64xbf16>
    %493 = vector.shape_cast %492 : vector<1x12x64xbf16> to vector<12x64xbf16>
    %494 = vector.shape_cast %491 : vector<12x64xbf16> to vector<1x12x64xbf16>
    tpu.vector_store %arg6[%c1_492, %c108_493, %c0_494], %494 {strides = array<i32>} : memref<2x144x64xbf16, #tpu.memory_space<vmem>>, vector<1x12x64xbf16>,
    %c640_495 = arith.constant 640 : index
    %c0_496 = arith.constant 0 : index
    %495 = vector.load %arg7[%c640_495, %c0_496] : memref<832x96xbf16, #tpu.memory_space<vmem>>, vector<128x96xbf16>
    %c0_497 = arith.constant 0 : index
    %c0_498 = arith.constant 0 : index
    %c0_499 = arith.constant 0 : index
    %496 = vector.load %arg4[%c0_497, %c0_498, %c0_499] : memref<3x96x64xbf16, #tpu.memory_space<vmem>>, vector<1x96x64xbf16>
    %497 = vector.shape_cast %496 : vector<1x96x64xbf16> to vector<96x64xbf16>
    %cst_500 = arith.constant dense<0.000000e+00> : vector<128x64xf32>
    %498 = tpu.matmul %495, %497, %cst_500 {dimension_numbers = #tpu.dot_dimension_numbers<[1], [0], [0], [1], [0, 0, 1, 1], [], []>} : vector<128x96xbf16>, vector<96x64xbf16>, vector<128x64xf32> -> vector<128x64xf32>
    %c672_501 = arith.constant 672 : index
    %c0_502 = arith.constant 0 : index
    %499 = vector.load %arg7[%c672_501, %c0_502] : memref<832x96xbf16, #tpu.memory_space<vmem>>, vector<128x96xbf16>
    %c1_503 = arith.constant 1 : index
    %c0_504 = arith.constant 0 : index
    %c0_505 = arith.constant 0 : index
    %500 = vector.load %arg4[%c1_503, %c0_504, %c0_505] : memref<3x96x64xbf16, #tpu.memory_space<vmem>>, vector<1x96x64xbf16>
    %501 = vector.shape_cast %500 : vector<1x96x64xbf16> to vector<96x64xbf16>
    %cst_506 = arith.constant dense<0.000000e+00> : vector<128x64xf32>
    %502 = tpu.matmul %499, %501, %cst_506 {dimension_numbers = #tpu.dot_dimension_numbers<[1], [0], [0], [1], [0, 0, 1, 1], [], []>} : vector<128x96xbf16>, vector<96x64xbf16>, vector<128x64xf32> -> vector<128x64xf32>
    %503 = arith.addf %498, %502 : vector<128x64xf32>
    %c704_507 = arith.constant 704 : index
    %c0_508 = arith.constant 0 : index
    %504 = vector.load %arg7[%c704_507, %c0_508] : memref<832x96xbf16, #tpu.memory_space<vmem>>, vector<128x96xbf16>
    %c2_509 = arith.constant 2 : index
    %c0_510 = arith.constant 0 : index
    %c0_511 = arith.constant 0 : index
    %505 = vector.load %arg4[%c2_509, %c0_510, %c0_511] : memref<3x96x64xbf16, #tpu.memory_space<vmem>>, vector<1x96x64xbf16>
    %506 = vector.shape_cast %505 : vector<1x96x64xbf16> to vector<96x64xbf16>
    %cst_512 = arith.constant dense<0.000000e+00> : vector<128x64xf32>
    %507 = tpu.matmul %504, %506, %cst_512 {dimension_numbers = #tpu.dot_dimension_numbers<[1], [0], [0], [1], [0, 0, 1, 1], [], []>} : vector<128x96xbf16>, vector<96x64xbf16>, vector<128x64xf32> -> vector<128x64xf32>
    %508 = arith.addf %503, %507 : vector<128x64xf32>
    %c0_513 = arith.constant 0 : index
    %c0_514 = arith.constant 0 : index
    %509 = vector.load %arg8[%c0_513, %c0_514] : memref<128x64xf32, #tpu.memory_space<vmem>>, vector<128x64xf32>
    tpu.vector_store %arg8[%c0_513, %c0_514], %508 {strides = array<i32>} : memref<128x64xf32, #tpu.memory_space<vmem>>, vector<128x64xf32>,
    %c0_515 = arith.constant 0 : index
    %c0_516 = arith.constant 0 : index
    %510 = tpu.strided_load %arg8[%c0_515, %c0_516] {strides = array<i32: 2, 1>} : memref<128x64xf32, #tpu.memory_space<vmem>>, vector<64x64xf32>
    %c1_517 = arith.constant 1 : index
    %c0_518 = arith.constant 0 : index
    %511 = tpu.strided_load %arg8[%c1_517, %c0_518] {strides = array<i32: 2, 1>} : memref<128x64xf32, #tpu.memory_space<vmem>>, vector<64x64xf32>
    %512 = arith.maximumf %510, %511 : vector<64x64xf32>
    %c0_519 = arith.constant 0 : index
    %c0_520 = arith.constant 0 : index
    %513 = vector.load %arg9[%c0_519, %c0_520] : memref<64x64xf32, #tpu.memory_space<vmem>>, vector<64x64xf32>
    tpu.vector_store %arg9[%c0_519, %c0_520], %512 {strides = array<i32>} : memref<64x64xf32, #tpu.memory_space<vmem>>, vector<64x64xf32>,
    %c0_521 = arith.constant 0 : index
    %c0_522 = arith.constant 0 : index
    %514 = vector.load %arg9[%c0_521, %c0_522] : memref<64x64xf32, #tpu.memory_space<vmem>>, vector<12x64xf32>
    %c16_523 = arith.constant 16 : index
    %c0_524 = arith.constant 0 : index
    %515 = vector.load %arg9[%c16_523, %c0_524] : memref<64x64xf32, #tpu.memory_space<vmem>>, vector<12x64xf32>
    %516 = arith.maximumf %514, %515 : vector<12x64xf32>
    %c0_525 = arith.constant 0 : index
    %c0_526 = arith.constant 0 : index
    %517 = vector.load %arg5[%c0_525, %c0_526] : memref<1x64xf32, #tpu.memory_space<vmem>>, vector<1x64xf32>
    %518 = vector.broadcast %517 : vector<1x64xf32> to vector<12x64xf32>
    %519 = arith.addf %516, %518 : vector<12x64xf32>
    %cst_527 = arith.constant 0.000000e+00 : f32
    %520 = vector.broadcast %cst_527 : f32 to vector<12x64xf32>
    %521 = arith.maximumf %519, %520 : vector<12x64xf32>
    %522 = arith.truncf %521 : vector<12x64xf32> to vector<12x64xbf16>
    %c1_528 = arith.constant 1 : index
    %c120_529 = arith.constant 120 : index
    %c0_530 = arith.constant 0 : index
    %523 = vector.load %arg6[%c1_528, %c120_529, %c0_530] : memref<2x144x64xbf16, #tpu.memory_space<vmem>>, vector<1x12x64xbf16>
    %524 = vector.shape_cast %523 : vector<1x12x64xbf16> to vector<12x64xbf16>
    %525 = vector.shape_cast %522 : vector<12x64xbf16> to vector<1x12x64xbf16>
    tpu.vector_store %arg6[%c1_528, %c120_529, %c0_530], %525 {strides = array<i32>} : memref<2x144x64xbf16, #tpu.memory_space<vmem>>, vector<1x12x64xbf16>,
    %c32_531 = arith.constant 32 : index
    %c0_532 = arith.constant 0 : index
    %526 = vector.load %arg9[%c32_531, %c0_532] : memref<64x64xf32, #tpu.memory_space<vmem>>, vector<12x64xf32>
    %c48_533 = arith.constant 48 : index
    %c0_534 = arith.constant 0 : index
    %527 = vector.load %arg9[%c48_533, %c0_534] : memref<64x64xf32, #tpu.memory_space<vmem>>, vector<12x64xf32>
    %528 = arith.maximumf %526, %527 : vector<12x64xf32>
    %c0_535 = arith.constant 0 : index
    %c0_536 = arith.constant 0 : index
    %529 = vector.load %arg5[%c0_535, %c0_536] : memref<1x64xf32, #tpu.memory_space<vmem>>, vector<1x64xf32>
    %530 = vector.broadcast %529 : vector<1x64xf32> to vector<12x64xf32>
    %531 = arith.addf %528, %530 : vector<12x64xf32>
    %cst_537 = arith.constant 0.000000e+00 : f32
    %532 = vector.broadcast %cst_537 : f32 to vector<12x64xf32>
    %533 = arith.maximumf %531, %532 : vector<12x64xf32>
    %534 = arith.truncf %533 : vector<12x64xf32> to vector<12x64xbf16>
    %c1_538 = arith.constant 1 : index
    %c132_539 = arith.constant 132 : index
    %c0_540 = arith.constant 0 : index
    %535 = vector.load %arg6[%c1_538, %c132_539, %c0_540] : memref<2x144x64xbf16, #tpu.memory_space<vmem>>, vector<1x12x64xbf16>
    %536 = vector.shape_cast %535 : vector<1x12x64xbf16> to vector<12x64xbf16>
    %537 = vector.shape_cast %534 : vector<12x64xbf16> to vector<1x12x64xbf16>
    tpu.vector_store %arg6[%c1_538, %c132_539, %c0_540], %537 {strides = array<i32>} : memref<2x144x64xbf16, #tpu.memory_space<vmem>>, vector<1x12x64xbf16>,
    return
  }
  func.func @transform_0(%arg0: i32) -> (i32, i32, i32) {
    %c0_i32 = arith.constant 0 : i32
    %c0_i32_0 = arith.constant 0 : i32
    %c0_i32_1 = arith.constant 0 : i32
    return %arg0, %c0_i32, %c0_i32_0 : i32, i32, i32
  }
  func.func @transform_1(%arg0: i32) -> (i32, i32) {
    %c0_i32 = arith.constant 0 : i32
    %c0_i32_0 = arith.constant 0 : i32
    %c0_i32_1 = arith.constant 0 : i32
    return %c0_i32, %c0_i32_0 : i32, i32
  }
  func.func @transform_2(%arg0: i32) -> (i32, i32) {
    %c0_i32 = arith.constant 0 : i32
    %c0_i32_0 = arith.constant 0 : i32
    %c0_i32_1 = arith.constant 0 : i32
    return %c0_i32, %c0_i32_0 : i32, i32
  }
  func.func @transform_3(%arg0: i32) -> (i32, i32, i32) {
    %c0_i32 = arith.constant 0 : i32
    %c0_i32_0 = arith.constant 0 : i32
    %c0_i32_1 = arith.constant 0 : i32
    %c0_i32_2 = arith.constant 0 : i32
    return %c0_i32, %c0_i32_0, %c0_i32_1 : i32, i32, i32
  }
  func.func @transform_4(%arg0: i32) -> (i32, i32) {
    %c0_i32 = arith.constant 0 : i32
    %c0_i32_0 = arith.constant 0 : i32
    %c0_i32_1 = arith.constant 0 : i32
    return %c0_i32, %c0_i32_0 : i32, i32
  }
  func.func @transform_5(%arg0: i32) -> (i32, i32, i32) {
    %c0_i32 = arith.constant 0 : i32
    %c0_i32_0 = arith.constant 0 : i32
    %c0_i32_1 = arith.constant 0 : i32
    return %arg0, %c0_i32, %c0_i32_0 : i32, i32, i32
  }
}

module attributes {stable_mosaic.version = 11 : i64} {
  func.func @_fc_kernel(%arg0: i32, %arg1: memref<2x9216xbf16, #tpu.memory_space<vmem>>, %arg2: memref<9216x128xbf16, #tpu.memory_space<vmem>>, %arg3: memref<1x128xf32, #tpu.memory_space<vmem>>, %arg4: memref<128x128xbf16, #tpu.memory_space<vmem>>, %arg5: memref<1x128xf32, #tpu.memory_space<vmem>>, %arg6: memref<2x128xf32, #tpu.memory_space<vmem>>) attributes {dimension_semantics = [#tpu.dimension_semantics<parallel>], iteration_bounds = array<i64: 1>, scalar_prefetch = 0 : i64, scratch_operands = 0 : i64, tpu.core_type = #tpu.core_type<tc>, window_params = [{transform_indices = @transform_0, window_bounds = array<i64: 2, 9216>}, {pipeline_mode = #tpu.pipeline_mode<synchronous>, transform_indices = @transform_1, window_bounds = array<i64: 9216, 128>}, {pipeline_mode = #tpu.pipeline_mode<synchronous>, transform_indices = @transform_2, window_bounds = array<i64: 1, 128>}, {pipeline_mode = #tpu.pipeline_mode<synchronous>, transform_indices = @transform_3, window_bounds = array<i64: 128, 128>}, {pipeline_mode = #tpu.pipeline_mode<synchronous>, transform_indices = @transform_4, window_bounds = array<i64: 1, 128>}, {transform_indices = @transform_5, window_bounds = array<i64: 2, 128>}]} {
    %c0 = arith.constant 0 : index
    %c0_0 = arith.constant 0 : index
    %0 = vector.load %arg1[%c0, %c0_0] : memref<2x9216xbf16, #tpu.memory_space<vmem>>, vector<2x9216xbf16>
    %c0_1 = arith.constant 0 : index
    %c0_2 = arith.constant 0 : index
    %1 = vector.load %arg2[%c0_1, %c0_2] : memref<9216x128xbf16, #tpu.memory_space<vmem>>, vector<9216x128xbf16>
    %cst = arith.constant dense<0.000000e+00> : vector<2x128xf32>
    %2 = tpu.matmul %0, %1, %cst {dimension_numbers = #tpu.dot_dimension_numbers<[1], [0], [0], [1], [0, 0, 1, 1], [], []>} : vector<2x9216xbf16>, vector<9216x128xbf16>, vector<2x128xf32> -> vector<2x128xf32>
    %c0_3 = arith.constant 0 : index
    %c0_4 = arith.constant 0 : index
    %3 = vector.load %arg3[%c0_3, %c0_4] : memref<1x128xf32, #tpu.memory_space<vmem>>, vector<1x128xf32>
    %4 = vector.broadcast %3 : vector<1x128xf32> to vector<2x128xf32>
    %5 = arith.addf %2, %4 : vector<2x128xf32>
    %cst_5 = arith.constant 0.000000e+00 : f32
    %6 = vector.broadcast %cst_5 : f32 to vector<2x128xf32>
    %7 = arith.maximumf %5, %6 : vector<2x128xf32>
    %8 = arith.truncf %7 : vector<2x128xf32> to vector<2x128xbf16>
    %c0_6 = arith.constant 0 : index
    %c0_7 = arith.constant 0 : index
    %9 = vector.load %arg4[%c0_6, %c0_7] : memref<128x128xbf16, #tpu.memory_space<vmem>>, vector<128x128xbf16>
    %cst_8 = arith.constant dense<0.000000e+00> : vector<2x128xf32>
    %10 = tpu.matmul %8, %9, %cst_8 {dimension_numbers = #tpu.dot_dimension_numbers<[1], [0], [0], [1], [0, 0, 1, 1], [], []>} : vector<2x128xbf16>, vector<128x128xbf16>, vector<2x128xf32> -> vector<2x128xf32>
    %c0_9 = arith.constant 0 : index
    %c0_10 = arith.constant 0 : index
    %11 = vector.load %arg5[%c0_9, %c0_10] : memref<1x128xf32, #tpu.memory_space<vmem>>, vector<1x128xf32>
    %12 = vector.broadcast %11 : vector<1x128xf32> to vector<2x128xf32>
    %13 = arith.addf %10, %12 : vector<2x128xf32>
    %c0_11 = arith.constant 0 : index
    %c0_12 = arith.constant 0 : index
    %14 = vector.load %arg6[%c0_11, %c0_12] : memref<2x128xf32, #tpu.memory_space<vmem>>, vector<2x128xf32>
    tpu.vector_store %arg6[%c0_11, %c0_12], %13 {strides = array<i32>} : memref<2x128xf32, #tpu.memory_space<vmem>>, vector<2x128xf32>,
    return
  }
  func.func @transform_0(%arg0: i32) -> (i32, i32) {
    %c0_i32 = arith.constant 0 : i32
    %c0_i32_0 = arith.constant 0 : i32
    return %arg0, %c0_i32 : i32, i32
  }
  func.func @transform_1(%arg0: i32) -> (i32, i32) {
    %c0_i32 = arith.constant 0 : i32
    %c0_i32_0 = arith.constant 0 : i32
    %c0_i32_1 = arith.constant 0 : i32
    return %c0_i32, %c0_i32_0 : i32, i32
  }
  func.func @transform_2(%arg0: i32) -> (i32, i32) {
    %c0_i32 = arith.constant 0 : i32
    %c0_i32_0 = arith.constant 0 : i32
    %c0_i32_1 = arith.constant 0 : i32
    return %c0_i32, %c0_i32_0 : i32, i32
  }
  func.func @transform_3(%arg0: i32) -> (i32, i32) {
    %c0_i32 = arith.constant 0 : i32
    %c0_i32_0 = arith.constant 0 : i32
    %c0_i32_1 = arith.constant 0 : i32
    return %c0_i32, %c0_i32_0 : i32, i32
  }
  func.func @transform_4(%arg0: i32) -> (i32, i32) {
    %c0_i32 = arith.constant 0 : i32
    %c0_i32_0 = arith.constant 0 : i32
    %c0_i32_1 = arith.constant 0 : i32
    return %c0_i32, %c0_i32_0 : i32, i32
  }
  func.func @transform_5(%arg0: i32) -> (i32, i32) {
    %c0_i32 = arith.constant 0 : i32
    %c0_i32_0 = arith.constant 0 : i32
    return %arg0, %c0_i32 : i32, i32
  }
}

</mosaic_0001>

<bundles_post_ra>
// kernel: convnet_forward.3
= control target key start
LH: loop header
LB: loop body
LE: loop exit
PB: predicated region body
PF: predicated region fallthrough
CT: control target
= control target key end

     0   :  { %10 = vsyncpa [#allocation3], 0  ;;  %s9056_s0 = inlined_call_operand.vmem [shape: bf16[2,9216], index: 0, kind: input, shape index: {}]   ;;  %s9057_s1 = inlined_call_operand.hbm [shape: bf16[9216,128], index: 1, kind: input, shape index: {}]   ;;  %s9058_s2 = inlined_call_operand.hbm [shape: f32[1,128], index: 2, kind: input, shape index: {}]   ;;  %s9059_s3 = inlined_call_operand.hbm [shape: bf16[128,128], index: 3, kind: input, shape index: {}]   ;;  %s9060_s4 = inlined_call_operand.hbm [shape: f32[1,128], index: 4, kind: input, shape index: {}]   ;;  %s9061_s5 = inlined_call_operand.hbm [shape: f32[2,128], index: 5, kind: output, shape index: {}]  }
   0x1   :  { %11 = vsyncpa [#allocation6], 0 }
   0x2   :  { %12 = vsyncpa [#allocation9], 0  ;;  %s34_s20 = sshll.u32 %s9058_s2, 4  ;;  %s35_s20 = int_to_ptr.hbm [resolvable:$true] %s34_s20 }
   0x3   :  { %13 = vsyncpa [#allocation4], 0  ;;  %s8959_s21 = smov [#allocation5]   ;;  %s20_s25 = sshll.u32 %s9057_s1, 4  ;;  %s21_s25 = int_to_ptr.hbm [resolvable:$true] %s20_s25 }
   0x4   :  { %s36_s22 = sshll.u32 %s8959_s21, 4  ;;  %s8960_s26 = smov [#allocation2]   ;;  %s37_s22 = int_to_ptr.vmem [resolvable:$true] %s36_s22 }
   0x5   :  { %39 = dma.hbm_to_vmem [thread:$0]  %s35_s20, 16, %s37_s22, [#allocation6]  }
   0x6   :  { %s22_s27 = sshll.u32 %s8960_s26, 4  ;;  %s8961_s28 = smov 64   ;;  %s23_s27 = int_to_ptr.vmem [resolvable:$true] %s22_s27 }
   0x7   :  { %s8962_s29 = smov 4   ;;  %s44_s2 = sshll.u32 %s9059_s3, 4  ;;  %s45_s2 = int_to_ptr.hbm [resolvable:$true] %s44_s2 }
   0x8   :  { %28 = dma.hbm_to_vmem [thread:$0]  %s21_s25, 73728, %s23_s27, [#allocation3], %s8961_s28, %s8961_s28, %s8962_s29  }
   0x9   :  { %s8963_s7 = smov [#allocation7]   ;;  %s58_s1 = sshll.u32 %s9060_s4, 4  ;;  %s59_s1 = int_to_ptr.hbm [resolvable:$true] %s58_s1 }
   0xa   :  { %s46_s8 = sshll.u32 %s8963_s7, 4  ;;  %s8964_s11 = smov [#allocation8]   ;;  %s47_s8 = int_to_ptr.vmem [resolvable:$true] %s46_s8 }
   0xb   :  { %52 = dma.hbm_to_vmem [thread:$0]  %s45_s2, 1024, %s47_s8, [#allocation6], %s8961_s28, %s8961_s28, %s8962_s29  }
   0xc   :  { %s60_s12 = sshll.u32 %s8964_s11, 4  ;;  %s61_s12 = int_to_ptr.vmem [resolvable:$true] %s60_s12 }
   0xd   :  { %63 = dma.hbm_to_vmem [thread:$0]  %s59_s1, 16, %s61_s12, [#allocation9]  }
   0xe   :  { %8951 = dma.done.wait [#allocation3], 73728  }
   0xf   :  { %8952 = vsyncadd [#allocation3], 4294893568 }
  0x10   :  { %8953 = dma.done.wait [#allocation6], 1040  }
  0x11   :  { %8954 = vsyncadd [#allocation6], 4294966256 }
  0x12   :  { %8955 = dma.done.wait [#allocation9], 16  }
  0x13   :  { %8956 = vsyncadd [#allocation9], 4294967280  ;;  %v8245_v0 = vld [vmem:[#allocation2 + $0x38] sm:$0xff]  ;;  %v8244_v4 = vld [vmem:[#allocation2 + $0x30] sm:$0xff]  ;;  %s5890_s2 = sshll.u32 %s9061_s5, 4  ;;  %s5891_s2 = int_to_ptr.hbm [resolvable:$true] %s5890_s2 }
  0x14   :  { %v8253_v1 = vld [vmem:[#allocation2 + $0x78] sm:$0xff]  ;;  %4863 = vmatpush.bf16.msra.mxu0 %v8245_v0  ;;  %v8252_v5 = vld [vmem:[#allocation2 + $0x70] sm:$0xff]  ;;  %v8243_v8 = vld [vmem:[#allocation2 + $0x28] sm:$0xff] }
  0x15   :  { %v8261_v2 = vld [vmem:[#allocation2 + $0xb8] sm:$0xff]  ;;  %4876 = vmatpush.bf16.msra.mxu1 %v8253_v1  ;;  %v8260_v6 = vld [vmem:[#allocation2 + $0xb0] sm:$0xff]  ;;  %v8251_v9 = vld [vmem:[#allocation2 + $0x68] sm:$0xff] }
  0x16   :  { %v8269_v3 = vld [vmem:[#allocation2 + $0xf8] sm:$0xff]  ;;  %4889 = vmatpush.bf16.msra.mxu2 %v8261_v2  ;;  %v8268_v7 = vld [vmem:[#allocation2 + $0xf0] sm:$0xff]  ;;  %v8259_v10 = vld [vmem:[#allocation2 + $0xa8] sm:$0xff] }
  0x17   :  { %4902 = vmatpush.bf16.msra.mxu3 %v8269_v3  ;;  %v8267_v11 = vld [vmem:[#allocation2 + $0xe8] sm:$0xff]  ;;  %v8242_v12 = vld [vmem:[#allocation2 + $0x20] sm:$0xff]  ;;  %v8241_v16 = vld [vmem:[#allocation2 + $0x18] sm:$0xff] }
  0x18   :  { %4864 = vmatpush.bf16.msra.mxu0 %v8244_v4  ;;  %v8250_v13 = vld [vmem:[#allocation2 + $0x60] sm:$0xff]  ;;  %v8249_v17 = vld [vmem:[#allocation2 + $0x58] sm:$0xff]  ;;  %v8240_v20 = vld [vmem:[#allocation2 + $0x10] sm:$0xff] }
  0x19   :  { %4877 = vmatpush.bf16.msra.mxu1 %v8252_v5  ;;  %v8258_v14 = vld [vmem:[#allocation2 + $0xa0] sm:$0xff]  ;;  %v8257_v18 = vld [vmem:[#allocation2 + $0x98] sm:$0xff]  ;;  %v8248_v21 = vld [vmem:[#allocation2 + $0x50] sm:$0xff] }
  0x1a   :  { %4890 = vmatpush.bf16.msra.mxu2 %v8260_v6  ;;  %v8266_v15 = vld [vmem:[#allocation2 + $0xe0] sm:$0xff]  ;;  %v8265_v19 = vld [vmem:[#allocation2 + $0xd8] sm:$0xff]  ;;  %v8256_v23 = vld [vmem:[#allocation2 + $0x90] sm:$0xff] }
  0x1b   :  { %4903 = vmatpush.bf16.msra.mxu3 %v8268_v7  ;;  %v80_v22 = vld [vmem:[%s9056_s0] sm:$0xff]  ;;  %v8264_v24 = vld [vmem:[#allocation2 + $0xd0] sm:$0xff]  ;;  %v8239_v25 = vld [vmem:[#allocation2 + $0x8] sm:$0xff] }
  0x1c   :  { %4865 = vmatpush.bf16.msra.mxu0 %v8243_v8  ;;  %1246 = vst [vmem:[#allocation1] ss:$9 sm:$0xff] %v80_v22  ;;  %v8247_v26 = vld [vmem:[#allocation2 + $0x48] sm:$0xff]  ;;  %v8238_v29 = vld [vmem:[#allocation2] sm:$0xff]  ;;  %v8277_v33 = vld [vmem:[#allocation2 + $0x138] sm:$0xff] }
  0x1d   :  { %4878 = vmatpush.bf16.msra.mxu1 %v8251_v9  ;;  %v8255_v27 = vld [vmem:[#allocation2 + $0x88] sm:$0xff]  ;;  %v8246_v30 = vld [vmem:[#allocation2 + $0x40] sm:$0xff]  ;;  %v8285_v34 = vld [vmem:[#allocation2 + $0x178] sm:$0xff] }
  0x1e   :  { %4891 = vmatpush.bf16.msra.mxu2 %v8259_v10  ;;  %v8263_v28 = vld [vmem:[#allocation2 + $0xc8] sm:$0xff]  ;;  %v8254_v31 = vld [vmem:[#allocation2 + $0x80] sm:$0xff]  ;;  %v8293_v35 = vld [vmem:[#allocation2 + $0x1b8] sm:$0xff] }
  0x1f   :  { %4904 = vmatpush.bf16.msra.mxu3 %v8267_v11  ;;  %v8262_v32 = vld [vmem:[#allocation2 + $0xc0] sm:$0xff]  ;;  %v8301_v36 = vld [vmem:[#allocation2 + $0x1f8] sm:$0xff]  ;;  %v8276_v37 = vld [vmem:[#allocation2 + $0x130] sm:$0xff] }
  0x20   :  { %4866 = vmatpush.bf16.msra.mxu0 %v8242_v12  ;;  %v8284_v40 = vld [vmem:[#allocation2 + $0x170] sm:$0xff]  ;;  %v8275_v45 = vld [vmem:[#allocation2 + $0x128] sm:$0xff]  ;;  %v8274_v49 = vld [vmem:[#allocation2 + $0x120] sm:$0xff] }
  0x21   :  { %4879 = vmatpush.bf16.msra.mxu1 %v8250_v13  ;;  %v8292_v43 = vld [vmem:[#allocation2 + $0x1b0] sm:$0xff]  ;;  %v8283_v46 = vld [vmem:[#allocation2 + $0x168] sm:$0xff]  ;;  %v8282_v50 = vld [vmem:[#allocation2 + $0x160] sm:$0xff] }
  0x22   :  { %4892 = vmatpush.bf16.msra.mxu2 %v8258_v14  ;;  %v8300_v44 = vld [vmem:[#allocation2 + $0x1f0] sm:$0xff]  ;;  %v8291_v47 = vld [vmem:[#allocation2 + $0x1a8] sm:$0xff]  ;;  %v8290_v51 = vld [vmem:[#allocation2 + $0x1a0] sm:$0xff] }
  0x23   :  { %4905 = vmatpush.bf16.msra.mxu3 %v8266_v15  ;;  %v1249_v38 = vld [vmem:[#allocation1 + $0x12] sm:$0xff]  ;;  %v1247_v39 = vld [vmem:[#allocation1] sm:$0xff]  ;;  %v1248_v42 = vld [vmem:[#allocation1 + $0x9] sm:$0xff] }
  0x24   :  { %4867 = vmatpush.bf16.msra.mxu0 %v8241_v16  ;;  %v1250_v41 = vld [vmem:[#allocation1 + $0x1b] sm:$0xff]  ;;  %v8299_v48 = vld [vmem:[#allocation2 + $0x1e8] sm:$0xff]  ;;  %v8298_v52 = vld [vmem:[#allocation2 + $0x1e0] sm:$0xff] }
  0x25   :  { %4880 = vmatpush.bf16.msra.mxu1 %v8249_v17  ;;  %v8273_v53 = vld [vmem:[#allocation2 + $0x118] sm:$0xff]  ;;  %v8272_v57 = vld [vmem:[#allocation2 + $0x110] sm:$0xff]  ;;  %v8271_v61 = vld [vmem:[#allocation2 + $0x108] sm:$0xff] }
  0x26   :  { %4893 = vmatpush.bf16.msra.mxu2 %v8257_v18  ;;  %v8281_v54 = vld [vmem:[#allocation2 + $0x158] sm:$0xff]  ;;  %v8280_v58 = vld [vmem:[#allocation2 + $0x150] sm:$0xff]  ;;  %v8279_v62 = vld [vmem:[#allocation2 + $0x148] sm:$0xff] }
  0x27   :  { %4906 = vmatpush.bf16.msra.mxu3 %v8265_v19  ;;  %v8289_v55 = vld [vmem:[#allocation2 + $0x198] sm:$0xff]  ;;  %v8288_v59 = vld [vmem:[#allocation2 + $0x190] sm:$0xff]  ;;  %v8287_v63 = vld [vmem:[#allocation2 + $0x188] sm:$0xff] }
  0x28   :  { %4868 = vmatpush.bf16.msra.mxu0 %v8240_v20  ;;  %v8297_v56 = vld [vmem:[#allocation2 + $0x1d8] sm:$0xff]  ;;  %v8296_v60 = vld [vmem:[#allocation2 + $0x1d0] sm:$0xff]  ;;  %v8295_v0 = vld [vmem:[#allocation2 + $0x1c8] sm:$0xff] }
  0x29   :  { %4881 = vmatpush.bf16.msra.mxu1 %v8248_v21  ;;  %v1253_v1 = vld [vmem:[#allocation1 + $0x36] sm:$0xff]  ;;  %v1251_v2 = vld [vmem:[#allocation1 + $0x24] sm:$0xff]  ;;  %v1252_v4 = vld [vmem:[#allocation1 + $0x2d] sm:$0xff] }
  0x2a   :  { %4894 = vmatpush.bf16.msra.mxu2 %v8256_v23  ;;  %v1254_v3 = vld [vmem:[#allocation1 + $0x3f] sm:$0xff]  ;;  %v81_v5 = vld [vmem:[%s9056_s0 + $0x8] sm:$0xff]  ;;  %v8307_v18 = vld [vmem:[#allocation2 + $0x228] sm:$0xff] }
  0x2b   :  { %4907 = vmatpush.bf16.msra.mxu3 %v8264_v24  ;;  %1256 = vst [vmem:[#allocation1] ss:$9 sm:$0xff] %v81_v5  ;;  %v8270_v6 = vld [vmem:[#allocation2 + $0x100] sm:$0xff]  ;;  %v8309_v10 = vld [vmem:[#allocation2 + $0x238] sm:$0xff]  ;;  %v8308_v14 = vld [vmem:[#allocation2 + $0x230] sm:$0xff] }
  0x2c   :  { %4869 = vmatpush.bf16.msra.mxu0 %v8239_v25  ;;  %v8278_v7 = vld [vmem:[#allocation2 + $0x140] sm:$0xff]  ;;  %v8317_v11 = vld [vmem:[#allocation2 + $0x278] sm:$0xff]  ;;  %v8316_v15 = vld [vmem:[#allocation2 + $0x270] sm:$0xff] }
  0x2d   :  { %4882 = vmatpush.bf16.msra.mxu1 %v8247_v26  ;;  %v8286_v8 = vld [vmem:[#allocation2 + $0x180] sm:$0xff]  ;;  %v8325_v12 = vld [vmem:[#allocation2 + $0x2b8] sm:$0xff]  ;;  %v8324_v16 = vld [vmem:[#allocation2 + $0x2b0] sm:$0xff] }
  0x2e   :  { %4895 = vmatpush.bf16.msra.mxu2 %v8255_v27  ;;  %v8294_v9 = vld [vmem:[#allocation2 + $0x1c0] sm:$0xff]  ;;  %v8333_v13 = vld [vmem:[#allocation2 + $0x2f8] sm:$0xff]  ;;  %v8332_v17 = vld [vmem:[#allocation2 + $0x2f0] sm:$0xff] }
  0x2f   :  { %4908 = vmatpush.bf16.msra.mxu3 %v8263_v28  ;;  %v8315_v19 = vld [vmem:[#allocation2 + $0x268] sm:$0xff]  ;;  %v8306_v22 = vld [vmem:[#allocation2 + $0x220] sm:$0xff]  ;;  %v8305_v26 = vld [vmem:[#allocation2 + $0x218] sm:$0xff] }
  0x30   :  { %4870 = vmatpush.bf16.msra.mxu0 %v8238_v29  ;;  %v8323_v20 = vld [vmem:[#allocation2 + $0x2a8] sm:$0xff]  ;;  %v8314_v23 = vld [vmem:[#allocation2 + $0x260] sm:$0xff]  ;;  %v8313_v27 = vld [vmem:[#allocation2 + $0x258] sm:$0xff] }
  0x31   :  { %4883 = vmatpush.bf16.msra.mxu1 %v8246_v30  ;;  %v8331_v21 = vld [vmem:[#allocation2 + $0x2e8] sm:$0xff]  ;;  %v8322_v24 = vld [vmem:[#allocation2 + $0x2a0] sm:$0xff]  ;;  %v8321_v28 = vld [vmem:[#allocation2 + $0x298] sm:$0xff] }
  0x32   :  { %4896 = vmatpush.bf16.msra.mxu2 %v8254_v31  ;;  %v8330_v25 = vld [vmem:[#allocation2 + $0x2e0] sm:$0xff]  ;;  %v8329_v29 = vld [vmem:[#allocation2 + $0x2d8] sm:$0xff]  ;;  %v8304_v30 = vld [vmem:[#allocation2 + $0x210] sm:$0xff] }
  0x33   :  { %4909 = vmatpush.bf16.msra.mxu3 %v8262_v32  ;;  %4871 = vmatmul.bf16.vlgmr.msra.gmra.mxu0 %v1247_v39  ;;  %v8312_v31 = vld [vmem:[#allocation2 + $0x250] sm:$0xff]  ;;  %v8310_v39 = vld [vmem:[#allocation2 + $0x240] sm:$0xff] }
  0x34   :  { %4915 = vmatpush.bf16.msrb.mxu0 %v8277_v33  ;;  %4884 = vmatmul.bf16.vlgmr.msra.gmra.mxu1 %v1248_v42  ;;  %v8320_v32 = vld [vmem:[#allocation2 + $0x290] sm:$0xff]  ;;  %v8341_v42 = vld [vmem:[#allocation2 + $0x338] sm:$0xff] }
  0x35   :  { %4928 = vmatpush.bf16.msrb.mxu1 %v8285_v34  ;;  %4897 = vmatmul.bf16.vlgmr.msra.gmra.mxu2 %v1249_v38  ;;  %v8328_v33 = vld [vmem:[#allocation2 + $0x2d0] sm:$0xff]  ;;  %v8303_v34 = vld [vmem:[#allocation2 + $0x208] sm:$0xff]  ;;  %v8302_v38 = vld [vmem:[#allocation2 + $0x200] sm:$0xff] }
  0x36   :  { %4941 = vmatpush.bf16.msrb.mxu2 %v8293_v35  ;;  %4910 = vmatmul.bf16.vlgmr.msra.gmra.mxu3 %v1250_v41  ;;  %v8311_v35 = vld [vmem:[#allocation2 + $0x248] sm:$0xff]  ;;  %v8326_v41 = vld [vmem:[#allocation2 + $0x2c0] sm:$0xff]  ;;  %v8360_v5 = vld [vmem:[#allocation2 + $0x3d0] sm:$0xff] }
  0x37   :  { %4954 = vmatpush.bf16.msrb.mxu3 %v8301_v36  ;;  %v8319_v36 = vld [vmem:[#allocation2 + $0x288] sm:$0xff] }
  0x38   :  { %4916 = vmatpush.bf16.msrb.mxu0 %v8276_v37  ;;  %v8327_v37 = vld [vmem:[#allocation2 + $0x2c8] sm:$0xff] }
  0x39   :  { %4929 = vmatpush.bf16.msrb.mxu1 %v8284_v40  ;;  %v8318_v40 = vld [vmem:[#allocation2 + $0x280] sm:$0xff] }
  0x3a   :  { %4942 = vmatpush.bf16.msrb.mxu2 %v8292_v43  ;;  %v8349_v43 = vld [vmem:[#allocation2 + $0x378] sm:$0xff] }
  0x3b   :  { %4955 = vmatpush.bf16.msrb.mxu3 %v8300_v44  ;;  %v8357_v44 = vld [vmem:[#allocation2 + $0x3b8] sm:$0xff] }
  0x3c   :  { %4917 = vmatpush.bf16.msrb.mxu0 %v8275_v45  ;;  %v8365_v45 = vld [vmem:[#allocation2 + $0x3f8] sm:$0xff] }
  0x3d   :  { %4930 = vmatpush.bf16.msrb.mxu1 %v8283_v46  ;;  %v1257_v46 = vld [vmem:[#allocation1] sm:$0xff] }
  0x3e   :  { %4943 = vmatpush.bf16.msrb.mxu2 %v8291_v47  ;;  %v1259_v47 = vld [vmem:[#allocation1 + $0x12] sm:$0xff] }
  0x3f   :  { %4956 = vmatpush.bf16.msrb.mxu3 %v8299_v48  ;;  %v1258_v48 = vld [vmem:[#allocation1 + $0x9] sm:$0xff] }
  0x40   :  { %4918 = vmatpush.bf16.msrb.mxu0 %v8274_v49  ;;  %v1260_v49 = vld [vmem:[#allocation1 + $0x1b] sm:$0xff] }
  0x41   :  { %4931 = vmatpush.bf16.msrb.mxu1 %v8282_v50  ;;  %v8340_v50 = vld [vmem:[#allocation2 + $0x330] sm:$0xff] }
  0x42   :  { %4944 = vmatpush.bf16.msrb.mxu2 %v8290_v51  ;;  %v8348_v51 = vld [vmem:[#allocation2 + $0x370] sm:$0xff] }
  0x43   :  { %4957 = vmatpush.bf16.msrb.mxu3 %v8298_v52  ;;  %v8356_v52 = vld [vmem:[#allocation2 + $0x3b0] sm:$0xff] }
  0x44   :  { %4919 = vmatpush.bf16.msrb.mxu0 %v8273_v53  ;;  %v8364_v53 = vld [vmem:[#allocation2 + $0x3f0] sm:$0xff] }
  0x45   :  { %4932 = vmatpush.bf16.msrb.mxu1 %v8281_v54  ;;  %v8339_v54 = vld [vmem:[#allocation2 + $0x328] sm:$0xff] }
  0x46   :  { %4945 = vmatpush.bf16.msrb.mxu2 %v8289_v55  ;;  %v8347_v55 = vld [vmem:[#allocation2 + $0x368] sm:$0xff] }
  0x47   :  { %4958 = vmatpush.bf16.msrb.mxu3 %v8297_v56  ;;  %v8355_v56 = vld [vmem:[#allocation2 + $0x3a8] sm:$0xff] }
  0x48   :  { %4920 = vmatpush.bf16.msrb.mxu0 %v8272_v57  ;;  %v8363_v57 = vld [vmem:[#allocation2 + $0x3e8] sm:$0xff] }
  0x49   :  { %4933 = vmatpush.bf16.msrb.mxu1 %v8280_v58  ;;  %v8338_v58 = vld [vmem:[#allocation2 + $0x320] sm:$0xff] }
  0x4a   :  { %4946 = vmatpush.bf16.msrb.mxu2 %v8288_v59  ;;  %v8346_v59 = vld [vmem:[#allocation2 + $0x360] sm:$0xff] }
  0x4b   :  { %4959 = vmatpush.bf16.msrb.mxu3 %v8296_v60  ;;  %v8354_v60 = vld [vmem:[#allocation2 + $0x3a0] sm:$0xff] }
  0x4c   :  { %4921 = vmatpush.bf16.msrb.mxu0 %v8271_v61  ;;  %v8362_v61 = vld [vmem:[#allocation2 + $0x3e0] sm:$0xff] }
  0x4d   :  { %4934 = vmatpush.bf16.msrb.mxu1 %v8279_v62  ;;  %v8337_v62 = vld [vmem:[#allocation2 + $0x318] sm:$0xff] }
  0x4e   :  { %4947 = vmatpush.bf16.msrb.mxu2 %v8287_v63  ;;  %v8345_v63 = vld [vmem:[#allocation2 + $0x358] sm:$0xff] }
  0x4f   :  { %4960 = vmatpush.bf16.msrb.mxu3 %v8295_v0  ;;  %v8353_v0 = vld [vmem:[#allocation2 + $0x398] sm:$0xff] }
  0x50   :  { %4922 = vmatpush.bf16.msrb.mxu0 %v8270_v6  ;;  %v8335_v6 = vld [vmem:[#allocation2 + $0x308] sm:$0xff] }
  0x51   :  { %4935 = vmatpush.bf16.msrb.mxu1 %v8278_v7  ;;  %v8343_v7 = vld [vmem:[#allocation2 + $0x348] sm:$0xff] }
  0x52   :  { %4948 = vmatpush.bf16.msrb.mxu2 %v8286_v8  ;;  %v8351_v8 = vld [vmem:[#allocation2 + $0x388] sm:$0xff] }
  0x53   :  { %4961 = vmatpush.bf16.msrb.mxu3 %v8294_v9  ;;  %4923 = vmatmul.bf16.vlgmr.msrb.gmra.mxu0 %v1251_v2  ;;  %v8336_v2 = vld [vmem:[#allocation2 + $0x310] sm:$0xff]  ;;  %v8359_v9 = vld [vmem:[#allocation2 + $0x3c8] sm:$0xff] }
  0x54   :  { %4967 = vmatpush.bf16.msra.mxu0 %v8309_v10  ;;  %4936 = vmatmul.bf16.vlgmr.msrb.gmra.mxu1 %v1252_v4  ;;  %v8352_v4 = vld [vmem:[#allocation2 + $0x390] sm:$0xff]  ;;  %v1261_v10 = vld [vmem:[#allocation1 + $0x24] sm:$0xff] }
  0x55   :  { %4980 = vmatpush.bf16.msra.mxu1 %v8317_v11  ;;  %4949 = vmatmul.bf16.vlgmr.msrb.gmra.mxu2 %v1253_v1  ;;  %v8361_v1 = vld [vmem:[#allocation2 + $0x3d8] sm:$0xff]  ;;  %v1263_v11 = vld [vmem:[#allocation1 + $0x36] sm:$0xff] }
  0x56   :  { %4993 = vmatpush.bf16.msra.mxu2 %v8325_v12  ;;  %4962 = vmatmul.bf16.vlgmr.msrb.gmra.mxu3 %v1254_v3  ;;  %v8344_v3 = vld [vmem:[#allocation2 + $0x350] sm:$0xff]  ;;  %v1262_v12 = vld [vmem:[#allocation1 + $0x2d] sm:$0xff] }
  0x57   :  { %5006 = vmatpush.bf16.msra.mxu3 %v8333_v13  ;;  %v1264_v13 = vld [vmem:[#allocation1 + $0x3f] sm:$0xff] }
  0x58   :  { %4968 = vmatpush.bf16.msra.mxu0 %v8308_v14  ;;  %v82_v14 = vld [vmem:[%s9056_s0 + $0x10] sm:$0xff] }
  0x59   :  { %4981 = vmatpush.bf16.msra.mxu1 %v8316_v15  ;;  %1266 = vst [vmem:[#allocation1] ss:$9 sm:$0xff] %v82_v14  ;;  %v8334_v15 = vld [vmem:[#allocation2 + $0x300] sm:$0xff]  ;;  %v8417_v14 = vld [vmem:[#allocation2 + $0x598] sm:$0xff] }
  0x5a   :  { %4994 = vmatpush.bf16.msra.mxu2 %v8324_v16  ;;  %v8342_v16 = vld [vmem:[#allocation2 + $0x340] sm:$0xff] }
  0x5b   :  { %5007 = vmatpush.bf16.msra.mxu3 %v8332_v17  ;;  %v8350_v17 = vld [vmem:[#allocation2 + $0x380] sm:$0xff] }
  0x5c   :  { %4969 = vmatpush.bf16.msra.mxu0 %v8307_v18  ;;  %v8358_v18 = vld [vmem:[#allocation2 + $0x3c0] sm:$0xff] }
  0x5d   :  { %4982 = vmatpush.bf16.msra.mxu1 %v8315_v19  ;;  %v8373_v19 = vld [vmem:[#allocation2 + $0x438] sm:$0xff] }
  0x5e   :  { %4995 = vmatpush.bf16.msra.mxu2 %v8323_v20  ;;  %v8381_v20 = vld [vmem:[#allocation2 + $0x478] sm:$0xff] }
  0x5f   :  { %5008 = vmatpush.bf16.msra.mxu3 %v8331_v21  ;;  %v8389_v21 = vld [vmem:[#allocation2 + $0x4b8] sm:$0xff] }
  0x60   :  { %4970 = vmatpush.bf16.msra.mxu0 %v8306_v22  ;;  %v8397_v22 = vld [vmem:[#allocation2 + $0x4f8] sm:$0xff] }
  0x61   :  { %4983 = vmatpush.bf16.msra.mxu1 %v8314_v23  ;;  %v8372_v23 = vld [vmem:[#allocation2 + $0x430] sm:$0xff] }
  0x62   :  { %4996 = vmatpush.bf16.msra.mxu2 %v8322_v24  ;;  %v8380_v24 = vld [vmem:[#allocation2 + $0x470] sm:$0xff] }
  0x63   :  { %5009 = vmatpush.bf16.msra.mxu3 %v8330_v25  ;;  %v8388_v25 = vld [vmem:[#allocation2 + $0x4b0] sm:$0xff] }
  0x64   :  { %4971 = vmatpush.bf16.msra.mxu0 %v8305_v26  ;;  %v8396_v26 = vld [vmem:[#allocation2 + $0x4f0] sm:$0xff] }
  0x65   :  { %4984 = vmatpush.bf16.msra.mxu1 %v8313_v27  ;;  %v8371_v27 = vld [vmem:[#allocation2 + $0x428] sm:$0xff] }
  0x66   :  { %4997 = vmatpush.bf16.msra.mxu2 %v8321_v28  ;;  %v8379_v28 = vld [vmem:[#allocation2 + $0x468] sm:$0xff] }
  0x67   :  { %5010 = vmatpush.bf16.msra.mxu3 %v8329_v29  ;;  %v8387_v29 = vld [vmem:[#allocation2 + $0x4a8] sm:$0xff] }
  0x68   :  { %4972 = vmatpush.bf16.msra.mxu0 %v8304_v30  ;;  %v8395_v30 = vld [vmem:[#allocation2 + $0x4e8] sm:$0xff] }
  0x69   :  { %4985 = vmatpush.bf16.msra.mxu1 %v8312_v31  ;;  %v8370_v31 = vld [vmem:[#allocation2 + $0x420] sm:$0xff] }
  0x6a   :  { %4998 = vmatpush.bf16.msra.mxu2 %v8320_v32  ;;  %v8378_v32 = vld [vmem:[#allocation2 + $0x460] sm:$0xff] }
  0x6b   :  { %5011 = vmatpush.bf16.msra.mxu3 %v8328_v33  ;;  %v8386_v33 = vld [vmem:[#allocation2 + $0x4a0] sm:$0xff] }
  0x6c   :  { %4973 = vmatpush.bf16.msra.mxu0 %v8303_v34  ;;  %v8394_v34 = vld [vmem:[#allocation2 + $0x4e0] sm:$0xff] }
  0x6d   :  { %4986 = vmatpush.bf16.msra.mxu1 %v8311_v35  ;;  %v8369_v35 = vld [vmem:[#allocation2 + $0x418] sm:$0xff] }
  0x6e   :  { %4999 = vmatpush.bf16.msra.mxu2 %v8319_v36  ;;  %v8377_v36 = vld [vmem:[#allocation2 + $0x458] sm:$0xff] }
  0x6f   :  { %5012 = vmatpush.bf16.msra.mxu3 %v8327_v37  ;;  %v8385_v37 = vld [vmem:[#allocation2 + $0x498] sm:$0xff] }
  0x70   :  { %4974 = vmatpush.bf16.msra.mxu0 %v8302_v38  ;;  %v8393_v38 = vld [vmem:[#allocation2 + $0x4d8] sm:$0xff] }
  0x71   :  { %4987 = vmatpush.bf16.msra.mxu1 %v8310_v39  ;;  %v8368_v39 = vld [vmem:[#allocation2 + $0x410] sm:$0xff] }
  0x72   :  { %5000 = vmatpush.bf16.msra.mxu2 %v8318_v40  ;;  %v8376_v40 = vld [vmem:[#allocation2 + $0x450] sm:$0xff] }
  0x73   :  { %5013 = vmatpush.bf16.msra.mxu3 %v8326_v41  ;;  %4975 = vmatmul.bf16.vlgmr.msra.gmra.mxu0 %v1257_v46  ;;  %v8384_v41 = vld [vmem:[#allocation2 + $0x490] sm:$0xff]  ;;  %v8391_v46 = vld [vmem:[#allocation2 + $0x4c8] sm:$0xff] }
  0x74   :  { %5019 = vmatpush.bf16.msrb.mxu0 %v8341_v42  ;;  %4988 = vmatmul.bf16.vlgmr.msra.gmra.mxu1 %v1258_v48  ;;  %v8392_v42 = vld [vmem:[#allocation2 + $0x4d0] sm:$0xff]  ;;  %v8374_v48 = vld [vmem:[#allocation2 + $0x440] sm:$0xff] }
  0x75   :  { %5032 = vmatpush.bf16.msrb.mxu1 %v8349_v43  ;;  %5001 = vmatmul.bf16.vlgmr.msra.gmra.mxu2 %v1259_v47  ;;  %v8367_v43 = vld [vmem:[#allocation2 + $0x408] sm:$0xff]  ;;  %v8366_v47 = vld [vmem:[#allocation2 + $0x400] sm:$0xff] }
  0x76   :  { %5045 = vmatpush.bf16.msrb.mxu2 %v8357_v44  ;;  %5014 = vmatmul.bf16.vlgmr.msra.gmra.mxu3 %v1260_v49  ;;  %v8375_v44 = vld [vmem:[#allocation2 + $0x448] sm:$0xff]  ;;  %v8382_v49 = vld [vmem:[#allocation2 + $0x480] sm:$0xff] }
  0x77   :  { %5058 = vmatpush.bf16.msrb.mxu3 %v8365_v45  ;;  %v8383_v45 = vld [vmem:[#allocation2 + $0x488] sm:$0xff] }
  0x78   :  { %5020 = vmatpush.bf16.msrb.mxu0 %v8340_v50  ;;  %v8390_v50 = vld [vmem:[#allocation2 + $0x4c0] sm:$0xff] }
  0x79   :  { %5033 = vmatpush.bf16.msrb.mxu1 %v8348_v51  ;;  %v8405_v51 = vld [vmem:[#allocation2 + $0x538] sm:$0xff] }
  0x7a   :  { %5046 = vmatpush.bf16.msrb.mxu2 %v8356_v52  ;;  %v8413_v52 = vld [vmem:[#allocation2 + $0x578] sm:$0xff] }
  0x7b   :  { %5059 = vmatpush.bf16.msrb.mxu3 %v8364_v53  ;;  %v8421_v53 = vld [vmem:[#allocation2 + $0x5b8] sm:$0xff] }
  0x7c   :  { %5021 = vmatpush.bf16.msrb.mxu0 %v8339_v54  ;;  %v8429_v54 = vld [vmem:[#allocation2 + $0x5f8] sm:$0xff] }
  0x7d   :  { %5034 = vmatpush.bf16.msrb.mxu1 %v8347_v55  ;;  %v1267_v55 = vld [vmem:[#allocation1] sm:$0xff] }
  0x7e   :  { %5047 = vmatpush.bf16.msrb.mxu2 %v8355_v56  ;;  %v1269_v56 = vld [vmem:[#allocation1 + $0x12] sm:$0xff] }
  0x7f   :  { %5060 = vmatpush.bf16.msrb.mxu3 %v8363_v57  ;;  %v1268_v57 = vld [vmem:[#allocation1 + $0x9] sm:$0xff] }
  0x80   :  { %5022 = vmatpush.bf16.msrb.mxu0 %v8338_v58  ;;  %v1270_v58 = vld [vmem:[#allocation1 + $0x1b] sm:$0xff] }
  0x81   :  { %5035 = vmatpush.bf16.msrb.mxu1 %v8346_v59  ;;  %v8404_v59 = vld [vmem:[#allocation2 + $0x530] sm:$0xff] }
  0x82   :  { %5048 = vmatpush.bf16.msrb.mxu2 %v8354_v60  ;;  %v8412_v60 = vld [vmem:[#allocation2 + $0x570] sm:$0xff] }
  0x83   :  { %5061 = vmatpush.bf16.msrb.mxu3 %v8362_v61  ;;  %v8420_v61 = vld [vmem:[#allocation2 + $0x5b0] sm:$0xff] }
  0x84   :  { %5023 = vmatpush.bf16.msrb.mxu0 %v8337_v62  ;;  %v8428_v62 = vld [vmem:[#allocation2 + $0x5f0] sm:$0xff] }
  0x85   :  { %5036 = vmatpush.bf16.msrb.mxu1 %v8345_v63  ;;  %v8403_v63 = vld [vmem:[#allocation2 + $0x528] sm:$0xff] }
  0x86   :  { %5049 = vmatpush.bf16.msrb.mxu2 %v8353_v0  ;;  %v8411_v0 = vld [vmem:[#allocation2 + $0x568] sm:$0xff] }
  0x87   :  { %5062 = vmatpush.bf16.msrb.mxu3 %v8361_v1  ;;  %v8829_v1 = vld [vmem:[#allocation5] ss:$0 sm:$0xff] }
  0x88   :  { %5024 = vmatpush.bf16.msrb.mxu0 %v8336_v2  ;;  %v8419_v2 = vld [vmem:[#allocation2 + $0x5a8] sm:$0xff] }
  0x89   :  { %5037 = vmatpush.bf16.msrb.mxu1 %v8344_v3  ;;  %v8427_v3 = vld [vmem:[#allocation2 + $0x5e8] sm:$0xff] }
  0x8a   :  { %5050 = vmatpush.bf16.msrb.mxu2 %v8352_v4 }
  0x8b   :  { %5063 = vmatpush.bf16.msrb.mxu3 %v8360_v5  ;;  %v8402_v5 = vld [vmem:[#allocation2 + $0x520] sm:$0xff] }
  0x8c   :  { %5025 = vmatpush.bf16.msrb.mxu0 %v8335_v6  ;;  %v8410_v6 = vld [vmem:[#allocation2 + $0x560] sm:$0xff] }
  0x8d   :  { %5038 = vmatpush.bf16.msrb.mxu1 %v8343_v7 }
  0x8e   :  { %5051 = vmatpush.bf16.msrb.mxu2 %v8351_v8 }
  0x8f   :  { %5064 = vmatpush.bf16.msrb.mxu3 %v8359_v9  ;;  %v8418_v9 = vld [vmem:[#allocation2 + $0x5a0] sm:$0xff] }
  0x90   :  { %5026 = vmatpush.bf16.msrb.mxu0 %v8334_v15  ;;  %v8425_v15 = vld [vmem:[#allocation2 + $0x5d8] sm:$0xff] }
  0x91   :  { %5039 = vmatpush.bf16.msrb.mxu1 %v8342_v16 }
  0x92   :  { %5052 = vmatpush.bf16.msrb.mxu2 %v8350_v17 }
  0x93   :  { %5065 = vmatpush.bf16.msrb.mxu3 %v8358_v18  ;;  %5027 = vmatmul.bf16.vlgmr.msrb.gmra.mxu0 %v1261_v10  ;;  %v8426_v10 = vld [vmem:[#allocation2 + $0x5e0] sm:$0xff] }
  0x94   :  { %5071 = vmatpush.bf16.msra.mxu0 %v8373_v19  ;;  %5040 = vmatmul.bf16.vlgmr.msrb.gmra.mxu1 %v1262_v12  ;;  %v8401_v12 = vld [vmem:[#allocation2 + $0x518] sm:$0xff] }
  0x95   :  { %5084 = vmatpush.bf16.msra.mxu1 %v8381_v20  ;;  %5053 = vmatmul.bf16.vlgmr.msrb.gmra.mxu2 %v1263_v11  ;;  %v8400_v20 = vld [vmem:[#allocation2 + $0x510] sm:$0xff] }
  0x96   :  { %5097 = vmatpush.bf16.msra.mxu2 %v8389_v21  ;;  %5066 = vmatmul.bf16.vlgmr.msrb.gmra.mxu3 %v1264_v13  ;;  %v8409_v13 = vld [vmem:[#allocation2 + $0x558] sm:$0xff]  ;;  %v8408_v21 = vld [vmem:[#allocation2 + $0x550] sm:$0xff] }
  0x97   :  { %5110 = vmatpush.bf16.msra.mxu3 %v8397_v22 }
  0x98   :  { %5072 = vmatpush.bf16.msra.mxu0 %v8372_v23 }
  0x99   :  { %5085 = vmatpush.bf16.msra.mxu1 %v8380_v24  ;;  %v8416_v24 = vld [vmem:[#allocation2 + $0x590] sm:$0xff] }
  0x9a   :  { %5098 = vmatpush.bf16.msra.mxu2 %v8388_v25  ;;  %v8424_v25 = vld [vmem:[#allocation2 + $0x5d0] sm:$0xff] }
  0x9b   :  { %5111 = vmatpush.bf16.msra.mxu3 %v8396_v26  ;;  %v8399_v26 = vld [vmem:[#allocation2 + $0x508] sm:$0xff] }
  0x9c   :  { %5073 = vmatpush.bf16.msra.mxu0 %v8371_v27  ;;  %v8407_v27 = vld [vmem:[#allocation2 + $0x548] sm:$0xff] }
  0x9d   :  { %5086 = vmatpush.bf16.msra.mxu1 %v8379_v28  ;;  %v8415_v28 = vld [vmem:[#allocation2 + $0x588] sm:$0xff] }
  0x9e   :  { %5099 = vmatpush.bf16.msra.mxu2 %v8387_v29  ;;  %v8423_v29 = vld [vmem:[#allocation2 + $0x5c8] sm:$0xff] }
  0x9f   :  { %5112 = vmatpush.bf16.msra.mxu3 %v8395_v30  ;;  %v1271_v30 = vld [vmem:[#allocation1 + $0x24] sm:$0xff] }
  0xa0   :  { %5074 = vmatpush.bf16.msra.mxu0 %v8370_v31  ;;  %v1273_v31 = vld [vmem:[#allocation1 + $0x36] sm:$0xff] }
  0xa1   :  { %5087 = vmatpush.bf16.msra.mxu1 %v8378_v32 }
  0xa2   :  { %5100 = vmatpush.bf16.msra.mxu2 %v8386_v33  ;;  %v1272_v33 = vld [vmem:[#allocation1 + $0x2d] sm:$0xff] }
  0xa3   :  { %5113 = vmatpush.bf16.msra.mxu3 %v8394_v34  ;;  %v1274_v34 = vld [vmem:[#allocation1 + $0x3f] sm:$0xff] }
  0xa4   :  { %5075 = vmatpush.bf16.msra.mxu0 %v8369_v35 }
  0xa5   :  { %5088 = vmatpush.bf16.msra.mxu1 %v8377_v36  ;;  %v83_v36 = vld [vmem:[%s9056_s0 + $0x18] sm:$0xff] }
  0xa6   :  { %5101 = vmatpush.bf16.msra.mxu2 %v8385_v37  ;;  %1276 = vst [vmem:[#allocation1] ss:$9 sm:$0xff] %v83_v36  ;;  %v8398_v37 = vld [vmem:[#allocation2 + $0x500] sm:$0xff]  ;;  %v8491_v36 = vld [vmem:[#allocation2 + $0x7e8] sm:$0xff] }
  0xa7   :  { %5114 = vmatpush.bf16.msra.mxu3 %v8393_v38  ;;  %v8406_v38 = vld [vmem:[#allocation2 + $0x540] sm:$0xff] }
  0xa8   :  { %5076 = vmatpush.bf16.msra.mxu0 %v8368_v39  ;;  %v8414_v39 = vld [vmem:[#allocation2 + $0x580] sm:$0xff] }
  0xa9   :  { %5089 = vmatpush.bf16.msra.mxu1 %v8376_v40  ;;  %v8422_v40 = vld [vmem:[#allocation2 + $0x5c0] sm:$0xff] }
  0xaa   :  { %5102 = vmatpush.bf16.msra.mxu2 %v8384_v41  ;;  %v8437_v41 = vld [vmem:[#allocation2 + $0x638] sm:$0xff] }
  0xab   :  { %5115 = vmatpush.bf16.msra.mxu3 %v8392_v42  ;;  %v8445_v42 = vld [vmem:[#allocation2 + $0x678] sm:$0xff] }
  0xac   :  { %5077 = vmatpush.bf16.msra.mxu0 %v8367_v43  ;;  %v8453_v43 = vld [vmem:[#allocation2 + $0x6b8] sm:$0xff] }
  0xad   :  { %5090 = vmatpush.bf16.msra.mxu1 %v8375_v44  ;;  %v8461_v44 = vld [vmem:[#allocation2 + $0x6f8] sm:$0xff] }
  0xae   :  { %5103 = vmatpush.bf16.msra.mxu2 %v8383_v45  ;;  %v8436_v45 = vld [vmem:[#allocation2 + $0x630] sm:$0xff] }
  0xaf   :  { %5116 = vmatpush.bf16.msra.mxu3 %v8391_v46  ;;  %v8444_v46 = vld [vmem:[#allocation2 + $0x670] sm:$0xff] }
  0xb0   :  { %5078 = vmatpush.bf16.msra.mxu0 %v8366_v47  ;;  %v4872_v4 = vpop.f32.mrf.mxu0  ;;  %v8452_v47 = vld [vmem:[#allocation2 + $0x6b0] sm:$0xff] }
  0xb1   :  { %5091 = vmatpush.bf16.msra.mxu1 %v8374_v48  ;;  %v4873_v7 = vadd.f32 %v8829_v1, %v4872_v4  ;;  %v4885_v8 = vpop.f32.mrf.mxu1  ;;  %v8460_v48 = vld [vmem:[#allocation2 + $0x6f0] sm:$0xff] }
  0xb2   :  { %5104 = vmatpush.bf16.msra.mxu2 %v8382_v49  ;;  %v8435_v49 = vld [vmem:[#allocation2 + $0x628] sm:$0xff] }
  0xb3   :  { %5117 = vmatpush.bf16.msra.mxu3 %v8390_v50  ;;  %5079 = vmatmul.bf16.vlgmr.msra.gmra.mxu0 %v1267_v55  ;;  %v4886_v11 = vadd.f32 %v4885_v8, %v4873_v7  ;;  %v8443_v50 = vld [vmem:[#allocation2 + $0x668] sm:$0xff]  ;;  %v8442_v55 = vld [vmem:[#allocation2 + $0x660] sm:$0xff] }
  0xb4   :  { %5123 = vmatpush.bf16.msrb.mxu0 %v8405_v51  ;;  %5092 = vmatmul.bf16.vlgmr.msra.gmra.mxu1 %v1268_v57  ;;  %v8451_v51 = vld [vmem:[#allocation2 + $0x6a8] sm:$0xff] }
  0xb5   :  { %5136 = vmatpush.bf16.msrb.mxu1 %v8413_v52  ;;  %5105 = vmatmul.bf16.vlgmr.msra.gmra.mxu2 %v1269_v56  ;;  %v8459_v52 = vld [vmem:[#allocation2 + $0x6e8] sm:$0xff] }
  0xb6   :  { %5149 = vmatpush.bf16.msrb.mxu2 %v8421_v53  ;;  %5118 = vmatmul.bf16.vlgmr.msra.gmra.mxu3 %v1270_v58  ;;  %v8450_v58 = vld [vmem:[#allocation2 + $0x6a0] sm:$0xff] }
  0xb7   :  { %5162 = vmatpush.bf16.msrb.mxu3 %v8429_v54  ;;  %v8434_v54 = vld [vmem:[#allocation2 + $0x620] sm:$0xff] }
  0xb8   :  { %5124 = vmatpush.bf16.msrb.mxu0 %v8404_v59  ;;  %v4898_v16 = vpop.f32.mrf.mxu2  ;;  %v4874_v19 = vpop.f32.mrf.mxu0  ;;  %v8458_v59 = vld [vmem:[#allocation2 + $0x6e0] sm:$0xff] }
  0xb9   :  { %5137 = vmatpush.bf16.msrb.mxu1 %v8412_v60  ;;  %v4899_v17 = vadd.f32 %v4898_v16, %v4886_v11  ;;  %v4911_v18 = vpop.f32.mrf.mxu3  ;;  %v4887_v23 = vpop.f32.mrf.mxu1  ;;  %v8431_v11 = vld [vmem:[#allocation2 + $0x608] sm:$0xff]  ;;  %v8446_v19 = vld [vmem:[#allocation2 + $0x680] sm:$0xff] }
  0xba   :  { %5150 = vmatpush.bf16.msrb.mxu2 %v8420_v61  ;;  %v8433_v61 = vld [vmem:[#allocation2 + $0x618] sm:$0xff] }
  0xbb   :  { %5163 = vmatpush.bf16.msrb.mxu3 %v8428_v62  ;;  %v9017_v22 = vadd.f32 %v4911_v18, %v4899_v17  ;;  %v8441_v62 = vld [vmem:[#allocation2 + $0x658] sm:$0xff]  ;;  %v8430_v17 = vld [vmem:[#allocation2 + $0x600] sm:$0xff] }
  0xbc   :  { %5125 = vmatpush.bf16.msrb.mxu0 %v8403_v63  ;;  %v8449_v63 = vld [vmem:[#allocation2 + $0x698] sm:$0xff]  ;;  %v8438_v18 = vld [vmem:[#allocation2 + $0x640] sm:$0xff] }
  0xbd   :  { %5138 = vmatpush.bf16.msrb.mxu1 %v8411_v0  ;;  %v8457_v0 = vld [vmem:[#allocation2 + $0x6d8] sm:$0xff] }
  0xbe   :  { %5151 = vmatpush.bf16.msrb.mxu2 %v8419_v2  ;;  %v8485_v23 = vld [vmem:[#allocation2 + $0x7b8] sm:$0xff] }
  0xbf   :  { %5164 = vmatpush.bf16.msrb.mxu3 %v8427_v3 }
  0xc0   :  { %5126 = vmatpush.bf16.msrb.mxu0 %v8402_v5  ;;  %v4900_v32 = vpop.f32.mrf.mxu2  ;;  %v8432_v5 = vld [vmem:[#allocation2 + $0x610] sm:$0xff] }
  0xc1   :  { %5139 = vmatpush.bf16.msrb.mxu1 %v8410_v6  ;;  %v4913_v35 = vpop.f32.mrf.mxu3  ;;  %v8440_v6 = vld [vmem:[#allocation2 + $0x650] sm:$0xff] }
  0xc2   :  { %5152 = vmatpush.bf16.msrb.mxu2 %v8418_v9  ;;  %v8448_v9 = vld [vmem:[#allocation2 + $0x690] sm:$0xff]  ;;  %v8483_v35 = vld [vmem:[#allocation2 + $0x7a8] sm:$0xff] }
  0xc3   :  { %5165 = vmatpush.bf16.msrb.mxu3 %v8426_v10  ;;  %v8456_v10 = vld [vmem:[#allocation2 + $0x6d0] sm:$0xff] }
  0xc4   :  { %5127 = vmatpush.bf16.msrb.mxu0 %v8401_v12  ;;  %v8439_v12 = vld [vmem:[#allocation2 + $0x648] sm:$0xff]  ;;  %v8492_v32 = vld [vmem:[#allocation2 + $0x7f0] sm:$0xff] }
  0xc5   :  { %5140 = vmatpush.bf16.msrb.mxu1 %v8409_v13  ;;  %v8447_v13 = vld [vmem:[#allocation2 + $0x688] sm:$0xff] }
  0xc6   :  { %5153 = vmatpush.bf16.msrb.mxu2 %v8417_v14  ;;  %v8455_v14 = vld [vmem:[#allocation2 + $0x6c8] sm:$0xff] }
  0xc7   :  { %5166 = vmatpush.bf16.msrb.mxu3 %v8425_v15 }
  0xc8   :  { %5128 = vmatpush.bf16.msrb.mxu0 %v8400_v20  ;;  %v8454_v20 = vld [vmem:[#allocation2 + $0x6c0] sm:$0xff] }
  0xc9   :  { %5141 = vmatpush.bf16.msrb.mxu1 %v8408_v21  ;;  %v8469_v21 = vld [vmem:[#allocation2 + $0x738] sm:$0xff] }
  0xca   :  { %5154 = vmatpush.bf16.msrb.mxu2 %v8416_v24  ;;  %v8493_v24 = vld [vmem:[#allocation2 + $0x7f8] sm:$0xff] }
  0xcb   :  { %5167 = vmatpush.bf16.msrb.mxu3 %v8424_v25  ;;  %v1277_v25 = vld [vmem:[#allocation1] sm:$0xff] }
  0xcc   :  { %5129 = vmatpush.bf16.msrb.mxu0 %v8399_v26  ;;  %v1279_v26 = vld [vmem:[#allocation1 + $0x12] sm:$0xff] }
  0xcd   :  { %5142 = vmatpush.bf16.msrb.mxu1 %v8407_v27  ;;  %v1278_v27 = vld [vmem:[#allocation1 + $0x9] sm:$0xff] }
  0xce   :  { %5155 = vmatpush.bf16.msrb.mxu2 %v8415_v28  ;;  %v1280_v28 = vld [vmem:[#allocation1 + $0x1b] sm:$0xff] }
  0xcf   :  { %5168 = vmatpush.bf16.msrb.mxu3 %v8423_v29  ;;  %v8468_v29 = vld [vmem:[#allocation2 + $0x730] sm:$0xff] }
  0xd0   :  { %5130 = vmatpush.bf16.msrb.mxu0 %v8398_v37  ;;  %v4924_v53 = vpop.f32.mrf.mxu0 }
  0xd1   :  { %5143 = vmatpush.bf16.msrb.mxu1 %v8406_v38  ;;  %v4925_v56 = vadd.f32 %v4924_v53, %v9017_v22  ;;  %v4937_v57 = vpop.f32.mrf.mxu1  ;;  %v8477_v22 = vld [vmem:[#allocation2 + $0x778] sm:$0xff] }
  0xd2   :  { %5156 = vmatpush.bf16.msrb.mxu2 %v8414_v39  ;;  %v8466_v39 = vld [vmem:[#allocation2 + $0x720] sm:$0xff] }
  0xd3   :  { %5169 = vmatpush.bf16.msrb.mxu3 %v8422_v40  ;;  %5131 = vmatmul.bf16.vlgmr.msrb.gmra.mxu0 %v1271_v30  ;;  %v4938_v60 = vadd.f32 %v4937_v57, %v4925_v56  ;;  %v8476_v30 = vld [vmem:[#allocation2 + $0x770] sm:$0xff]  ;;  %v8474_v40 = vld [vmem:[#allocation2 + $0x760] sm:$0xff] }
  0xd4   :  { %5175 = vmatpush.bf16.msra.mxu0 %v8437_v41  ;;  %5144 = vmatmul.bf16.vlgmr.msrb.gmra.mxu1 %v1272_v33  ;;  %v8467_v33 = vld [vmem:[#allocation2 + $0x728] sm:$0xff]  ;;  %v8480_v57 = vld [vmem:[#allocation2 + $0x790] sm:$0xff] }
  0xd5   :  { %5188 = vmatpush.bf16.msra.mxu1 %v8445_v42  ;;  %5157 = vmatmul.bf16.vlgmr.msrb.gmra.mxu2 %v1273_v31  ;;  %v8484_v31 = vld [vmem:[#allocation2 + $0x7b0] sm:$0xff]  ;;  %v8482_v42 = vld [vmem:[#allocation2 + $0x7a0] sm:$0xff] }
  0xd6   :  { %5201 = vmatpush.bf16.msra.mxu2 %v8453_v43  ;;  %5170 = vmatmul.bf16.vlgmr.msrb.gmra.mxu3 %v1274_v34  ;;  %v8475_v34 = vld [vmem:[#allocation2 + $0x768] sm:$0xff]  ;;  %v8490_v43 = vld [vmem:[#allocation2 + $0x7e0] sm:$0xff] }
  0xd7   :  { %5214 = vmatpush.bf16.msra.mxu3 %v8461_v44 }
  0xd8   :  { %5176 = vmatpush.bf16.msra.mxu0 %v8436_v45  ;;  %v4950_v1 = vpop.f32.mrf.mxu2  ;;  %v4926_v4 = vpop.f32.mrf.mxu0  ;;  %v8465_v45 = vld [vmem:[#allocation2 + $0x718] sm:$0xff] }
  0xd9   :  { %5189 = vmatpush.bf16.msra.mxu1 %v8444_v46  ;;  %v4951_v2 = vadd.f32 %v4950_v1, %v4938_v60  ;;  %v4963_v3 = vpop.f32.mrf.mxu3  ;;  %v4939_v8 = vpop.f32.mrf.mxu1  ;;  %v8473_v46 = vld [vmem:[#allocation2 + $0x758] sm:$0xff]  ;;  %v8471_v60 = vld [vmem:[#allocation2 + $0x748] sm:$0xff] }
  0xda   :  { %5202 = vmatpush.bf16.msra.mxu2 %v8452_v47  ;;  %v8481_v47 = vld [vmem:[#allocation2 + $0x798] sm:$0xff]  ;;  %v8478_v8 = vld [vmem:[#allocation2 + $0x780] sm:$0xff] }
  0xdb   :  { %5215 = vmatpush.bf16.msra.mxu3 %v8460_v48  ;;  %v4964_v7 = vadd.f32 %v4963_v3, %v4951_v2  ;;  %v8489_v48 = vld [vmem:[#allocation2 + $0x7d8] sm:$0xff]  ;;  %v1282_v2 = vld [vmem:[#allocation1 + $0x2d] sm:$0xff] }
  0xdc   :  { %5177 = vmatpush.bf16.msra.mxu0 %v8435_v49  ;;  %v1284_v3 = vld [vmem:[#allocation1 + $0x3f] sm:$0xff] }
  0xdd   :  { %5190 = vmatpush.bf16.msra.mxu1 %v8443_v50 }
  0xde   :  { %5203 = vmatpush.bf16.msra.mxu2 %v8451_v51 }
  0xdf   :  { %5216 = vmatpush.bf16.msra.mxu3 %v8459_v52 }
  0xe0   :  { %5178 = vmatpush.bf16.msra.mxu0 %v8434_v54  ;;  %v4952_v15 = vpop.f32.mrf.mxu2  ;;  %v8464_v54 = vld [vmem:[#allocation2 + $0x710] sm:$0xff] }
  0xe1   :  { %5191 = vmatpush.bf16.msra.mxu1 %v8442_v55  ;;  %v4965_v16 = vpop.f32.mrf.mxu3  ;;  %v8472_v55 = vld [vmem:[#allocation2 + $0x750] sm:$0xff] }
  0xe2   :  { %5204 = vmatpush.bf16.msra.mxu2 %v8450_v58  ;;  %v8488_v58 = vld [vmem:[#allocation2 + $0x7d0] sm:$0xff] }
  0xe3   :  { %5217 = vmatpush.bf16.msra.mxu3 %v8458_v59  ;;  %v8463_v59 = vld [vmem:[#allocation2 + $0x708] sm:$0xff]  ;;  %v8508_v15 = vld [vmem:[#allocation2 + $0x870] sm:$0xff] }
  0xe4   :  { %5179 = vmatpush.bf16.msra.mxu0 %v8433_v61  ;;  %v8479_v61 = vld [vmem:[#allocation2 + $0x788] sm:$0xff]  ;;  %v8516_v16 = vld [vmem:[#allocation2 + $0x8b0] sm:$0xff] }
  0xe5   :  { %5192 = vmatpush.bf16.msra.mxu1 %v8441_v62  ;;  %v8487_v62 = vld [vmem:[#allocation2 + $0x7c8] sm:$0xff] }
  0xe6   :  { %5205 = vmatpush.bf16.msra.mxu2 %v8449_v63  ;;  %v1281_v63 = vld [vmem:[#allocation1 + $0x24] sm:$0xff] }
  0xe7   :  { %5218 = vmatpush.bf16.msra.mxu3 %v8457_v0  ;;  %v1283_v0 = vld [vmem:[#allocation1 + $0x36] sm:$0xff] }
  0xe8   :  { %5180 = vmatpush.bf16.msra.mxu0 %v8432_v5  ;;  %v84_v5 = vld [vmem:[%s9056_s0 + $0x20] sm:$0xff] }
  0xe9   :  { %5193 = vmatpush.bf16.msra.mxu1 %v8440_v6  ;;  %1286 = vst [vmem:[#allocation1] ss:$9 sm:$0xff] %v84_v5  ;;  %v8462_v6 = vld [vmem:[#allocation2 + $0x700] sm:$0xff]  ;;  %v8555_v5 = vld [vmem:[#allocation2 + $0x9e8] sm:$0xff] }
  0xea   :  { %5206 = vmatpush.bf16.msra.mxu2 %v8448_v9  ;;  %v8486_v9 = vld [vmem:[#allocation2 + $0x7c0] sm:$0xff] }
  0xeb   :  { %5219 = vmatpush.bf16.msra.mxu3 %v8456_v10  ;;  %v8501_v10 = vld [vmem:[#allocation2 + $0x838] sm:$0xff] }
  0xec   :  { %5181 = vmatpush.bf16.msra.mxu0 %v8431_v11  ;;  %v8509_v11 = vld [vmem:[#allocation2 + $0x878] sm:$0xff] }
  0xed   :  { %5194 = vmatpush.bf16.msra.mxu1 %v8439_v12  ;;  %v8517_v12 = vld [vmem:[#allocation2 + $0x8b8] sm:$0xff] }
  0xee   :  { %5207 = vmatpush.bf16.msra.mxu2 %v8447_v13  ;;  %v8525_v13 = vld [vmem:[#allocation2 + $0x8f8] sm:$0xff] }
  0xef   :  { %5220 = vmatpush.bf16.msra.mxu3 %v8455_v14  ;;  %v8500_v14 = vld [vmem:[#allocation2 + $0x830] sm:$0xff] }
  0xf0   :  { %5182 = vmatpush.bf16.msra.mxu0 %v8430_v17  ;;  %v4976_v37 = vpop.f32.mrf.mxu0  ;;  %v8524_v17 = vld [vmem:[#allocation2 + $0x8f0] sm:$0xff] }
  0xf1   :  { %5195 = vmatpush.bf16.msra.mxu1 %v8438_v18  ;;  %v4977_v38 = vadd.f32 %v4976_v37, %v4964_v7  ;;  %v4989_v41 = vpop.f32.mrf.mxu1  ;;  %v8470_v7 = vld [vmem:[#allocation2 + $0x740] sm:$0xff]  ;;  %v8499_v18 = vld [vmem:[#allocation2 + $0x828] sm:$0xff] }
  0xf2   :  { %5208 = vmatpush.bf16.msra.mxu2 %v8446_v19  ;;  %v8507_v19 = vld [vmem:[#allocation2 + $0x868] sm:$0xff] }
  0xf3   :  { %5221 = vmatpush.bf16.msra.mxu3 %v8454_v20  ;;  %5183 = vmatmul.bf16.vlgmr.msra.gmra.mxu0 %v1277_v25  ;;  %v4990_v44 = vadd.f32 %v4989_v41, %v4977_v38  ;;  %v8515_v20 = vld [vmem:[#allocation2 + $0x8a8] sm:$0xff]  ;;  %v8506_v25 = vld [vmem:[#allocation2 + $0x860] sm:$0xff] }
  0xf4   :  { %5227 = vmatpush.bf16.msrb.mxu0 %v8469_v21  ;;  %5196 = vmatmul.bf16.vlgmr.msra.gmra.mxu1 %v1278_v27  ;;  %v8523_v21 = vld [vmem:[#allocation2 + $0x8e8] sm:$0xff]  ;;  %v8514_v27 = vld [vmem:[#allocation2 + $0x8a0] sm:$0xff] }
  0xf5   :  { %5240 = vmatpush.bf16.msrb.mxu1 %v8477_v22  ;;  %5209 = vmatmul.bf16.vlgmr.msra.gmra.mxu2 %v1279_v26 }
  0xf6   :  { %5253 = vmatpush.bf16.msrb.mxu2 %v8485_v23  ;;  %5222 = vmatmul.bf16.vlgmr.msra.gmra.mxu3 %v1280_v28  ;;  %v8522_v28 = vld [vmem:[#allocation2 + $0x8e0] sm:$0xff] }
  0xf7   :  { %5266 = vmatpush.bf16.msrb.mxu3 %v8493_v24  ;;  %v8498_v24 = vld [vmem:[#allocation2 + $0x820] sm:$0xff] }
  0xf8   :  { %5228 = vmatpush.bf16.msrb.mxu0 %v8468_v29  ;;  %v5002_v49 = vpop.f32.mrf.mxu2  ;;  %v4978_v52 = vpop.f32.mrf.mxu0 }
  0xf9   :  { %5241 = vmatpush.bf16.msrb.mxu1 %v8476_v30  ;;  %v5003_v50 = vadd.f32 %v5002_v49, %v4990_v44  ;;  %v5015_v51 = vpop.f32.mrf.mxu3  ;;  %v4991_v56 = vpop.f32.mrf.mxu1  ;;  %v8497_v30 = vld [vmem:[#allocation2 + $0x818] sm:$0xff]  ;;  %v8495_v44 = vld [vmem:[#allocation2 + $0x808] sm:$0xff]  ;;  %v8510_v52 = vld [vmem:[#allocation2 + $0x880] sm:$0xff] }
  0xfa   :  { %5254 = vmatpush.bf16.msrb.mxu2 %v8484_v31  ;;  %v8505_v31 = vld [vmem:[#allocation2 + $0x858] sm:$0xff] }
  0xfb   :  { %5267 = vmatpush.bf16.msrb.mxu3 %v8492_v32  ;;  %v9023_v53 = vadd.f32 %v5015_v51, %v5003_v50  ;;  %v8513_v32 = vld [vmem:[#allocation2 + $0x898] sm:$0xff]  ;;  %v8494_v50 = vld [vmem:[#allocation2 + $0x800] sm:$0xff] }
  0xfc   :  { %5229 = vmatpush.bf16.msrb.mxu0 %v8467_v33  ;;  %v8521_v33 = vld [vmem:[#allocation2 + $0x8d8] sm:$0xff]  ;;  %v8502_v51 = vld [vmem:[#allocation2 + $0x840] sm:$0xff] }
  0xfd   :  { %5242 = vmatpush.bf16.msrb.mxu1 %v8475_v34  ;;  %v8549_v56 = vld [vmem:[#allocation2 + $0x9b8] sm:$0xff] }
  0xfe   :  { %5255 = vmatpush.bf16.msrb.mxu2 %v8483_v35 }
  0xff   :  { %5268 = vmatpush.bf16.msrb.mxu3 %v8491_v36 }
 0x100   :  { %5230 = vmatpush.bf16.msrb.mxu0 %v8466_v39  ;;  %v5004_v1 = vpop.f32.mrf.mxu2  ;;  %v8496_v39 = vld [vmem:[#allocation2 + $0x810] sm:$0xff] }
 0x101   :  { %5243 = vmatpush.bf16.msrb.mxu1 %v8474_v40  ;;  %v5017_v4 = vpop.f32.mrf.mxu3  ;;  %v8504_v40 = vld [vmem:[#allocation2 + $0x850] sm:$0xff] }
 0x102   :  { %5256 = vmatpush.bf16.msrb.mxu2 %v8482_v42  ;;  %v8512_v42 = vld [vmem:[#allocation2 + $0x890] sm:$0xff]  ;;  %v8547_v4 = vld [vmem:[#allocation2 + $0x9a8] sm:$0xff] }
 0x103   :  { %5269 = vmatpush.bf16.msrb.mxu3 %v8490_v43  ;;  %v8520_v43 = vld [vmem:[#allocation2 + $0x8d0] sm:$0xff] }
 0x104   :  { %5231 = vmatpush.bf16.msrb.mxu0 %v8465_v45  ;;  %v8503_v45 = vld [vmem:[#allocation2 + $0x848] sm:$0xff]  ;;  %v8556_v1 = vld [vmem:[#allocation2 + $0x9f0] sm:$0xff] }
 0x105   :  { %5244 = vmatpush.bf16.msrb.mxu1 %v8473_v46  ;;  %v8511_v46 = vld [vmem:[#allocation2 + $0x888] sm:$0xff] }
 0x106   :  { %5257 = vmatpush.bf16.msrb.mxu2 %v8481_v47  ;;  %v8519_v47 = vld [vmem:[#allocation2 + $0x8c8] sm:$0xff] }
 0x107   :  { %5270 = vmatpush.bf16.msrb.mxu3 %v8489_v48 }
 0x108   :  { %5232 = vmatpush.bf16.msrb.mxu0 %v8464_v54  ;;  %v8533_v54 = vld [vmem:[#allocation2 + $0x938] sm:$0xff] }
 0x109   :  { %5245 = vmatpush.bf16.msrb.mxu1 %v8472_v55  ;;  %v8541_v55 = vld [vmem:[#allocation2 + $0x978] sm:$0xff] }
 0x10a   :  { %5258 = vmatpush.bf16.msrb.mxu2 %v8480_v57  ;;  %v8557_v57 = vld [vmem:[#allocation2 + $0x9f8] sm:$0xff] }
 0x10b   :  { %5271 = vmatpush.bf16.msrb.mxu3 %v8488_v58  ;;  %v1287_v58 = vld [vmem:[#allocation1] sm:$0xff] }
 0x10c   :  { %5233 = vmatpush.bf16.msrb.mxu0 %v8463_v59  ;;  %v1289_v59 = vld [vmem:[#allocation1 + $0x12] sm:$0xff] }
 0x10d   :  { %5246 = vmatpush.bf16.msrb.mxu1 %v8471_v60  ;;  %v1288_v60 = vld [vmem:[#allocation1 + $0x9] sm:$0xff] }
 0x10e   :  { %5259 = vmatpush.bf16.msrb.mxu2 %v8479_v61  ;;  %v1290_v61 = vld [vmem:[#allocation1 + $0x1b] sm:$0xff] }
 0x10f   :  { %5272 = vmatpush.bf16.msrb.mxu3 %v8487_v62  ;;  %v8532_v62 = vld [vmem:[#allocation2 + $0x930] sm:$0xff] }
 0x110   :  { %5234 = vmatpush.bf16.msrb.mxu0 %v8462_v6  ;;  %v5028_v22 = vpop.f32.mrf.mxu0 }
 0x111   :  { %5247 = vmatpush.bf16.msrb.mxu1 %v8470_v7  ;;  %v5029_v23 = vadd.f32 %v5028_v22, %v9023_v53  ;;  %v5041_v26 = vpop.f32.mrf.mxu1  ;;  %v8518_v53 = vld [vmem:[#allocation2 + $0x8c0] sm:$0xff] }
 0x112   :  { %5260 = vmatpush.bf16.msrb.mxu2 %v8478_v8  ;;  %v8530_v8 = vld [vmem:[#allocation2 + $0x920] sm:$0xff] }
 0x113   :  { %5273 = vmatpush.bf16.msrb.mxu3 %v8486_v9  ;;  %5235 = vmatmul.bf16.vlgmr.msrb.gmra.mxu0 %v1281_v63  ;;  %v5042_v29 = vadd.f32 %v5041_v26, %v5029_v23  ;;  %v8540_v63 = vld [vmem:[#allocation2 + $0x970] sm:$0xff]  ;;  %v8538_v9 = vld [vmem:[#allocation2 + $0x960] sm:$0xff] }
 0x114   :  { %5279 = vmatpush.bf16.msra.mxu0 %v8501_v10  ;;  %5248 = vmatmul.bf16.vlgmr.msrb.gmra.mxu1 %v1282_v2  ;;  %v8531_v2 = vld [vmem:[#allocation2 + $0x928] sm:$0xff]  ;;  %v8528_v23 = vld [vmem:[#allocation2 + $0x910] sm:$0xff] }
 0x115   :  { %5292 = vmatpush.bf16.msra.mxu1 %v8509_v11  ;;  %5261 = vmatmul.bf16.vlgmr.msrb.gmra.mxu2 %v1283_v0  ;;  %v8548_v0 = vld [vmem:[#allocation2 + $0x9b0] sm:$0xff]  ;;  %v8546_v11 = vld [vmem:[#allocation2 + $0x9a0] sm:$0xff] }
 0x116   :  { %5305 = vmatpush.bf16.msra.mxu2 %v8517_v12  ;;  %5274 = vmatmul.bf16.vlgmr.msrb.gmra.mxu3 %v1284_v3  ;;  %v8539_v3 = vld [vmem:[#allocation2 + $0x968] sm:$0xff]  ;;  %v8554_v12 = vld [vmem:[#allocation2 + $0x9e0] sm:$0xff]  ;;  %v8544_v26 = vld [vmem:[#allocation2 + $0x990] sm:$0xff] }
 0x117   :  { %5318 = vmatpush.bf16.msra.mxu3 %v8525_v13 }
 0x118   :  { %5280 = vmatpush.bf16.msra.mxu0 %v8500_v14  ;;  %v5054_v34 = vpop.f32.mrf.mxu2  ;;  %v5030_v37 = vpop.f32.mrf.mxu0  ;;  %v8529_v14 = vld [vmem:[#allocation2 + $0x918] sm:$0xff] }
 0x119   :  { %5293 = vmatpush.bf16.msra.mxu1 %v8508_v15  ;;  %v5055_v35 = vadd.f32 %v5054_v34, %v5042_v29  ;;  %v5067_v36 = vpop.f32.mrf.mxu3  ;;  %v5043_v41 = vpop.f32.mrf.mxu1  ;;  %v8537_v15 = vld [vmem:[#allocation2 + $0x958] sm:$0xff]  ;;  %v8535_v29 = vld [vmem:[#allocation2 + $0x948] sm:$0xff] }
 0x11a   :  { %5306 = vmatpush.bf16.msra.mxu2 %v8516_v16  ;;  %v8545_v16 = vld [vmem:[#allocation2 + $0x998] sm:$0xff]  ;;  %v8542_v41 = vld [vmem:[#allocation2 + $0x980] sm:$0xff] }
 0x11b   :  { %5319 = vmatpush.bf16.msra.mxu3 %v8524_v17  ;;  %v5068_v38 = vadd.f32 %v5067_v36, %v5055_v35  ;;  %v8553_v17 = vld [vmem:[#allocation2 + $0x9d8] sm:$0xff]  ;;  %v1292_v35 = vld [vmem:[#allocation1 + $0x2d] sm:$0xff] }
 0x11c   :  { %5281 = vmatpush.bf16.msra.mxu0 %v8499_v18  ;;  %v1294_v36 = vld [vmem:[#allocation1 + $0x3f] sm:$0xff] }
 0x11d   :  { %5294 = vmatpush.bf16.msra.mxu1 %v8507_v19 }
 0x11e   :  { %5307 = vmatpush.bf16.msra.mxu2 %v8515_v20 }
 0x11f   :  { %5320 = vmatpush.bf16.msra.mxu3 %v8523_v21 }
 0x120   :  { %5282 = vmatpush.bf16.msra.mxu0 %v8498_v24  ;;  %v5056_v48 = vpop.f32.mrf.mxu2  ;;  %v8536_v24 = vld [vmem:[#allocation2 + $0x950] sm:$0xff] }
 0x121   :  { %5295 = vmatpush.bf16.msra.mxu1 %v8506_v25  ;;  %v5069_v49 = vpop.f32.mrf.mxu3  ;;  %v8572_v48 = vld [vmem:[#allocation2 + $0xa70] sm:$0xff] }
 0x122   :  { %5308 = vmatpush.bf16.msra.mxu2 %v8514_v27  ;;  %v8552_v27 = vld [vmem:[#allocation2 + $0x9d0] sm:$0xff] }
 0x123   :  { %5321 = vmatpush.bf16.msra.mxu3 %v8522_v28  ;;  %v8527_v28 = vld [vmem:[#allocation2 + $0x908] sm:$0xff]  ;;  %v8580_v49 = vld [vmem:[#allocation2 + $0xab0] sm:$0xff] }
 0x124   :  { %5283 = vmatpush.bf16.msra.mxu0 %v8497_v30  ;;  %v8543_v30 = vld [vmem:[#allocation2 + $0x988] sm:$0xff] }
 0x125   :  { %5296 = vmatpush.bf16.msra.mxu1 %v8505_v31  ;;  %v8551_v31 = vld [vmem:[#allocation2 + $0x9c8] sm:$0xff] }
 0x126   :  { %5309 = vmatpush.bf16.msra.mxu2 %v8513_v32  ;;  %v1291_v32 = vld [vmem:[#allocation1 + $0x24] sm:$0xff] }
 0x127   :  { %5322 = vmatpush.bf16.msra.mxu3 %v8521_v33  ;;  %v1293_v33 = vld [vmem:[#allocation1 + $0x36] sm:$0xff] }
 0x128   :  { %5284 = vmatpush.bf16.msra.mxu0 %v8496_v39  ;;  %v8526_v39 = vld [vmem:[#allocation2 + $0x900] sm:$0xff] }
 0x129   :  { %5297 = vmatpush.bf16.msra.mxu1 %v8504_v40  ;;  %v8534_v40 = vld [vmem:[#allocation2 + $0x940] sm:$0xff] }
 0x12a   :  { %5310 = vmatpush.bf16.msra.mxu2 %v8512_v42  ;;  %v8550_v42 = vld [vmem:[#allocation2 + $0x9c0] sm:$0xff] }
 0x12b   :  { %5323 = vmatpush.bf16.msra.mxu3 %v8520_v43  ;;  %v8565_v43 = vld [vmem:[#allocation2 + $0xa38] sm:$0xff] }
 0x12c   :  { %5285 = vmatpush.bf16.msra.mxu0 %v8495_v44  ;;  %v8573_v44 = vld [vmem:[#allocation2 + $0xa78] sm:$0xff] }
 0x12d   :  { %5298 = vmatpush.bf16.msra.mxu1 %v8503_v45  ;;  %v8581_v45 = vld [vmem:[#allocation2 + $0xab8] sm:$0xff] }
 0x12e   :  { %5311 = vmatpush.bf16.msra.mxu2 %v8511_v46  ;;  %v8589_v46 = vld [vmem:[#allocation2 + $0xaf8] sm:$0xff] }
 0x12f   :  { %5324 = vmatpush.bf16.msra.mxu3 %v8519_v47  ;;  %v8564_v47 = vld [vmem:[#allocation2 + $0xa30] sm:$0xff] }
 0x130   :  { %5286 = vmatpush.bf16.msra.mxu0 %v8494_v50  ;;  %v5080_v6 = vpop.f32.mrf.mxu0  ;;  %v8588_v50 = vld [vmem:[#allocation2 + $0xaf0] sm:$0xff] }
 0x131   :  { %5299 = vmatpush.bf16.msra.mxu1 %v8502_v51  ;;  %v5081_v7 = vadd.f32 %v5080_v6, %v5068_v38  ;;  %v5093_v10 = vpop.f32.mrf.mxu1  ;;  %v85_v38 = vld [vmem:[%s9056_s0 + $0x28] sm:$0xff]  ;;  %v8563_v51 = vld [vmem:[#allocation2 + $0xa28] sm:$0xff] }
 0x132   :  { %5312 = vmatpush.bf16.msra.mxu2 %v8510_v52  ;;  %1296 = vst [vmem:[#allocation1] ss:$9 sm:$0xff] %v85_v38  ;;  %v8571_v52 = vld [vmem:[#allocation2 + $0xa68] sm:$0xff] }
 0x133   :  { %5325 = vmatpush.bf16.msra.mxu3 %v8518_v53  ;;  %5287 = vmatmul.bf16.vlgmr.msra.gmra.mxu0 %v1287_v58  ;;  %v5094_v13 = vadd.f32 %v5093_v10, %v5081_v7  ;;  %v8579_v53 = vld [vmem:[#allocation2 + $0xaa8] sm:$0xff]  ;;  %v8570_v58 = vld [vmem:[#allocation2 + $0xa60] sm:$0xff] }
 0x134   :  { %5331 = vmatpush.bf16.msrb.mxu0 %v8533_v54  ;;  %5300 = vmatmul.bf16.vlgmr.msra.gmra.mxu1 %v1288_v60  ;;  %v8587_v54 = vld [vmem:[#allocation2 + $0xae8] sm:$0xff]  ;;  %v8578_v60 = vld [vmem:[#allocation2 + $0xaa0] sm:$0xff] }
 0x135   :  { %5344 = vmatpush.bf16.msrb.mxu1 %v8541_v55  ;;  %5313 = vmatmul.bf16.vlgmr.msra.gmra.mxu2 %v1289_v59  ;;  %v8619_v38 = vld [vmem:[#allocation2 + $0xbe8] sm:$0xff] }
 0x136   :  { %5357 = vmatpush.bf16.msrb.mxu2 %v8549_v56  ;;  %5326 = vmatmul.bf16.vlgmr.msra.gmra.mxu3 %v1290_v61  ;;  %v8586_v61 = vld [vmem:[#allocation2 + $0xae0] sm:$0xff] }
 0x137   :  { %5370 = vmatpush.bf16.msrb.mxu3 %v8557_v57  ;;  %v8562_v57 = vld [vmem:[#allocation2 + $0xa20] sm:$0xff] }
 0x138   :  { %5332 = vmatpush.bf16.msrb.mxu0 %v8532_v62  ;;  %v5106_v18 = vpop.f32.mrf.mxu2  ;;  %v5082_v21 = vpop.f32.mrf.mxu0 }
 0x139   :  { %5345 = vmatpush.bf16.msrb.mxu1 %v8540_v63  ;;  %v5107_v19 = vadd.f32 %v5106_v18, %v5094_v13  ;;  %v5119_v20 = vpop.f32.mrf.mxu3  ;;  %v5095_v25 = vpop.f32.mrf.mxu1  ;;  %v8561_v63 = vld [vmem:[#allocation2 + $0xa18] sm:$0xff]  ;;  %v8559_v13 = vld [vmem:[#allocation2 + $0xa08] sm:$0xff]  ;;  %v8574_v21 = vld [vmem:[#allocation2 + $0xa80] sm:$0xff] }
 0x13a   :  { %5358 = vmatpush.bf16.msrb.mxu2 %v8548_v0  ;;  %v8569_v0 = vld [vmem:[#allocation2 + $0xa58] sm:$0xff] }
 0x13b   :  { %5371 = vmatpush.bf16.msrb.mxu3 %v8556_v1  ;;  %v9029_v22 = vadd.f32 %v5119_v20, %v5107_v19  ;;  %v8577_v1 = vld [vmem:[#allocation2 + $0xa98] sm:$0xff]  ;;  %v8558_v19 = vld [vmem:[#allocation2 + $0xa00] sm:$0xff] }
 0x13c   :  { %5333 = vmatpush.bf16.msrb.mxu0 %v8531_v2  ;;  %v8585_v2 = vld [vmem:[#allocation2 + $0xad8] sm:$0xff]  ;;  %v8566_v20 = vld [vmem:[#allocation2 + $0xa40] sm:$0xff] }
 0x13d   :  { %5346 = vmatpush.bf16.msrb.mxu1 %v8539_v3  ;;  %v8613_v25 = vld [vmem:[#allocation2 + $0xbb8] sm:$0xff] }
 0x13e   :  { %5359 = vmatpush.bf16.msrb.mxu2 %v8547_v4 }
 0x13f   :  { %5372 = vmatpush.bf16.msrb.mxu3 %v8555_v5 }
 0x140   :  { %5334 = vmatpush.bf16.msrb.mxu0 %v8530_v8  ;;  %v5108_v34 = vpop.f32.mrf.mxu2  ;;  %v8560_v8 = vld [vmem:[#allocation2 + $0xa10] sm:$0xff] }
 0x141   :  { %5347 = vmatpush.bf16.msrb.mxu1 %v8538_v9  ;;  %v5121_v37 = vpop.f32.mrf.mxu3  ;;  %v8568_v9 = vld [vmem:[#allocation2 + $0xa50] sm:$0xff] }
 0x142   :  { %5360 = vmatpush.bf16.msrb.mxu2 %v8546_v11  ;;  %v8576_v11 = vld [vmem:[#allocation2 + $0xa90] sm:$0xff]  ;;  %v8611_v37 = vld [vmem:[#allocation2 + $0xba8] sm:$0xff] }
 0x143   :  { %5373 = vmatpush.bf16.msrb.mxu3 %v8554_v12  ;;  %v8584_v12 = vld [vmem:[#allocation2 + $0xad0] sm:$0xff] }
 0x144   :  { %5335 = vmatpush.bf16.msrb.mxu0 %v8529_v14  ;;  %v8567_v14 = vld [vmem:[#allocation2 + $0xa48] sm:$0xff]  ;;  %v8620_v34 = vld [vmem:[#allocation2 + $0xbf0] sm:$0xff] }
 0x145   :  { %5348 = vmatpush.bf16.msrb.mxu1 %v8537_v15  ;;  %v8575_v15 = vld [vmem:[#allocation2 + $0xa88] sm:$0xff] }
 0x146   :  { %5361 = vmatpush.bf16.msrb.mxu2 %v8545_v16  ;;  %v8583_v16 = vld [vmem:[#allocation2 + $0xac8] sm:$0xff] }
 0x147   :  { %5374 = vmatpush.bf16.msrb.mxu3 %v8553_v17 }
 0x148   :  { %5336 = vmatpush.bf16.msrb.mxu0 %v8528_v23  ;;  %v8597_v23 = vld [vmem:[#allocation2 + $0xb38] sm:$0xff] }
 0x149   :  { %5349 = vmatpush.bf16.msrb.mxu1 %v8536_v24  ;;  %v8605_v24 = vld [vmem:[#allocation2 + $0xb78] sm:$0xff] }
 0x14a   :  { %5362 = vmatpush.bf16.msrb.mxu2 %v8544_v26  ;;  %v8621_v26 = vld [vmem:[#allocation2 + $0xbf8] sm:$0xff] }
 0x14b   :  { %5375 = vmatpush.bf16.msrb.mxu3 %v8552_v27  ;;  %v1297_v27 = vld [vmem:[#allocation1] sm:$0xff] }
 0x14c   :  { %5337 = vmatpush.bf16.msrb.mxu0 %v8527_v28  ;;  %v1299_v28 = vld [vmem:[#allocation1 + $0x12] sm:$0xff] }
 0x14d   :  { %5350 = vmatpush.bf16.msrb.mxu1 %v8535_v29  ;;  %v1298_v29 = vld [vmem:[#allocation1 + $0x9] sm:$0xff] }
 0x14e   :  { %5363 = vmatpush.bf16.msrb.mxu2 %v8543_v30  ;;  %v1300_v30 = vld [vmem:[#allocation1 + $0x1b] sm:$0xff] }
 0x14f   :  { %5376 = vmatpush.bf16.msrb.mxu3 %v8551_v31  ;;  %v8596_v31 = vld [vmem:[#allocation2 + $0xb30] sm:$0xff] }
 0x150   :  { %5338 = vmatpush.bf16.msrb.mxu0 %v8526_v39  ;;  %v5132_v55 = vpop.f32.mrf.mxu0 }
 0x151   :  { %5351 = vmatpush.bf16.msrb.mxu1 %v8534_v40  ;;  %v5133_v56 = vadd.f32 %v5132_v55, %v9029_v22  ;;  %v5145_v59 = vpop.f32.mrf.mxu1  ;;  %v8582_v22 = vld [vmem:[#allocation2 + $0xac0] sm:$0xff] }
 0x152   :  { %5364 = vmatpush.bf16.msrb.mxu2 %v8542_v41  ;;  %v8594_v41 = vld [vmem:[#allocation2 + $0xb20] sm:$0xff] }
 0x153   :  { %5377 = vmatpush.bf16.msrb.mxu3 %v8550_v42  ;;  %5339 = vmatmul.bf16.vlgmr.msrb.gmra.mxu0 %v1291_v32  ;;  %v5146_v62 = vadd.f32 %v5145_v59, %v5133_v56  ;;  %v8604_v32 = vld [vmem:[#allocation2 + $0xb70] sm:$0xff]  ;;  %v8602_v42 = vld [vmem:[#allocation2 + $0xb60] sm:$0xff] }
 0x154   :  { %5383 = vmatpush.bf16.msra.mxu0 %v8565_v43  ;;  %5352 = vmatmul.bf16.vlgmr.msrb.gmra.mxu1 %v1292_v35  ;;  %v8595_v35 = vld [vmem:[#allocation2 + $0xb28] sm:$0xff]  ;;  %v8592_v56 = vld [vmem:[#allocation2 + $0xb10] sm:$0xff] }
 0x155   :  { %5396 = vmatpush.bf16.msra.mxu1 %v8573_v44  ;;  %5365 = vmatmul.bf16.vlgmr.msrb.gmra.mxu2 %v1293_v33  ;;  %v8612_v33 = vld [vmem:[#allocation2 + $0xbb0] sm:$0xff]  ;;  %v8610_v44 = vld [vmem:[#allocation2 + $0xba0] sm:$0xff] }
 0x156   :  { %5409 = vmatpush.bf16.msra.mxu2 %v8581_v45  ;;  %5378 = vmatmul.bf16.vlgmr.msrb.gmra.mxu3 %v1294_v36  ;;  %v8603_v36 = vld [vmem:[#allocation2 + $0xb68] sm:$0xff]  ;;  %v8618_v45 = vld [vmem:[#allocation2 + $0xbe0] sm:$0xff]  ;;  %v8608_v59 = vld [vmem:[#allocation2 + $0xb90] sm:$0xff] }
 0x157   :  { %5422 = vmatpush.bf16.msra.mxu3 %v8589_v46 }
 0x158   :  { %5384 = vmatpush.bf16.msra.mxu0 %v8564_v47  ;;  %v5158_v3 = vpop.f32.mrf.mxu2  ;;  %v5134_v6 = vpop.f32.mrf.mxu0  ;;  %v8593_v47 = vld [vmem:[#allocation2 + $0xb18] sm:$0xff] }
 0x159   :  { %5397 = vmatpush.bf16.msra.mxu1 %v8572_v48  ;;  %v5159_v4 = vadd.f32 %v5158_v3, %v5146_v62  ;;  %v5171_v5 = vpop.f32.mrf.mxu3  ;;  %v5147_v10 = vpop.f32.mrf.mxu1  ;;  %v8601_v48 = vld [vmem:[#allocation2 + $0xb58] sm:$0xff]  ;;  %v8599_v62 = vld [vmem:[#allocation2 + $0xb48] sm:$0xff] }
 0x15a   :  { %5410 = vmatpush.bf16.msra.mxu2 %v8580_v49  ;;  %v8609_v49 = vld [vmem:[#allocation2 + $0xb98] sm:$0xff]  ;;  %v8606_v10 = vld [vmem:[#allocation2 + $0xb80] sm:$0xff] }
 0x15b   :  { %5423 = vmatpush.bf16.msra.mxu3 %v8588_v50  ;;  %v5172_v7 = vadd.f32 %v5171_v5, %v5159_v4  ;;  %v8617_v50 = vld [vmem:[#allocation2 + $0xbd8] sm:$0xff]  ;;  %v1302_v4 = vld [vmem:[#allocation1 + $0x2d] sm:$0xff] }
 0x15c   :  { %5385 = vmatpush.bf16.msra.mxu0 %v8563_v51  ;;  %v1304_v5 = vld [vmem:[#allocation1 + $0x3f] sm:$0xff] }
 0x15d   :  { %5398 = vmatpush.bf16.msra.mxu1 %v8571_v52 }
 0x15e   :  { %5411 = vmatpush.bf16.msra.mxu2 %v8579_v53 }
 0x15f   :  { %5424 = vmatpush.bf16.msra.mxu3 %v8587_v54 }
 0x160   :  { %5386 = vmatpush.bf16.msra.mxu0 %v8562_v57  ;;  %v5160_v17 = vpop.f32.mrf.mxu2  ;;  %v8600_v57 = vld [vmem:[#allocation2 + $0xb50] sm:$0xff] }
 0x161   :  { %5399 = vmatpush.bf16.msra.mxu1 %v8570_v58  ;;  %v5173_v18 = vpop.f32.mrf.mxu3  ;;  %v8636_v17 = vld [vmem:[#allocation2 + $0xc70] sm:$0xff] }
 0x162   :  { %5412 = vmatpush.bf16.msra.mxu2 %v8578_v60  ;;  %v8616_v60 = vld [vmem:[#allocation2 + $0xbd0] sm:$0xff] }
 0x163   :  { %5425 = vmatpush.bf16.msra.mxu3 %v8586_v61  ;;  %v8591_v61 = vld [vmem:[#allocation2 + $0xb08] sm:$0xff]  ;;  %v8644_v18 = vld [vmem:[#allocation2 + $0xcb0] sm:$0xff] }
 0x164   :  { %5387 = vmatpush.bf16.msra.mxu0 %v8561_v63  ;;  %v8607_v63 = vld [vmem:[#allocation2 + $0xb88] sm:$0xff] }
 0x165   :  { %5400 = vmatpush.bf16.msra.mxu1 %v8569_v0  ;;  %v8615_v0 = vld [vmem:[#allocation2 + $0xbc8] sm:$0xff] }
 0x166   :  { %5413 = vmatpush.bf16.msra.mxu2 %v8577_v1  ;;  %v1301_v1 = vld [vmem:[#allocation1 + $0x24] sm:$0xff] }
 0x167   :  { %5426 = vmatpush.bf16.msra.mxu3 %v8585_v2  ;;  %v1303_v2 = vld [vmem:[#allocation1 + $0x36] sm:$0xff] }
 0x168   :  { %5388 = vmatpush.bf16.msra.mxu0 %v8560_v8  ;;  %v8590_v8 = vld [vmem:[#allocation2 + $0xb00] sm:$0xff] }
 0x169   :  { %5401 = vmatpush.bf16.msra.mxu1 %v8568_v9  ;;  %v8598_v9 = vld [vmem:[#allocation2 + $0xb40] sm:$0xff] }
 0x16a   :  { %5414 = vmatpush.bf16.msra.mxu2 %v8576_v11  ;;  %v8614_v11 = vld [vmem:[#allocation2 + $0xbc0] sm:$0xff] }
 0x16b   :  { %5427 = vmatpush.bf16.msra.mxu3 %v8584_v12  ;;  %v8629_v12 = vld [vmem:[#allocation2 + $0xc38] sm:$0xff] }
 0x16c   :  { %5389 = vmatpush.bf16.msra.mxu0 %v8559_v13  ;;  %v8637_v13 = vld [vmem:[#allocation2 + $0xc78] sm:$0xff] }
 0x16d   :  { %5402 = vmatpush.bf16.msra.mxu1 %v8567_v14  ;;  %v8645_v14 = vld [vmem:[#allocation2 + $0xcb8] sm:$0xff] }
 0x16e   :  { %5415 = vmatpush.bf16.msra.mxu2 %v8575_v15  ;;  %v8653_v15 = vld [vmem:[#allocation2 + $0xcf8] sm:$0xff] }
 0x16f   :  { %5428 = vmatpush.bf16.msra.mxu3 %v8583_v16  ;;  %v8628_v16 = vld [vmem:[#allocation2 + $0xc30] sm:$0xff] }
 0x170   :  { %5390 = vmatpush.bf16.msra.mxu0 %v8558_v19  ;;  %v5184_v39 = vpop.f32.mrf.mxu0  ;;  %v8652_v19 = vld [vmem:[#allocation2 + $0xcf0] sm:$0xff] }
 0x171   :  { %5403 = vmatpush.bf16.msra.mxu1 %v8566_v20  ;;  %v5185_v40 = vadd.f32 %v5184_v39, %v5172_v7  ;;  %v5197_v43 = vpop.f32.mrf.mxu1  ;;  %v86_v7 = vld [vmem:[%s9056_s0 + $0x30] sm:$0xff] }
 0x172   :  { %5416 = vmatpush.bf16.msra.mxu2 %v8574_v21  ;;  %1306 = vst [vmem:[#allocation1] ss:$9 sm:$0xff] %v86_v7  ;;  %v8627_v20 = vld [vmem:[#allocation2 + $0xc28] sm:$0xff] }
 0x173   :  { %5429 = vmatpush.bf16.msra.mxu3 %v8582_v22  ;;  %5391 = vmatmul.bf16.vlgmr.msra.gmra.mxu0 %v1297_v27  ;;  %v5198_v46 = vadd.f32 %v5197_v43, %v5185_v40  ;;  %v8635_v21 = vld [vmem:[#allocation2 + $0xc68] sm:$0xff]  ;;  %v8634_v27 = vld [vmem:[#allocation2 + $0xc60] sm:$0xff] }
 0x174   :  { %5435 = vmatpush.bf16.msrb.mxu0 %v8597_v23  ;;  %5404 = vmatmul.bf16.vlgmr.msra.gmra.mxu1 %v1298_v29  ;;  %v8643_v22 = vld [vmem:[#allocation2 + $0xca8] sm:$0xff]  ;;  %v8642_v29 = vld [vmem:[#allocation2 + $0xca0] sm:$0xff] }
 0x175   :  { %5448 = vmatpush.bf16.msrb.mxu1 %v8605_v24  ;;  %5417 = vmatmul.bf16.vlgmr.msra.gmra.mxu2 %v1299_v28  ;;  %v8651_v23 = vld [vmem:[#allocation2 + $0xce8] sm:$0xff] }
 0x176   :  { %5461 = vmatpush.bf16.msrb.mxu2 %v8613_v25  ;;  %5430 = vmatmul.bf16.vlgmr.msra.gmra.mxu3 %v1300_v30  ;;  %v8650_v30 = vld [vmem:[#allocation2 + $0xce0] sm:$0xff]  ;;  %v8683_v7 = vld [vmem:[#allocation2 + $0xde8] sm:$0xff] }
 0x177   :  { %5474 = vmatpush.bf16.msrb.mxu3 %v8621_v26  ;;  %v8626_v26 = vld [vmem:[#allocation2 + $0xc20] sm:$0xff] }
 0x178   :  { %5436 = vmatpush.bf16.msrb.mxu0 %v8596_v31  ;;  %v5210_v51 = vpop.f32.mrf.mxu2  ;;  %v5186_v54 = vpop.f32.mrf.mxu0 }
 0x179   :  { %5449 = vmatpush.bf16.msrb.mxu1 %v8604_v32  ;;  %v5211_v52 = vadd.f32 %v5210_v51, %v5198_v46  ;;  %v5223_v53 = vpop.f32.mrf.mxu3  ;;  %v5199_v58 = vpop.f32.mrf.mxu1  ;;  %v8625_v32 = vld [vmem:[#allocation2 + $0xc18] sm:$0xff]  ;;  %v8623_v46 = vld [vmem:[#allocation2 + $0xc08] sm:$0xff]  ;;  %v8638_v54 = vld [vmem:[#allocation2 + $0xc80] sm:$0xff] }
 0x17a   :  { %5462 = vmatpush.bf16.msrb.mxu2 %v8612_v33  ;;  %v8633_v33 = vld [vmem:[#allocation2 + $0xc58] sm:$0xff] }
 0x17b   :  { %5475 = vmatpush.bf16.msrb.mxu3 %v8620_v34  ;;  %v9035_v55 = vadd.f32 %v5223_v53, %v5211_v52  ;;  %v8641_v34 = vld [vmem:[#allocation2 + $0xc98] sm:$0xff]  ;;  %v8622_v52 = vld [vmem:[#allocation2 + $0xc00] sm:$0xff] }
 0x17c   :  { %5437 = vmatpush.bf16.msrb.mxu0 %v8595_v35  ;;  %v8649_v35 = vld [vmem:[#allocation2 + $0xcd8] sm:$0xff]  ;;  %v8630_v53 = vld [vmem:[#allocation2 + $0xc40] sm:$0xff] }
 0x17d   :  { %5450 = vmatpush.bf16.msrb.mxu1 %v8603_v36  ;;  %v8677_v58 = vld [vmem:[#allocation2 + $0xdb8] sm:$0xff] }
 0x17e   :  { %5463 = vmatpush.bf16.msrb.mxu2 %v8611_v37 }
 0x17f   :  { %5476 = vmatpush.bf16.msrb.mxu3 %v8619_v38 }
 0x180   :  { %5438 = vmatpush.bf16.msrb.mxu0 %v8594_v41  ;;  %v5212_v3 = vpop.f32.mrf.mxu2  ;;  %v8624_v41 = vld [vmem:[#allocation2 + $0xc10] sm:$0xff] }
 0x181   :  { %5451 = vmatpush.bf16.msrb.mxu1 %v8602_v42  ;;  %v5225_v6 = vpop.f32.mrf.mxu3  ;;  %v8632_v42 = vld [vmem:[#allocation2 + $0xc50] sm:$0xff] }
 0x182   :  { %5464 = vmatpush.bf16.msrb.mxu2 %v8610_v44  ;;  %v8640_v44 = vld [vmem:[#allocation2 + $0xc90] sm:$0xff]  ;;  %v8675_v6 = vld [vmem:[#allocation2 + $0xda8] sm:$0xff] }
 0x183   :  { %5477 = vmatpush.bf16.msrb.mxu3 %v8618_v45  ;;  %v8648_v45 = vld [vmem:[#allocation2 + $0xcd0] sm:$0xff] }
 0x184   :  { %5439 = vmatpush.bf16.msrb.mxu0 %v8593_v47  ;;  %v8631_v47 = vld [vmem:[#allocation2 + $0xc48] sm:$0xff]  ;;  %v8684_v3 = vld [vmem:[#allocation2 + $0xdf0] sm:$0xff] }
 0x185   :  { %5452 = vmatpush.bf16.msrb.mxu1 %v8601_v48  ;;  %v8639_v48 = vld [vmem:[#allocation2 + $0xc88] sm:$0xff] }
 0x186   :  { %5465 = vmatpush.bf16.msrb.mxu2 %v8609_v49  ;;  %v8647_v49 = vld [vmem:[#allocation2 + $0xcc8] sm:$0xff] }
 0x187   :  { %5478 = vmatpush.bf16.msrb.mxu3 %v8617_v50 }
 0x188   :  { %5440 = vmatpush.bf16.msrb.mxu0 %v8592_v56  ;;  %v8661_v56 = vld [vmem:[#allocation2 + $0xd38] sm:$0xff] }
 0x189   :  { %5453 = vmatpush.bf16.msrb.mxu1 %v8600_v57  ;;  %v8669_v57 = vld [vmem:[#allocation2 + $0xd78] sm:$0xff] }
 0x18a   :  { %5466 = vmatpush.bf16.msrb.mxu2 %v8608_v59  ;;  %v8685_v59 = vld [vmem:[#allocation2 + $0xdf8] sm:$0xff] }
 0x18b   :  { %5479 = vmatpush.bf16.msrb.mxu3 %v8616_v60  ;;  %v1307_v60 = vld [vmem:[#allocation1] sm:$0xff] }
 0x18c   :  { %5441 = vmatpush.bf16.msrb.mxu0 %v8591_v61  ;;  %v1309_v61 = vld [vmem:[#allocation1 + $0x12] sm:$0xff] }
 0x18d   :  { %5454 = vmatpush.bf16.msrb.mxu1 %v8599_v62  ;;  %v1308_v62 = vld [vmem:[#allocation1 + $0x9] sm:$0xff] }
 0x18e   :  { %5467 = vmatpush.bf16.msrb.mxu2 %v8607_v63  ;;  %v1310_v63 = vld [vmem:[#allocation1 + $0x1b] sm:$0xff] }
 0x18f   :  { %5480 = vmatpush.bf16.msrb.mxu3 %v8615_v0  ;;  %v8660_v0 = vld [vmem:[#allocation2 + $0xd30] sm:$0xff] }
 0x190   :  { %5442 = vmatpush.bf16.msrb.mxu0 %v8590_v8  ;;  %v5236_v24 = vpop.f32.mrf.mxu0 }
 0x191   :  { %5455 = vmatpush.bf16.msrb.mxu1 %v8598_v9  ;;  %v5237_v25 = vadd.f32 %v5236_v24, %v9035_v55  ;;  %v5249_v28 = vpop.f32.mrf.mxu1  ;;  %v8646_v55 = vld [vmem:[#allocation2 + $0xcc0] sm:$0xff] }
 0x192   :  { %5468 = vmatpush.bf16.msrb.mxu2 %v8606_v10  ;;  %v8658_v10 = vld [vmem:[#allocation2 + $0xd20] sm:$0xff] }
 0x193   :  { %5481 = vmatpush.bf16.msrb.mxu3 %v8614_v11  ;;  %5443 = vmatmul.bf16.vlgmr.msrb.gmra.mxu0 %v1301_v1  ;;  %v5250_v31 = vadd.f32 %v5249_v28, %v5237_v25  ;;  %v8668_v1 = vld [vmem:[#allocation2 + $0xd70] sm:$0xff]  ;;  %v8666_v11 = vld [vmem:[#allocation2 + $0xd60] sm:$0xff] }
 0x194   :  { %5487 = vmatpush.bf16.msra.mxu0 %v8629_v12  ;;  %5456 = vmatmul.bf16.vlgmr.msrb.gmra.mxu1 %v1302_v4  ;;  %v8659_v4 = vld [vmem:[#allocation2 + $0xd28] sm:$0xff]  ;;  %v8656_v25 = vld [vmem:[#allocation2 + $0xd10] sm:$0xff] }
 0x195   :  { %5500 = vmatpush.bf16.msra.mxu1 %v8637_v13  ;;  %5469 = vmatmul.bf16.vlgmr.msrb.gmra.mxu2 %v1303_v2  ;;  %v8676_v2 = vld [vmem:[#allocation2 + $0xdb0] sm:$0xff]  ;;  %v8674_v13 = vld [vmem:[#allocation2 + $0xda0] sm:$0xff] }
 0x196   :  { %5513 = vmatpush.bf16.msra.mxu2 %v8645_v14  ;;  %5482 = vmatmul.bf16.vlgmr.msrb.gmra.mxu3 %v1304_v5  ;;  %v8667_v5 = vld [vmem:[#allocation2 + $0xd68] sm:$0xff]  ;;  %v8682_v14 = vld [vmem:[#allocation2 + $0xde0] sm:$0xff]  ;;  %v8672_v28 = vld [vmem:[#allocation2 + $0xd90] sm:$0xff] }
 0x197   :  { %5526 = vmatpush.bf16.msra.mxu3 %v8653_v15 }
 0x198   :  { %5488 = vmatpush.bf16.msra.mxu0 %v8628_v16  ;;  %v5262_v36 = vpop.f32.mrf.mxu2  ;;  %v5238_v39 = vpop.f32.mrf.mxu0  ;;  %v8657_v16 = vld [vmem:[#allocation2 + $0xd18] sm:$0xff] }
 0x199   :  { %5501 = vmatpush.bf16.msra.mxu1 %v8636_v17  ;;  %v5263_v37 = vadd.f32 %v5262_v36, %v5250_v31  ;;  %v5275_v38 = vpop.f32.mrf.mxu3  ;;  %v5251_v43 = vpop.f32.mrf.mxu1  ;;  %v8665_v17 = vld [vmem:[#allocation2 + $0xd58] sm:$0xff]  ;;  %v8663_v31 = vld [vmem:[#allocation2 + $0xd48] sm:$0xff] }
 0x19a   :  { %5514 = vmatpush.bf16.msra.mxu2 %v8644_v18  ;;  %v8673_v18 = vld [vmem:[#allocation2 + $0xd98] sm:$0xff]  ;;  %v8670_v43 = vld [vmem:[#allocation2 + $0xd80] sm:$0xff] }
 0x19b   :  { %5527 = vmatpush.bf16.msra.mxu3 %v8652_v19  ;;  %v5276_v40 = vadd.f32 %v5275_v38, %v5263_v37  ;;  %v8681_v19 = vld [vmem:[#allocation2 + $0xdd8] sm:$0xff]  ;;  %v1312_v37 = vld [vmem:[#allocation1 + $0x2d] sm:$0xff] }
 0x19c   :  { %5489 = vmatpush.bf16.msra.mxu0 %v8627_v20  ;;  %v1314_v38 = vld [vmem:[#allocation1 + $0x3f] sm:$0xff] }
 0x19d   :  { %5502 = vmatpush.bf16.msra.mxu1 %v8635_v21 }
 0x19e   :  { %5515 = vmatpush.bf16.msra.mxu2 %v8643_v22 }
 0x19f   :  { %5528 = vmatpush.bf16.msra.mxu3 %v8651_v23 }
 0x1a0   :  { %5490 = vmatpush.bf16.msra.mxu0 %v8626_v26  ;;  %v5264_v50 = vpop.f32.mrf.mxu2  ;;  %v8664_v26 = vld [vmem:[#allocation2 + $0xd50] sm:$0xff] }
 0x1a1   :  { %5503 = vmatpush.bf16.msra.mxu1 %v8634_v27  ;;  %v5277_v51 = vpop.f32.mrf.mxu3  ;;  %v8700_v50 = vld [vmem:[#allocation2 + $0xe70] sm:$0xff] }
 0x1a2   :  { %5516 = vmatpush.bf16.msra.mxu2 %v8642_v29  ;;  %v8680_v29 = vld [vmem:[#allocation2 + $0xdd0] sm:$0xff] }
 0x1a3   :  { %5529 = vmatpush.bf16.msra.mxu3 %v8650_v30  ;;  %v8655_v30 = vld [vmem:[#allocation2 + $0xd08] sm:$0xff]  ;;  %v8708_v51 = vld [vmem:[#allocation2 + $0xeb0] sm:$0xff] }
 0x1a4   :  { %5491 = vmatpush.bf16.msra.mxu0 %v8625_v32  ;;  %v8671_v32 = vld [vmem:[#allocation2 + $0xd88] sm:$0xff] }
 0x1a5   :  { %5504 = vmatpush.bf16.msra.mxu1 %v8633_v33  ;;  %v8679_v33 = vld [vmem:[#allocation2 + $0xdc8] sm:$0xff] }
 0x1a6   :  { %5517 = vmatpush.bf16.msra.mxu2 %v8641_v34  ;;  %v1311_v34 = vld [vmem:[#allocation1 + $0x24] sm:$0xff] }
 0x1a7   :  { %5530 = vmatpush.bf16.msra.mxu3 %v8649_v35  ;;  %v1313_v35 = vld [vmem:[#allocation1 + $0x36] sm:$0xff] }
 0x1a8   :  { %5492 = vmatpush.bf16.msra.mxu0 %v8624_v41  ;;  %v8654_v41 = vld [vmem:[#allocation2 + $0xd00] sm:$0xff] }
 0x1a9   :  { %5505 = vmatpush.bf16.msra.mxu1 %v8632_v42  ;;  %v8662_v42 = vld [vmem:[#allocation2 + $0xd40] sm:$0xff] }
 0x1aa   :  { %5518 = vmatpush.bf16.msra.mxu2 %v8640_v44  ;;  %v8678_v44 = vld [vmem:[#allocation2 + $0xdc0] sm:$0xff] }
 0x1ab   :  { %5531 = vmatpush.bf16.msra.mxu3 %v8648_v45  ;;  %v8693_v45 = vld [vmem:[#allocation2 + $0xe38] sm:$0xff] }
 0x1ac   :  { %5493 = vmatpush.bf16.msra.mxu0 %v8623_v46  ;;  %v8701_v46 = vld [vmem:[#allocation2 + $0xe78] sm:$0xff] }
 0x1ad   :  { %5506 = vmatpush.bf16.msra.mxu1 %v8631_v47  ;;  %v8709_v47 = vld [vmem:[#allocation2 + $0xeb8] sm:$0xff] }
 0x1ae   :  { %5519 = vmatpush.bf16.msra.mxu2 %v8639_v48  ;;  %v8717_v48 = vld [vmem:[#allocation2 + $0xef8] sm:$0xff] }
 0x1af   :  { %5532 = vmatpush.bf16.msra.mxu3 %v8647_v49  ;;  %v8692_v49 = vld [vmem:[#allocation2 + $0xe30] sm:$0xff] }
 0x1b0   :  { %5494 = vmatpush.bf16.msra.mxu0 %v8622_v52  ;;  %v5288_v8 = vpop.f32.mrf.mxu0  ;;  %v8716_v52 = vld [vmem:[#allocation2 + $0xef0] sm:$0xff] }
 0x1b1   :  { %5507 = vmatpush.bf16.msra.mxu1 %v8630_v53  ;;  %v5289_v9 = vadd.f32 %v5288_v8, %v5276_v40  ;;  %v5301_v12 = vpop.f32.mrf.mxu1  ;;  %v87_v40 = vld [vmem:[%s9056_s0 + $0x38] sm:$0xff]  ;;  %v8691_v53 = vld [vmem:[#allocation2 + $0xe28] sm:$0xff] }
 0x1b2   :  { %5520 = vmatpush.bf16.msra.mxu2 %v8638_v54  ;;  %1316 = vst [vmem:[#allocation1] ss:$9 sm:$0xff] %v87_v40  ;;  %v8699_v54 = vld [vmem:[#allocation2 + $0xe68] sm:$0xff] }
 0x1b3   :  { %5533 = vmatpush.bf16.msra.mxu3 %v8646_v55  ;;  %5495 = vmatmul.bf16.vlgmr.msra.gmra.mxu0 %v1307_v60  ;;  %v5302_v15 = vadd.f32 %v5301_v12, %v5289_v9  ;;  %v8707_v55 = vld [vmem:[#allocation2 + $0xea8] sm:$0xff]  ;;  %v8698_v60 = vld [vmem:[#allocation2 + $0xe60] sm:$0xff] }
 0x1b4   :  { %5539 = vmatpush.bf16.msrb.mxu0 %v8661_v56  ;;  %5508 = vmatmul.bf16.vlgmr.msra.gmra.mxu1 %v1308_v62  ;;  %v8715_v56 = vld [vmem:[#allocation2 + $0xee8] sm:$0xff]  ;;  %v8706_v62 = vld [vmem:[#allocation2 + $0xea0] sm:$0xff] }
 0x1b5   :  { %5552 = vmatpush.bf16.msrb.mxu1 %v8669_v57  ;;  %5521 = vmatmul.bf16.vlgmr.msra.gmra.mxu2 %v1309_v61  ;;  %v8747_v40 = vld [vmem:[#allocation2 + $0xfe8] sm:$0xff] }
 0x1b6   :  { %5565 = vmatpush.bf16.msrb.mxu2 %v8677_v58  ;;  %5534 = vmatmul.bf16.vlgmr.msra.gmra.mxu3 %v1310_v63  ;;  %v8714_v63 = vld [vmem:[#allocation2 + $0xee0] sm:$0xff] }
 0x1b7   :  { %5578 = vmatpush.bf16.msrb.mxu3 %v8685_v59  ;;  %v8690_v59 = vld [vmem:[#allocation2 + $0xe20] sm:$0xff] }
 0x1b8   :  { %5540 = vmatpush.bf16.msrb.mxu0 %v8660_v0  ;;  %v5314_v20 = vpop.f32.mrf.mxu2  ;;  %v5290_v23 = vpop.f32.mrf.mxu0 }
 0x1b9   :  { %5553 = vmatpush.bf16.msrb.mxu1 %v8668_v1  ;;  %v5315_v21 = vadd.f32 %v5314_v20, %v5302_v15  ;;  %v5327_v22 = vpop.f32.mrf.mxu3  ;;  %v5303_v27 = vpop.f32.mrf.mxu1  ;;  %v8689_v1 = vld [vmem:[#allocation2 + $0xe18] sm:$0xff]  ;;  %v8687_v15 = vld [vmem:[#allocation2 + $0xe08] sm:$0xff]  ;;  %v8702_v23 = vld [vmem:[#allocation2 + $0xe80] sm:$0xff] }
 0x1ba   :  { %5566 = vmatpush.bf16.msrb.mxu2 %v8676_v2  ;;  %v8697_v2 = vld [vmem:[#allocation2 + $0xe58] sm:$0xff] }
 0x1bb   :  { %5579 = vmatpush.bf16.msrb.mxu3 %v8684_v3  ;;  %v9041_v24 = vadd.f32 %v5327_v22, %v5315_v21  ;;  %v8705_v3 = vld [vmem:[#allocation2 + $0xe98] sm:$0xff]  ;;  %v8686_v21 = vld [vmem:[#allocation2 + $0xe00] sm:$0xff] }
 0x1bc   :  { %5541 = vmatpush.bf16.msrb.mxu0 %v8659_v4  ;;  %v8713_v4 = vld [vmem:[#allocation2 + $0xed8] sm:$0xff]  ;;  %v8694_v22 = vld [vmem:[#allocation2 + $0xe40] sm:$0xff] }
 0x1bd   :  { %5554 = vmatpush.bf16.msrb.mxu1 %v8667_v5  ;;  %v8741_v27 = vld [vmem:[#allocation2 + $0xfb8] sm:$0xff] }
 0x1be   :  { %5567 = vmatpush.bf16.msrb.mxu2 %v8675_v6 }
 0x1bf   :  { %5580 = vmatpush.bf16.msrb.mxu3 %v8683_v7 }
 0x1c0   :  { %5542 = vmatpush.bf16.msrb.mxu0 %v8658_v10  ;;  %v5316_v36 = vpop.f32.mrf.mxu2  ;;  %v8688_v10 = vld [vmem:[#allocation2 + $0xe10] sm:$0xff] }
 0x1c1   :  { %5555 = vmatpush.bf16.msrb.mxu1 %v8666_v11  ;;  %v5329_v39 = vpop.f32.mrf.mxu3  ;;  %v8696_v11 = vld [vmem:[#allocation2 + $0xe50] sm:$0xff] }
 0x1c2   :  { %5568 = vmatpush.bf16.msrb.mxu2 %v8674_v13  ;;  %v8704_v13 = vld [vmem:[#allocation2 + $0xe90] sm:$0xff]  ;;  %v8739_v39 = vld [vmem:[#allocation2 + $0xfa8] sm:$0xff] }
 0x1c3   :  { %5581 = vmatpush.bf16.msrb.mxu3 %v8682_v14  ;;  %v8712_v14 = vld [vmem:[#allocation2 + $0xed0] sm:$0xff] }
 0x1c4   :  { %5543 = vmatpush.bf16.msrb.mxu0 %v8657_v16  ;;  %v8695_v16 = vld [vmem:[#allocation2 + $0xe48] sm:$0xff]  ;;  %v8748_v36 = vld [vmem:[#allocation2 + $0xff0] sm:$0xff] }
 0x1c5   :  { %5556 = vmatpush.bf16.msrb.mxu1 %v8665_v17  ;;  %v8703_v17 = vld [vmem:[#allocation2 + $0xe88] sm:$0xff] }
 0x1c6   :  { %5569 = vmatpush.bf16.msrb.mxu2 %v8673_v18  ;;  %v8711_v18 = vld [vmem:[#allocation2 + $0xec8] sm:$0xff] }
 0x1c7   :  { %5582 = vmatpush.bf16.msrb.mxu3 %v8681_v19 }
 0x1c8   :  { %5544 = vmatpush.bf16.msrb.mxu0 %v8656_v25  ;;  %v8725_v25 = vld [vmem:[#allocation2 + $0xf38] sm:$0xff] }
 0x1c9   :  { %5557 = vmatpush.bf16.msrb.mxu1 %v8664_v26  ;;  %v8733_v26 = vld [vmem:[#allocation2 + $0xf78] sm:$0xff] }
 0x1ca   :  { %5570 = vmatpush.bf16.msrb.mxu2 %v8672_v28  ;;  %v8749_v28 = vld [vmem:[#allocation2 + $0xff8] sm:$0xff] }
 0x1cb   :  { %5583 = vmatpush.bf16.msrb.mxu3 %v8680_v29  ;;  %v1317_v29 = vld [vmem:[#allocation1] sm:$0xff] }
 0x1cc   :  { %5545 = vmatpush.bf16.msrb.mxu0 %v8655_v30  ;;  %v1319_v30 = vld [vmem:[#allocation1 + $0x12] sm:$0xff] }
 0x1cd   :  { %5558 = vmatpush.bf16.msrb.mxu1 %v8663_v31  ;;  %v1318_v31 = vld [vmem:[#allocation1 + $0x9] sm:$0xff] }
 0x1ce   :  { %5571 = vmatpush.bf16.msrb.mxu2 %v8671_v32  ;;  %v1320_v32 = vld [vmem:[#allocation1 + $0x1b] sm:$0xff] }
 0x1cf   :  { %5584 = vmatpush.bf16.msrb.mxu3 %v8679_v33  ;;  %v8724_v33 = vld [vmem:[#allocation2 + $0xf30] sm:$0xff] }
 0x1d0   :  { %5546 = vmatpush.bf16.msrb.mxu0 %v8654_v41  ;;  %v5340_v57 = vpop.f32.mrf.mxu0 }
 0x1d1   :  { %5559 = vmatpush.bf16.msrb.mxu1 %v8662_v42  ;;  %v5341_v58 = vadd.f32 %v5340_v57, %v9041_v24  ;;  %v5353_v61 = vpop.f32.mrf.mxu1  ;;  %v8710_v24 = vld [vmem:[#allocation2 + $0xec0] sm:$0xff] }
 0x1d2   :  { %5572 = vmatpush.bf16.msrb.mxu2 %v8670_v43  ;;  %v8722_v43 = vld [vmem:[#allocation2 + $0xf20] sm:$0xff] }
 0x1d3   :  { %5585 = vmatpush.bf16.msrb.mxu3 %v8678_v44  ;;  %5547 = vmatmul.bf16.vlgmr.msrb.gmra.mxu0 %v1311_v34  ;;  %v5354_v0 = vadd.f32 %v5353_v61, %v5341_v58  ;;  %v8732_v34 = vld [vmem:[#allocation2 + $0xf70] sm:$0xff]  ;;  %v8730_v44 = vld [vmem:[#allocation2 + $0xf60] sm:$0xff] }
 0x1d4   :  { %5591 = vmatpush.bf16.msra.mxu0 %v8693_v45  ;;  %5560 = vmatmul.bf16.vlgmr.msrb.gmra.mxu1 %v1312_v37  ;;  %v8723_v37 = vld [vmem:[#allocation2 + $0xf28] sm:$0xff]  ;;  %v8720_v58 = vld [vmem:[#allocation2 + $0xf10] sm:$0xff] }
 0x1d5   :  { %5604 = vmatpush.bf16.msra.mxu1 %v8701_v46  ;;  %5573 = vmatmul.bf16.vlgmr.msrb.gmra.mxu2 %v1313_v35  ;;  %v8740_v35 = vld [vmem:[#allocation2 + $0xfb0] sm:$0xff]  ;;  %v8738_v46 = vld [vmem:[#allocation2 + $0xfa0] sm:$0xff] }
 0x1d6   :  { %5617 = vmatpush.bf16.msra.mxu2 %v8709_v47  ;;  %5586 = vmatmul.bf16.vlgmr.msrb.gmra.mxu3 %v1314_v38  ;;  %v8731_v38 = vld [vmem:[#allocation2 + $0xf68] sm:$0xff]  ;;  %v8746_v47 = vld [vmem:[#allocation2 + $0xfe0] sm:$0xff]  ;;  %v8736_v61 = vld [vmem:[#allocation2 + $0xf90] sm:$0xff] }
 0x1d7   :  { %5630 = vmatpush.bf16.msra.mxu3 %v8717_v48 }
 0x1d8   :  { %5592 = vmatpush.bf16.msra.mxu0 %v8692_v49  ;;  %v5366_v5 = vpop.f32.mrf.mxu2  ;;  %v5342_v8 = vpop.f32.mrf.mxu0  ;;  %v8721_v49 = vld [vmem:[#allocation2 + $0xf18] sm:$0xff] }
 0x1d9   :  { %5605 = vmatpush.bf16.msra.mxu1 %v8700_v50  ;;  %v5367_v6 = vadd.f32 %v5366_v5, %v5354_v0  ;;  %v5379_v7 = vpop.f32.mrf.mxu3  ;;  %v5355_v12 = vpop.f32.mrf.mxu1  ;;  %v8729_v50 = vld [vmem:[#allocation2 + $0xf58] sm:$0xff]  ;;  %v8727_v0 = vld [vmem:[#allocation2 + $0xf48] sm:$0xff] }
 0x1da   :  { %5618 = vmatpush.bf16.msra.mxu2 %v8708_v51  ;;  %v8737_v51 = vld [vmem:[#allocation2 + $0xf98] sm:$0xff]  ;;  %v8734_v12 = vld [vmem:[#allocation2 + $0xf80] sm:$0xff] }
 0x1db   :  { %5631 = vmatpush.bf16.msra.mxu3 %v8716_v52  ;;  %v5380_v9 = vadd.f32 %v5379_v7, %v5367_v6  ;;  %v8745_v52 = vld [vmem:[#allocation2 + $0xfd8] sm:$0xff]  ;;  %v1322_v6 = vld [vmem:[#allocation1 + $0x2d] sm:$0xff] }
 0x1dc   :  { %5593 = vmatpush.bf16.msra.mxu0 %v8691_v53  ;;  %v1324_v7 = vld [vmem:[#allocation1 + $0x3f] sm:$0xff] }
 0x1dd   :  { %5606 = vmatpush.bf16.msra.mxu1 %v8699_v54 }
 0x1de   :  { %5619 = vmatpush.bf16.msra.mxu2 %v8707_v55 }
 0x1df   :  { %5632 = vmatpush.bf16.msra.mxu3 %v8715_v56 }
 0x1e0   :  { %5594 = vmatpush.bf16.msra.mxu0 %v8690_v59  ;;  %v5368_v19 = vpop.f32.mrf.mxu2  ;;  %v8728_v59 = vld [vmem:[#allocation2 + $0xf50] sm:$0xff] }
 0x1e1   :  { %5607 = vmatpush.bf16.msra.mxu1 %v8698_v60  ;;  %v5381_v20 = vpop.f32.mrf.mxu3  ;;  %v8764_v19 = vld [vmem:[#allocation2 + $0x1070] sm:$0xff] }
 0x1e2   :  { %5620 = vmatpush.bf16.msra.mxu2 %v8706_v62  ;;  %v8744_v62 = vld [vmem:[#allocation2 + $0xfd0] sm:$0xff] }
 0x1e3   :  { %5633 = vmatpush.bf16.msra.mxu3 %v8714_v63  ;;  %v8719_v63 = vld [vmem:[#allocation2 + $0xf08] sm:$0xff]  ;;  %v8772_v20 = vld [vmem:[#allocation2 + $0x10b0] sm:$0xff] }
 0x1e4   :  { %5595 = vmatpush.bf16.msra.mxu0 %v8689_v1  ;;  %v8735_v1 = vld [vmem:[#allocation2 + $0xf88] sm:$0xff] }
 0x1e5   :  { %5608 = vmatpush.bf16.msra.mxu1 %v8697_v2  ;;  %v8743_v2 = vld [vmem:[#allocation2 + $0xfc8] sm:$0xff] }
 0x1e6   :  { %5621 = vmatpush.bf16.msra.mxu2 %v8705_v3  ;;  %v1321_v3 = vld [vmem:[#allocation1 + $0x24] sm:$0xff] }
 0x1e7   :  { %5634 = vmatpush.bf16.msra.mxu3 %v8713_v4  ;;  %v1323_v4 = vld [vmem:[#allocation1 + $0x36] sm:$0xff] }
 0x1e8   :  { %5596 = vmatpush.bf16.msra.mxu0 %v8688_v10  ;;  %v8718_v10 = vld [vmem:[#allocation2 + $0xf00] sm:$0xff] }
 0x1e9   :  { %5609 = vmatpush.bf16.msra.mxu1 %v8696_v11  ;;  %v8726_v11 = vld [vmem:[#allocation2 + $0xf40] sm:$0xff] }
 0x1ea   :  { %5622 = vmatpush.bf16.msra.mxu2 %v8704_v13  ;;  %v8742_v13 = vld [vmem:[#allocation2 + $0xfc0] sm:$0xff] }
 0x1eb   :  { %5635 = vmatpush.bf16.msra.mxu3 %v8712_v14  ;;  %v8757_v14 = vld [vmem:[#allocation2 + $0x1038] sm:$0xff] }
 0x1ec   :  { %5597 = vmatpush.bf16.msra.mxu0 %v8687_v15  ;;  %v8765_v15 = vld [vmem:[#allocation2 + $0x1078] sm:$0xff] }
 0x1ed   :  { %5610 = vmatpush.bf16.msra.mxu1 %v8695_v16  ;;  %v8773_v16 = vld [vmem:[#allocation2 + $0x10b8] sm:$0xff] }
 0x1ee   :  { %5623 = vmatpush.bf16.msra.mxu2 %v8703_v17  ;;  %v8781_v17 = vld [vmem:[#allocation2 + $0x10f8] sm:$0xff] }
 0x1ef   :  { %5636 = vmatpush.bf16.msra.mxu3 %v8711_v18  ;;  %v8756_v18 = vld [vmem:[#allocation2 + $0x1030] sm:$0xff] }
 0x1f0   :  { %5598 = vmatpush.bf16.msra.mxu0 %v8686_v21  ;;  %v5392_v41 = vpop.f32.mrf.mxu0  ;;  %v8780_v21 = vld [vmem:[#allocation2 + $0x10f0] sm:$0xff] }
 0x1f1   :  { %5611 = vmatpush.bf16.msra.mxu1 %v8694_v22  ;;  %v5393_v42 = vadd.f32 %v5392_v41, %v5380_v9  ;;  %v5405_v45 = vpop.f32.mrf.mxu1  ;;  %v88_v9 = vld [vmem:[%s9056_s0 + $0x40] sm:$0xff]  ;;  %v8755_v22 = vld [vmem:[#allocation2 + $0x1028] sm:$0xff]  ;;  %s8965_s0 = smov [#allocation10]  }
 0x1f2   :  { %5624 = vmatpush.bf16.msra.mxu2 %v8702_v23  ;;  %1326 = vst [vmem:[#allocation1] ss:$9 sm:$0xff] %v88_v9  ;;  %v8763_v23 = vld [vmem:[#allocation2 + $0x1068] sm:$0xff]  ;;  %s5888_s29 = sshll.u32 %s8965_s0, 4  ;;  %s5889_s29 = int_to_ptr.vmem [resolvable:$true] %s5888_s29 }
 0x1f3   :  { %5637 = vmatpush.bf16.msra.mxu3 %v8710_v24  ;;  %5599 = vmatmul.bf16.vlgmr.msra.gmra.mxu0 %v1317_v29  ;;  %v5406_v48 = vadd.f32 %v5405_v45, %v5393_v42  ;;  %v8771_v24 = vld [vmem:[#allocation2 + $0x10a8] sm:$0xff]  ;;  %v8762_v29 = vld [vmem:[#allocation2 + $0x1060] sm:$0xff] }
 0x1f4   :  { %5643 = vmatpush.bf16.msrb.mxu0 %v8725_v25  ;;  %5612 = vmatmul.bf16.vlgmr.msra.gmra.mxu1 %v1318_v31  ;;  %v8779_v25 = vld [vmem:[#allocation2 + $0x10e8] sm:$0xff]  ;;  %v8770_v31 = vld [vmem:[#allocation2 + $0x10a0] sm:$0xff] }
 0x1f5   :  { %5656 = vmatpush.bf16.msrb.mxu1 %v8733_v26  ;;  %5625 = vmatmul.bf16.vlgmr.msra.gmra.mxu2 %v1319_v30  ;;  %v8811_v9 = vld [vmem:[#allocation2 + $0x11e8] sm:$0xff] }
 0x1f6   :  { %5669 = vmatpush.bf16.msrb.mxu2 %v8741_v27  ;;  %5638 = vmatmul.bf16.vlgmr.msra.gmra.mxu3 %v1320_v32  ;;  %v8778_v32 = vld [vmem:[#allocation2 + $0x10e0] sm:$0xff] }
 0x1f7   :  { %5682 = vmatpush.bf16.msrb.mxu3 %v8749_v28  ;;  %v8754_v28 = vld [vmem:[#allocation2 + $0x1020] sm:$0xff] }
 0x1f8   :  { %5644 = vmatpush.bf16.msrb.mxu0 %v8724_v33  ;;  %v5418_v53 = vpop.f32.mrf.mxu2  ;;  %v5394_v56 = vpop.f32.mrf.mxu0 }
 0x1f9   :  { %5657 = vmatpush.bf16.msrb.mxu1 %v8732_v34  ;;  %v5419_v54 = vadd.f32 %v5418_v53, %v5406_v48  ;;  %v5431_v55 = vpop.f32.mrf.mxu3  ;;  %v5407_v60 = vpop.f32.mrf.mxu1  ;;  %v8753_v34 = vld [vmem:[#allocation2 + $0x1018] sm:$0xff]  ;;  %v8751_v48 = vld [vmem:[#allocation2 + $0x1008] sm:$0xff]  ;;  %v8766_v56 = vld [vmem:[#allocation2 + $0x1080] sm:$0xff] }
 0x1fa   :  { %5670 = vmatpush.bf16.msrb.mxu2 %v8740_v35  ;;  %v8761_v35 = vld [vmem:[#allocation2 + $0x1058] sm:$0xff] }
 0x1fb   :  { %5683 = vmatpush.bf16.msrb.mxu3 %v8748_v36  ;;  %v9047_v57 = vadd.f32 %v5431_v55, %v5419_v54  ;;  %v8769_v36 = vld [vmem:[#allocation2 + $0x1098] sm:$0xff]  ;;  %v8750_v54 = vld [vmem:[#allocation2 + $0x1000] sm:$0xff] }
 0x1fc   :  { %5645 = vmatpush.bf16.msrb.mxu0 %v8723_v37  ;;  %v8777_v37 = vld [vmem:[#allocation2 + $0x10d8] sm:$0xff]  ;;  %v8758_v55 = vld [vmem:[#allocation2 + $0x1040] sm:$0xff] }
 0x1fd   :  { %5658 = vmatpush.bf16.msrb.mxu1 %v8731_v38  ;;  %v8805_v60 = vld [vmem:[#allocation2 + $0x11b8] sm:$0xff] }
 0x1fe   :  { %5671 = vmatpush.bf16.msrb.mxu2 %v8739_v39 }
 0x1ff   :  { %5684 = vmatpush.bf16.msrb.mxu3 %v8747_v40 }
 0x200   :  { %5646 = vmatpush.bf16.msrb.mxu0 %v8722_v43  ;;  %v5420_v5 = vpop.f32.mrf.mxu2  ;;  %v8752_v43 = vld [vmem:[#allocation2 + $0x1010] sm:$0xff] }
 0x201   :  { %5659 = vmatpush.bf16.msrb.mxu1 %v8730_v44  ;;  %v5433_v8 = vpop.f32.mrf.mxu3  ;;  %v8760_v44 = vld [vmem:[#allocation2 + $0x1050] sm:$0xff] }
 0x202   :  { %5672 = vmatpush.bf16.msrb.mxu2 %v8738_v46  ;;  %v8768_v46 = vld [vmem:[#allocation2 + $0x1090] sm:$0xff]  ;;  %v8803_v8 = vld [vmem:[#allocation2 + $0x11a8] sm:$0xff] }
 0x203   :  { %5685 = vmatpush.bf16.msrb.mxu3 %v8746_v47  ;;  %v8776_v47 = vld [vmem:[#allocation2 + $0x10d0] sm:$0xff] }
 0x204   :  { %5647 = vmatpush.bf16.msrb.mxu0 %v8721_v49  ;;  %v8759_v49 = vld [vmem:[#allocation2 + $0x1048] sm:$0xff]  ;;  %v8812_v5 = vld [vmem:[#allocation2 + $0x11f0] sm:$0xff] }
 0x205   :  { %5660 = vmatpush.bf16.msrb.mxu1 %v8729_v50  ;;  %v8767_v50 = vld [vmem:[#allocation2 + $0x1088] sm:$0xff] }
 0x206   :  { %5673 = vmatpush.bf16.msrb.mxu2 %v8737_v51  ;;  %v8775_v51 = vld [vmem:[#allocation2 + $0x10c8] sm:$0xff] }
 0x207   :  { %5686 = vmatpush.bf16.msrb.mxu3 %v8745_v52 }
 0x208   :  { %5648 = vmatpush.bf16.msrb.mxu0 %v8720_v58  ;;  %v8789_v58 = vld [vmem:[#allocation2 + $0x1138] sm:$0xff] }
 0x209   :  { %5661 = vmatpush.bf16.msrb.mxu1 %v8728_v59  ;;  %v8797_v59 = vld [vmem:[#allocation2 + $0x1178] sm:$0xff] }
 0x20a   :  { %5674 = vmatpush.bf16.msrb.mxu2 %v8736_v61  ;;  %v8813_v61 = vld [vmem:[#allocation2 + $0x11f8] sm:$0xff] }
 0x20b   :  { %5687 = vmatpush.bf16.msrb.mxu3 %v8744_v62  ;;  %v1327_v62 = vld [vmem:[#allocation1] sm:$0xff] }
 0x20c   :  { %5649 = vmatpush.bf16.msrb.mxu0 %v8719_v63  ;;  %v1329_v63 = vld [vmem:[#allocation1 + $0x12] sm:$0xff] }
 0x20d   :  { %5662 = vmatpush.bf16.msrb.mxu1 %v8727_v0  ;;  %v1328_v0 = vld [vmem:[#allocation1 + $0x9] sm:$0xff] }
 0x20e   :  { %5675 = vmatpush.bf16.msrb.mxu2 %v8735_v1  ;;  %v1330_v1 = vld [vmem:[#allocation1 + $0x1b] sm:$0xff] }
 0x20f   :  { %5688 = vmatpush.bf16.msrb.mxu3 %v8743_v2  ;;  %v8788_v2 = vld [vmem:[#allocation2 + $0x1130] sm:$0xff] }
 0x210   :  { %5650 = vmatpush.bf16.msrb.mxu0 %v8718_v10  ;;  %v5444_v26 = vpop.f32.mrf.mxu0 }
 0x211   :  { %5663 = vmatpush.bf16.msrb.mxu1 %v8726_v11  ;;  %v5445_v27 = vadd.f32 %v5444_v26, %v9047_v57  ;;  %v5457_v30 = vpop.f32.mrf.mxu1  ;;  %v8774_v57 = vld [vmem:[#allocation2 + $0x10c0] sm:$0xff] }
 0x212   :  { %5676 = vmatpush.bf16.msrb.mxu2 %v8734_v12  ;;  %v8786_v12 = vld [vmem:[#allocation2 + $0x1120] sm:$0xff] }
 0x213   :  { %5689 = vmatpush.bf16.msrb.mxu3 %v8742_v13  ;;  %5651 = vmatmul.bf16.vlgmr.msrb.gmra.mxu0 %v1321_v3  ;;  %v5458_v33 = vadd.f32 %v5457_v30, %v5445_v27  ;;  %v8796_v3 = vld [vmem:[#allocation2 + $0x1170] sm:$0xff]  ;;  %v8794_v13 = vld [vmem:[#allocation2 + $0x1160] sm:$0xff] }
 0x214   :  { %5695 = vmatpush.bf16.msra.mxu0 %v8757_v14  ;;  %5664 = vmatmul.bf16.vlgmr.msrb.gmra.mxu1 %v1322_v6  ;;  %v8787_v6 = vld [vmem:[#allocation2 + $0x1128] sm:$0xff]  ;;  %v8784_v27 = vld [vmem:[#allocation2 + $0x1110] sm:$0xff] }
 0x215   :  { %5708 = vmatpush.bf16.msra.mxu1 %v8765_v15  ;;  %5677 = vmatmul.bf16.vlgmr.msrb.gmra.mxu2 %v1323_v4  ;;  %v8804_v4 = vld [vmem:[#allocation2 + $0x11b0] sm:$0xff]  ;;  %v8802_v15 = vld [vmem:[#allocation2 + $0x11a0] sm:$0xff] }
 0x216   :  { %5721 = vmatpush.bf16.msra.mxu2 %v8773_v16  ;;  %5690 = vmatmul.bf16.vlgmr.msrb.gmra.mxu3 %v1324_v7  ;;  %v8795_v7 = vld [vmem:[#allocation2 + $0x1168] sm:$0xff]  ;;  %v8810_v16 = vld [vmem:[#allocation2 + $0x11e0] sm:$0xff]  ;;  %v8800_v30 = vld [vmem:[#allocation2 + $0x1190] sm:$0xff] }
 0x217   :  { %5734 = vmatpush.bf16.msra.mxu3 %v8781_v17 }
 0x218   :  { %5696 = vmatpush.bf16.msra.mxu0 %v8756_v18  ;;  %v5470_v38 = vpop.f32.mrf.mxu2  ;;  %v5446_v41 = vpop.f32.mrf.mxu0  ;;  %v8785_v18 = vld [vmem:[#allocation2 + $0x1118] sm:$0xff] }
 0x219   :  { %5709 = vmatpush.bf16.msra.mxu1 %v8764_v19  ;;  %v5471_v39 = vadd.f32 %v5470_v38, %v5458_v33  ;;  %v5483_v40 = vpop.f32.mrf.mxu3  ;;  %v5459_v45 = vpop.f32.mrf.mxu1  ;;  %v8793_v19 = vld [vmem:[#allocation2 + $0x1158] sm:$0xff]  ;;  %v8791_v33 = vld [vmem:[#allocation2 + $0x1148] sm:$0xff]  ;;  %v8782_v38 = vld [vmem:[#allocation2 + $0x1100] sm:$0xff] }
 0x21a   :  { %5722 = vmatpush.bf16.msra.mxu2 %v8772_v20  ;;  %v8801_v20 = vld [vmem:[#allocation2 + $0x1198] sm:$0xff]  ;;  %v8806_v41 = vld [vmem:[#allocation2 + $0x11c0] sm:$0xff] }
 0x21b   :  { %5735 = vmatpush.bf16.msra.mxu3 %v8780_v21  ;;  %v5484_v42 = vadd.f32 %v5483_v40, %v5471_v39  ;;  %v8809_v21 = vld [vmem:[#allocation2 + $0x11d8] sm:$0xff]  ;;  %v8790_v39 = vld [vmem:[#allocation2 + $0x1140] sm:$0xff] }
 0x21c   :  { %5697 = vmatpush.bf16.msra.mxu0 %v8755_v22  ;;  %v8798_v40 = vld [vmem:[#allocation2 + $0x1180] sm:$0xff]  ;;  %v1334_v45 = vld [vmem:[#allocation1 + $0x3f] sm:$0xff] }
 0x21d   :  { %5710 = vmatpush.bf16.msra.mxu1 %v8763_v23 }
 0x21e   :  { %5723 = vmatpush.bf16.msra.mxu2 %v8771_v24 }
 0x21f   :  { %5736 = vmatpush.bf16.msra.mxu3 %v8779_v25 }
 0x220   :  { %5698 = vmatpush.bf16.msra.mxu0 %v8754_v28  ;;  %v5472_v52 = vpop.f32.mrf.mxu2  ;;  %v8792_v28 = vld [vmem:[#allocation2 + $0x1150] sm:$0xff] }
 0x221   :  { %5711 = vmatpush.bf16.msra.mxu1 %v8762_v29  ;;  %v5485_v53 = vpop.f32.mrf.mxu3 }
 0x222   :  { %5724 = vmatpush.bf16.msra.mxu2 %v8770_v31  ;;  %v8808_v31 = vld [vmem:[#allocation2 + $0x11d0] sm:$0xff] }
 0x223   :  { %5737 = vmatpush.bf16.msra.mxu3 %v8778_v32  ;;  %v8783_v32 = vld [vmem:[#allocation2 + $0x1108] sm:$0xff] }
 0x224   :  { %5699 = vmatpush.bf16.msra.mxu0 %v8753_v34  ;;  %v8799_v34 = vld [vmem:[#allocation2 + $0x1188] sm:$0xff] }
 0x225   :  { %5712 = vmatpush.bf16.msra.mxu1 %v8761_v35  ;;  %v8807_v35 = vld [vmem:[#allocation2 + $0x11c8] sm:$0xff] }
 0x226   :  { %5725 = vmatpush.bf16.msra.mxu2 %v8769_v36 }
 0x227   :  { %5738 = vmatpush.bf16.msra.mxu3 %v8777_v37 }
 0x228   :  { %5700 = vmatpush.bf16.msra.mxu0 %v8752_v43  ;;  %v1332_v43 = vld [vmem:[#allocation1 + $0x2d] sm:$0xff] }
 0x229   :  { %5713 = vmatpush.bf16.msra.mxu1 %v8760_v44  ;;  %v1333_v44 = vld [vmem:[#allocation1 + $0x36] sm:$0xff] }
 0x22a   :  { %5726 = vmatpush.bf16.msra.mxu2 %v8768_v46 }
 0x22b   :  { %5739 = vmatpush.bf16.msra.mxu3 %v8776_v47 }
 0x22c   :  { %5701 = vmatpush.bf16.msra.mxu0 %v8751_v48 }
 0x22d   :  { %5714 = vmatpush.bf16.msra.mxu1 %v8759_v49 }
 0x22e   :  { %5727 = vmatpush.bf16.msra.mxu2 %v8767_v50 }
 0x22f   :  { %5740 = vmatpush.bf16.msra.mxu3 %v8775_v51 }
 0x230   :  { %5702 = vmatpush.bf16.msra.mxu0 %v8750_v54  ;;  %v5496_v10 = vpop.f32.mrf.mxu0 }
 0x231   :  { %5715 = vmatpush.bf16.msra.mxu1 %v8758_v55  ;;  %v5497_v11 = vadd.f32 %v5496_v10, %v5484_v42  ;;  %v5509_v14 = vpop.f32.mrf.mxu1  ;;  %v1331_v42 = vld [vmem:[#allocation1 + $0x24] sm:$0xff] }
 0x232   :  { %5728 = vmatpush.bf16.msra.mxu2 %v8766_v56  ;;  %v8821_v10 = vld [vmem:[#allocation7 + $0x38] sm:$0xff] }
 0x233   :  { %5741 = vmatpush.bf16.msra.mxu3 %v8774_v57  ;;  %5703 = vmatmul.bf16.vlgmr.msra.gmra.mxu0 %v1327_v62  ;;  %v5510_v17 = vadd.f32 %v5509_v14, %v5497_v11  ;;  %v8819_v14 = vld [vmem:[#allocation7 + $0x28] sm:$0xff] }
 0x234   :  { %5747 = vmatpush.bf16.msrb.mxu0 %v8789_v58  ;;  %5716 = vmatmul.bf16.vlgmr.msra.gmra.mxu1 %v1328_v0 }
 0x235   :  { %5760 = vmatpush.bf16.msrb.mxu1 %v8797_v59  ;;  %5729 = vmatmul.bf16.vlgmr.msra.gmra.mxu2 %v1329_v63 }
 0x236   :  { %5773 = vmatpush.bf16.msrb.mxu2 %v8805_v60  ;;  %5742 = vmatmul.bf16.vlgmr.msra.gmra.mxu3 %v1330_v1 }
 0x237   :  { %5786 = vmatpush.bf16.msrb.mxu3 %v8813_v61 }
 0x238   :  { %5748 = vmatpush.bf16.msrb.mxu0 %v8788_v2  ;;  %v5522_v22 = vpop.f32.mrf.mxu2  ;;  %v5498_v25 = vpop.f32.mrf.mxu0 }
 0x239   :  { %5761 = vmatpush.bf16.msrb.mxu1 %v8796_v3  ;;  %v5523_v23 = vadd.f32 %v5522_v22, %v5510_v17  ;;  %v5535_v24 = vpop.f32.mrf.mxu3  ;;  %v5511_v29 = vpop.f32.mrf.mxu1  ;;  %v8818_v17 = vld [vmem:[#allocation7 + $0x20] sm:$0xff]  ;;  %v8815_v22 = vld [vmem:[#allocation7 + $0x8] sm:$0xff] }
 0x23a   :  { %5774 = vmatpush.bf16.msrb.mxu2 %v8804_v4 }
 0x23b   :  { %5787 = vmatpush.bf16.msrb.mxu3 %v8812_v5  ;;  %v5536_v26 = vadd.f32 %v5535_v24, %v5523_v23 }
 0x23c   :  { %5749 = vmatpush.bf16.msrb.mxu0 %v8787_v6 }
 0x23d   :  { %5762 = vmatpush.bf16.msrb.mxu1 %v8795_v7 }
 0x23e   :  { %5775 = vmatpush.bf16.msrb.mxu2 %v8803_v8 }
 0x23f   :  { %5788 = vmatpush.bf16.msrb.mxu3 %v8811_v9 }
 0x240   :  { %5750 = vmatpush.bf16.msrb.mxu0 %v8786_v12  ;;  %v5524_v36 = vpop.f32.mrf.mxu2 }
 0x241   :  { %5763 = vmatpush.bf16.msrb.mxu1 %v8794_v13  ;;  %v5537_v37 = vpop.f32.mrf.mxu3  ;;  %v8820_v13 = vld [vmem:[#allocation7 + $0x30] sm:$0xff] }
 0x242   :  { %5776 = vmatpush.bf16.msrb.mxu2 %v8802_v15 }
 0x243   :  { %5789 = vmatpush.bf16.msrb.mxu3 %v8810_v16 }
 0x244   :  { %5751 = vmatpush.bf16.msrb.mxu0 %v8785_v18  ;;  %v8817_v18 = vld [vmem:[#allocation7 + $0x18] sm:$0xff] }
 0x245   :  { %5764 = vmatpush.bf16.msrb.mxu1 %v8793_v19 }
 0x246   :  { %5777 = vmatpush.bf16.msrb.mxu2 %v8801_v20  ;;  %v8816_v20 = vld [vmem:[#allocation7 + $0x10] sm:$0xff] }
 0x247   :  { %5790 = vmatpush.bf16.msrb.mxu3 %v8809_v21 }
 0x248   :  { %5752 = vmatpush.bf16.msrb.mxu0 %v8784_v27  ;;  %v8814_v27 = vld [vmem:[#allocation7] sm:$0xff] }
 0x249   :  { %5765 = vmatpush.bf16.msrb.mxu1 %v8792_v28 }
 0x24a   :  { %5778 = vmatpush.bf16.msrb.mxu2 %v8800_v30 }
 0x24b   :  { %5791 = vmatpush.bf16.msrb.mxu3 %v8808_v31 }
 0x24c   :  { %5753 = vmatpush.bf16.msrb.mxu0 %v8783_v32 }
 0x24d   :  { %5766 = vmatpush.bf16.msrb.mxu1 %v8791_v33 }
 0x24e   :  { %5779 = vmatpush.bf16.msrb.mxu2 %v8799_v34 }
 0x24f   :  { %5792 = vmatpush.bf16.msrb.mxu3 %v8807_v35 }
 0x250   :  { %5754 = vmatpush.bf16.msrb.mxu0 %v8782_v38  ;;  %v5548_v46 = vpop.f32.mrf.mxu0 }
 0x251   :  { %5767 = vmatpush.bf16.msrb.mxu1 %v8790_v39  ;;  %v5549_v47 = vadd.f32 %v5548_v46, %v5536_v26  ;;  %v5561_v48 = vpop.f32.mrf.mxu1 }
 0x252   :  { %5780 = vmatpush.bf16.msrb.mxu2 %v8798_v40 }
 0x253   :  { %5793 = vmatpush.bf16.msrb.mxu3 %v8806_v41  ;;  %5755 = vmatmul.bf16.vlgmr.msrb.gmra.mxu0 %v1331_v42  ;;  %v5562_v49 = vadd.f32 %v5561_v48, %v5549_v47 }
 0x254   :  { %5768 = vmatmul.bf16.vlgmr.msrb.gmra.mxu1 %v1332_v43  ;;  %5869 = vmatpush.bf16.msra.mxu0 %v8821_v10 }
 0x255   :  { %5781 = vmatmul.bf16.vlgmr.msrb.gmra.mxu2 %v1333_v44 }
 0x256   :  { %5794 = vmatmul.bf16.vlgmr.msrb.gmra.mxu3 %v1334_v45 }
 0x258   :  { %v5574_v50 = vpop.f32.mrf.mxu2  ;;  %v5550_v53 = vpop.f32.mrf.mxu0  ;;  %5870 = vmatpush.bf16.msra.mxu0 %v8820_v13 }
 0x259   :  { %v5575_v51 = vadd.f32 %v5574_v50, %v5562_v49  ;;  %v5587_v52 = vpop.f32.mrf.mxu3  ;;  %v5563_v55 = vpop.f32.mrf.mxu1 }
 0x25b   :  { %v5588_v54 = vadd.f32 %v5587_v52, %v5575_v51  ;;  %v8830_v52 = vld [vmem:[#allocation8] ss:$0 sm:$0xff] }
 0x25c   :  { %5871 = vmatpush.bf16.msra.mxu0 %v8819_v14 }
 0x260   :  { %v5576_v56 = vpop.f32.mrf.mxu2  ;;  %5872 = vmatpush.bf16.msra.mxu0 %v8818_v17 }
 0x261   :  { %v5589_v57 = vpop.f32.mrf.mxu3 }
 0x264   :  { %5873 = vmatpush.bf16.msra.mxu0 %v8817_v18 }
 0x268   :  { %5874 = vmatpush.bf16.msra.mxu0 %v8816_v20 }
 0x26c   :  { %5875 = vmatpush.bf16.msra.mxu0 %v8815_v22 }
 0x270   :  { %v5600_v58 = vpop.f32.mrf.mxu0  ;;  %5876 = vmatpush.bf16.msra.mxu0 %v8814_v27 }
 0x271   :  { %v5601_v59 = vadd.f32 %v5600_v58, %v5588_v54  ;;  %v5613_v60 = vpop.f32.mrf.mxu1 }
 0x273   :  { %v5614_v61 = vadd.f32 %v5613_v60, %v5601_v59 }
 0x278   :  { %v5626_v62 = vpop.f32.mrf.mxu2  ;;  %v5602_v1 = vpop.f32.mrf.mxu0 }
 0x279   :  { %v5627_v63 = vadd.f32 %v5626_v62, %v5614_v61  ;;  %v5639_v0 = vpop.f32.mrf.mxu3  ;;  %v5615_v3 = vpop.f32.mrf.mxu1 }
 0x27b   :  { %v5640_v2 = vadd.f32 %v5639_v0, %v5627_v63 }
 0x280   :  { %v5628_v4 = vpop.f32.mrf.mxu2 }
 0x281   :  { %v5641_v5 = vpop.f32.mrf.mxu3 }
 0x290   :  { %v5652_v6 = vpop.f32.mrf.mxu0 }
 0x291   :  { %v5665_v7 = vpop.f32.mrf.mxu1  ;;  %v5653_v24 = vadd.f32 %v5652_v6, %v5640_v2 }
 0x293   :  { %v5666_v29 = vadd.f32 %v5665_v7, %v5653_v24 }
 0x298   :  { %v5678_v8 = vpop.f32.mrf.mxu2  ;;  %v5654_v11 = vpop.f32.mrf.mxu0 }
 0x299   :  { %v5691_v9 = vpop.f32.mrf.mxu3  ;;  %v5667_v12 = vpop.f32.mrf.mxu1  ;;  %v5679_v30 = vadd.f32 %v5678_v8, %v5666_v29 }
 0x29b   :  { %v5692_v33 = vadd.f32 %v5691_v9, %v5679_v30 }
 0x2a0   :  { %v5680_v15 = vpop.f32.mrf.mxu2 }
 0x2a1   :  { %v5693_v16 = vpop.f32.mrf.mxu3 }
 0x2b0   :  { %v5704_v19 = vpop.f32.mrf.mxu0 }
 0x2b1   :  { %v5717_v21 = vpop.f32.mrf.mxu1  ;;  %v5705_v34 = vadd.f32 %v5704_v19, %v5692_v33 }
 0x2b3   :  { %v5718_v35 = vadd.f32 %v5717_v21, %v5705_v34 }
 0x2b8   :  { %v5730_v23 = vpop.f32.mrf.mxu2  ;;  %v5706_v26 = vpop.f32.mrf.mxu0 }
 0x2b9   :  { %v5743_v25 = vpop.f32.mrf.mxu3  ;;  %v5719_v28 = vpop.f32.mrf.mxu1  ;;  %v5731_v36 = vadd.f32 %v5730_v23, %v5718_v35 }
 0x2bb   :  { %v5744_v37 = vadd.f32 %v5743_v25, %v5731_v36 }
 0x2c0   :  { %v5732_v31 = vpop.f32.mrf.mxu2 }
 0x2c1   :  { %v5745_v32 = vpop.f32.mrf.mxu3 }
 0x2d0   :  { %v5756_v38 = vpop.f32.mrf.mxu0 }
 0x2d1   :  { %v5769_v39 = vpop.f32.mrf.mxu1  ;;  %v5757_v40 = vadd.f32 %v5756_v38, %v5744_v37 }
 0x2d3   :  { %v5770_v41 = vadd.f32 %v5769_v39, %v5757_v40 }
 0x2d8   :  { %v5782_v42 = vpop.f32.mrf.mxu2  ;;  %v5758_v45 = vpop.f32.mrf.mxu0 }
 0x2d9   :  { %v5795_v43 = vpop.f32.mrf.mxu3  ;;  %v5783_v44 = vadd.f32 %v5782_v42, %v5770_v41  ;;  %v5771_v46 = vpop.f32.mrf.mxu1 }
 0x2db   :  { %v5796_v47 = vadd.f32 %v5795_v43, %v5783_v44 }
 0x2dd   :  { %v5799_v48 = vmax.f32 %v5796_v47, 0.0 }
 0x2df   :  { %v5800_v49 = vpack.c.bf16 %v5799_v48, %v5799_v48 }
 0x2e0   :  { %v5784_v50 = vpop.f32.mrf.mxu2 }
 0x2e1   :  { %v5797_v51 = vpop.f32.mrf.mxu3  ;;  %5877 = vmatmul.bf16.vlgmr.msra.gmra.mxu0 %v5800_v49 }
 0x35e   :  { %v5878_v53 = vpop.f32.mrf.mxu0 }
 0x35f   :  { %v5879_v54 = vadd.f32 %v8830_v52, %v5878_v53 }
 0x361   :  { %5882 = vst [vmem:[#allocation10] sm:$0x3] %v5879_v54 }
 0x362   :  { %5893 = dma.vmem_to_hbm [thread:$0]  %s5889_s29, 32, %s5891_s2, [#allocation4]  }
 0x366   :  { %v5880_v55 = vpop.f32.mrf.mxu0 }
 0x367   :  { %8957 = dma.done.wait [#allocation4], 32  }
 0x368   :  { %8958 = vsyncadd [#allocation4], 4294967264 }
 0x369   :  { %5898 = vsyncpa [#allocation3], 1 }
 0x36a   :  { %5899 = vsyncpa [#allocation6], 1 }
 0x36b   :  { %5900 = vsyncpa [#allocation9], 1 }
 0x36c   :  { %5901 = vsyncpa [#allocation4], 1 }

// kernel: convnet_forward.2
= control target key start
LH: loop header
LB: loop body
LE: loop exit
PB: predicated region body
PF: predicated region fallthrough
CT: control target
= control target key end

     0   :  { %10 = vsyncpa [#allocation6], 0  ;;  %s16270_s0 = inlined_call_operand.vmem [shape: bf16[2,832,27], index: 0, kind: input, shape index: {}]   ;;  %s16271_s1 = inlined_call_operand.hbm [shape: bf16[27,96], index: 1, kind: input, shape index: {}]   ;;  %s16272_s2 = inlined_call_operand.hbm [shape: f32[1,96], index: 2, kind: input, shape index: {}]   ;;  %s16273_s3 = inlined_call_operand.vmem [shape: bf16[3,96,64], index: 3, kind: input, shape index: {}]   ;;  %s16274_s4 = inlined_call_operand.hbm [shape: f32[1,64], index: 4, kind: input, shape index: {}]   ;;  %s16275_s5 = inlined_call_operand.vmem [shape: bf16[2,144,64], index: 5, kind: output, shape index: {}]  }
   0x1   :  { %11 = vsyncpa [#allocation8], 0  ;;  %s32_s20 = sshll.u32 %s16272_s2, 4  ;;  %s12927_s21 = smov [#allocation7]   ;;  %s33_s20 = int_to_ptr.hbm [resolvable:$true] %s32_s20 }
   0x2   :  { %s34_s22 = sshll.u32 %s12927_s21, 4  ;;  %s18_s25 = sshll.u32 %s16271_s1, 4  ;;  %s35_s22 = int_to_ptr.vmem [resolvable:$true] %s34_s22  ;;  %s19_s25 = int_to_ptr.hbm [resolvable:$true] %s18_s25 }
   0x3   :  { %37 = dma.hbm_to_vmem [thread:$0]  %s33_s20, 16, %s35_s22, [#allocation8]  }
   0x4   :  { %s12928_s26 = smov [#allocation5]   ;;  %s12929_s28 = smov 64  }
   0x5   :  { %s20_s27 = sshll.u32 %s12928_s26, 4  ;;  %s12930_s29 = smov 4   ;;  %s21_s27 = int_to_ptr.vmem [resolvable:$true] %s20_s27 }
   0x6   :  { %26 = dma.hbm_to_vmem [thread:$0]  %s19_s25, 256, %s21_s27, [#allocation6], %s12929_s28, %s12929_s28, %s12930_s29  }
   0x7   :  { %s45_s2 = sshll.u32 %s16274_s4, 4  ;;  %s12931_s7 = smov [#allocation9]   ;;  %s46_s2 = int_to_ptr.hbm [resolvable:$true] %s45_s2 }
   0x8   :  { %s47_s8 = sshll.u32 %s12931_s7, 4  ;;  %s48_s8 = int_to_ptr.vmem [resolvable:$true] %s47_s8 }
   0x9   :  { %50 = dma.hbm_to_vmem [thread:$0]  %s46_s2, 16, %s48_s8, [#allocation8]  }
   0xa   :  { %12923 = dma.done.wait [#allocation6], 256  }
   0xb   :  { %12924 = vsyncadd [#allocation6], 4294967040 }
   0xc   :  { %12925 = dma.done.wait [#allocation8], 32  }
   0xd   :  { %12926 = vsyncadd [#allocation8], 4294967264  ;;  %vm604_vm0 = vcmask 1044480   ;;  %vm605_vm1 = vcmask 1045504   ;;  %v12932_v0 = vmov 65535   ;;  %vm447_vm2 = vcmask 220160  }
   0xe   :  { %v606_v1 = vsel %vm604_vm0, 4294967295, %v12932_v0  ;;  %v9511_v2 = vld [vmem:[#allocation5 + $0x8] sm:$0xf]  ;;  %v12318_v3 = vld [vmem:[#allocation5 + $0x8] sm:$0x30]  ;;  %v12317_v7 = vld [vmem:[#allocation5] sm:$0xff] }
   0xf   :  { %v12972_v4 = vsel %vm605_vm1, %v606_v1, 0  ;;  %v9512_v5 = vor.u32 %v12318_v3, %v9511_v2  ;;  %v12265_v8 = vld [vmem:[%s16270_s0] sm:$0xff]  ;;  %v12266_v9 = vld [vmem:[%s16270_s0 + $0x8] sm:$0xff]  ;;  %v12267_v10 = vld [vmem:[%s16270_s0 + $0x10] sm:$0xff]  ;;  %vm1088_vm3 = vcmask 781312   ;;  %vm1314_vm4 = vcmask 785408  }
  0x10   :  { %v12268_v11 = vld [vmem:[%s16270_s0 + $0x18] sm:$0xff]  ;;  %v12269_v12 = vld [vmem:[%s16270_s0 + $0x20] sm:$0xff]  ;;  %v12270_v13 = vld [vmem:[%s16270_s0 + $0x28] sm:$0xff]  ;;  %vm1683_vm5 = vcmask 523264   ;;  %vm1763_vm6 = vcmask 519168   ;;  %vm1765_vm7 = vcmask 517120  }
  0x11   :  { %v609_v6 = vand.u32 %v9512_v5, %v12972_v4  ;;  %v12271_v14 = vld [vmem:[%s16270_s0 + $0x30] sm:$0xff]  ;;  %v12272_v15 = vld [vmem:[%s16270_s0 + $0x38] sm:$0xff]  ;;  %v12273_v17 = vld [vmem:[%s16270_s0 + $0x40] sm:$0xff]  ;;  %vm1794_vm8 = vcmask 519170   ;;  %vm1785_vm9 = vcmask 1041408   ;;  %vm1786_vm10 = vcmask 1045508  }
  0x12   :  { %v13007_v16 = vld [vmem:[#allocation7] ss:$0 sm:$0xff]  ;;  %v12340_v18 = vld [vmem:[%s16273_s3 + $0x58] sm:$0xff]  ;;  %v12338_v24 = vld [vmem:[%s16273_s3 + $0x48] sm:$0xff] }
  0x13   :  { %617 = vmatpush.bf16.msra.mxu0 %v609_v6  ;;  %12805 = vmatpush.bf16.msra.mxu3 %v609_v6  ;;  %v12339_v22 = vld [vmem:[%s16273_s3 + $0x50] sm:$0xff]  ;;  %v12337_v28 = vld [vmem:[%s16273_s3 + $0x40] sm:$0xff]  ;;  %v12274_v30 = vld [vmem:[%s16270_s0 + $0x48] sm:$0xff] }
  0x14   :  { %1341 = vmatpush.bf16.msra.mxu1 %v12340_v18  ;;  %12807 = vmatpush.bf16.msra.mxu2 %v12340_v18  ;;  %v12336_v31 = vld [vmem:[%s16273_s3 + $0x38] sm:$0xff]  ;;  %v12335_v35 = vld [vmem:[%s16273_s3 + $0x30] sm:$0xff]  ;;  %v12354_v42 = vld [vmem:[%s16273_s3 + $0x88] sm:$0xff] }
  0x15   :  { %v12275_v41 = vld [vmem:[%s16270_s0 + $0x50] sm:$0xff]  ;;  %v12353_v46 = vld [vmem:[%s16273_s3 + $0x80] sm:$0xff]  ;;  %v12316_v48 = vld [vmem:[%s16270_s0 + $0x198] sm:$0xff] }
  0x16   :  { %v12352_v49 = vld [vmem:[%s16273_s3 + $0x78] sm:$0xff]  ;;  %v12351_v53 = vld [vmem:[%s16273_s3 + $0x70] sm:$0xff]  ;;  %v12350_v56 = vld [vmem:[%s16273_s3 + $0x68] sm:$0xff] }
  0x17   :  { %618 = vmatpush.bf16.msra.mxu0 %v12317_v7  ;;  %12806 = vmatpush.bf16.msra.mxu3 %v12317_v7  ;;  %v12276_v55 = vld [vmem:[%s16270_s0 + $0x58] sm:$0xff]  ;;  %v12349_v60 = vld [vmem:[%s16273_s3 + $0x60] sm:$0xff]  ;;  %vm13816_vm11 = vmor %vm1785_vm9, %vm1786_vm10 }
  0x18   :  { %1342 = vmatpush.bf16.msra.mxu1 %v12339_v22  ;;  %12808 = vmatpush.bf16.msra.mxu2 %v12339_v22  ;;  %v12277_v3 = vld [vmem:[%s16270_s0 + $0x60] sm:$0xff]  ;;  %v12376_v5 = vld [vmem:[%s16273_s3 + $0x58] sm:$0xff] }
  0x1a   :  { %9513 = vmatmul.msk.bf16.vlgmr.msra.gmra.mxu0 %vm447_vm2, %v12265_v8  ;;  %9564 = vmatmul.msk.bf16.vlgmr.msra.gmra.mxu3 %vm447_vm2, %v12316_v48 }
  0x1b   :  { %1620 = vmatpush.bf16.msrb.mxu3 %v12354_v42 }
  0x1c   :  { %1343 = vmatpush.bf16.msra.mxu1 %v12338_v24  ;;  %12809 = vmatpush.bf16.msra.mxu2 %v12338_v24 }
  0x1f   :  { %1621 = vmatpush.bf16.msrb.mxu3 %v12353_v46 }
  0x20   :  { %1344 = vmatpush.bf16.msra.mxu1 %v12337_v28  ;;  %12810 = vmatpush.bf16.msra.mxu2 %v12337_v28  ;;  %v12279_v28 = vld [vmem:[%s16270_s0 + $0x70] sm:$0xff] }
  0x23   :  { %1622 = vmatpush.bf16.msrb.mxu3 %v12352_v49 }
  0x24   :  { %1345 = vmatpush.bf16.msra.mxu1 %v12336_v31  ;;  %12811 = vmatpush.bf16.msra.mxu2 %v12336_v31 }
  0x27   :  { %1623 = vmatpush.bf16.msrb.mxu3 %v12351_v53  ;;  %v12372_v53 = vld [vmem:[%s16273_s3 + $0x38] sm:$0xff] }
  0x28   :  { %1346 = vmatpush.bf16.msra.mxu1 %v12335_v35  ;;  %12812 = vmatpush.bf16.msra.mxu2 %v12335_v35 }
  0x2a   :  { %9514 = vmatmul.msk.bf16.gmra.mxu0 %vm447_vm2, %v12266_v9 }
  0x2b   :  { %1624 = vmatpush.bf16.msrb.mxu3 %v12350_v56 }
  0x2c   :  { %1943 = vmatpush.bf16.msrb.mxu1 %v12376_v5 }
  0x2f   :  { %1625 = vmatpush.bf16.msrb.mxu3 %v12349_v60 }
  0x3a   :  { %9515 = vmatmul.msk.bf16.gmra.mxu0 %vm447_vm2, %v12267_v10 }
  0x4a   :  { %9516 = vmatmul.msk.bf16.gmra.mxu0 %vm447_vm2, %v12268_v11 }
  0x5a   :  { %9517 = vmatmul.msk.bf16.gmra.mxu0 %vm447_vm2, %v12269_v12 }
  0x6a   :  { %9518 = vmatmul.msk.bf16.gmra.mxu0 %vm447_vm2, %v12270_v13 }
  0x7a   :  { %9519 = vmatmul.msk.bf16.gmra.mxu0 %vm447_vm2, %v12271_v14 }
  0x8a   :  { %9520 = vmatmul.msk.bf16.gmra.mxu0 %vm447_vm2, %v12272_v15  ;;  %v12278_v15 = vld [vmem:[%s16270_s0 + $0x68] sm:$0xff] }
  0x97   :  { %v620_v19 = vpop.f32.mrf.mxu0 }
  0x98   :  { %v621_v20 = vadd.f32 %v13007_v16, %v620_v19 }
  0x9a   :  { %v880_v21 = vmax.f32 %v621_v20, 0.0  ;;  %9521 = vmatmul.msk.bf16.gmra.mxu0 %vm447_vm2, %v12273_v17  ;;  %v12375_v17 = vld [vmem:[%s16273_s3 + $0x50] sm:$0xff] }
  0x9b   :  { %1944 = vmatpush.bf16.msrb.mxu1 %v12375_v17 }
  0x9c   :  { %v984_v23 = vpack.c.bf16 %v880_v21, %v880_v21 }
  0x9e   :  { %1089 = vst.msk [vmem:[#allocation2] sm:$0xf] %vm1088_vm3, %v984_v23 }
  0x9f   :  { %v622_v25 = vpop.f32.mrf.mxu0 }
  0xa0   :  { %v623_v26 = vadd.f32 %v13007_v16, %v622_v25 }
  0xa2   :  { %v881_v27 = vmax.f32 %v623_v26, 0.0 }
  0xa4   :  { %v985_v29 = vpack.c.bf16 %v881_v27, %v881_v27 }
  0xa6   :  { %1090 = vst.msk [vmem:[#allocation2 + $0x4] sm:$0xf] %vm1088_vm3, %v985_v29  ;;  %v12374_v29 = vld [vmem:[%s16273_s3 + $0x48] sm:$0xff] }
  0xa7   :  { %v625_v32 = vpop.f32.mrf.mxu0  ;;  %1945 = vmatpush.bf16.msrb.mxu1 %v12374_v29  ;;  %v12389_v29 = vld [vmem:[%s16273_s3 + $0x80] sm:$0xff] }
  0xa8   :  { %v626_v33 = vadd.f32 %v13007_v16, %v625_v32 }
  0xaa   :  { %v882_v34 = vmax.f32 %v626_v33, 0.0  ;;  %9522 = vmatmul.msk.bf16.gmra.mxu0 %vm447_vm2, %v12274_v30 }
  0xac   :  { %v986_v36 = vpack.c.bf16 %v882_v34, %v882_v34 }
  0xae   :  { %1091 = vst.msk [vmem:[#allocation2 + $0x8] sm:$0xf] %vm1088_vm3, %v986_v36 }
  0xaf   :  { %v627_v37 = vpop.f32.mrf.mxu0 }
  0xb0   :  { %v628_v38 = vadd.f32 %v13007_v16, %v627_v37 }
  0xb2   :  { %v883_v39 = vmax.f32 %v628_v38, 0.0 }
  0xb4   :  { %v987_v40 = vpack.c.bf16 %v883_v39, %v883_v39 }
  0xb6   :  { %1092 = vst.msk [vmem:[#allocation2 + $0xc] sm:$0xf] %vm1088_vm3, %v987_v40  ;;  %v12280_v40 = vld [vmem:[%s16270_s0 + $0x78] sm:$0xff] }
  0xb7   :  { %v630_v43 = vpop.f32.mrf.mxu0 }
  0xb8   :  { %v631_v44 = vadd.f32 %v13007_v16, %v630_v43 }
  0xba   :  { %v884_v45 = vmax.f32 %v631_v44, 0.0  ;;  %9523 = vmatmul.msk.bf16.gmra.mxu0 %vm447_vm2, %v12275_v41  ;;  %v12373_v41 = vld [vmem:[%s16273_s3 + $0x40] sm:$0xff] }
  0xbb   :  { %1946 = vmatpush.bf16.msrb.mxu1 %v12373_v41  ;;  %v12284_v41 = vld [vmem:[%s16270_s0 + $0x98] sm:$0xff] }
  0xbc   :  { %v988_v47 = vpack.c.bf16 %v884_v45, %v884_v45 }
  0xbe   :  { %1093 = vst.msk [vmem:[#allocation2 + $0x10] sm:$0xf] %vm1088_vm3, %v988_v47 }
  0xbf   :  { %v632_v50 = vpop.f32.mrf.mxu0  ;;  %1947 = vmatpush.bf16.msrb.mxu1 %v12372_v53  ;;  %v12319_v53 = vld [vmem:[#allocation2] sm:$0xff] }
  0xc0   :  { %v633_v51 = vadd.f32 %v13007_v16, %v632_v50 }
  0xc2   :  { %v885_v52 = vmax.f32 %v633_v51, 0.0 }
  0xc4   :  { %v989_v54 = vpack.c.bf16 %v885_v52, %v885_v52  ;;  %v12281_v52 = vld [vmem:[%s16270_s0 + $0x80] sm:$0xff] }
  0xc6   :  { %1094 = vst.msk [vmem:[#allocation2 + $0x14] sm:$0xf] %vm1088_vm3, %v989_v54  ;;  %v12332_v54 = vld [vmem:[%s16273_s3 + $0x28] sm:$0xff] }
  0xc7   :  { %v635_v57 = vpop.f32.mrf.mxu0  ;;  %1442 = vmatpush.bf16.msrb.mxu2 %v12332_v54 }
  0xc8   :  { %v636_v58 = vadd.f32 %v13007_v16, %v635_v57 }
  0xca   :  { %v886_v59 = vmax.f32 %v636_v58, 0.0  ;;  %9524 = vmatmul.msk.bf16.gmra.mxu0 %vm447_vm2, %v12276_v55  ;;  %v12331_v58 = vld [vmem:[%s16273_s3 + $0x20] sm:$0xff] }
  0xcb   :  { %1443 = vmatpush.bf16.msrb.mxu2 %v12331_v58 }
  0xcc   :  { %v990_v61 = vpack.c.bf16 %v886_v59, %v886_v59 }
  0xcd   :  { %v13078_v62 = vld [vmem:[#allocation2 + $0x10] sm:$0xff] }
  0xce   :  { %1095 = vst.msk [vmem:[#allocation2 + $0x18] sm:$0xf] %vm1088_vm3, %v990_v61  ;;  %9633 = vmatmul.msk.bf16.vlgmr.msra.gmra.mxu1 %vm1314_vm4, %v13078_v62 }
  0xcf   :  { %v637_v63 = vpop.f32.mrf.mxu0 }
  0xd0   :  { %v638_v0 = vadd.f32 %v13007_v16, %v637_v63  ;;  %v12330_v63 = vld [vmem:[%s16273_s3 + $0x18] sm:$0xff] }
  0xd1   :  { %1444 = vmatpush.bf16.msrb.mxu2 %v12330_v63 }
  0xd2   :  { %v887_v1 = vmax.f32 %v638_v0, 0.0 }
  0xd4   :  { %v991_v2 = vpack.c.bf16 %v887_v1, %v887_v1 }
  0xd6   :  { %1096 = vst.msk [vmem:[#allocation2 + $0x1c] sm:$0xf] %vm1088_vm3, %v991_v2 }
  0xd7   :  { %v640_v6 = vpop.f32.mrf.mxu0 }
  0xd8   :  { %v641_v7 = vadd.f32 %v13007_v16, %v640_v6  ;;  %v12282_v6 = vld [vmem:[%s16270_s0 + $0x88] sm:$0xff] }
  0xda   :  { %v888_v8 = vmax.f32 %v641_v7, 0.0  ;;  %9525 = vmatmul.msk.bf16.gmra.mxu0 %vm447_vm2, %v12277_v3  ;;  %v12329_v3 = vld [vmem:[%s16273_s3 + $0x10] sm:$0xff] }
  0xdb   :  { %1445 = vmatpush.bf16.msrb.mxu2 %v12329_v3  ;;  %v12371_v7 = vld [vmem:[%s16273_s3 + $0x30] sm:$0xff]  ;;  %v12624_v3 = vld [vmem:[%s16273_s3 + $0x88] sm:$0xff] }
  0xdc   :  { %v992_v9 = vpack.c.bf16 %v888_v8, %v888_v8  ;;  %v12328_v8 = vld [vmem:[%s16273_s3 + $0x8] sm:$0xff]  ;;  %1948 = vmatpush.bf16.msrb.mxu1 %v12371_v7  ;;  %6240 = vmatpush.bf16.msrb.mxu0 %v12624_v3 }
  0xdd   :  { %v13093_v10 = vld [vmem:[#allocation2 + $0x18] sm:$0xff] }
  0xde   :  { %1097 = vst.msk [vmem:[#allocation2 + $0x20] sm:$0xf] %vm1088_vm3, %v992_v9  ;;  %9634 = vmatmul.msk.bf16.gmra.mxu1 %vm1314_vm4, %v13093_v10 }
  0xdf   :  { %v642_v11 = vpop.f32.mrf.mxu0  ;;  %1446 = vmatpush.bf16.msrb.mxu2 %v12328_v8 }
  0xe0   :  { %v643_v12 = vadd.f32 %v13007_v16, %v642_v11 }
  0xe2   :  { %v889_v13 = vmax.f32 %v643_v12, 0.0 }
  0xe4   :  { %v993_v14 = vpack.c.bf16 %v889_v13, %v889_v13  ;;  %v12327_v13 = vld [vmem:[%s16273_s3] sm:$0xff] }
  0xe5   :  { %1447 = vmatpush.bf16.msrb.mxu2 %v12327_v13 }
  0xe6   :  { %1098 = vst.msk [vmem:[#allocation2 + $0x24] sm:$0xf] %vm1088_vm3, %v993_v14 }
  0xe7   :  { %v645_v18 = vpop.f32.mrf.mxu0 }
  0xe8   :  { %v646_v19 = vadd.f32 %v13007_v16, %v645_v18 }
  0xea   :  { %v890_v20 = vmax.f32 %v646_v19, 0.0  ;;  %9526 = vmatmul.msk.bf16.gmra.mxu0 %vm447_vm2, %v12278_v15 }
  0xec   :  { %v994_v21 = vpack.c.bf16 %v890_v20, %v890_v20 }
  0xed   :  { %v13108_v22 = vld [vmem:[#allocation2 + $0x20] sm:$0xff] }
  0xee   :  { %v12341_v23 = vld [vmem:[#allocation2 + $0x20] sm:$0xff]  ;;  %1099 = vst.msk [vmem:[#allocation2 + $0x28] sm:$0xf] %vm1088_vm3, %v994_v21  ;;  %9635 = vmatmul.msk.bf16.gmra.mxu1 %vm1314_vm4, %v13108_v22 }
  0xef   :  { %v647_v24 = vpop.f32.mrf.mxu0  ;;  %9749 = vmatmul.msk.bf16.vlgmr.msrb.gmra.mxu3 %vm1314_vm4, %v12341_v23  ;;  %v12283_v23 = vld [vmem:[%s16270_s0 + $0x90] sm:$0xff] }
  0xf0   :  { %v648_v25 = vadd.f32 %v13007_v16, %v647_v24  ;;  %v12412_v24 = vld [vmem:[%s16273_s3 + $0x58] sm:$0xff] }
  0xf1   :  { %2522 = vmatpush.bf16.msra.mxu1 %v12412_v24 }
  0xf2   :  { %v891_v26 = vmax.f32 %v648_v25, 0.0 }
  0xf4   :  { %v995_v27 = vpack.c.bf16 %v891_v26, %v891_v26  ;;  %v12390_v26 = vld [vmem:[%s16273_s3 + $0x88] sm:$0xff] }
  0xf5   :  { %2221 = vmatpush.bf16.msra.mxu3 %v12390_v26 }
  0xf6   :  { %1100 = vst.msk [vmem:[#allocation2 + $0x2c] sm:$0xf] %vm1088_vm3, %v995_v27 }
  0xf7   :  { %v650_v30 = vpop.f32.mrf.mxu0 }
  0xf8   :  { %v651_v31 = vadd.f32 %v13007_v16, %v650_v30 }
  0xf9   :  { %2222 = vmatpush.bf16.msra.mxu3 %v12389_v29 }
  0xfa   :  { %v892_v32 = vmax.f32 %v651_v31, 0.0  ;;  %9527 = vmatmul.msk.bf16.gmra.mxu0 %vm447_vm2, %v12279_v28 }
  0xfc   :  { %v996_v33 = vpack.c.bf16 %v892_v32, %v892_v32 }
  0xfd   :  { %v13124_v34 = vld [vmem:[#allocation2 + $0x28] sm:$0xff] }
  0xfe   :  { %v12342_v35 = vld [vmem:[#allocation2 + $0x28] sm:$0xff]  ;;  %1101 = vst.msk [vmem:[#allocation2 + $0x30] sm:$0xf] %vm1088_vm3, %v996_v33  ;;  %9636 = vmatmul.msk.bf16.gmra.mxu1 %vm1314_vm4, %v13124_v34 }
  0xff   :  { %v652_v36 = vpop.f32.mrf.mxu0  ;;  %9750 = vmatmul.msk.bf16.gmra.mxu3 %vm1314_vm4, %v12342_v35  ;;  %v12388_v35 = vld [vmem:[%s16273_s3 + $0x78] sm:$0xff] }
 0x100   :  { %v653_v37 = vadd.f32 %v13007_v16, %v652_v36  ;;  %2223 = vmatpush.bf16.msra.mxu3 %v12388_v35 }
 0x102   :  { %v893_v38 = vmax.f32 %v653_v37, 0.0 }
 0x104   :  { %v997_v39 = vpack.c.bf16 %v893_v38, %v893_v38  ;;  %v875_v38 = vpop.f32.mrf.mxu3 }
 0x106   :  { %1102 = vst.msk [vmem:[#allocation2 + $0x34] sm:$0xf] %vm1088_vm3, %v997_v39  ;;  %v12387_v39 = vld [vmem:[%s16273_s3 + $0x70] sm:$0xff] }
 0x107   :  { %v655_v42 = vpop.f32.mrf.mxu0  ;;  %2224 = vmatpush.bf16.msra.mxu3 %v12387_v39 }
 0x108   :  { %v656_v43 = vadd.f32 %v13007_v16, %v655_v42  ;;  %v876_v42 = vadd.f32 %v13007_v16, %v875_v38 }
 0x10a   :  { %v894_v44 = vmax.f32 %v656_v43, 0.0  ;;  %9528 = vmatmul.msk.bf16.gmra.mxu0 %vm447_vm2, %v12280_v40  ;;  %v12411_v43 = vld [vmem:[%s16273_s3 + $0x50] sm:$0xff] }
 0x10b   :  { %2523 = vmatpush.bf16.msra.mxu1 %v12411_v43 }
 0x10c   :  { %v998_v45 = vpack.c.bf16 %v894_v44, %v894_v44 }
 0x10d   :  { %v13140_v46 = vld [vmem:[#allocation2 + $0x30] sm:$0xff] }
 0x10e   :  { %v12343_v47 = vld [vmem:[#allocation2 + $0x30] sm:$0xff]  ;;  %1103 = vst.msk [vmem:[#allocation2 + $0x38] sm:$0xf] %vm1088_vm3, %v998_v45  ;;  %9637 = vmatmul.msk.bf16.gmra.mxu1 %vm1314_vm4, %v13140_v46  ;;  %v12386_v45 = vld [vmem:[%s16273_s3 + $0x68] sm:$0xff] }
 0x10f   :  { %v657_v48 = vpop.f32.mrf.mxu0  ;;  %9751 = vmatmul.msk.bf16.gmra.mxu3 %vm1314_vm4, %v12343_v47 }
 0x110   :  { %v658_v49 = vadd.f32 %v13007_v16, %v657_v48  ;;  %v982_v48 = vmax.f32 %v876_v42, 0.0  ;;  %2225 = vmatpush.bf16.msra.mxu3 %v12386_v45  ;;  %v12368_v45 = vld [vmem:[%s16273_s3 + $0x28] sm:$0xff] }
 0x112   :  { %v895_v50 = vmax.f32 %v658_v49, 0.0 }
 0x114   :  { %v999_v51 = vpack.c.bf16 %v895_v50, %v895_v50  ;;  %v1086_v50 = vpack.c.bf16 %v982_v48, %v982_v48 }
 0x116   :  { %1104 = vst.msk [vmem:[#allocation2 + $0x3c] sm:$0xf] %vm1088_vm3, %v999_v51  ;;  %v12385_v51 = vld [vmem:[%s16273_s3 + $0x60] sm:$0xff] }
 0x117   :  { %v660_v55 = vpop.f32.mrf.mxu0  ;;  %1191 = vst.msk [vmem:[#allocation2 + $0x198] sm:$0xf] %vm1088_vm3, %v1086_v50  ;;  %2226 = vmatpush.bf16.msra.mxu3 %v12385_v51 }
 0x118   :  { %v661_v56 = vadd.f32 %v13007_v16, %v660_v55 }
 0x11a   :  { %v896_v57 = vmax.f32 %v661_v56, 0.0  ;;  %9529 = vmatmul.msk.bf16.gmra.mxu0 %vm447_vm2, %v12281_v52  ;;  %v877_v56 = vpop.f32.mrf.mxu3 }
 0x11c   :  { %v1000_v59 = vpack.c.bf16 %v896_v57, %v896_v57  ;;  %v878_v57 = vadd.f32 %v13007_v16, %v877_v56 }
 0x11d   :  { %v13162_v60 = vld [vmem:[#allocation2 + $0x38] sm:$0xff] }
 0x11e   :  { %v12344_v61 = vld [vmem:[#allocation2 + $0x38] sm:$0xff]  ;;  %1105 = vst.msk [vmem:[#allocation2 + $0x40] sm:$0xf] %vm1088_vm3, %v1000_v59  ;;  %9638 = vmatmul.msk.bf16.gmra.mxu1 %vm1314_vm4, %v13162_v60 }
 0x11f   :  { %v662_v0 = vpop.f32.mrf.mxu0  ;;  %9752 = vmatmul.msk.bf16.gmra.mxu3 %vm1314_vm4, %v12344_v61  ;;  %v983_v61 = vmax.f32 %v878_v57, 0.0 }
 0x120   :  { %v663_v1 = vadd.f32 %v13007_v16, %v662_v0 }
 0x121   :  { %v1087_v0 = vpack.c.bf16 %v983_v61, %v983_v61 }
 0x122   :  { %v897_v2 = vmax.f32 %v663_v1, 0.0 }
 0x123   :  { %1192 = vst.msk [vmem:[#allocation2 + $0x19c] sm:$0xf] %vm1088_vm3, %v1087_v0 }
 0x124   :  { %v1001_v5 = vpack.c.bf16 %v897_v2, %v897_v2  ;;  %v12285_v2 = vld [vmem:[%s16270_s0 + $0xa0] sm:$0xff] }
 0x126   :  { %1106 = vst.msk [vmem:[#allocation2 + $0x44] sm:$0xf] %vm1088_vm3, %v1001_v5 }
 0x127   :  { %v665_v9 = vpop.f32.mrf.mxu0 }
 0x128   :  { %v666_v11 = vadd.f32 %v13007_v16, %v665_v9 }
 0x12a   :  { %v898_v12 = vmax.f32 %v666_v11, 0.0  ;;  %9530 = vmatmul.msk.bf16.gmra.mxu0 %vm447_vm2, %v12282_v6  ;;  %v12320_v11 = vld [vmem:[#allocation2 + $0x8] sm:$0xff] }
 0x12c   :  { %v1002_v14 = vpack.c.bf16 %v898_v12, %v898_v12 }
 0x12d   :  { %v12333_v15 = vld [vmem:[#allocation2 + $0x40] sm:$0xff] }
 0x12e   :  { %v12345_v17 = vld [vmem:[#allocation2 + $0x40] sm:$0xff]  ;;  %1107 = vst.msk [vmem:[#allocation2 + $0x48] sm:$0xf] %vm1088_vm3, %v1002_v14  ;;  %9639 = vmatmul.msk.bf16.vlgmr.msra.gmra.mxu2 %vm1314_vm4, %v12333_v15  ;;  %v12410_v14 = vld [vmem:[%s16273_s3 + $0x48] sm:$0xff] }
 0x12f   :  { %v667_v18 = vpop.f32.mrf.mxu0  ;;  %9753 = vmatmul.msk.bf16.gmra.mxu3 %vm1314_vm4, %v12345_v17  ;;  %2524 = vmatpush.bf16.msra.mxu1 %v12410_v14 }
 0x130   :  { %v668_v19 = vadd.f32 %v13007_v16, %v667_v18  ;;  %2044 = vmatpush.bf16.msra.mxu2 %v12368_v45 }
 0x132   :  { %v899_v20 = vmax.f32 %v668_v19, 0.0 }
 0x134   :  { %v1003_v21 = vpack.c.bf16 %v899_v20, %v899_v20 }
 0x136   :  { %1108 = vst.msk [vmem:[#allocation2 + $0x4c] sm:$0xf] %vm1088_vm3, %v1003_v21  ;;  %v12286_v21 = vld [vmem:[%s16270_s0 + $0xa8] sm:$0xff] }
 0x137   :  { %v670_v25 = vpop.f32.mrf.mxu0 }
 0x138   :  { %v671_v27 = vadd.f32 %v13007_v16, %v670_v25 }
 0x13a   :  { %v900_v28 = vmax.f32 %v671_v27, 0.0  ;;  %9531 = vmatmul.msk.bf16.gmra.mxu0 %vm447_vm2, %v12283_v23 }
 0x13c   :  { %v1004_v30 = vpack.c.bf16 %v900_v28, %v900_v28 }
 0x13d   :  { %v12334_v31 = vld [vmem:[#allocation2 + $0x48] sm:$0xff] }
 0x13e   :  { %v12346_v32 = vld [vmem:[#allocation2 + $0x48] sm:$0xff]  ;;  %1109 = vst.msk [vmem:[#allocation2 + $0x50] sm:$0xf] %vm1088_vm3, %v1004_v30  ;;  %9640 = vmatmul.msk.bf16.gmra.mxu2 %vm1314_vm4, %v12334_v31 }
 0x13f   :  { %v672_v33 = vpop.f32.mrf.mxu0  ;;  %9754 = vmatmul.msk.bf16.gmra.mxu3 %vm1314_vm4, %v12346_v32 }
 0x140   :  { %v673_v36 = vadd.f32 %v13007_v16, %v672_v33 }
 0x142   :  { %v901_v37 = vmax.f32 %v673_v36, 0.0 }
 0x144   :  { %v1005_v40 = vpack.c.bf16 %v901_v37, %v901_v37  ;;  %v12287_v37 = vld [vmem:[%s16270_s0 + $0xb0] sm:$0xff] }
 0x146   :  { %1110 = vst.msk [vmem:[#allocation2 + $0x54] sm:$0xf] %vm1088_vm3, %v1005_v40 }
 0x147   :  { %v675_v44 = vpop.f32.mrf.mxu0 }
 0x148   :  { %v676_v47 = vadd.f32 %v13007_v16, %v675_v44 }
 0x14a   :  { %v902_v49 = vmax.f32 %v676_v47, 0.0  ;;  %9532 = vmatmul.msk.bf16.gmra.mxu0 %vm447_vm2, %v12284_v41 }
 0x14b   :  { %v13253_v5 = vpop.f32.mrf.mxu1 }
 0x14c   :  { %v1006_v52 = vpack.c.bf16 %v902_v49, %v902_v49 }
 0x14d   :  { %v12347_v54 = vld [vmem:[#allocation2 + $0x50] sm:$0xff] }
 0x14e   :  { %v13236_v55 = vld [vmem:[#allocation2 + $0x50] sm:$0xff]  ;;  %1111 = vst.msk [vmem:[#allocation2 + $0x58] sm:$0xf] %vm1088_vm3, %v1006_v52  ;;  %9673 = vmatmul.msk.bf16.vlgmr.msrb.gmra.mxu2 %vm1314_vm4, %v12319_v53  ;;  %v12288_v53 = vld [vmem:[%s16270_s0 + $0xb8] sm:$0xff] }
 0x14f   :  { %v677_v58 = vpop.f32.mrf.mxu0  ;;  %9755 = vmatmul.msk.bf16.gmra.mxu3 %vm1314_vm4, %v12347_v54  ;;  %9825 = vmatmul.msk.bf16.vlgmr.msrb.gmra.mxu1 %vm1314_vm4, %v13236_v55 }
 0x150   :  { %v678_v59 = vadd.f32 %v13007_v16, %v677_v58 }
 0x152   :  { %v903_v63 = vmax.f32 %v678_v59, 0.0 }
 0x153   :  { %v13268_v18 = vpop.f32.mrf.mxu1 }
 0x154   :  { %v1007_v1 = vpack.c.bf16 %v903_v63, %v903_v63 }
 0x156   :  { %1112 = vst.msk [vmem:[#allocation2 + $0x5c] sm:$0xf] %vm1088_vm3, %v1007_v1 }
 0x157   :  { %v680_v6 = vpop.f32.mrf.mxu0 }
 0x158   :  { %v681_v7 = vadd.f32 %v13007_v16, %v680_v6 }
 0x15a   :  { %v904_v8 = vmax.f32 %v681_v7, 0.0  ;;  %9533 = vmatmul.msk.bf16.gmra.mxu0 %vm447_vm2, %v12285_v2 }
 0x15b   :  { %v13276_v26 = vpop.f32.mrf.mxu1 }
 0x15c   :  { %v1008_v9 = vpack.c.bf16 %v904_v8, %v904_v8 }
 0x15d   :  { %v12348_v12 = vld [vmem:[#allocation2 + $0x58] sm:$0xff] }
 0x15e   :  { %v13257_v13 = vld [vmem:[#allocation2 + $0x58] sm:$0xff]  ;;  %1113 = vst.msk [vmem:[#allocation2 + $0x60] sm:$0xf] %vm1088_vm3, %v1008_v9  ;;  %9674 = vmatmul.msk.bf16.gmra.mxu2 %vm1314_vm4, %v12320_v11  ;;  %v12289_v9 = vld [vmem:[%s16270_s0 + $0xc0] sm:$0xff] }
 0x15f   :  { %v682_v15 = vpop.f32.mrf.mxu0  ;;  %9756 = vmatmul.msk.bf16.gmra.mxu3 %vm1314_vm4, %v12348_v12  ;;  %9826 = vmatmul.msk.bf16.gmra.mxu1 %vm1314_vm4, %v13257_v13 }
 0x160   :  { %v683_v17 = vadd.f32 %v13007_v16, %v682_v15 }
 0x162   :  { %v905_v19 = vmax.f32 %v683_v17, 0.0 }
 0x163   :  { %v13289_v36 = vpop.f32.mrf.mxu1 }
 0x164   :  { %v1009_v20 = vpack.c.bf16 %v905_v19, %v905_v19 }
 0x166   :  { %1114 = vst.msk [vmem:[#allocation2 + $0x64] sm:$0xf] %vm1088_vm3, %v1009_v20 }
 0x167   :  { %v685_v23 = vpop.f32.mrf.mxu0 }
 0x168   :  { %v686_v24 = vadd.f32 %v13007_v16, %v685_v23  ;;  %v12407_v23 = vld [vmem:[%s16273_s3 + $0x30] sm:$0xff] }
 0x16a   :  { %v906_v25 = vmax.f32 %v686_v24, 0.0  ;;  %9534 = vmatmul.msk.bf16.gmra.mxu0 %vm447_vm2, %v12286_v21 }
 0x16b   :  { %v13308_v47 = vpop.f32.mrf.mxu1 }
 0x16c   :  { %v1010_v27 = vpack.c.bf16 %v906_v25, %v906_v25  ;;  %v12366_v25 = vld [vmem:[%s16273_s3 + $0x18] sm:$0xff] }
 0x16d   :  { %v13278_v28 = vld [vmem:[#allocation2 + $0x60] sm:$0xff] }
 0x16e   :  { %v12377_v29 = vld [vmem:[#allocation2 + $0x60] sm:$0xff]  ;;  %1115 = vst.msk [vmem:[#allocation2 + $0x68] sm:$0xf] %vm1088_vm3, %v1010_v27  ;;  %9675 = vmatmul.msk.bf16.gmra.mxu2 %vm1314_vm4, %v13078_v62 }
 0x16f   :  { %v687_v30 = vpop.f32.mrf.mxu0  ;;  %9941 = vmatmul.msk.bf16.vlgmr.msra.gmra.mxu3 %vm1314_vm4, %v12377_v29  ;;  %9827 = vmatmul.msk.bf16.gmra.mxu1 %vm1314_vm4, %v13278_v28  ;;  %v12409_v62 = vld [vmem:[%s16273_s3 + $0x40] sm:$0xff] }
 0x170   :  { %v688_v31 = vadd.f32 %v13007_v16, %v687_v30  ;;  %2525 = vmatpush.bf16.msra.mxu1 %v12409_v62  ;;  %v12364_v62 = vld [vmem:[%s16273_s3 + $0x8] sm:$0xff] }
 0x172   :  { %v907_v32 = vmax.f32 %v688_v31, 0.0  ;;  %v13287_v33 = vpop.f32.mrf.mxu3 }
 0x173   :  { %v13326_v57 = vpop.f32.mrf.mxu1 }
 0x174   :  { %v1011_v35 = vpack.c.bf16 %v907_v32, %v907_v32  ;;  %v12290_v32 = vld [vmem:[%s16270_s0 + $0xc8] sm:$0xff] }
 0x176   :  { %1116 = vst.msk [vmem:[#allocation2 + $0x6c] sm:$0xf] %vm1088_vm3, %v1011_v35 }
 0x177   :  { %v690_v38 = vpop.f32.mrf.mxu0 }
 0x178   :  { %v691_v39 = vadd.f32 %v13007_v16, %v690_v38 }
 0x17a   :  { %v908_v40 = vmax.f32 %v691_v39, 0.0  ;;  %9535 = vmatmul.msk.bf16.gmra.mxu0 %vm447_vm2, %v12287_v37  ;;  %v13300_v41 = vpop.f32.mrf.mxu3 }
 0x17b   :  { %v13342_v7 = vpop.f32.mrf.mxu1 }
 0x17c   :  { %v1012_v42 = vpack.c.bf16 %v908_v40, %v908_v40 }
 0x17d   :  { %v13302_v43 = vld [vmem:[#allocation2 + $0x68] sm:$0xff] }
 0x17e   :  { %v12378_v44 = vld [vmem:[#allocation2 + $0x68] sm:$0xff]  ;;  %1117 = vst.msk [vmem:[#allocation2 + $0x70] sm:$0xf] %vm1088_vm3, %v1012_v42  ;;  %9676 = vmatmul.msk.bf16.gmra.mxu2 %vm1314_vm4, %v13093_v10  ;;  %v12408_v10 = vld [vmem:[%s16273_s3 + $0x38] sm:$0xff]  ;;  %v12363_v42 = vld [vmem:[%s16273_s3] sm:$0xff] }
 0x17f   :  { %v692_v48 = vpop.f32.mrf.mxu0  ;;  %9942 = vmatmul.msk.bf16.gmra.mxu3 %vm1314_vm4, %v12378_v44  ;;  %9828 = vmatmul.msk.bf16.gmra.mxu1 %vm1314_vm4, %v13302_v43 }
 0x180   :  { %v693_v49 = vadd.f32 %v13007_v16, %v692_v48  ;;  %2526 = vmatpush.bf16.msra.mxu1 %v12408_v10 }
 0x182   :  { %v909_v50 = vmax.f32 %v693_v49, 0.0  ;;  %v13316_v51 = vpop.f32.mrf.mxu3 }
 0x183   :  { %v13355_v19 = vpop.f32.mrf.mxu1 }
 0x184   :  { %v1013_v52 = vpack.c.bf16 %v909_v50, %v909_v50  ;;  %2527 = vmatpush.bf16.msra.mxu1 %v12407_v23 }
 0x186   :  { %1118 = vst.msk [vmem:[#allocation2 + $0x74] sm:$0xf] %vm1088_vm3, %v1013_v52 }
 0x187   :  { %v695_v54 = vpop.f32.mrf.mxu0 }
 0x188   :  { %v696_v56 = vadd.f32 %v13007_v16, %v695_v54 }
 0x18a   :  { %v910_v58 = vmax.f32 %v696_v56, 0.0  ;;  %9536 = vmatmul.msk.bf16.gmra.mxu0 %vm447_vm2, %v12288_v53  ;;  %v13329_v59 = vpop.f32.mrf.mxu3 }
 0x18b   :  { %v13381_v35 = vpop.f32.mrf.mxu1 }
 0x18c   :  { %v1014_v61 = vpack.c.bf16 %v910_v58, %v910_v58  ;;  %v12448_v58 = vld [vmem:[%s16273_s3 + $0x58] sm:$0xff] }
 0x18d   :  { %v13331_v63 = vld [vmem:[#allocation2 + $0x70] sm:$0xff]  ;;  %3101 = vmatpush.bf16.msrb.mxu1 %v12448_v58 }
 0x18e   :  { %v12379_v0 = vld [vmem:[#allocation2 + $0x70] sm:$0xff]  ;;  %1119 = vst.msk [vmem:[#allocation2 + $0x78] sm:$0xf] %vm1088_vm3, %v1014_v61  ;;  %9677 = vmatmul.msk.bf16.gmra.mxu2 %vm1314_vm4, %v13108_v22  ;;  %v12367_v22 = vld [vmem:[%s16273_s3 + $0x20] sm:$0xff] }
 0x18f   :  { %v697_v1 = vpop.f32.mrf.mxu0  ;;  %9943 = vmatmul.msk.bf16.gmra.mxu3 %vm1314_vm4, %v12379_v0  ;;  %9829 = vmatmul.msk.bf16.gmra.mxu1 %vm1314_vm4, %v13331_v63  ;;  %v12426_v0 = vld [vmem:[%s16273_s3 + $0x88] sm:$0xff] }
 0x190   :  { %v698_v2 = vadd.f32 %v13007_v16, %v697_v1  ;;  %2045 = vmatpush.bf16.msra.mxu2 %v12367_v22  ;;  %2800 = vmatpush.bf16.msrb.mxu3 %v12426_v0  ;;  %v12425_v22 = vld [vmem:[%s16273_s3 + $0x80] sm:$0xff] }
 0x192   :  { %v911_v3 = vmax.f32 %v698_v2, 0.0  ;;  %v13340_v6 = vpop.f32.mrf.mxu3 }
 0x193   :  { %v13399_v52 = vpop.f32.mrf.mxu1 }
 0x194   :  { %v1015_v8 = vpack.c.bf16 %v911_v3, %v911_v3  ;;  %2046 = vmatpush.bf16.msra.mxu2 %v12366_v25  ;;  %2801 = vmatpush.bf16.msrb.mxu3 %v12425_v22 }
 0x196   :  { %1120 = vst.msk [vmem:[#allocation2 + $0x7c] sm:$0xf] %vm1088_vm3, %v1015_v8 }
 0x197   :  { %v700_v11 = vpop.f32.mrf.mxu0 }
 0x198   :  { %v701_v12 = vadd.f32 %v13007_v16, %v700_v11 }
 0x19a   :  { %v912_v14 = vmax.f32 %v701_v12, 0.0  ;;  %9537 = vmatmul.msk.bf16.gmra.mxu0 %vm447_vm2, %v12289_v9  ;;  %v13353_v15 = vpop.f32.mrf.mxu3 }
 0x19b   :  { %v13421_v9 = vpop.f32.mrf.mxu1 }
 0x19c   :  { %v1016_v17 = vpack.c.bf16 %v912_v14, %v912_v14 }
 0x19d   :  { %v13357_v20 = vld [vmem:[#allocation2 + $0x78] sm:$0xff] }
 0x19e   :  { %v12380_v21 = vld [vmem:[#allocation2 + $0x78] sm:$0xff]  ;;  %1121 = vst.msk [vmem:[#allocation2 + $0x80] sm:$0xf] %vm1088_vm3, %v1016_v17  ;;  %9678 = vmatmul.msk.bf16.gmra.mxu2 %vm1314_vm4, %v13124_v34  ;;  %v12365_v34 = vld [vmem:[%s16273_s3 + $0x10] sm:$0xff] }
 0x19f   :  { %v702_v24 = vpop.f32.mrf.mxu0  ;;  %9944 = vmatmul.msk.bf16.gmra.mxu3 %vm1314_vm4, %v12380_v21  ;;  %9830 = vmatmul.msk.bf16.gmra.mxu1 %vm1314_vm4, %v13357_v20  ;;  %v12424_v21 = vld [vmem:[%s16273_s3 + $0x78] sm:$0xff] }
 0x1a0   :  { %v703_v27 = vadd.f32 %v13007_v16, %v702_v24  ;;  %2047 = vmatpush.bf16.msra.mxu2 %v12365_v34  ;;  %2802 = vmatpush.bf16.msrb.mxu3 %v12424_v21 }
 0x1a2   :  { %v913_v29 = vmax.f32 %v703_v27, 0.0  ;;  %v13372_v30 = vpop.f32.mrf.mxu3 }
 0x1a3   :  { %v13442_v34 = vpop.f32.mrf.mxu1 }
 0x1a4   :  { %v1017_v31 = vpack.c.bf16 %v913_v29, %v913_v29  ;;  %2048 = vmatpush.bf16.msra.mxu2 %v12364_v62 }
 0x1a6   :  { %1122 = vst.msk [vmem:[#allocation2 + $0x84] sm:$0xf] %vm1088_vm3, %v1017_v31  ;;  %v12292_v31 = vld [vmem:[%s16270_s0 + $0xd8] sm:$0xff] }
 0x1a7   :  { %v705_v37 = vpop.f32.mrf.mxu0 }
 0x1a8   :  { %v706_v38 = vadd.f32 %v13007_v16, %v705_v37  ;;  %2049 = vmatpush.bf16.msra.mxu2 %v12363_v42  ;;  %v12422_v37 = vld [vmem:[%s16273_s3 + $0x68] sm:$0xff] }
 0x1aa   :  { %v914_v39 = vmax.f32 %v706_v38, 0.0  ;;  %9538 = vmatmul.msk.bf16.gmra.mxu0 %vm447_vm2, %v12290_v32  ;;  %v13388_v40 = vpop.f32.mrf.mxu3  ;;  %v12447_v38 = vld [vmem:[%s16273_s3 + $0x50] sm:$0xff] }
 0x1ab   :  { %3102 = vmatpush.bf16.msrb.mxu1 %v12447_v38 }
 0x1ac   :  { %v1018_v44 = vpack.c.bf16 %v914_v39, %v914_v39 }
 0x1ad   :  { %v12369_v45 = vld [vmem:[#allocation2 + $0x80] sm:$0xff] }
 0x1ae   :  { %v12381_v48 = vld [vmem:[#allocation2 + $0x80] sm:$0xff]  ;;  %1123 = vst.msk [vmem:[#allocation2 + $0x88] sm:$0xf] %vm1088_vm3, %v1018_v44  ;;  %9679 = vmatmul.msk.bf16.gmra.mxu2 %vm1314_vm4, %v13140_v46  ;;  %v12291_v46 = vld [vmem:[%s16270_s0 + $0xd0] sm:$0xff] }
 0x1af   :  { %v707_v49 = vpop.f32.mrf.mxu0  ;;  %9945 = vmatmul.msk.bf16.gmra.mxu3 %vm1314_vm4, %v12381_v48  ;;  %9831 = vmatmul.msk.bf16.gmra.mxu1 %vm1314_vm4, %v12369_v45  ;;  %v12421_v45 = vld [vmem:[%s16273_s3 + $0x60] sm:$0xff] }
 0x1b0   :  { %v708_v50 = vadd.f32 %v13007_v16, %v707_v49 }
 0x1b1   :  { %v13401_v10 = vpop.f32.mrf.mxu2 }
 0x1b2   :  { %v915_v53 = vmax.f32 %v708_v50, 0.0  ;;  %v13403_v54 = vpop.f32.mrf.mxu3  ;;  %v12355_v50 = vld [vmem:[#allocation2 + $0x40] sm:$0xff] }
 0x1b4   :  { %v1019_v56 = vpack.c.bf16 %v915_v53, %v915_v53 }
 0x1b6   :  { %1124 = vst.msk [vmem:[#allocation2 + $0x8c] sm:$0xf] %vm1088_vm3, %v1019_v56 }
 0x1b7   :  { %v710_v61 = vpop.f32.mrf.mxu0 }
 0x1b8   :  { %v711_v1 = vadd.f32 %v13007_v16, %v710_v61 }
 0x1b9   :  { %v13417_v3 = vpop.f32.mrf.mxu2 }
 0x1ba   :  { %v916_v2 = vmax.f32 %v711_v1, 0.0  ;;  %9539 = vmatmul.msk.bf16.gmra.mxu0 %vm447_vm2, %v12291_v46  ;;  %v13419_v8 = vpop.f32.mrf.mxu3 }
 0x1bc   :  { %v1020_v11 = vpack.c.bf16 %v916_v2, %v916_v2 }
 0x1bd   :  { %v12370_v12 = vld [vmem:[#allocation2 + $0x88] sm:$0xff] }
 0x1be   :  { %v12382_v14 = vld [vmem:[#allocation2 + $0x88] sm:$0xff]  ;;  %1125 = vst.msk [vmem:[#allocation2 + $0x90] sm:$0xf] %vm1088_vm3, %v1020_v11  ;;  %9680 = vmatmul.msk.bf16.gmra.mxu2 %vm1314_vm4, %v13162_v60  ;;  %v12423_v60 = vld [vmem:[%s16273_s3 + $0x70] sm:$0xff] }
 0x1bf   :  { %v712_v17 = vpop.f32.mrf.mxu0  ;;  %9946 = vmatmul.msk.bf16.gmra.mxu3 %vm1314_vm4, %v12382_v14  ;;  %9832 = vmatmul.msk.bf16.gmra.mxu1 %vm1314_vm4, %v12370_v12  ;;  %v12293_v14 = vld [vmem:[%s16270_s0 + $0xe0] sm:$0xff] }
 0x1c0   :  { %v713_v23 = vadd.f32 %v13007_v16, %v712_v17  ;;  %2803 = vmatpush.bf16.msrb.mxu3 %v12423_v60 }
 0x1c1   :  { %v13435_v25 = vpop.f32.mrf.mxu2 }
 0x1c2   :  { %v917_v24 = vmax.f32 %v713_v23, 0.0  ;;  %v13437_v27 = vpop.f32.mrf.mxu3 }
 0x1c4   :  { %v1021_v29 = vpack.c.bf16 %v917_v24, %v917_v24  ;;  %2804 = vmatpush.bf16.msrb.mxu3 %v12422_v37 }
 0x1c6   :  { %1126 = vst.msk [vmem:[#allocation2 + $0x94] sm:$0xf] %vm1088_vm3, %v1021_v29 }
 0x1c7   :  { %v715_v32 = vpop.f32.mrf.mxu0 }
 0x1c8   :  { %v716_v62 = vadd.f32 %v13007_v16, %v715_v32  ;;  %2805 = vmatpush.bf16.msrb.mxu3 %v12421_v45  ;;  %v12356_v32 = vld [vmem:[#allocation2 + $0x48] sm:$0xff] }
 0x1c9   :  { %v13456_v42 = vpop.f32.mrf.mxu2 }
 0x1ca   :  { %v918_v39 = vmax.f32 %v716_v62, 0.0  ;;  %9540 = vmatmul.msk.bf16.gmra.mxu0 %vm447_vm2, %v12292_v31  ;;  %v13458_v44 = vpop.f32.mrf.mxu3 }
 0x1cc   :  { %v1022_v48 = vpack.c.bf16 %v918_v39, %v918_v39  ;;  %v13463_v49 = vpop.f32.mrf.mxu1 }
 0x1cd   :  { %v12383_v53 = vld [vmem:[#allocation2 + $0x90] sm:$0xff] }
 0x1ce   :  { %v13465_v56 = vld [vmem:[#allocation2 + $0x90] sm:$0xff]  ;;  %1127 = vst.msk [vmem:[#allocation2 + $0x98] sm:$0xf] %vm1088_vm3, %v1022_v48  ;;  %9865 = vmatmul.msk.bf16.vlgmr.msra.gmra.mxu2 %vm1314_vm4, %v12355_v50 }
 0x1cf   :  { %v717_v46 = vpop.f32.mrf.mxu0  ;;  %9947 = vmatmul.msk.bf16.gmra.mxu3 %vm1314_vm4, %v12383_v53  ;;  %10017 = vmatmul.msk.bf16.vlgmr.msra.gmra.mxu1 %vm1314_vm4, %v13465_v56 }
 0x1d0   :  { %v718_v58 = vadd.f32 %v13007_v16, %v717_v46 }
 0x1d1   :  { %v1449_v0 = vpop.f32.mrf.mxu2 }
 0x1d2   :  { %v919_v61 = vmax.f32 %v718_v58, 0.0  ;;  %v13473_v1 = vpop.f32.mrf.mxu3  ;;  %v1450_v2 = vadd.f32 %v1449_v0, %v13253_v5  ;;  %v12294_v58 = vld [vmem:[%s16270_s0 + $0xe8] sm:$0xff] }
 0x1d4   :  { %v1023_v22 = vpack.c.bf16 %v919_v61, %v919_v61  ;;  %v1667_v11 = vadd.f32 %v13287_v33, %v1450_v2  ;;  %v13477_v12 = vpop.f32.mrf.mxu1 }
 0x1d6   :  { %1128 = vst.msk [vmem:[#allocation2 + $0x9c] sm:$0xf] %vm1088_vm3, %v1023_v22 }
 0x1d7   :  { %1684 = vst.msk [vmem:[#allocation3] sm:$0xff] %vm1683_vm5, %v1667_v11  ;;  %v720_v17 = vpop.f32.mrf.mxu0 }
 0x1d8   :  { %v721_v21 = vadd.f32 %v13007_v16, %v720_v17 }
 0x1d9   :  { %v1451_v5 = vpop.f32.mrf.mxu2 }
 0x1da   :  { %v920_v23 = vmax.f32 %v721_v21, 0.0  ;;  %9541 = vmatmul.msk.bf16.gmra.mxu0 %vm447_vm2, %v12293_v14  ;;  %v13486_v24 = vpop.f32.mrf.mxu3  ;;  %v1452_v33 = vadd.f32 %v1451_v5, %v13268_v18 }
 0x1dc   :  { %v1024_v60 = vpack.c.bf16 %v920_v23, %v920_v23  ;;  %v1668_v29 = vadd.f32 %v13300_v41, %v1452_v33  ;;  %v13490_v31 = vpop.f32.mrf.mxu1 }
 0x1dd   :  { %v12384_v37 = vld [vmem:[#allocation2 + $0x98] sm:$0xff] }
 0x1de   :  { %v13492_v62 = vld [vmem:[#allocation2 + $0x98] sm:$0xff]  ;;  %1129 = vst.msk [vmem:[#allocation2 + $0xa0] sm:$0xf] %vm1088_vm3, %v1024_v60  ;;  %9866 = vmatmul.msk.bf16.gmra.mxu2 %vm1314_vm4, %v12356_v32 }
 0x1df   :  { %1685 = vst.msk [vmem:[#allocation3 + $0x8] sm:$0xff] %vm1683_vm5, %v1668_v29  ;;  %v722_v38 = vpop.f32.mrf.mxu0  ;;  %9948 = vmatmul.msk.bf16.gmra.mxu3 %vm1314_vm4, %v12384_v37  ;;  %10018 = vmatmul.msk.bf16.gmra.mxu1 %vm1314_vm4, %v13492_v62 }
 0x1e0   :  { %v723_v18 = vadd.f32 %v13007_v16, %v722_v38 }
 0x1e1   :  { %v1454_v39 = vpop.f32.mrf.mxu2 }
 0x1e2   :  { %v921_v41 = vmax.f32 %v723_v18, 0.0  ;;  %v13501_v45 = vpop.f32.mrf.mxu3  ;;  %v1455_v48 = vadd.f32 %v1454_v39, %v13276_v26  ;;  %v12446_v26 = vld [vmem:[%s16273_s3 + $0x48] sm:$0xff] }
 0x1e3   :  { %3103 = vmatpush.bf16.msrb.mxu1 %v12446_v26 }
 0x1e4   :  { %v1025_v50 = vpack.c.bf16 %v921_v41, %v921_v41  ;;  %v1669_v53 = vadd.f32 %v13316_v51, %v1455_v48  ;;  %v13505_v46 = vpop.f32.mrf.mxu1  ;;  %v12623_v51 = vld [vmem:[%s16273_s3 + $0x80] sm:$0xff] }
 0x1e5   :  { %6241 = vmatpush.bf16.msrb.mxu0 %v12623_v51 }
 0x1e6   :  { %v1700_v61 = vld [vmem:[#allocation3] ss:$2 sm:$0xff]  ;;  %v1716_v0 = vld [vmem:[#allocation3 + $0x1] ss:$2 sm:$0xff]  ;;  %1130 = vst.msk [vmem:[#allocation2 + $0xa4] sm:$0xf] %vm1088_vm3, %v1025_v50 }
 0x1e7   :  { %v1731_v2 = vmax.f32 %v1700_v61, %v1716_v0  ;;  %1686 = vst.msk [vmem:[#allocation3 + $0x10] sm:$0xff] %vm1683_vm5, %v1669_v53  ;;  %v725_v22 = vpop.f32.mrf.mxu0 }
 0x1e8   :  { %v726_v11 = vadd.f32 %v13007_v16, %v725_v22 }
 0x1e9   :  { %1739 = vst.msk [vmem:[#allocation4] sm:$0xff] %vm1683_vm5, %v1731_v2  ;;  %v1456_v17 = vpop.f32.mrf.mxu2 }
 0x1ea   :  { %v922_v14 = vmax.f32 %v726_v11, 0.0  ;;  %9542 = vmatmul.msk.bf16.gmra.mxu0 %vm447_vm2, %v12294_v58  ;;  %v13521_v21 = vpop.f32.mrf.mxu3  ;;  %v1457_v23 = vadd.f32 %v1456_v17, %v13289_v36  ;;  %v13534_v36 = vld [vmem:[#allocation7] ss:$0 sm:$0xff] }
 0x1ec   :  { %v1026_v16 = vpack.c.bf16 %v922_v14, %v922_v14  ;;  %v1670_v5 = vadd.f32 %v13329_v59, %v1457_v23  ;;  %v13525_v33 = vpop.f32.mrf.mxu1 }
 0x1ed   :  { %v13527_v60 = vld [vmem:[#allocation2 + $0xa0] sm:$0xff] }
 0x1ee   :  { %v12413_v29 = vld [vmem:[#allocation2 + $0xa0] sm:$0xff]  ;;  %1131 = vst.msk [vmem:[#allocation2 + $0xa8] sm:$0xf] %vm1088_vm3, %v1026_v16  ;;  %9867 = vmatmul.msk.bf16.gmra.mxu2 %vm1314_vm4, %v13236_v55  ;;  %v12295_v55 = vld [vmem:[%s16270_s0 + $0xf0] sm:$0xff] }
 0x1ef   :  { %1687 = vst.msk [vmem:[#allocation3 + $0x18] sm:$0xff] %vm1683_vm5, %v1670_v5  ;;  %v727_v32 = vpop.f32.mrf.mxu0  ;;  %10133 = vmatmul.msk.bf16.vlgmr.msrb.gmra.mxu3 %vm1314_vm4, %v12413_v29  ;;  %10019 = vmatmul.msk.bf16.gmra.mxu1 %vm1314_vm4, %v13527_v60 }
 0x1f0   :  { %v728_v37 = vadd.f32 %v13534_v36, %v727_v32 }
 0x1f1   :  { %v1459_v38 = vpop.f32.mrf.mxu2 }
 0x1f2   :  { %v923_v59 = vmax.f32 %v728_v37, 0.0  ;;  %v13539_v18 = vpop.f32.mrf.mxu3  ;;  %v1460_v41 = vadd.f32 %v1459_v38, %v13308_v47  ;;  %v12445_v47 = vld [vmem:[%s16273_s3 + $0x40] sm:$0xff] }
 0x1f3   :  { %3104 = vmatpush.bf16.msrb.mxu1 %v12445_v47 }
 0x1f4   :  { %v1027_v39 = vpack.c.bf16 %v923_v59, %v923_v59  ;;  %v1671_v48 = vadd.f32 %v13340_v6, %v1460_v41  ;;  %v13543_v50 = vpop.f32.mrf.mxu1 }
 0x1f6   :  { %v1702_v53 = vld [vmem:[#allocation3 + $0x10] ss:$2 sm:$0xff]  ;;  %v1718_v58 = vld [vmem:[#allocation3 + $0x11] ss:$2 sm:$0xff]  ;;  %1132 = vst.msk [vmem:[#allocation2 + $0xac] sm:$0xf] %vm1088_vm3, %v1027_v39 }
 0x1f7   :  { %v1732_v61 = vmax.f32 %v1702_v53, %v1718_v58  ;;  %1688 = vst.msk [vmem:[#allocation3 + $0x20] sm:$0xff] %vm1683_vm5, %v1671_v48  ;;  %v730_v0 = vpop.f32.mrf.mxu0 }
 0x1f8   :  { %v731_v2 = vadd.f32 %v13534_v36, %v730_v0 }
 0x1f9   :  { %1740 = vst.msk [vmem:[#allocation4 + $0x8] sm:$0xff] %vm1683_vm5, %v1732_v61  ;;  %v1461_v22 = vpop.f32.mrf.mxu2 }
 0x1fa   :  { %v924_v6 = vmax.f32 %v731_v2, 0.0  ;;  %9543 = vmatmul.msk.bf16.gmra.mxu0 %vm447_vm2, %v12295_v55  ;;  %v13556_v11 = vpop.f32.mrf.mxu3  ;;  %v1462_v26 = vadd.f32 %v1461_v22, %v13326_v57 }
 0x1fc   :  { %v1028_v51 = vpack.c.bf16 %v924_v6, %v924_v6  ;;  %v1672_v14 = vadd.f32 %v13353_v15, %v1462_v26  ;;  %v13560_v17 = vpop.f32.mrf.mxu1 }
 0x1fd   :  { %v13562_v23 = vld [vmem:[#allocation2 + $0xa8] sm:$0xff] }
 0x1fe   :  { %v12414_v16 = vld [vmem:[#allocation2 + $0xa8] sm:$0xff]  ;;  %1133 = vst.msk [vmem:[#allocation2 + $0xb0] sm:$0xf] %vm1088_vm3, %v1028_v51  ;;  %9868 = vmatmul.msk.bf16.gmra.mxu2 %vm1314_vm4, %v13257_v13  ;;  %v12296_v13 = vld [vmem:[%s16270_s0 + $0xf8] sm:$0xff] }
 0x1ff   :  { %1689 = vst.msk [vmem:[#allocation3 + $0x28] sm:$0xff] %vm1683_vm5, %v1672_v14  ;;  %v732_v5 = vpop.f32.mrf.mxu0  ;;  %10134 = vmatmul.msk.bf16.gmra.mxu3 %vm1314_vm4, %v12414_v16  ;;  %10020 = vmatmul.msk.bf16.gmra.mxu1 %vm1314_vm4, %v13562_v23 }
 0x200   :  { %v733_v57 = vadd.f32 %v13534_v36, %v732_v5 }
 0x201   :  { %v1464_v29 = vpop.f32.mrf.mxu2 }
 0x202   :  { %v925_v15 = vmax.f32 %v733_v57, 0.0  ;;  %v13572_v32 = vpop.f32.mrf.mxu3  ;;  %v1465_v37 = vadd.f32 %v1464_v29, %v13342_v7  ;;  %v12404_v7 = vld [vmem:[%s16273_s3 + $0x28] sm:$0xff] }
 0x203   :  { %2623 = vmatpush.bf16.msrb.mxu2 %v12404_v7 }
 0x204   :  { %v1029_v59 = vpack.c.bf16 %v925_v15, %v925_v15  ;;  %v1673_v38 = vadd.f32 %v13372_v30, %v1465_v37  ;;  %v13576_v41 = vpop.f32.mrf.mxu1  ;;  %v12444_v30 = vld [vmem:[%s16273_s3 + $0x38] sm:$0xff] }
 0x205   :  { %3105 = vmatpush.bf16.msrb.mxu1 %v12444_v30 }
 0x206   :  { %v1704_v39 = vld [vmem:[#allocation3 + $0x20] ss:$2 sm:$0xff]  ;;  %v1720_v48 = vld [vmem:[#allocation3 + $0x21] ss:$2 sm:$0xff]  ;;  %1134 = vst.msk [vmem:[#allocation2 + $0xb4] sm:$0xf] %vm1088_vm3, %v1029_v59 }
 0x207   :  { %v1733_v55 = vmax.f32 %v1704_v39, %v1720_v48  ;;  %1690 = vst.msk [vmem:[#allocation3 + $0x30] sm:$0xff] %vm1683_vm5, %v1673_v38  ;;  %v735_v53 = vpop.f32.mrf.mxu0 }
 0x208   :  { %v736_v58 = vadd.f32 %v13534_v36, %v735_v53 }
 0x209   :  { %1741 = vst.msk [vmem:[#allocation4 + $0x10] sm:$0xff] %vm1683_vm5, %v1733_v55  ;;  %v1466_v0 = vpop.f32.mrf.mxu2  ;;  %v12297_v55 = vld [vmem:[%s16270_s0 + $0x100] sm:$0xff] }
 0x20a   :  { %v926_v61 = vmax.f32 %v736_v58, 0.0  ;;  %9544 = vmatmul.msk.bf16.gmra.mxu0 %vm447_vm2, %v12296_v13  ;;  %v13592_v2 = vpop.f32.mrf.mxu3  ;;  %v1467_v47 = vadd.f32 %v1466_v0, %v13355_v19  ;;  %v12820_v19 = vld [vmem:[#allocation9] ss:$0 sm:$0xff] }
 0x20c   :  { %v1030_v6 = vpack.c.bf16 %v926_v61, %v926_v61  ;;  %v1674_v22 = vadd.f32 %v13388_v40, %v1467_v47  ;;  %v13596_v26 = vpop.f32.mrf.mxu1  ;;  %v1747_v40 = vld [vmem:[#allocation4] sm:$0xff] }
 0x20d   :  { %v13598_v51 = vld [vmem:[#allocation2 + $0xb0] sm:$0xff] }
 0x20e   :  { %v12415_v14 = vld [vmem:[#allocation2 + $0xb0] sm:$0xff]  ;;  %1135 = vst.msk [vmem:[#allocation2 + $0xb8] sm:$0xf] %vm1088_vm3, %v1030_v6  ;;  %9869 = vmatmul.msk.bf16.gmra.mxu2 %vm1314_vm4, %v13278_v28 }
 0x20f   :  { %1691 = vst.msk [vmem:[#allocation3 + $0x38] sm:$0xff] %vm1683_vm5, %v1674_v22  ;;  %v737_v16 = vpop.f32.mrf.mxu0  ;;  %10135 = vmatmul.msk.bf16.gmra.mxu3 %vm1314_vm4, %v12415_v14  ;;  %10021 = vmatmul.msk.bf16.gmra.mxu1 %vm1314_vm4, %v13598_v51 }
 0x210   :  { %v738_v5 = vadd.f32 %v13534_v36, %v737_v16  ;;  %v1749_v57 = vld [vmem:[#allocation4 + $0x10] sm:$0xff] }
 0x211   :  { %v1751_v15 = vmax.f32 %v1747_v40, %v1749_v57  ;;  %v1469_v37 = vpop.f32.mrf.mxu2 }
 0x212   :  { %v927_v29 = vmax.f32 %v738_v5, 0.0  ;;  %v13608_v59 = vpop.f32.mrf.mxu3  ;;  %v1470_v38 = vadd.f32 %v1469_v37, %v13381_v35  ;;  %v1748_v37 = vld [vmem:[#allocation4 + $0x8] sm:$0xf] }
 0x213   :  { %v1757_v13 = vadd.f32 %v12820_v19, %v1751_v15 }
 0x214   :  { %v1031_v39 = vpack.c.bf16 %v927_v29, %v927_v29  ;;  %v1675_v28 = vadd.f32 %v13403_v54, %v1470_v38  ;;  %v13612_v48 = vpop.f32.mrf.mxu1  ;;  %v12403_v54 = vld [vmem:[%s16273_s3 + $0x20] sm:$0xff] }
 0x215   :  { %v1759_v53 = vmax.f32 %v1757_v13, 0.0  ;;  %2624 = vmatpush.bf16.msrb.mxu2 %v12403_v54 }
 0x216   :  { %v1706_v58 = vld [vmem:[#allocation3 + $0x30] ss:$2 sm:$0xff]  ;;  %v1722_v7 = vld [vmem:[#allocation3 + $0x31] ss:$2 sm:$0xff]  ;;  %1136 = vst.msk [vmem:[#allocation2 + $0xbc] sm:$0xf] %vm1088_vm3, %v1031_v39 }
 0x217   :  { %v1734_v30 = vmax.f32 %v1706_v58, %v1722_v7  ;;  %1692 = vst.msk [vmem:[#allocation3 + $0x40] sm:$0xff] %vm1683_vm5, %v1675_v28  ;;  %v740_v61 = vpop.f32.mrf.mxu0  ;;  %v1761_v35 = vpack.c.bf16 %v1759_v53, %v1759_v53  ;;  %v12401_v53 = vld [vmem:[%s16273_s3 + $0x10] sm:$0xff] }
 0x218   :  { %v741_v0 = vadd.f32 %v13534_v36, %v740_v61 }
 0x219   :  { %1742 = vst.msk [vmem:[#allocation4 + $0x18] sm:$0xff] %vm1683_vm5, %v1734_v30  ;;  %v1471_v6 = vpop.f32.mrf.mxu2 }
 0x21a   :  { %v928_v47 = vmax.f32 %v741_v0, 0.0  ;;  %9545 = vmatmul.msk.bf16.gmra.mxu0 %vm447_vm2, %v12297_v55  ;;  %v13625_v22 = vpop.f32.mrf.mxu3  ;;  %1764 = vst.msk [vmem:[%s16275_s5] sm:$0xf] %vm1763_vm6, %v1761_v35  ;;  %v1472_v14 = vadd.f32 %v1471_v6, %v13399_v52  ;;  %v12402_v52 = vld [vmem:[%s16273_s3 + $0x18] sm:$0xff]  ;;  %v12298_v35 = vld [vmem:[%s16270_s0 + $0x108] sm:$0xff] }
 0x21b   :  { %2625 = vmatpush.bf16.msrb.mxu2 %v12402_v52 }
 0x21c   :  { %v1032_v16 = vpack.c.bf16 %v928_v47, %v928_v47  ;;  %v1676_v5 = vadd.f32 %v13419_v8, %v1472_v14  ;;  %v13633_v40 = vpop.f32.mrf.mxu1 }
 0x21d   :  { %v13635_v57 = vld [vmem:[#allocation2 + $0xb8] sm:$0xff] }
 0x21e   :  { %v12416_v15 = vld [vmem:[#allocation2 + $0xb8] sm:$0xff]  ;;  %1137 = vst.msk [vmem:[#allocation2 + $0xc0] sm:$0xf] %vm1088_vm3, %v1032_v16  ;;  %9870 = vmatmul.msk.bf16.gmra.mxu2 %vm1314_vm4, %v13302_v43  ;;  %v12443_v16 = vld [vmem:[%s16273_s3 + $0x30] sm:$0xff] }
 0x21f   :  { %1693 = vst.msk [vmem:[#allocation3 + $0x48] sm:$0xff] %vm1683_vm5, %v1676_v5  ;;  %v742_v29 = vpop.f32.mrf.mxu0  ;;  %10136 = vmatmul.msk.bf16.gmra.mxu3 %vm1314_vm4, %v12416_v15  ;;  %10022 = vmatmul.msk.bf16.gmra.mxu1 %vm1314_vm4, %v13635_v57 }
 0x220   :  { %v743_v8 = vadd.f32 %v13534_v36, %v742_v29  ;;  %v1750_v38 = vld [vmem:[#allocation4 + $0x18] sm:$0xf]  ;;  %2626 = vmatpush.bf16.msrb.mxu2 %v12401_v53  ;;  %3106 = vmatpush.bf16.msrb.mxu1 %v12443_v16 }
 0x221   :  { %v1752_v13 = vmax.f32 %v1748_v37, %v1750_v38  ;;  %v1474_v28 = vpop.f32.mrf.mxu2 }
 0x222   :  { %v929_v39 = vmax.f32 %v743_v8, 0.0  ;;  %v13648_v55 = vpop.f32.mrf.mxu3  ;;  %v1475_v43 = vadd.f32 %v1474_v28, %v13421_v9  ;;  %v12399_v8 = vld [vmem:[%s16273_s3] sm:$0xff] }
 0x223   :  { %v1758_v58 = vadd.f32 %v12820_v19, %v1752_v13 }
 0x224   :  { %v1033_v7 = vpack.c.bf16 %v929_v39, %v929_v39  ;;  %v1677_v30 = vadd.f32 %v13437_v27, %v1475_v43  ;;  %v13655_v61 = vpop.f32.mrf.mxu1  ;;  %v12400_v27 = vld [vmem:[%s16273_s3 + $0x8] sm:$0xff] }
 0x225   :  { %v1760_v0 = vmax.f32 %v1758_v58, 0.0  ;;  %2627 = vmatpush.bf16.msrb.mxu2 %v12400_v27  ;;  %v12484_v27 = vld [vmem:[%s16273_s3 + $0x58] sm:$0xff] }
 0x226   :  { %v1708_v54 = vld [vmem:[#allocation3 + $0x40] ss:$2 sm:$0xff]  ;;  %v1724_v47 = vld [vmem:[#allocation3 + $0x41] ss:$2 sm:$0xff]  ;;  %1138 = vst.msk [vmem:[#allocation2 + $0xc4] sm:$0xf] %vm1088_vm3, %v1033_v7  ;;  %3680 = vmatpush.bf16.msra.mxu1 %v12484_v27 }
 0x227   :  { %v1735_v9 = vmax.f32 %v1708_v54, %v1724_v47  ;;  %1694 = vst.msk [vmem:[#allocation3 + $0x50] sm:$0xff] %vm1683_vm5, %v1677_v30  ;;  %v745_v6 = vpop.f32.mrf.mxu0  ;;  %v1762_v19 = vpack.c.bf16 %v1760_v0, %v1760_v0 }
 0x228   :  { %v746_v14 = vadd.f32 %v13534_v36, %v745_v6 }
 0x229   :  { %1743 = vst.msk [vmem:[#allocation4 + $0x20] sm:$0xff] %vm1683_vm5, %v1735_v9  ;;  %v1476_v15 = vpop.f32.mrf.mxu2  ;;  %2628 = vmatpush.bf16.msrb.mxu2 %v12399_v8 }
 0x22a   :  { %v930_v5 = vmax.f32 %v746_v14, 0.0  ;;  %9546 = vmatmul.msk.bf16.gmra.mxu0 %vm447_vm2, %v12298_v35  ;;  %v13671_v29 = vpop.f32.mrf.mxu3  ;;  %1766 = vst.msk [vmem:[%s16275_s5 + $0x4] sm:$0x3] %vm1765_vm7, %v1762_v19  ;;  %v1477_v52 = vadd.f32 %v1476_v15, %v13442_v34  ;;  %v12461_v15 = vld [vmem:[%s16273_s3 + $0x80] sm:$0xff] }
 0x22c   :  { %v1034_v37 = vpack.c.bf16 %v930_v5, %v930_v5  ;;  %v1678_v38 = vadd.f32 %v13458_v44, %v1477_v52  ;;  %v13682_v13 = vpop.f32.mrf.mxu1 }
 0x22d   :  { %v12405_v39 = vld [vmem:[#allocation2 + $0xc0] sm:$0xff] }
 0x22e   :  { %v12417_v28 = vld [vmem:[#allocation2 + $0xc0] sm:$0xff]  ;;  %1139 = vst.msk [vmem:[#allocation2 + $0xc8] sm:$0xf] %vm1088_vm3, %v1034_v37  ;;  %9871 = vmatmul.msk.bf16.gmra.mxu2 %vm1314_vm4, %v13331_v63  ;;  %v12299_v63 = vld [vmem:[%s16270_s0 + $0x110] sm:$0xff] }
 0x22f   :  { %1695 = vst.msk [vmem:[#allocation3 + $0x58] sm:$0xff] %vm1683_vm5, %v1678_v38  ;;  %v747_v43 = vpop.f32.mrf.mxu0  ;;  %10137 = vmatmul.msk.bf16.gmra.mxu3 %vm1314_vm4, %v12417_v28  ;;  %10023 = vmatmul.msk.bf16.gmra.mxu1 %vm1314_vm4, %v12405_v39 }
 0x230   :  { %v748_v34 = vadd.f32 %v13534_v36, %v747_v43 }
 0x231   :  { %v1479_v53 = vpop.f32.mrf.mxu2 }
 0x232   :  { %v931_v44 = vmax.f32 %v748_v34, 0.0  ;;  %v13691_v58 = vpop.f32.mrf.mxu3  ;;  %v1480_v7 = vadd.f32 %v1479_v53, %v13401_v10  ;;  %v12462_v10 = vld [vmem:[%s16273_s3 + $0x88] sm:$0xff] }
 0x233   :  { %3379 = vmatpush.bf16.msra.mxu3 %v12462_v10  ;;  %v12483_v10 = vld [vmem:[%s16273_s3 + $0x50] sm:$0xff] }
 0x234   :  { %v1035_v30 = vpack.c.bf16 %v931_v44, %v931_v44  ;;  %v1679_v35 = vadd.f32 %v13473_v1, %v1480_v7  ;;  %v13695_v0 = vpop.f32.mrf.mxu1  ;;  %3681 = vmatpush.bf16.msra.mxu1 %v12483_v10 }
 0x236   :  { %v1710_v54 = vld [vmem:[#allocation3 + $0x50] ss:$2 sm:$0xff]  ;;  %v1726_v47 = vld [vmem:[#allocation3 + $0x51] ss:$2 sm:$0xff]  ;;  %1140 = vst.msk [vmem:[#allocation2 + $0xcc] sm:$0xf] %vm1088_vm3, %v1035_v30 }
 0x237   :  { %v1736_v9 = vmax.f32 %v1710_v54, %v1726_v47  ;;  %1696 = vst.msk [vmem:[#allocation3 + $0x60] sm:$0xff] %vm1683_vm5, %v1679_v35  ;;  %v750_v6 = vpop.f32.mrf.mxu0  ;;  %3380 = vmatpush.bf16.msra.mxu3 %v12461_v15 }
 0x238   :  { %v751_v1 = vadd.f32 %v13534_v36, %v750_v6  ;;  %v12458_v6 = vld [vmem:[%s16273_s3 + $0x68] sm:$0xff] }
 0x239   :  { %1744 = vst.msk [vmem:[#allocation4 + $0x28] sm:$0xff] %vm1683_vm5, %v1736_v9  ;;  %v1481_v14 = vpop.f32.mrf.mxu2 }
 0x23a   :  { %v932_v19 = vmax.f32 %v751_v1, 0.0  ;;  %9547 = vmatmul.msk.bf16.gmra.mxu0 %vm447_vm2, %v12299_v63  ;;  %v13711_v16 = vpop.f32.mrf.mxu3  ;;  %v1482_v5 = vadd.f32 %v1481_v14, %v13417_v3  ;;  %v12460_v3 = vld [vmem:[%s16273_s3 + $0x78] sm:$0xff] }
 0x23b   :  { %3381 = vmatpush.bf16.msra.mxu3 %v12460_v3  ;;  %v12300_v63 = vld [vmem:[%s16270_s0 + $0x118] sm:$0xff]  ;;  %v12821_v3 = vld [vmem:[#allocation9] ss:$0 sm:$0xff] }
 0x23c   :  { %v1036_v52 = vpack.c.bf16 %v932_v19, %v932_v19  ;;  %v1680_v8 = vadd.f32 %v13486_v24, %v1482_v5  ;;  %v13718_v37 = vpop.f32.mrf.mxu1  ;;  %v12457_v5 = vld [vmem:[%s16273_s3 + $0x60] sm:$0xff] }
 0x23d   :  { %v12406_v38 = vld [vmem:[#allocation2 + $0xc8] sm:$0xff] }
 0x23e   :  { %v12418_v39 = vld [vmem:[#allocation2 + $0xc8] sm:$0xff]  ;;  %1141 = vst.msk [vmem:[#allocation2 + $0xd0] sm:$0xf] %vm1088_vm3, %v1036_v52  ;;  %9872 = vmatmul.msk.bf16.gmra.mxu2 %vm1314_vm4, %v13357_v20  ;;  %v12459_v20 = vld [vmem:[%s16273_s3 + $0x70] sm:$0xff] }
 0x23f   :  { %1697 = vst.msk [vmem:[#allocation3 + $0x68] sm:$0xff] %vm1683_vm5, %v1680_v8  ;;  %v752_v28 = vpop.f32.mrf.mxu0  ;;  %10138 = vmatmul.msk.bf16.gmra.mxu3 %vm1314_vm4, %v12418_v39  ;;  %10024 = vmatmul.msk.bf16.gmra.mxu1 %vm1314_vm4, %v12406_v38  ;;  %v12391_v38 = vld [vmem:[#allocation2 + $0x80] sm:$0xff] }
 0x240   :  { %v753_v24 = vadd.f32 %v13534_v36, %v752_v28  ;;  %3382 = vmatpush.bf16.msra.mxu3 %v12459_v20 }
 0x241   :  { %v1484_v34 = vpop.f32.mrf.mxu2 }
 0x242   :  { %v933_v43 = vmax.f32 %v753_v24, 0.0  ;;  %v13730_v44 = vpop.f32.mrf.mxu3  ;;  %v1485_v53 = vadd.f32 %v1484_v34, %v13435_v25 }
 0x244   :  { %v1037_v7 = vpack.c.bf16 %v933_v43, %v933_v43  ;;  %v1681_v30 = vadd.f32 %v13501_v45, %v1485_v53  ;;  %v13737_v35 = vpop.f32.mrf.mxu1  ;;  %3383 = vmatpush.bf16.msra.mxu3 %v12458_v6 }
 0x246   :  { %v1712_v54 = vld [vmem:[#allocation3 + $0x60] ss:$2 sm:$0xff]  ;;  %v1728_v47 = vld [vmem:[#allocation3 + $0x61] ss:$2 sm:$0xff]  ;;  %1142 = vst.msk [vmem:[#allocation2 + $0xd4] sm:$0xf] %vm1088_vm3, %v1037_v7 }
 0x247   :  { %v1737_v9 = vmax.f32 %v1712_v54, %v1728_v47  ;;  %1698 = vst.msk [vmem:[#allocation3 + $0x70] sm:$0xff] %vm1683_vm5, %v1681_v30  ;;  %v755_v25 = vpop.f32.mrf.mxu0 }
 0x248   :  { %v756_v45 = vadd.f32 %v13534_v36, %v755_v25  ;;  %3384 = vmatpush.bf16.msra.mxu3 %v12457_v5  ;;  %v12301_v25 = vld [vmem:[%s16270_s0 + $0x120] sm:$0xff] }
 0x249   :  { %1745 = vst.msk [vmem:[#allocation4 + $0x30] sm:$0xff] %vm1683_vm5, %v1737_v9  ;;  %v1486_v27 = vpop.f32.mrf.mxu2 }
 0x24a   :  { %v934_v1 = vmax.f32 %v756_v45, 0.0  ;;  %9548 = vmatmul.msk.bf16.gmra.mxu0 %vm447_vm2, %v12300_v63  ;;  %v13753_v19 = vpop.f32.mrf.mxu3  ;;  %v1487_v14 = vadd.f32 %v1486_v27, %v13456_v42 }
 0x24c   :  { %v1038_v15 = vpack.c.bf16 %v934_v1, %v934_v1  ;;  %v1682_v52 = vadd.f32 %v13521_v21, %v1487_v14  ;;  %v13760_v8 = vpop.f32.mrf.mxu1  ;;  %v1767_v21 = vld [vmem:[#allocation4 + $0x20] sm:$0xff] }
 0x24d   :  { %v12419_v39 = vld [vmem:[#allocation2 + $0xd0] sm:$0xff] }
 0x24e   :  { %v13762_v28 = vld [vmem:[#allocation2 + $0xd0] sm:$0xff]  ;;  %1143 = vst.msk [vmem:[#allocation2 + $0xd8] sm:$0xf] %vm1088_vm3, %v1038_v15  ;;  %10057 = vmatmul.msk.bf16.vlgmr.msrb.gmra.mxu2 %vm1314_vm4, %v12391_v38 }
 0x24f   :  { %1699 = vst.msk [vmem:[#allocation3 + $0x78] sm:$0xff] %vm1683_vm5, %v1682_v52  ;;  %v757_v42 = vpop.f32.mrf.mxu0  ;;  %10139 = vmatmul.msk.bf16.gmra.mxu3 %vm1314_vm4, %v12419_v39  ;;  %10209 = vmatmul.msk.bf16.vlgmr.msrb.gmra.mxu1 %vm1314_vm4, %v13762_v28 }
 0x250   :  { %v758_v24 = vadd.f32 %v13534_v36, %v757_v42  ;;  %v1769_v43 = vld [vmem:[#allocation4 + $0x30] sm:$0xff] }
 0x251   :  { %v1771_v34 = vmax.f32 %v1767_v21, %v1769_v43  ;;  %v2051_v20 = vpop.f32.mrf.mxu2  ;;  %v12392_v21 = vld [vmem:[#allocation2 + $0x88] sm:$0xff] }
 0x252   :  { %v935_v53 = vmax.f32 %v758_v24, 0.0  ;;  %v13771_v7 = vpop.f32.mrf.mxu3  ;;  %v2052_v30 = vadd.f32 %v2051_v20, %v13463_v49 }
 0x253   :  { %v1777_v63 = vadd.f32 %v12821_v3, %v1771_v34 }
 0x254   :  { %v1039_v54 = vpack.c.bf16 %v935_v53, %v935_v53  ;;  %v2268_v47 = vadd.f32 %v13539_v18, %v2052_v30  ;;  %v13775_v9 = vpop.f32.mrf.mxu1 }
 0x255   :  { %v1779_v6 = vmax.f32 %v1777_v63, 0.0 }
 0x256   :  { %v1714_v45 = vld [vmem:[#allocation3 + $0x70] ss:$2 sm:$0xff]  ;;  %v1730_v10 = vld [vmem:[#allocation3 + $0x71] ss:$2 sm:$0xff]  ;;  %1144 = vst.msk [vmem:[#allocation2 + $0xdc] sm:$0xf] %vm1088_vm3, %v1039_v54 }
 0x257   :  { %v1738_v1 = vmax.f32 %v1714_v45, %v1730_v10  ;;  %2284 = vst.msk [vmem:[#allocation3] sm:$0xff] %vm1683_vm5, %v2268_v47  ;;  %v760_v27 = vpop.f32.mrf.mxu0  ;;  %v1781_v49 = vpack.c.bf16 %v1779_v6, %v1779_v6 }
 0x258   :  { %v761_v14 = vadd.f32 %v13534_v36, %v760_v27  ;;  %v12302_v27 = vld [vmem:[%s16270_s0 + $0x128] sm:$0xff] }
 0x259   :  { %1746 = vst.msk [vmem:[#allocation4 + $0x38] sm:$0xff] %vm1683_vm5, %v1738_v1  ;;  %v1788_v18 = vrot.slane %v1781_v49, 6  ;;  %v2053_v15 = vpop.f32.mrf.mxu2 }
 0x25a   :  { %v936_v5 = vmax.f32 %v761_v14, 0.0  ;;  %9549 = vmatmul.msk.bf16.gmra.mxu0 %vm447_vm2, %v12301_v25  ;;  %v13785_v52 = vpop.f32.mrf.mxu3  ;;  %v2054_v38 = vadd.f32 %v2053_v15, %v13477_v12 }
 0x25b   :  { %1795 = vst.msk [vmem:[%s16275_s5 + $0x4] sm:$0xc] %vm1794_vm8, %v1788_v18 }
 0x25c   :  { %v1040_v39 = vpack.c.bf16 %v936_v5, %v936_v5  ;;  %v2269_v42 = vadd.f32 %v13556_v11, %v2054_v38  ;;  %v13793_v24 = vpop.f32.mrf.mxu1  ;;  %v1768_v11 = vld [vmem:[#allocation4 + $0x28] sm:$0xf] }
 0x25d   :  { %v12420_v43 = vld [vmem:[#allocation2 + $0xd8] sm:$0xff] }
 0x25e   :  { %v13795_v34 = vld [vmem:[#allocation2 + $0xd8] sm:$0xff]  ;;  %1145 = vst.msk [vmem:[#allocation2 + $0xe0] sm:$0xf] %vm1088_vm3, %v1040_v39  ;;  %10058 = vmatmul.msk.bf16.gmra.mxu2 %vm1314_vm4, %v12392_v21  ;;  %v12482_v39 = vld [vmem:[%s16273_s3 + $0x48] sm:$0xff]  ;;  %v1789_v21 = vrot.slane %v1788_v18, 4 }
 0x25f   :  { %2285 = vst.msk [vmem:[#allocation3 + $0x8] sm:$0xff] %vm1683_vm5, %v2269_v42  ;;  %v762_v53 = vpop.f32.mrf.mxu0  ;;  %10140 = vmatmul.msk.bf16.gmra.mxu3 %vm1314_vm4, %v12420_v43  ;;  %10210 = vmatmul.msk.bf16.gmra.mxu1 %vm1314_vm4, %v13795_v34  ;;  %v12622_v42 = vld [vmem:[%s16273_s3 + $0x78] sm:$0xff] }
 0x260   :  { %v763_v12 = vadd.f32 %v13534_v36, %v762_v53  ;;  %v1770_v20 = vld [vmem:[#allocation4 + $0x38] sm:$0xf]  ;;  %3682 = vmatpush.bf16.msra.mxu1 %v12482_v39  ;;  %6242 = vmatpush.bf16.msrb.mxu0 %v12622_v42 }
 0x261   :  { %v1772_v30 = vmax.f32 %v1768_v11, %v1770_v20  ;;  %v2056_v54 = vpop.f32.mrf.mxu2 }
 0x262   :  { %v937_v63 = vmax.f32 %v763_v12, 0.0  ;;  %v13804_v47 = vpop.f32.mrf.mxu3  ;;  %v2057_v25 = vadd.f32 %v2056_v54, %v13490_v31 }
 0x263   :  { %v1778_v6 = vadd.f32 %v12821_v3, %v1772_v30 }
 0x264   :  { %v1041_v45 = vpack.c.bf16 %v937_v63, %v937_v63  ;;  %v2270_v10 = vadd.f32 %v13572_v32, %v2057_v25  ;;  %v13808_v1 = vpop.f32.mrf.mxu1 }
 0x265   :  { %v1780_v49 = vmax.f32 %v1778_v6, 0.0 }
 0x266   :  { %v2300_v14 = vld [vmem:[#allocation3] ss:$2 sm:$0xff]  ;;  %v2308_v5 = vld [vmem:[#allocation3 + $0x1] ss:$2 sm:$0xff]  ;;  %1146 = vst.msk [vmem:[#allocation2 + $0xe4] sm:$0xf] %vm1088_vm3, %v1041_v45 }
 0x267   :  { %v2316_v15 = vmax.f32 %v2300_v14, %v2308_v5  ;;  %2286 = vst.msk [vmem:[#allocation3 + $0x10] sm:$0xff] %vm1683_vm5, %v2270_v10  ;;  %v765_v31 = vpop.f32.mrf.mxu0  ;;  %v1782_v3 = vpack.c.bf16 %v1780_v49, %v1780_v49 }
 0x268   :  { %v766_v32 = vadd.f32 %v13534_v36, %v765_v31 }
 0x269   :  { %2324 = vst.msk [vmem:[#allocation4] sm:$0xff] %vm1683_vm5, %v2316_v15  ;;  %v1790_v43 = vrot.slane %v1782_v3, 6  ;;  %v2058_v12 = vpop.f32.mrf.mxu2 }
 0x26a   :  { %v938_v53 = vmax.f32 %v766_v32, 0.0  ;;  %9550 = vmatmul.msk.bf16.gmra.mxu0 %vm447_vm2, %v12302_v27  ;;  %v13828_v11 = vpop.f32.mrf.mxu3  ;;  %v2059_v20 = vadd.f32 %v2058_v12, %v13505_v46 }
 0x26b   :  { %v1791_v30 = vsel %vm13816_vm11, %v1789_v21, %v1790_v43 }
 0x26c   :  { %v1042_v63 = vpack.c.bf16 %v938_v53, %v938_v53  ;;  %1796 = vst.msk [vmem:[%s16275_s5 + $0x8] sm:$0xf] %vm1763_vm6, %v1791_v30  ;;  %v2271_v18 = vadd.f32 %v13592_v2, %v2059_v20  ;;  %v13838_v54 = vpop.f32.mrf.mxu1 }
 0x26d   :  { %v13840_v25 = vld [vmem:[#allocation2 + $0xe0] sm:$0xff] }
 0x26e   :  { %v12449_v6 = vld [vmem:[#allocation2 + $0xe0] sm:$0xff]  ;;  %1147 = vst.msk [vmem:[#allocation2 + $0xe8] sm:$0xf] %vm1088_vm3, %v1042_v63  ;;  %10059 = vmatmul.msk.bf16.gmra.mxu2 %vm1314_vm4, %v13465_v56  ;;  %v12303_v56 = vld [vmem:[%s16270_s0 + $0x130] sm:$0xff] }
 0x26f   :  { %2287 = vst.msk [vmem:[#allocation3 + $0x18] sm:$0xff] %vm1683_vm5, %v2271_v18  ;;  %v767_v46 = vpop.f32.mrf.mxu0  ;;  %10325 = vmatmul.msk.bf16.vlgmr.msra.gmra.mxu3 %vm1314_vm4, %v12449_v6  ;;  %10211 = vmatmul.msk.bf16.gmra.mxu1 %vm1314_vm4, %v13840_v25 }
 0x270   :  { %v768_v45 = vadd.f32 %v13534_v36, %v767_v46 }
 0x271   :  { %v2061_v10 = vpop.f32.mrf.mxu2 }
 0x272   :  { %v939_v2 = vmax.f32 %v768_v45, 0.0  ;;  %v13850_v27 = vpop.f32.mrf.mxu3  ;;  %v2062_v49 = vadd.f32 %v2061_v10, %v13525_v33  ;;  %v12481_v33 = vld [vmem:[%s16273_s3 + $0x40] sm:$0xff] }
 0x273   :  { %3683 = vmatpush.bf16.msra.mxu1 %v12481_v33 }
 0x274   :  { %v1043_v14 = vpack.c.bf16 %v939_v2, %v939_v2  ;;  %v2272_v5 = vadd.f32 %v13608_v59, %v2062_v49  ;;  %v13854_v15 = vpop.f32.mrf.mxu1 }
 0x276   :  { %v2301_v31 = vld [vmem:[#allocation3 + $0x10] ss:$2 sm:$0xff]  ;;  %v2309_v3 = vld [vmem:[#allocation3 + $0x11] ss:$2 sm:$0xff]  ;;  %1148 = vst.msk [vmem:[#allocation2 + $0xec] sm:$0xf] %vm1088_vm3, %v1043_v14 }
 0x277   :  { %v2317_v32 = vmax.f32 %v2301_v31, %v2309_v3  ;;  %2288 = vst.msk [vmem:[#allocation3 + $0x20] sm:$0xff] %vm1683_vm5, %v2272_v5  ;;  %v770_v39 = vpop.f32.mrf.mxu0 }
 0x278   :  { %v771_v42 = vadd.f32 %v13534_v36, %v770_v39 }
 0x279   :  { %2325 = vst.msk [vmem:[#allocation4 + $0x8] sm:$0xff] %vm1683_vm5, %v2317_v32  ;;  %v2063_v21 = vpop.f32.mrf.mxu2 }
 0x27a   :  { %v940_v59 = vmax.f32 %v771_v42, 0.0  ;;  %9551 = vmatmul.msk.bf16.gmra.mxu0 %vm447_vm2, %v12303_v56  ;;  %v13867_v43 = vpop.f32.mrf.mxu3  ;;  %v2064_v53 = vadd.f32 %v2063_v21, %v13543_v50 }
 0x27c   :  { %v1044_v12 = vpack.c.bf16 %v940_v59, %v940_v59  ;;  %v2273_v20 = vadd.f32 %v13625_v22, %v2064_v53  ;;  %v13871_v30 = vpop.f32.mrf.mxu1 }
 0x27d   :  { %v13873_v63 = vld [vmem:[#allocation2 + $0xe8] sm:$0xff] }
 0x27e   :  { %v12450_v18 = vld [vmem:[#allocation2 + $0xe8] sm:$0xff]  ;;  %1149 = vst.msk [vmem:[#allocation2 + $0xf0] sm:$0xf] %vm1088_vm3, %v1044_v12  ;;  %10060 = vmatmul.msk.bf16.gmra.mxu2 %vm1314_vm4, %v13492_v62  ;;  %v12304_v62 = vld [vmem:[%s16270_s0 + $0x138] sm:$0xff] }
 0x27f   :  { %2289 = vst.msk [vmem:[#allocation3 + $0x28] sm:$0xff] %vm1683_vm5, %v2273_v20  ;;  %v772_v6 = vpop.f32.mrf.mxu0  ;;  %10326 = vmatmul.msk.bf16.gmra.mxu3 %vm1314_vm4, %v12450_v18  ;;  %10212 = vmatmul.msk.bf16.gmra.mxu1 %vm1314_vm4, %v13873_v63 }
 0x280   :  { %v773_v50 = vadd.f32 %v13534_v36, %v772_v6 }
 0x281   :  { %v2066_v46 = vpop.f32.mrf.mxu2 }
 0x282   :  { %v941_v22 = vmax.f32 %v773_v50, 0.0  ;;  %v13883_v45 = vpop.f32.mrf.mxu3  ;;  %v2067_v2 = vadd.f32 %v2066_v46, %v13560_v17  ;;  %v12440_v17 = vld [vmem:[%s16273_s3 + $0x28] sm:$0xff] }
 0x283   :  { %3202 = vmatpush.bf16.msra.mxu2 %v12440_v17 }
 0x284   :  { %v1045_v10 = vpack.c.bf16 %v941_v22, %v941_v22  ;;  %v2274_v49 = vadd.f32 %v13648_v55, %v2067_v2  ;;  %v13887_v14 = vpop.f32.mrf.mxu1  ;;  %v12480_v55 = vld [vmem:[%s16273_s3 + $0x38] sm:$0xff] }
 0x285   :  { %3684 = vmatpush.bf16.msra.mxu1 %v12480_v55 }
 0x286   :  { %v2302_v5 = vld [vmem:[#allocation3 + $0x20] ss:$2 sm:$0xff]  ;;  %v2310_v56 = vld [vmem:[#allocation3 + $0x21] ss:$2 sm:$0xff]  ;;  %1150 = vst.msk [vmem:[#allocation2 + $0xf4] sm:$0xf] %vm1088_vm3, %v1045_v10 }
 0x287   :  { %v2318_v31 = vmax.f32 %v2302_v5, %v2310_v56  ;;  %2290 = vst.msk [vmem:[#allocation3 + $0x30] sm:$0xff] %vm1683_vm5, %v2274_v49  ;;  %v775_v3 = vpop.f32.mrf.mxu0 }
 0x288   :  { %v776_v32 = vadd.f32 %v13534_v36, %v775_v3  ;;  %v12305_v3 = vld [vmem:[%s16270_s0 + $0x140] sm:$0xff] }
 0x289   :  { %2326 = vst.msk [vmem:[#allocation4 + $0x10] sm:$0xff] %vm1683_vm5, %v2318_v31  ;;  %v2068_v42 = vpop.f32.mrf.mxu2 }
 0x28a   :  { %v942_v39 = vmax.f32 %v776_v32, 0.0  ;;  %9552 = vmatmul.msk.bf16.gmra.mxu0 %vm447_vm2, %v12304_v62  ;;  %v13903_v33 = vpop.f32.mrf.mxu3  ;;  %v2069_v59 = vadd.f32 %v2068_v42, %v13576_v41  ;;  %v12822_v41 = vld [vmem:[#allocation9] ss:$0 sm:$0xff] }
 0x28c   :  { %v1046_v21 = vpack.c.bf16 %v942_v39, %v942_v39  ;;  %v2275_v53 = vadd.f32 %v13671_v29, %v2069_v59  ;;  %v13907_v12 = vpop.f32.mrf.mxu1  ;;  %v2332_v29 = vld [vmem:[#allocation4] sm:$0xff] }
 0x28d   :  { %v13909_v20 = vld [vmem:[#allocation2 + $0xf0] sm:$0xff] }
 0x28e   :  { %v12451_v18 = vld [vmem:[#allocation2 + $0xf0] sm:$0xff]  ;;  %1151 = vst.msk [vmem:[#allocation2 + $0xf8] sm:$0xf] %vm1088_vm3, %v1046_v21  ;;  %10061 = vmatmul.msk.bf16.gmra.mxu2 %vm1314_vm4, %v13527_v60 }
 0x28f   :  { %2291 = vst.msk [vmem:[#allocation3 + $0x38] sm:$0xff] %vm1683_vm5, %v2275_v53  ;;  %v777_v6 = vpop.f32.mrf.mxu0  ;;  %10327 = vmatmul.msk.bf16.gmra.mxu3 %vm1314_vm4, %v12451_v18  ;;  %10213 = vmatmul.msk.bf16.gmra.mxu1 %vm1314_vm4, %v13909_v20 }
 0x290   :  { %v778_v50 = vadd.f32 %v13534_v36, %v777_v6  ;;  %v2334_v22 = vld [vmem:[#allocation4 + $0x10] sm:$0xff] }
 0x291   :  { %v2336_v46 = vmax.f32 %v2332_v29, %v2334_v22  ;;  %v2071_v10 = vpop.f32.mrf.mxu2 }
 0x292   :  { %v943_v2 = vmax.f32 %v778_v50, 0.0  ;;  %v13919_v49 = vpop.f32.mrf.mxu3  ;;  %v2072_v62 = vadd.f32 %v2071_v10, %v13596_v26 }
 0x293   :  { %v2342_v5 = vadd.f32 %v12822_v41, %v2336_v46 }
 0x294   :  { %v1047_v56 = vpack.c.bf16 %v943_v2, %v943_v2  ;;  %v2276_v60 = vadd.f32 %v13691_v58, %v2072_v62  ;;  %v13923_v31 = vpop.f32.mrf.mxu1  ;;  %v12439_v58 = vld [vmem:[%s16273_s3 + $0x20] sm:$0xff]  ;;  %v2333_v62 = vld [vmem:[#allocation4 + $0x8] sm:$0xf] }
 0x295   :  { %v2344_v32 = vmax.f32 %v2342_v5, 0.0  ;;  %3203 = vmatpush.bf16.msra.mxu2 %v12439_v58 }
 0x296   :  { %v2303_v17 = vld [vmem:[#allocation3 + $0x30] ss:$2 sm:$0xff]  ;;  %v2311_v55 = vld [vmem:[#allocation3 + $0x31] ss:$2 sm:$0xff]  ;;  %1152 = vst.msk [vmem:[#allocation2 + $0xfc] sm:$0xf] %vm1088_vm3, %v1047_v56 }
 0x297   :  { %v2319_v39 = vmax.f32 %v2303_v17, %v2311_v55  ;;  %2292 = vst.msk [vmem:[#allocation3 + $0x40] sm:$0xff] %vm1683_vm5, %v2276_v60  ;;  %v780_v42 = vpop.f32.mrf.mxu0  ;;  %v2346_v26 = vpack.c.bf16 %v2344_v32, %v2344_v32  ;;  %v12437_v17 = vld [vmem:[%s16273_s3 + $0x10] sm:$0xff] }
 0x298   :  { %v781_v59 = vadd.f32 %v13534_v36, %v780_v42 }
 0x299   :  { %2327 = vst.msk [vmem:[#allocation4 + $0x18] sm:$0xff] %vm1683_vm5, %v2319_v39  ;;  %v2073_v53 = vpop.f32.mrf.mxu2 }
 0x29a   :  { %v944_v21 = vmax.f32 %v781_v59, 0.0  ;;  %9553 = vmatmul.msk.bf16.gmra.mxu0 %vm447_vm2, %v12305_v3  ;;  %v13936_v18 = vpop.f32.mrf.mxu3  ;;  %2348 = vst.msk [vmem:[%s16275_s5 + $0xc] sm:$0xf] %vm1763_vm6, %v2346_v26  ;;  %v2074_v6 = vadd.f32 %v2073_v53, %v13612_v48  ;;  %v12438_v48 = vld [vmem:[%s16273_s3 + $0x18] sm:$0xff]  ;;  %v12306_v59 = vld [vmem:[%s16270_s0 + $0x148] sm:$0xff] }
 0x29b   :  { %3204 = vmatpush.bf16.msra.mxu2 %v12438_v48 }
 0x29c   :  { %v1048_v50 = vpack.c.bf16 %v944_v21, %v944_v21  ;;  %v2277_v29 = vadd.f32 %v13711_v16, %v2074_v6  ;;  %v13944_v22 = vpop.f32.mrf.mxu1 }
 0x29d   :  { %v13946_v46 = vld [vmem:[#allocation2 + $0xf8] sm:$0xff] }
 0x29e   :  { %v12452_v2 = vld [vmem:[#allocation2 + $0xf8] sm:$0xff]  ;;  %1153 = vst.msk [vmem:[#allocation2 + $0x100] sm:$0xf] %vm1088_vm3, %v1048_v50  ;;  %10062 = vmatmul.msk.bf16.gmra.mxu2 %vm1314_vm4, %v13562_v23 }
 0x29f   :  { %2293 = vst.msk [vmem:[#allocation3 + $0x48] sm:$0xff] %vm1683_vm5, %v2277_v29  ;;  %v782_v10 = vpop.f32.mrf.mxu0  ;;  %10328 = vmatmul.msk.bf16.gmra.mxu3 %vm1314_vm4, %v12452_v2  ;;  %10214 = vmatmul.msk.bf16.gmra.mxu1 %vm1314_vm4, %v13946_v46  ;;  %v12479_v29 = vld [vmem:[%s16273_s3 + $0x30] sm:$0xff] }
 0x2a0   :  { %v783_v16 = vadd.f32 %v13534_v36, %v782_v10  ;;  %v2335_v5 = vld [vmem:[#allocation4 + $0x18] sm:$0xf]  ;;  %3205 = vmatpush.bf16.msra.mxu2 %v12437_v17  ;;  %3685 = vmatpush.bf16.msra.mxu1 %v12479_v29 }
 0x2a1   :  { %v2337_v56 = vmax.f32 %v2333_v62, %v2335_v5  ;;  %v2076_v3 = vpop.f32.mrf.mxu2  ;;  %v12435_v62 = vld [vmem:[%s16273_s3] sm:$0xff] }
 0x2a2   :  { %v945_v60 = vmax.f32 %v783_v16, 0.0  ;;  %v13959_v32 = vpop.f32.mrf.mxu3  ;;  %v2077_v23 = vadd.f32 %v2076_v3, %v13633_v40 }
 0x2a3   :  { %v2343_v55 = vadd.f32 %v12822_v41, %v2337_v56 }
 0x2a4   :  { %v1049_v39 = vpack.c.bf16 %v945_v60, %v945_v60  ;;  %v2278_v42 = vadd.f32 %v13730_v44, %v2077_v23  ;;  %v13966_v26 = vpop.f32.mrf.mxu1  ;;  %v12436_v44 = vld [vmem:[%s16273_s3 + $0x8] sm:$0xff] }
 0x2a5   :  { %v2345_v58 = vmax.f32 %v2343_v55, 0.0  ;;  %3206 = vmatpush.bf16.msra.mxu2 %v12436_v44  ;;  %v14016_v44 = vld [vmem:[#allocation7] ss:$0 sm:$0xff] }
 0x2a6   :  { %v2304_v21 = vld [vmem:[#allocation3 + $0x40] ss:$2 sm:$0xff]  ;;  %v2312_v53 = vld [vmem:[#allocation3 + $0x41] ss:$2 sm:$0xff]  ;;  %1154 = vst.msk [vmem:[#allocation2 + $0x104] sm:$0xf] %vm1088_vm3, %v1049_v39 }
 0x2a7   :  { %v2320_v40 = vmax.f32 %v2304_v21, %v2312_v53  ;;  %2294 = vst.msk [vmem:[#allocation3 + $0x50] sm:$0xff] %vm1683_vm5, %v2278_v42  ;;  %v785_v6 = vpop.f32.mrf.mxu0  ;;  %v2347_v41 = vpack.c.bf16 %v2345_v58, %v2345_v58 }
 0x2a8   :  { %v786_v50 = vadd.f32 %v13534_v36, %v785_v6 }
 0x2a9   :  { %2328 = vst.msk [vmem:[#allocation4 + $0x20] sm:$0xff] %vm1683_vm5, %v2320_v40  ;;  %v2078_v10 = vpop.f32.mrf.mxu2  ;;  %3207 = vmatpush.bf16.msra.mxu2 %v12435_v62 }
 0x2aa   :  { %v946_v2 = vmax.f32 %v786_v50, 0.0  ;;  %9554 = vmatmul.msk.bf16.gmra.mxu0 %vm447_vm2, %v12306_v59  ;;  %v13982_v48 = vpop.f32.mrf.mxu3  ;;  %2349 = vst.msk [vmem:[%s16275_s5 + $0x10] sm:$0x3] %vm1765_vm7, %v2347_v41  ;;  %v2079_v16 = vadd.f32 %v2078_v10, %v13655_v61  ;;  %v12520_v41 = vld [vmem:[%s16273_s3 + $0x58] sm:$0xff] }
 0x2ab   :  { %4259 = vmatpush.bf16.msrb.mxu1 %v12520_v41 }
 0x2ac   :  { %v1050_v5 = vpack.c.bf16 %v946_v2, %v946_v2  ;;  %v2279_v56 = vadd.f32 %v13753_v19, %v2079_v16  ;;  %v13993_v60 = vpop.f32.mrf.mxu1  ;;  %v12497_v16 = vld [vmem:[%s16273_s3 + $0x80] sm:$0xff] }
 0x2ad   :  { %v12441_v3 = vld [vmem:[#allocation2 + $0x100] sm:$0xff] }
 0x2ae   :  { %v12453_v23 = vld [vmem:[#allocation2 + $0x100] sm:$0xff]  ;;  %1155 = vst.msk [vmem:[#allocation2 + $0x108] sm:$0xf] %vm1088_vm3, %v1050_v5  ;;  %10063 = vmatmul.msk.bf16.gmra.mxu2 %vm1314_vm4, %v13598_v51  ;;  %v12307_v51 = vld [vmem:[%s16270_s0 + $0x150] sm:$0xff] }
 0x2af   :  { %2295 = vst.msk [vmem:[#allocation3 + $0x58] sm:$0xff] %vm1683_vm5, %v2279_v56  ;;  %v787_v17 = vpop.f32.mrf.mxu0  ;;  %10329 = vmatmul.msk.bf16.gmra.mxu3 %vm1314_vm4, %v12453_v23  ;;  %10215 = vmatmul.msk.bf16.gmra.mxu1 %vm1314_vm4, %v12441_v3 }
 0x2b0   :  { %v788_v61 = vadd.f32 %v13534_v36, %v787_v17 }
 0x2b1   :  { %v2081_v55 = vpop.f32.mrf.mxu2 }
 0x2b2   :  { %v947_v19 = vmax.f32 %v788_v61, 0.0  ;;  %v14002_v39 = vpop.f32.mrf.mxu3  ;;  %v2082_v42 = vadd.f32 %v2081_v55, %v13682_v13  ;;  %v12498_v13 = vld [vmem:[%s16273_s3 + $0x88] sm:$0xff] }
 0x2b3   :  { %3958 = vmatpush.bf16.msrb.mxu3 %v12498_v13  ;;  %v12494_v13 = vld [vmem:[%s16273_s3 + $0x68] sm:$0xff] }
 0x2b4   :  { %v1051_v59 = vpack.c.bf16 %v947_v19, %v947_v19  ;;  %v2280_v58 = vadd.f32 %v13771_v7, %v2082_v42  ;;  %v14006_v21 = vpop.f32.mrf.mxu1 }
 0x2b6   :  { %v2305_v53 = vld [vmem:[#allocation3 + $0x50] ss:$2 sm:$0xff]  ;;  %v2313_v40 = vld [vmem:[#allocation3 + $0x51] ss:$2 sm:$0xff]  ;;  %1156 = vst.msk [vmem:[#allocation2 + $0x10c] sm:$0xf] %vm1088_vm3, %v1051_v59 }
 0x2b7   :  { %v2321_v36 = vmax.f32 %v2305_v53, %v2313_v40  ;;  %2296 = vst.msk [vmem:[#allocation3 + $0x60] sm:$0xff] %vm1683_vm5, %v2280_v58  ;;  %v790_v6 = vpop.f32.mrf.mxu0  ;;  %3959 = vmatpush.bf16.msrb.mxu3 %v12497_v16  ;;  %v12308_v53 = vld [vmem:[%s16270_s0 + $0x158] sm:$0xff]  ;;  %v12493_v16 = vld [vmem:[%s16273_s3 + $0x60] sm:$0xff] }
 0x2b8   :  { %v791_v7 = vadd.f32 %v14016_v44, %v790_v6 }
 0x2b9   :  { %2329 = vst.msk [vmem:[#allocation4 + $0x28] sm:$0xff] %vm1683_vm5, %v2321_v36  ;;  %v2083_v29 = vpop.f32.mrf.mxu2 }
 0x2ba   :  { %v948_v50 = vmax.f32 %v791_v7, 0.0  ;;  %9555 = vmatmul.msk.bf16.gmra.mxu0 %vm447_vm2, %v12307_v51  ;;  %v14024_v2 = vpop.f32.mrf.mxu3  ;;  %v2084_v10 = vadd.f32 %v2083_v29, %v13695_v0  ;;  %v12496_v0 = vld [vmem:[%s16273_s3 + $0x78] sm:$0xff]  ;;  %v12519_v7 = vld [vmem:[%s16273_s3 + $0x50] sm:$0xff] }
 0x2bb   :  { %3960 = vmatpush.bf16.msrb.mxu3 %v12496_v0  ;;  %4260 = vmatpush.bf16.msrb.mxu1 %v12519_v7 }
 0x2bc   :  { %v1052_v62 = vpack.c.bf16 %v948_v50, %v948_v50  ;;  %v2281_v5 = vadd.f32 %v13785_v52, %v2084_v10  ;;  %v14031_v56 = vpop.f32.mrf.mxu1 }
 0x2bd   :  { %v12442_v3 = vld [vmem:[#allocation2 + $0x108] sm:$0xff] }
 0x2be   :  { %v12454_v23 = vld [vmem:[#allocation2 + $0x108] sm:$0xff]  ;;  %1157 = vst.msk [vmem:[#allocation2 + $0x110] sm:$0xf] %vm1088_vm3, %v1052_v62  ;;  %10064 = vmatmul.msk.bf16.gmra.mxu2 %vm1314_vm4, %v13635_v57  ;;  %v12495_v57 = vld [vmem:[%s16273_s3 + $0x70] sm:$0xff] }
 0x2bf   :  { %2297 = vst.msk [vmem:[#allocation3 + $0x68] sm:$0xff] %vm1683_vm5, %v2281_v5  ;;  %v792_v17 = vpop.f32.mrf.mxu0  ;;  %10330 = vmatmul.msk.bf16.gmra.mxu3 %vm1314_vm4, %v12454_v23  ;;  %10216 = vmatmul.msk.bf16.gmra.mxu1 %vm1314_vm4, %v12442_v3  ;;  %v12427_v23 = vld [vmem:[#allocation2 + $0xc0] sm:$0xff] }
 0x2c0   :  { %v793_v52 = vadd.f32 %v14016_v44, %v792_v17  ;;  %3961 = vmatpush.bf16.msrb.mxu3 %v12495_v57 }
 0x2c1   :  { %v2086_v19 = vpop.f32.mrf.mxu2 }
 0x2c2   :  { %v949_v61 = vmax.f32 %v793_v52, 0.0  ;;  %v14043_v55 = vpop.f32.mrf.mxu3  ;;  %v2087_v42 = vadd.f32 %v2086_v19, %v13718_v37  ;;  %v12823_v52 = vld [vmem:[#allocation9] ss:$0 sm:$0xff] }
 0x2c4   :  { %v1053_v59 = vpack.c.bf16 %v949_v61, %v949_v61  ;;  %v2282_v58 = vadd.f32 %v13804_v47, %v2087_v42  ;;  %v14050_v51 = vpop.f32.mrf.mxu1  ;;  %3962 = vmatpush.bf16.msrb.mxu3 %v12494_v13  ;;  %v12309_v13 = vld [vmem:[%s16270_s0 + $0x160] sm:$0xff] }
 0x2c6   :  { %v2306_v40 = vld [vmem:[#allocation3 + $0x60] ss:$2 sm:$0xff]  ;;  %v2314_v36 = vld [vmem:[#allocation3 + $0x61] ss:$2 sm:$0xff]  ;;  %1158 = vst.msk [vmem:[#allocation2 + $0x114] sm:$0xf] %vm1088_vm3, %v1053_v59 }
 0x2c7   :  { %v2322_v6 = vmax.f32 %v2306_v40, %v2314_v36  ;;  %2298 = vst.msk [vmem:[#allocation3 + $0x70] sm:$0xff] %vm1683_vm5, %v2282_v58  ;;  %v795_v37 = vpop.f32.mrf.mxu0 }
 0x2c8   :  { %v796_v47 = vadd.f32 %v14016_v44, %v795_v37  ;;  %3963 = vmatpush.bf16.msrb.mxu3 %v12493_v16 }
 0x2c9   :  { %2330 = vst.msk [vmem:[#allocation4 + $0x30] sm:$0xff] %vm1683_vm5, %v2322_v6  ;;  %v2088_v50 = vpop.f32.mrf.mxu2 }
 0x2ca   :  { %v950_v41 = vmax.f32 %v796_v47, 0.0  ;;  %9556 = vmatmul.msk.bf16.gmra.mxu0 %vm447_vm2, %v12308_v53  ;;  %v14066_v29 = vpop.f32.mrf.mxu3  ;;  %v2089_v10 = vadd.f32 %v2088_v50, %v13737_v35 }
 0x2cc   :  { %v1054_v62 = vpack.c.bf16 %v950_v41, %v950_v41  ;;  %v2283_v5 = vadd.f32 %v13828_v11, %v2089_v10  ;;  %v14073_v3 = vpop.f32.mrf.mxu1  ;;  %v2350_v11 = vld [vmem:[#allocation4 + $0x20] sm:$0xff] }
 0x2cd   :  { %v12455_v17 = vld [vmem:[#allocation2 + $0x110] sm:$0xff] }
 0x2ce   :  { %v14075_v0 = vld [vmem:[#allocation2 + $0x110] sm:$0xff]  ;;  %1159 = vst.msk [vmem:[#allocation2 + $0x118] sm:$0xf] %vm1088_vm3, %v1054_v62  ;;  %10249 = vmatmul.msk.bf16.vlgmr.msra.gmra.mxu2 %vm1314_vm4, %v12427_v23 }
 0x2cf   :  { %2299 = vst.msk [vmem:[#allocation3 + $0x78] sm:$0xff] %vm1683_vm5, %v2283_v5  ;;  %v797_v35 = vpop.f32.mrf.mxu0  ;;  %10331 = vmatmul.msk.bf16.gmra.mxu3 %vm1314_vm4, %v12455_v17  ;;  %10401 = vmatmul.msk.bf16.vlgmr.msra.gmra.mxu1 %vm1314_vm4, %v14075_v0 }
 0x2d0   :  { %v798_v61 = vadd.f32 %v14016_v44, %v797_v35  ;;  %v2352_v19 = vld [vmem:[#allocation4 + $0x30] sm:$0xff] }
 0x2d1   :  { %v2354_v42 = vmax.f32 %v2350_v11, %v2352_v19  ;;  %v2630_v59 = vpop.f32.mrf.mxu2  ;;  %v12428_v19 = vld [vmem:[#allocation2 + $0xc8] sm:$0xff] }
 0x2d2   :  { %v951_v57 = vmax.f32 %v798_v61, 0.0  ;;  %v14084_v58 = vpop.f32.mrf.mxu3  ;;  %v2631_v53 = vadd.f32 %v2630_v59, %v13760_v8 }
 0x2d3   :  { %v2360_v40 = vadd.f32 %v12823_v52, %v2354_v42 }
 0x2d4   :  { %v1055_v36 = vpack.c.bf16 %v951_v57, %v951_v57  ;;  %v2847_v6 = vadd.f32 %v13850_v27, %v2631_v53  ;;  %v14088_v37 = vpop.f32.mrf.mxu1 }
 0x2d5   :  { %v2362_v47 = vmax.f32 %v2360_v40, 0.0 }
 0x2d6   :  { %v2307_v7 = vld [vmem:[#allocation3 + $0x70] ss:$2 sm:$0xff]  ;;  %v2315_v41 = vld [vmem:[#allocation3 + $0x71] ss:$2 sm:$0xff]  ;;  %1160 = vst.msk [vmem:[#allocation2 + $0x11c] sm:$0xf] %vm1088_vm3, %v1055_v36 }
 0x2d7   :  { %v2323_v50 = vmax.f32 %v2307_v7, %v2315_v41  ;;  %2863 = vst.msk [vmem:[#allocation3] sm:$0xff] %vm1683_vm5, %v2847_v6  ;;  %v800_v10 = vpop.f32.mrf.mxu0  ;;  %v2364_v8 = vpack.c.bf16 %v2362_v47, %v2362_v47 }
 0x2d8   :  { %v801_v16 = vadd.f32 %v14016_v44, %v800_v10 }
 0x2d9   :  { %2331 = vst.msk [vmem:[#allocation4 + $0x38] sm:$0xff] %vm1683_vm5, %v2323_v50  ;;  %v2368_v27 = vrot.slane %v2364_v8, 6  ;;  %v2632_v5 = vpop.f32.mrf.mxu2  ;;  %v12310_v8 = vld [vmem:[%s16270_s0 + $0x168] sm:$0xff] }
 0x2da   :  { %v952_v62 = vmax.f32 %v801_v16, 0.0  ;;  %9557 = vmatmul.msk.bf16.gmra.mxu0 %vm447_vm2, %v12309_v13  ;;  %v14098_v23 = vpop.f32.mrf.mxu3  ;;  %v2633_v17 = vadd.f32 %v2632_v5, %v13775_v9 }
 0x2db   :  { %2374 = vst.msk [vmem:[%s16275_s5 + $0x10] sm:$0xc] %vm1794_vm8, %v2368_v27 }
 0x2dc   :  { %v1056_v35 = vpack.c.bf16 %v952_v62, %v952_v62  ;;  %v2848_v61 = vadd.f32 %v13867_v43, %v2633_v17  ;;  %v14106_v11 = vpop.f32.mrf.mxu1  ;;  %v2351_v43 = vld [vmem:[#allocation4 + $0x28] sm:$0xf] }
 0x2dd   :  { %v12456_v42 = vld [vmem:[#allocation2 + $0x118] sm:$0xff] }
 0x2de   :  { %v14108_v57 = vld [vmem:[#allocation2 + $0x118] sm:$0xff]  ;;  %1161 = vst.msk [vmem:[#allocation2 + $0x120] sm:$0xf] %vm1088_vm3, %v1056_v35  ;;  %10250 = vmatmul.msk.bf16.gmra.mxu2 %vm1314_vm4, %v12428_v19 }
 0x2df   :  { %2864 = vst.msk [vmem:[#allocation3 + $0x8] sm:$0xff] %vm1683_vm5, %v2848_v61  ;;  %v802_v59 = vpop.f32.mrf.mxu0  ;;  %10332 = vmatmul.msk.bf16.gmra.mxu3 %vm1314_vm4, %v12456_v42  ;;  %10402 = vmatmul.msk.bf16.gmra.mxu1 %vm1314_vm4, %v14108_v57  ;;  %v2369_v61 = vrot.slane %v2368_v27, 4 }
 0x2e0   :  { %v803_v9 = vadd.f32 %v14016_v44, %v802_v59  ;;  %v2353_v53 = vld [vmem:[#allocation4 + $0x38] sm:$0xf] }
 0x2e1   :  { %v2355_v40 = vmax.f32 %v2351_v43, %v2353_v53  ;;  %v2635_v6 = vpop.f32.mrf.mxu2 }
 0x2e2   :  { %v953_v36 = vmax.f32 %v803_v9, 0.0  ;;  %v14117_v13 = vpop.f32.mrf.mxu3  ;;  %v2636_v47 = vadd.f32 %v2635_v6, %v13793_v24 }
 0x2e3   :  { %v2361_v7 = vadd.f32 %v12823_v52, %v2355_v40 }
 0x2e4   :  { %v1057_v41 = vpack.c.bf16 %v953_v36, %v953_v36  ;;  %v2849_v50 = vadd.f32 %v13883_v45, %v2636_v47  ;;  %v14121_v10 = vpop.f32.mrf.mxu1  ;;  %v12518_v45 = vld [vmem:[%s16273_s3 + $0x48] sm:$0xff] }
 0x2e5   :  { %v2363_v16 = vmax.f32 %v2361_v7, 0.0  ;;  %4261 = vmatpush.bf16.msrb.mxu1 %v12518_v45  ;;  %v12517_v45 = vld [vmem:[%s16273_s3 + $0x40] sm:$0xff] }
 0x2e6   :  { %v2879_v62 = vld [vmem:[#allocation3] ss:$2 sm:$0xff]  ;;  %v2887_v5 = vld [vmem:[#allocation3 + $0x1] ss:$2 sm:$0xff]  ;;  %1162 = vst.msk [vmem:[#allocation2 + $0x124] sm:$0xf] %vm1088_vm3, %v1057_v41 }
 0x2e7   :  { %v2895_v17 = vmax.f32 %v2879_v62, %v2887_v5  ;;  %2865 = vst.msk [vmem:[#allocation3 + $0x10] sm:$0xff] %vm1683_vm5, %v2849_v50  ;;  %v805_v35 = vpop.f32.mrf.mxu0  ;;  %v2365_v24 = vpack.c.bf16 %v2363_v16, %v2363_v16 }
 0x2e8   :  { %v806_v52 = vadd.f32 %v14016_v44, %v805_v35 }
 0x2e9   :  { %2903 = vst.msk [vmem:[#allocation4] sm:$0xff] %vm1683_vm5, %v2895_v17  ;;  %v2370_v19 = vrot.slane %v2365_v24, 6  ;;  %v2637_v59 = vpop.f32.mrf.mxu2  ;;  %4262 = vmatpush.bf16.msrb.mxu1 %v12517_v45 }
 0x2ea   :  { %v954_v42 = vmax.f32 %v806_v52, 0.0  ;;  %9558 = vmatmul.msk.bf16.gmra.mxu0 %vm447_vm2, %v12310_v8  ;;  %v2638_v9 = vadd.f32 %v2637_v59, %v13808_v1  ;;  %v14137_v40 = vpop.f32.mrf.mxu3 }
 0x2eb   :  { %v2371_v43 = vsel %vm13816_vm11, %v2369_v61, %v2370_v19 }
 0x2ec   :  { %v1058_v53 = vpack.c.bf16 %v954_v42, %v954_v42  ;;  %2375 = vst.msk [vmem:[%s16275_s5 + $0x14] sm:$0xf] %vm1763_vm6, %v2371_v43  ;;  %v2850_v27 = vadd.f32 %v13903_v33, %v2638_v9  ;;  %v14144_v36 = vpop.f32.mrf.mxu1 }
 0x2ed   :  { %v14146_v6 = vld [vmem:[#allocation2 + $0x120] sm:$0xff] }
 0x2ee   :  { %v12485_v47 = vld [vmem:[#allocation2 + $0x120] sm:$0xff]  ;;  %1163 = vst.msk [vmem:[#allocation2 + $0x128] sm:$0xf] %vm1088_vm3, %v1058_v53  ;;  %10251 = vmatmul.msk.bf16.gmra.mxu2 %vm1314_vm4, %v13762_v28  ;;  %v12311_v28 = vld [vmem:[%s16270_s0 + $0x170] sm:$0xff] }
 0x2ef   :  { %2866 = vst.msk [vmem:[#allocation3 + $0x18] sm:$0xff] %vm1683_vm5, %v2850_v27  ;;  %v807_v1 = vpop.f32.mrf.mxu0  ;;  %10517 = vmatmul.msk.bf16.vlgmr.msrb.gmra.mxu3 %vm1314_vm4, %v12485_v47  ;;  %10403 = vmatmul.msk.bf16.gmra.mxu1 %vm1314_vm4, %v14146_v6 }
 0x2f0   :  { %v808_v7 = vadd.f32 %v14016_v44, %v807_v1 }
 0x2f1   :  { %v2640_v41 = vpop.f32.mrf.mxu2 }
 0x2f2   :  { %v955_v33 = vmax.f32 %v808_v7, 0.0  ;;  %v2641_v50 = vadd.f32 %v2640_v41, %v13838_v54  ;;  %v14164_v35 = vpop.f32.mrf.mxu3 }
 0x2f4   :  { %v1059_v8 = vpack.c.bf16 %v955_v33, %v955_v33  ;;  %v2851_v16 = vadd.f32 %v13919_v49, %v2641_v50  ;;  %v14158_v62 = vpop.f32.mrf.mxu1  ;;  %v12621_v49 = vld [vmem:[%s16273_s3 + $0x70] sm:$0xff] }
 0x2f5   :  { %6243 = vmatpush.bf16.msrb.mxu0 %v12621_v49 }
 0x2f6   :  { %v2880_v5 = vld [vmem:[#allocation3 + $0x10] ss:$2 sm:$0xff]  ;;  %v2888_v17 = vld [vmem:[#allocation3 + $0x11] ss:$2 sm:$0xff]  ;;  %1164 = vst.msk [vmem:[#allocation2 + $0x12c] sm:$0xf] %vm1088_vm3, %v1059_v8 }
 0x2f7   :  { %v2896_v24 = vmax.f32 %v2880_v5, %v2888_v17  ;;  %2867 = vst.msk [vmem:[#allocation3 + $0x20] sm:$0xff] %vm1683_vm5, %v2851_v16  ;;  %v810_v52 = vpop.f32.mrf.mxu0 }
 0x2f8   :  { %v811_v54 = vadd.f32 %v14016_v44, %v810_v52 }
 0x2f9   :  { %2904 = vst.msk [vmem:[#allocation4 + $0x8] sm:$0xff] %vm1683_vm5, %v2896_v24  ;;  %v2642_v19 = vpop.f32.mrf.mxu2 }
 0x2fa   :  { %v956_v61 = vmax.f32 %v811_v54, 0.0  ;;  %9559 = vmatmul.msk.bf16.gmra.mxu0 %vm447_vm2, %v12311_v28  ;;  %v2643_v42 = vadd.f32 %v2642_v19, %v13854_v15  ;;  %v14187_v15 = vpop.f32.mrf.mxu3 }
 0x2fc   :  { %v1060_v59 = vpack.c.bf16 %v956_v61, %v956_v61  ;;  %v2852_v9 = vadd.f32 %v13936_v18, %v2643_v42  ;;  %v14178_v43 = vpop.f32.mrf.mxu1 }
 0x2fd   :  { %v14180_v53 = vld [vmem:[#allocation2 + $0x128] sm:$0xff] }
 0x2fe   :  { %v12486_v27 = vld [vmem:[#allocation2 + $0x128] sm:$0xff]  ;;  %1165 = vst.msk [vmem:[#allocation2 + $0x130] sm:$0xf] %vm1088_vm3, %v1060_v59  ;;  %10252 = vmatmul.msk.bf16.gmra.mxu2 %vm1314_vm4, %v13795_v34  ;;  %v12312_v34 = vld [vmem:[%s16270_s0 + $0x178] sm:$0xff] }
 0x2ff   :  { %2868 = vst.msk [vmem:[#allocation3 + $0x28] sm:$0xff] %vm1683_vm5, %v2852_v9  ;;  %v812_v47 = vpop.f32.mrf.mxu0  ;;  %10518 = vmatmul.msk.bf16.gmra.mxu3 %vm1314_vm4, %v12486_v27  ;;  %10404 = vmatmul.msk.bf16.gmra.mxu1 %vm1314_vm4, %v14180_v53 }
 0x300   :  { %v813_v1 = vadd.f32 %v14016_v44, %v812_v47 }
 0x301   :  { %v2645_v7 = vpop.f32.mrf.mxu2 }
 0x302   :  { %v957_v18 = vmax.f32 %v813_v1, 0.0  ;;  %v2646_v33 = vadd.f32 %v2645_v7, %v13871_v30  ;;  %v12476_v30 = vld [vmem:[%s16273_s3 + $0x28] sm:$0xff]  ;;  %v14209_v52 = vpop.f32.mrf.mxu3 }
 0x303   :  { %3781 = vmatpush.bf16.msrb.mxu2 %v12476_v30 }
 0x304   :  { %v1061_v41 = vpack.c.bf16 %v957_v18, %v957_v18  ;;  %v2853_v50 = vadd.f32 %v13959_v32, %v2646_v33  ;;  %v14194_v8 = vpop.f32.mrf.mxu1  ;;  %v12516_v32 = vld [vmem:[%s16273_s3 + $0x38] sm:$0xff] }
 0x305   :  { %4263 = vmatpush.bf16.msrb.mxu1 %v12516_v32 }
 0x306   :  { %v2881_v16 = vld [vmem:[#allocation3 + $0x20] ss:$2 sm:$0xff]  ;;  %v2889_v28 = vld [vmem:[#allocation3 + $0x21] ss:$2 sm:$0xff]  ;;  %1166 = vst.msk [vmem:[#allocation2 + $0x134] sm:$0xf] %vm1088_vm3, %v1061_v41 }
 0x307   :  { %v2897_v5 = vmax.f32 %v2881_v16, %v2889_v28  ;;  %2869 = vst.msk [vmem:[#allocation3 + $0x30] sm:$0xff] %vm1683_vm5, %v2853_v50  ;;  %v815_v17 = vpop.f32.mrf.mxu0 }
 0x308   :  { %v816_v24 = vadd.f32 %v14016_v44, %v815_v17 }
 0x309   :  { %2905 = vst.msk [vmem:[#allocation4 + $0x10] sm:$0xff] %vm1683_vm5, %v2897_v5  ;;  %v2647_v49 = vpop.f32.mrf.mxu2  ;;  %v12313_v5 = vld [vmem:[%s16270_s0 + $0x180] sm:$0xff] }
 0x30a   :  { %v958_v54 = vmax.f32 %v816_v24, 0.0  ;;  %9560 = vmatmul.msk.bf16.gmra.mxu0 %vm447_vm2, %v12312_v34  ;;  %v2648_v45 = vadd.f32 %v2647_v49, %v13887_v14  ;;  %v12824_v14 = vld [vmem:[#allocation9] ss:$0 sm:$0xff]  ;;  %v14227_v34 = vpop.f32.mrf.mxu3 }
 0x30c   :  { %v1062_v61 = vpack.c.bf16 %v958_v54, %v958_v54  ;;  %v2854_v19 = vadd.f32 %v13982_v48, %v2648_v45  ;;  %v14214_v42 = vpop.f32.mrf.mxu1  ;;  %v2911_v48 = vld [vmem:[#allocation4] sm:$0xff] }
 0x30d   :  { %v14216_v59 = vld [vmem:[#allocation2 + $0x130] sm:$0xff] }
 0x30e   :  { %v12487_v9 = vld [vmem:[#allocation2 + $0x130] sm:$0xff]  ;;  %1167 = vst.msk [vmem:[#allocation2 + $0x138] sm:$0xf] %vm1088_vm3, %v1062_v61  ;;  %10253 = vmatmul.msk.bf16.gmra.mxu2 %vm1314_vm4, %v13840_v25 }
 0x30f   :  { %2870 = vst.msk [vmem:[#allocation3 + $0x38] sm:$0xff] %vm1683_vm5, %v2854_v19  ;;  %v817_v27 = vpop.f32.mrf.mxu0  ;;  %10519 = vmatmul.msk.bf16.gmra.mxu3 %vm1314_vm4, %v12487_v9  ;;  %10405 = vmatmul.msk.bf16.gmra.mxu1 %vm1314_vm4, %v14216_v59 }
 0x310   :  { %v818_v47 = vadd.f32 %v14016_v44, %v817_v27  ;;  %v2913_v1 = vld [vmem:[#allocation4 + $0x10] sm:$0xff] }
 0x311   :  { %v2915_v18 = vmax.f32 %v2911_v48, %v2913_v1  ;;  %v2650_v33 = vpop.f32.mrf.mxu2 }
 0x312   :  { %v959_v7 = vmax.f32 %v818_v47, 0.0  ;;  %v2651_v41 = vadd.f32 %v2650_v33, %v13907_v12  ;;  %v2912_v33 = vld [vmem:[#allocation4 + $0x8] sm:$0xf] }
 0x313   :  { %v2921_v50 = vadd.f32 %v12824_v14, %v2915_v18  ;;  %v14253_v18 = vpop.f32.mrf.mxu3 }
 0x314   :  { %v1063_v16 = vpack.c.bf16 %v959_v7, %v959_v7  ;;  %v2855_v25 = vadd.f32 %v14002_v39, %v2651_v41  ;;  %v14230_v28 = vpop.f32.mrf.mxu1  ;;  %v12475_v39 = vld [vmem:[%s16273_s3 + $0x20] sm:$0xff] }
 0x315   :  { %v2923_v17 = vmax.f32 %v2921_v50, 0.0  ;;  %3782 = vmatpush.bf16.msrb.mxu2 %v12475_v39  ;;  %v11035_v50 = vld [vmem:[#allocation5 + $0x8] sm:$0xf] }
 0x316   :  { %v2882_v24 = vld [vmem:[#allocation3 + $0x30] ss:$2 sm:$0xff]  ;;  %v2890_v30 = vld [vmem:[#allocation3 + $0x31] ss:$2 sm:$0xff]  ;;  %1168 = vst.msk [vmem:[#allocation2 + $0x13c] sm:$0xf] %vm1088_vm3, %v1063_v16 }
 0x317   :  { %v2898_v32 = vmax.f32 %v2882_v24, %v2890_v30  ;;  %2871 = vst.msk [vmem:[#allocation3 + $0x40] sm:$0xff] %vm1683_vm5, %v2855_v25  ;;  %v820_v12 = vpop.f32.mrf.mxu0  ;;  %v2925_v54 = vpack.c.bf16 %v2923_v17, %v2923_v17  ;;  %v12588_v16 = vld [vmem:[#allocation5 + $0x8] sm:$0x30]  ;;  %v12473_v24 = vld [vmem:[%s16273_s3 + $0x10] sm:$0xff] }
 0x318   :  { %v821_v49 = vadd.f32 %v14016_v44, %v820_v12  ;;  %v12314_v39 = vld [vmem:[%s16270_s0 + $0x188] sm:$0xff] }
 0x319   :  { %2906 = vst.msk [vmem:[#allocation4 + $0x18] sm:$0xff] %vm1683_vm5, %v2898_v32  ;;  %v2652_v61 = vpop.f32.mrf.mxu2  ;;  %v11036_v32 = vor.u32 %v12588_v16, %v11035_v50 }
 0x31a   :  { %v960_v45 = vmax.f32 %v821_v49, 0.0  ;;  %9561 = vmatmul.msk.bf16.gmra.mxu0 %vm447_vm2, %v12313_v5  ;;  %2927 = vst.msk [vmem:[%s16275_s5 + $0x18] sm:$0xf] %vm1763_vm6, %v2925_v54  ;;  %v2653_v19 = vadd.f32 %v2652_v61, %v13923_v31  ;;  %v12474_v31 = vld [vmem:[%s16273_s3 + $0x18] sm:$0xff] }
 0x31b   :  { %3783 = vmatpush.bf16.msrb.mxu2 %v12474_v31  ;;  %v12515_v31 = vld [vmem:[%s16273_s3 + $0x30] sm:$0xff] }
 0x31c   :  { %v1064_v9 = vpack.c.bf16 %v960_v45, %v960_v45  ;;  %v2856_v27 = vadd.f32 %v14024_v2, %v2653_v19  ;;  %v14249_v47 = vpop.f32.mrf.mxu1  ;;  %4264 = vmatpush.bf16.msrb.mxu1 %v12515_v31 }
 0x31d   :  { %v14251_v48 = vld [vmem:[#allocation2 + $0x138] sm:$0xff] }
 0x31e   :  { %v12488_v1 = vld [vmem:[#allocation2 + $0x138] sm:$0xff]  ;;  %1169 = vst.msk [vmem:[#allocation2 + $0x140] sm:$0xf] %vm1088_vm3, %v1064_v9  ;;  %10254 = vmatmul.msk.bf16.gmra.mxu2 %vm1314_vm4, %v13873_v63 }
 0x31f   :  { %2872 = vst.msk [vmem:[#allocation3 + $0x48] sm:$0xff] %vm1683_vm5, %v2856_v27  ;;  %v822_v7 = vpop.f32.mrf.mxu0  ;;  %10520 = vmatmul.msk.bf16.gmra.mxu3 %vm1314_vm4, %v12488_v1  ;;  %10406 = vmatmul.msk.bf16.gmra.mxu1 %vm1314_vm4, %v14251_v48  ;;  %v5233_v27 = vand.u32 %v11036_v32, %v12972_v4  ;;  %v14282_v1 = vpop.f32.mrf.mxu3 }
 0x320   :  { %v823_v2 = vadd.f32 %v14016_v44, %v822_v7  ;;  %v2914_v41 = vld [vmem:[#allocation4 + $0x18] sm:$0xf]  ;;  %3784 = vmatpush.bf16.msrb.mxu2 %v12473_v24 }
 0x321   :  { %v2916_v25 = vmax.f32 %v2912_v33, %v2914_v41  ;;  %v2655_v17 = vpop.f32.mrf.mxu2  ;;  %v12471_v41 = vld [vmem:[%s16273_s3] sm:$0xff]  ;;  %5241 = vmatpush.bf16.msra.mxu1 %v5233_v27 }
 0x322   :  { %v961_v5 = vmax.f32 %v823_v2, 0.0  ;;  %v2656_v63 = vadd.f32 %v2655_v17, %v13944_v22  ;;  %v12533_v27 = vld [vmem:[%s16273_s3 + $0x80] sm:$0xff] }
 0x323   :  { %v2922_v30 = vadd.f32 %v12824_v14, %v2916_v25 }
 0x324   :  { %v1065_v12 = vpack.c.bf16 %v961_v5, %v961_v5  ;;  %v2857_v54 = vadd.f32 %v14043_v55, %v2656_v63  ;;  %v14271_v49 = vpop.f32.mrf.mxu1  ;;  %v12472_v55 = vld [vmem:[%s16273_s3 + $0x8] sm:$0xff] }
 0x325   :  { %v2924_v45 = vmax.f32 %v2922_v30, 0.0  ;;  %3785 = vmatpush.bf16.msrb.mxu2 %v12472_v55 }
 0x326   :  { %v2883_v61 = vld [vmem:[#allocation3 + $0x40] ss:$2 sm:$0xff]  ;;  %v2891_v19 = vld [vmem:[#allocation3 + $0x41] ss:$2 sm:$0xff]  ;;  %1170 = vst.msk [vmem:[#allocation2 + $0x144] sm:$0xf] %vm1088_vm3, %v1065_v12 }
 0x327   :  { %v2899_v22 = vmax.f32 %v2883_v61, %v2891_v19  ;;  %2873 = vst.msk [vmem:[#allocation3 + $0x50] sm:$0xff] %vm1683_vm5, %v2857_v54  ;;  %v825_v14 = vpop.f32.mrf.mxu0  ;;  %v2926_v9 = vpack.c.bf16 %v2924_v45, %v2924_v45 }
 0x328   :  { %v826_v7 = vadd.f32 %v14016_v44, %v825_v14 }
 0x329   :  { %2907 = vst.msk [vmem:[#allocation4 + $0x20] sm:$0xff] %vm1683_vm5, %v2899_v22  ;;  %v2657_v33 = vpop.f32.mrf.mxu2  ;;  %3786 = vmatpush.bf16.msrb.mxu2 %v12471_v41 }
 0x32a   :  { %v962_v2 = vmax.f32 %v826_v7, 0.0  ;;  %9562 = vmatmul.msk.bf16.gmra.mxu0 %vm447_vm2, %v12314_v39  ;;  %2928 = vst.msk [vmem:[%s16275_s5 + $0x1c] sm:$0x3] %vm1765_vm7, %v2926_v9  ;;  %v2658_v4 = vadd.f32 %v2657_v33, %v13966_v26 }
 0x32c   :  { %v1066_v50 = vpack.c.bf16 %v962_v2, %v962_v2  ;;  %v2858_v16 = vadd.f32 %v14066_v29, %v2658_v4  ;;  %v14299_v25 = vpop.f32.mrf.mxu1  ;;  %v14308_v29 = vpop.f32.mrf.mxu3 }
 0x32d   :  { %v12477_v5 = vld [vmem:[#allocation2 + $0x140] sm:$0xff] }
 0x32e   :  { %v12489_v17 = vld [vmem:[#allocation2 + $0x140] sm:$0xff]  ;;  %1171 = vst.msk [vmem:[#allocation2 + $0x148] sm:$0xf] %vm1088_vm3, %v1066_v50  ;;  %10255 = vmatmul.msk.bf16.gmra.mxu2 %vm1314_vm4, %v13909_v20  ;;  %v12315_v20 = vld [vmem:[%s16270_s0 + $0x190] sm:$0xff] }
 0x32f   :  { %2874 = vst.msk [vmem:[#allocation3 + $0x58] sm:$0xff] %vm1683_vm5, %v2858_v16  ;;  %v827_v63 = vpop.f32.mrf.mxu0  ;;  %10521 = vmatmul.msk.bf16.gmra.mxu3 %vm1314_vm4, %v12489_v17  ;;  %10407 = vmatmul.msk.bf16.gmra.mxu1 %vm1314_vm4, %v12477_v5 }
 0x330   :  { %v828_v26 = vadd.f32 %v14016_v44, %v827_v63  ;;  %v12531_v63 = vld [vmem:[%s16273_s3 + $0x70] sm:$0xff] }
 0x331   :  { %v2660_v30 = vpop.f32.mrf.mxu2 }
 0x332   :  { %v963_v24 = vmax.f32 %v828_v26, 0.0  ;;  %v2661_v32 = vadd.f32 %v2660_v30, %v13993_v60  ;;  %v12534_v60 = vld [vmem:[%s16273_s3 + $0x88] sm:$0xff] }
 0x333   :  { %4537 = vmatpush.bf16.msra.mxu3 %v12534_v60 }
 0x334   :  { %v1067_v12 = vpack.c.bf16 %v963_v24, %v963_v24  ;;  %v2859_v54 = vadd.f32 %v14084_v58, %v2661_v32  ;;  %v14312_v39 = vpop.f32.mrf.mxu1  ;;  %v14329_v7 = vpop.f32.mrf.mxu3 }
 0x336   :  { %v2884_v45 = vld [vmem:[#allocation3 + $0x50] ss:$2 sm:$0xff]  ;;  %v2892_v61 = vld [vmem:[#allocation3 + $0x51] ss:$2 sm:$0xff]  ;;  %1172 = vst.msk [vmem:[#allocation2 + $0x14c] sm:$0xf] %vm1088_vm3, %v1067_v12 }
 0x337   :  { %v2900_v19 = vmax.f32 %v2884_v45, %v2892_v61  ;;  %2875 = vst.msk [vmem:[#allocation3 + $0x60] sm:$0xff] %vm1683_vm5, %v2859_v54  ;;  %v830_v22 = vpop.f32.mrf.mxu0  ;;  %4538 = vmatpush.bf16.msra.mxu3 %v12533_v27 }
 0x338   :  { %v831_v58 = vadd.f32 %v14016_v44, %v830_v22  ;;  %v12529_v22 = vld [vmem:[%s16273_s3 + $0x60] sm:$0xff] }
 0x339   :  { %2908 = vst.msk [vmem:[#allocation4 + $0x28] sm:$0xff] %vm1683_vm5, %v2900_v19  ;;  %v2662_v55 = vpop.f32.mrf.mxu2 }
 0x33a   :  { %v964_v14 = vmax.f32 %v831_v58, 0.0  ;;  %9563 = vmatmul.msk.bf16.gmra.mxu0 %vm447_vm2, %v12315_v20  ;;  %v2663_v9 = vadd.f32 %v2662_v55, %v14006_v21  ;;  %v12532_v21 = vld [vmem:[%s16273_s3 + $0x78] sm:$0xff]  ;;  %v12530_v20 = vld [vmem:[%s16273_s3 + $0x68] sm:$0xff]  ;;  %v12463_v55 = vld [vmem:[#allocation2 + $0x100] sm:$0xff] }
 0x33b   :  { %4539 = vmatpush.bf16.msra.mxu3 %v12532_v21 }
 0x33c   :  { %v1068_v31 = vpack.c.bf16 %v964_v14, %v964_v14  ;;  %v2860_v2 = vadd.f32 %v14098_v23, %v2663_v9  ;;  %v14332_v33 = vpop.f32.mrf.mxu1  ;;  %v14351_v30 = vpop.f32.mrf.mxu3 }
 0x33d   :  { %v12478_v4 = vld [vmem:[#allocation2 + $0x148] sm:$0xff] }
 0x33e   :  { %v12490_v41 = vld [vmem:[#allocation2 + $0x148] sm:$0xff]  ;;  %1173 = vst.msk [vmem:[#allocation2 + $0x150] sm:$0xf] %vm1088_vm3, %v1068_v31  ;;  %10256 = vmatmul.msk.bf16.gmra.mxu2 %vm1314_vm4, %v13946_v46 }
 0x33f   :  { %2876 = vst.msk [vmem:[#allocation3 + $0x68] sm:$0xff] %vm1683_vm5, %v2860_v2  ;;  %v832_v50 = vpop.f32.mrf.mxu0  ;;  %10522 = vmatmul.msk.bf16.gmra.mxu3 %vm1314_vm4, %v12490_v41  ;;  %10408 = vmatmul.msk.bf16.gmra.mxu1 %vm1314_vm4, %v12478_v4  ;;  %v2929_v4 = vld [vmem:[#allocation4 + $0x20] sm:$0xff] }
 0x340   :  { %v833_v23 = vadd.f32 %v14016_v44, %v832_v50  ;;  %4540 = vmatpush.bf16.msra.mxu3 %v12531_v63 }
 0x341   :  { %v2665_v5 = vpop.f32.mrf.mxu2 }
 0x342   :  { %v965_v16 = vmax.f32 %v833_v23, 0.0  ;;  %v2666_v17 = vadd.f32 %v2665_v5, %v14031_v56 }
 0x344   :  { %v1069_v46 = vpack.c.bf16 %v965_v16, %v965_v16  ;;  %v2861_v26 = vadd.f32 %v14117_v13, %v2666_v17  ;;  %v14349_v24 = vpop.f32.mrf.mxu1  ;;  %4541 = vmatpush.bf16.msra.mxu3 %v12530_v20  ;;  %v14373_v2 = vpop.f32.mrf.mxu3 }
 0x346   :  { %v2885_v32 = vld [vmem:[#allocation3 + $0x60] ss:$2 sm:$0xff]  ;;  %v2893_v12 = vld [vmem:[#allocation3 + $0x61] ss:$2 sm:$0xff]  ;;  %1174 = vst.msk [vmem:[#allocation2 + $0x154] sm:$0xf] %vm1088_vm3, %v1069_v46 }
 0x347   :  { %v2901_v54 = vmax.f32 %v2885_v32, %v2893_v12  ;;  %2877 = vst.msk [vmem:[#allocation3 + $0x70] sm:$0xff] %vm1683_vm5, %v2861_v26  ;;  %v835_v56 = vpop.f32.mrf.mxu0 }
 0x348   :  { %v836_v45 = vadd.f32 %v14016_v44, %v835_v56  ;;  %4542 = vmatpush.bf16.msra.mxu3 %v12529_v22 }
 0x349   :  { %2909 = vst.msk [vmem:[#allocation4 + $0x30] sm:$0xff] %vm1683_vm5, %v2901_v54  ;;  %v2667_v61 = vpop.f32.mrf.mxu2 }
 0x34a   :  { %v966_v13 = vmax.f32 %v836_v45, 0.0  ;;  %v2668_v19 = vadd.f32 %v2667_v61, %v14050_v51  ;;  %v12825_v51 = vld [vmem:[#allocation9] ss:$0 sm:$0xff] }
 0x34c   :  { %v1070_v60 = vpack.c.bf16 %v966_v13, %v966_v13  ;;  %v2862_v58 = vadd.f32 %v14137_v40, %v2668_v19  ;;  %v14365_v14 = vpop.f32.mrf.mxu1  ;;  %v14386_v13 = vpop.f32.mrf.mxu3 }
 0x34d   :  { %v12491_v9 = vld [vmem:[#allocation2 + $0x150] sm:$0xff] }
 0x34e   :  { %v14367_v27 = vld [vmem:[#allocation2 + $0x150] sm:$0xff]  ;;  %1175 = vst.msk [vmem:[#allocation2 + $0x158] sm:$0xf] %vm1088_vm3, %v1070_v60  ;;  %10441 = vmatmul.msk.bf16.vlgmr.msrb.gmra.mxu2 %vm1314_vm4, %v12463_v55  ;;  %v12464_v55 = vld [vmem:[#allocation2 + $0x108] sm:$0xff] }
 0x34f   :  { %2878 = vst.msk [vmem:[#allocation3 + $0x78] sm:$0xff] %vm1683_vm5, %v2862_v58  ;;  %v837_v31 = vpop.f32.mrf.mxu0  ;;  %10523 = vmatmul.msk.bf16.gmra.mxu3 %vm1314_vm4, %v12491_v9  ;;  %10593 = vmatmul.msk.bf16.vlgmr.msrb.gmra.mxu1 %vm1314_vm4, %v14367_v27 }
 0x350   :  { %v838_v40 = vadd.f32 %v14016_v44, %v837_v31  ;;  %v2931_v41 = vld [vmem:[#allocation4 + $0x30] sm:$0xff] }
 0x351   :  { %v2933_v50 = vmax.f32 %v2929_v4, %v2931_v41  ;;  %v3209_v23 = vpop.f32.mrf.mxu2 }
 0x352   :  { %v967_v21 = vmax.f32 %v838_v40, 0.0  ;;  %v3210_v16 = vadd.f32 %v3209_v23, %v14073_v3 }
 0x353   :  { %v2939_v5 = vadd.f32 %v12825_v51, %v2933_v50 }
 0x354   :  { %v1071_v17 = vpack.c.bf16 %v967_v21, %v967_v21  ;;  %v3426_v63 = vadd.f32 %v14164_v35, %v3210_v16  ;;  %v14380_v46 = vpop.f32.mrf.mxu1 }
 0x355   :  { %v2941_v26 = vmax.f32 %v2939_v5, 0.0  ;;  %v14406_v5 = vpop.f32.mrf.mxu3 }
 0x356   :  { %v2886_v32 = vld [vmem:[#allocation3 + $0x70] ss:$2 sm:$0xff]  ;;  %v2894_v12 = vld [vmem:[#allocation3 + $0x71] ss:$2 sm:$0xff]  ;;  %1176 = vst.msk [vmem:[#allocation2 + $0x15c] sm:$0xf] %vm1088_vm3, %v1071_v17 }
 0x357   :  { %v2902_v54 = vmax.f32 %v2886_v32, %v2894_v12  ;;  %3442 = vst.msk [vmem:[#allocation3] sm:$0xff] %vm1683_vm5, %v3426_v63  ;;  %v840_v56 = vpop.f32.mrf.mxu0  ;;  %v2943_v20 = vpack.c.bf16 %v2941_v26, %v2941_v26 }
 0x358   :  { %v841_v45 = vadd.f32 %v14016_v44, %v840_v56 }
 0x359   :  { %2910 = vst.msk [vmem:[#allocation4 + $0x38] sm:$0xff] %vm1683_vm5, %v2902_v54  ;;  %v2947_v3 = vrot.slane %v2943_v20, 6  ;;  %v3211_v61 = vpop.f32.mrf.mxu2 }
 0x35a   :  { %v968_v35 = vmax.f32 %v841_v45, 0.0  ;;  %v3212_v19 = vadd.f32 %v3211_v61, %v14088_v37 }
 0x35b   :  { %2953 = vst.msk [vmem:[%s16275_s5 + $0x1c] sm:$0xc] %vm1794_vm8, %v2947_v3 }
 0x35c   :  { %v1072_v22 = vpack.c.bf16 %v968_v35, %v968_v35  ;;  %v3427_v60 = vadd.f32 %v14187_v15, %v3212_v19  ;;  %v14394_v58 = vpop.f32.mrf.mxu1  ;;  %v2930_v15 = vld [vmem:[#allocation4 + $0x28] sm:$0xf] }
 0x35d   :  { %v12492_v9 = vld [vmem:[#allocation2 + $0x158] sm:$0xff] }
 0x35e   :  { %v14396_v31 = vld [vmem:[#allocation2 + $0x158] sm:$0xff]  ;;  %1177 = vst.msk [vmem:[#allocation2 + $0x160] sm:$0xf] %vm1088_vm3, %v1072_v22  ;;  %10442 = vmatmul.msk.bf16.gmra.mxu2 %vm1314_vm4, %v12464_v55 }
 0x35f   :  { %3443 = vst.msk [vmem:[#allocation3 + $0x8] sm:$0xff] %vm1683_vm5, %v3427_v60  ;;  %v842_v40 = vpop.f32.mrf.mxu0  ;;  %10524 = vmatmul.msk.bf16.gmra.mxu3 %vm1314_vm4, %v12492_v9  ;;  %10594 = vmatmul.msk.bf16.gmra.mxu1 %vm1314_vm4, %v14396_v31 }
 0x360   :  { %v843_v37 = vadd.f32 %v14016_v44, %v842_v40  ;;  %v2932_v4 = vld [vmem:[#allocation4 + $0x38] sm:$0xf] }
 0x361   :  { %v2934_v41 = vmax.f32 %v2930_v15, %v2932_v4  ;;  %v3214_v21 = vpop.f32.mrf.mxu2 }
 0x362   :  { %v969_v50 = vmax.f32 %v843_v37, 0.0  ;;  %v3215_v23 = vadd.f32 %v3214_v21, %v14106_v11  ;;  %v14427_v37 = vpop.f32.mrf.mxu3 }
 0x363   :  { %v2940_v16 = vadd.f32 %v12825_v51, %v2934_v41  ;;  %v2948_v51 = vrot.slane %v2947_v3, 4 }
 0x364   :  { %v1073_v17 = vpack.c.bf16 %v969_v50, %v969_v50  ;;  %v3428_v63 = vadd.f32 %v14209_v52, %v3215_v23  ;;  %v14409_v26 = vpop.f32.mrf.mxu1 }
 0x365   :  { %v2942_v32 = vmax.f32 %v2940_v16, 0.0 }
 0x366   :  { %v3458_v12 = vld [vmem:[#allocation3] ss:$2 sm:$0xff]  ;;  %v3466_v54 = vld [vmem:[#allocation3 + $0x1] ss:$2 sm:$0xff]  ;;  %1178 = vst.msk [vmem:[#allocation2 + $0x164] sm:$0xf] %vm1088_vm3, %v1073_v17 }
 0x367   :  { %v3474_v56 = vmax.f32 %v3458_v12, %v3466_v54  ;;  %3444 = vst.msk [vmem:[#allocation3 + $0x10] sm:$0xff] %vm1683_vm5, %v3428_v63  ;;  %v845_v20 = vpop.f32.mrf.mxu0  ;;  %v2944_v45 = vpack.c.bf16 %v2942_v32, %v2942_v32 }
 0x368   :  { %v846_v11 = vadd.f32 %v14016_v44, %v845_v20 }
 0x369   :  { %3482 = vst.msk [vmem:[#allocation4] sm:$0xff] %vm1683_vm5, %v3474_v56  ;;  %v2949_v35 = vrot.slane %v2944_v45, 6  ;;  %v3216_v52 = vpop.f32.mrf.mxu2 }
 0x36a   :  { %v970_v61 = vmax.f32 %v846_v11, 0.0  ;;  %v3217_v19 = vadd.f32 %v3216_v52, %v14121_v10  ;;  %v14443_v32 = vpop.f32.mrf.mxu3 }
 0x36b   :  { %v2950_v22 = vsel %vm13816_vm11, %v2948_v51, %v2949_v35 }
 0x36c   :  { %v1074_v60 = vpack.c.bf16 %v970_v61, %v970_v61  ;;  %2954 = vst.msk [vmem:[%s16275_s5 + $0x20] sm:$0xf] %vm1763_vm6, %v2950_v22  ;;  %v3429_v55 = vadd.f32 %v14227_v34, %v3217_v19  ;;  %v14423_v9 = vpop.f32.mrf.mxu1 }
 0x36d   :  { %v14425_v40 = vld [vmem:[#allocation2 + $0x160] sm:$0xff] }
 0x36e   :  { %v12521_v3 = vld [vmem:[#allocation2 + $0x160] sm:$0xff]  ;;  %1179 = vst.msk [vmem:[#allocation2 + $0x168] sm:$0xf] %vm1088_vm3, %v1074_v60  ;;  %10443 = vmatmul.msk.bf16.gmra.mxu2 %vm1314_vm4, %v14075_v0 }
 0x36f   :  { %3445 = vst.msk [vmem:[#allocation3 + $0x18] sm:$0xff] %vm1683_vm5, %v3429_v55  ;;  %v847_v10 = vpop.f32.mrf.mxu0  ;;  %10709 = vmatmul.msk.bf16.vlgmr.msra.gmra.mxu3 %vm1314_vm4, %v12521_v3  ;;  %10595 = vmatmul.msk.bf16.gmra.mxu1 %vm1314_vm4, %v14425_v40 }
 0x370   :  { %v848_v15 = vadd.f32 %v14016_v44, %v847_v10 }
 0x371   :  { %v3219_v4 = vpop.f32.mrf.mxu2 }
 0x372   :  { %v971_v34 = vmax.f32 %v848_v15, 0.0  ;;  %v3220_v41 = vadd.f32 %v3219_v4, %v14144_v36  ;;  %v12587_v36 = vld [vmem:[#allocation5] sm:$0xff] }
 0x373   :  { %5242 = vmatpush.bf16.msra.mxu1 %v12587_v36 }
 0x374   :  { %v1075_v50 = vpack.c.bf16 %v971_v34, %v971_v34  ;;  %v3430_v21 = vadd.f32 %v14253_v18, %v3220_v41  ;;  %v14439_v23 = vpop.f32.mrf.mxu1  ;;  %v12620_v18 = vld [vmem:[%s16273_s3 + $0x68] sm:$0xff] }
 0x375   :  { %6244 = vmatpush.bf16.msrb.mxu0 %v12620_v18 }
 0x376   :  { %v3459_v16 = vld [vmem:[#allocation3 + $0x10] ss:$2 sm:$0xff]  ;;  %v3467_v17 = vld [vmem:[#allocation3 + $0x11] ss:$2 sm:$0xff]  ;;  %1180 = vst.msk [vmem:[#allocation2 + $0x16c] sm:$0xf] %vm1088_vm3, %v1075_v50 }
 0x377   :  { %v3475_v0 = vmax.f32 %v3459_v16, %v3467_v17  ;;  %3446 = vst.msk [vmem:[#allocation3 + $0x20] sm:$0xff] %vm1683_vm5, %v3430_v21  ;;  %v850_v63 = vpop.f32.mrf.mxu0 }
 0x378   :  { %v851_v12 = vadd.f32 %v14016_v44, %v850_v63 }
 0x379   :  { %3483 = vst.msk [vmem:[#allocation4 + $0x8] sm:$0xff] %vm1683_vm5, %v3475_v0  ;;  %v3221_v56 = vpop.f32.mrf.mxu2 }
 0x37a   :  { %v972_v54 = vmax.f32 %v851_v12, 0.0  ;;  %v3222_v20 = vadd.f32 %v3221_v56, %v14158_v62  ;;  %v14461_v62 = vld [vmem:[#allocation7] ss:$0 sm:$0xff] }
 0x37c   :  { %v1076_v45 = vpack.c.bf16 %v972_v54, %v972_v54  ;;  %v3431_v11 = vadd.f32 %v14282_v1, %v3222_v20  ;;  %v14452_v51 = vpop.f32.mrf.mxu1  ;;  %v14466_v1 = vpop.f32.mrf.mxu3 }
 0x37d   :  { %v14454_v35 = vld [vmem:[#allocation2 + $0x168] sm:$0xff] }
 0x37e   :  { %v12522_v44 = vld [vmem:[#allocation2 + $0x168] sm:$0xff]  ;;  %1181 = vst.msk [vmem:[#allocation2 + $0x170] sm:$0xf] %vm1088_vm3, %v1076_v45  ;;  %10444 = vmatmul.msk.bf16.gmra.mxu2 %vm1314_vm4, %v14108_v57 }
 0x37f   :  { %3447 = vst.msk [vmem:[#allocation3 + $0x28] sm:$0xff] %vm1683_vm5, %v3431_v11  ;;  %v852_v61 = vpop.f32.mrf.mxu0  ;;  %10710 = vmatmul.msk.bf16.gmra.mxu3 %vm1314_vm4, %v12522_v44  ;;  %10596 = vmatmul.msk.bf16.gmra.mxu1 %vm1314_vm4, %v14454_v35 }
 0x380   :  { %v853_v52 = vadd.f32 %v14461_v62, %v852_v61 }
 0x381   :  { %v3224_v22 = vpop.f32.mrf.mxu2 }
 0x382   :  { %v973_v19 = vmax.f32 %v853_v52, 0.0  ;;  %v3225_v60 = vadd.f32 %v3224_v22, %v14178_v43  ;;  %v12512_v43 = vld [vmem:[%s16273_s3 + $0x28] sm:$0xff] }
 0x383   :  { %4360 = vmatpush.bf16.msra.mxu2 %v12512_v43 }
 0x384   :  { %v1077_v55 = vpack.c.bf16 %v973_v19, %v973_v19  ;;  %v3432_v3 = vadd.f32 %v14308_v29, %v3225_v60  ;;  %v14470_v10 = vpop.f32.mrf.mxu1  ;;  %v14480_v16 = vpop.f32.mrf.mxu3 }
 0x386   :  { %v3460_v57 = vld [vmem:[#allocation3 + $0x20] ss:$2 sm:$0xff]  ;;  %v3468_v15 = vld [vmem:[#allocation3 + $0x21] ss:$2 sm:$0xff]  ;;  %1182 = vst.msk [vmem:[#allocation2 + $0x174] sm:$0xf] %vm1088_vm3, %v1077_v55 }
 0x387   :  { %v3476_v34 = vmax.f32 %v3460_v57, %v3468_v15  ;;  %3448 = vst.msk [vmem:[#allocation3 + $0x30] sm:$0xff] %vm1683_vm5, %v3432_v3  ;;  %v855_v4 = vpop.f32.mrf.mxu0 }
 0x388   :  { %v856_v41 = vadd.f32 %v14461_v62, %v855_v4 }
 0x389   :  { %3484 = vst.msk [vmem:[#allocation4 + $0x10] sm:$0xff] %vm1683_vm5, %v3476_v34  ;;  %v3226_v29 = vpop.f32.mrf.mxu2 }
 0x38a   :  { %v974_v50 = vmax.f32 %v856_v41, 0.0  ;;  %v3227_v21 = vadd.f32 %v3226_v29, %v14194_v8  ;;  %v12826_v8 = vld [vmem:[#allocation9] ss:$0 sm:$0xff] }
 0x38c   :  { %v1078_v17 = vpack.c.bf16 %v974_v50, %v974_v50  ;;  %v3433_v0 = vadd.f32 %v14329_v7, %v3227_v21  ;;  %v14483_v63 = vpop.f32.mrf.mxu1  ;;  %v3490_v7 = vld [vmem:[#allocation4] sm:$0xff]  ;;  %v14499_v60 = vpop.f32.mrf.mxu3 }
 0x38d   :  { %v14485_v12 = vld [vmem:[#allocation2 + $0x170] sm:$0xff] }
 0x38e   :  { %v12523_v36 = vld [vmem:[#allocation2 + $0x170] sm:$0xff]  ;;  %1183 = vst.msk [vmem:[#allocation2 + $0x178] sm:$0xf] %vm1088_vm3, %v1078_v17  ;;  %10445 = vmatmul.msk.bf16.gmra.mxu2 %vm1314_vm4, %v14146_v6 }
 0x38f   :  { %3449 = vst.msk [vmem:[#allocation3 + $0x38] sm:$0xff] %vm1683_vm5, %v3433_v0  ;;  %v857_v18 = vpop.f32.mrf.mxu0  ;;  %10711 = vmatmul.msk.bf16.gmra.mxu3 %vm1314_vm4, %v12523_v36  ;;  %10597 = vmatmul.msk.bf16.gmra.mxu1 %vm1314_vm4, %v14485_v12 }
 0x390   :  { %v858_v54 = vadd.f32 %v14461_v62, %v857_v18  ;;  %v3492_v56 = vld [vmem:[#allocation4 + $0x10] sm:$0xff] }
 0x391   :  { %v3494_v20 = vmax.f32 %v3490_v7, %v3492_v56  ;;  %v3229_v11 = vpop.f32.mrf.mxu2 }
 0x392   :  { %v975_v45 = vmax.f32 %v858_v54, 0.0  ;;  %v3230_v44 = vadd.f32 %v3229_v11, %v14214_v42  ;;  %v3491_v54 = vld [vmem:[#allocation4 + $0x8] sm:$0xf]  ;;  %v12509_v11 = vld [vmem:[%s16273_s3 + $0x10] sm:$0xff] }
 0x393   :  { %v3500_v61 = vadd.f32 %v12826_v8, %v3494_v20 }
 0x394   :  { %v1079_v52 = vpack.c.bf16 %v975_v45, %v975_v45  ;;  %v3434_v19 = vadd.f32 %v14351_v30, %v3230_v44  ;;  %v14497_v6 = vpop.f32.mrf.mxu1  ;;  %v12511_v30 = vld [vmem:[%s16273_s3 + $0x20] sm:$0xff] }
 0x395   :  { %v3502_v22 = vmax.f32 %v3500_v61, 0.0  ;;  %4361 = vmatpush.bf16.msra.mxu2 %v12511_v30 }
 0x396   :  { %v3461_v55 = vld [vmem:[#allocation3 + $0x30] ss:$2 sm:$0xff]  ;;  %v3469_v3 = vld [vmem:[#allocation3 + $0x31] ss:$2 sm:$0xff]  ;;  %1184 = vst.msk [vmem:[#allocation2 + $0x17c] sm:$0xf] %vm1088_vm3, %v1079_v52 }
 0x397   :  { %v3477_v57 = vmax.f32 %v3461_v55, %v3469_v3  ;;  %3450 = vst.msk [vmem:[#allocation3 + $0x40] sm:$0xff] %vm1683_vm5, %v3434_v19  ;;  %v860_v15 = vpop.f32.mrf.mxu0  ;;  %v3504_v34 = vpack.c.bf16 %v3502_v22, %v3502_v22 }
 0x398   :  { %v861_v42 = vadd.f32 %v14461_v62, %v860_v15  ;;  %v12508_v15 = vld [vmem:[%s16273_s3 + $0x8] sm:$0xff] }
 0x399   :  { %3485 = vst.msk [vmem:[#allocation4 + $0x18] sm:$0xff] %vm1683_vm5, %v3477_v57  ;;  %v3231_v41 = vpop.f32.mrf.mxu2 }
 0x39a   :  { %v976_v4 = vmax.f32 %v861_v42, 0.0  ;;  %3506 = vst.msk [vmem:[%s16275_s5 + $0x24] sm:$0xf] %vm1763_vm6, %v3504_v34  ;;  %v3232_v43 = vadd.f32 %v3231_v41, %v14230_v28  ;;  %v12510_v28 = vld [vmem:[%s16273_s3 + $0x18] sm:$0xff]  ;;  %v12507_v41 = vld [vmem:[%s16273_s3] sm:$0xff] }
 0x39b   :  { %4362 = vmatpush.bf16.msra.mxu2 %v12510_v28 }
 0x39c   :  { %v1080_v50 = vpack.c.bf16 %v976_v4, %v976_v4  ;;  %v3435_v29 = vadd.f32 %v14373_v2, %v3232_v43  ;;  %v14514_v21 = vpop.f32.mrf.mxu1  ;;  %v14526_v2 = vpop.f32.mrf.mxu3 }
 0x39d   :  { %v14516_v17 = vld [vmem:[#allocation2 + $0x178] sm:$0xff] }
 0x39e   :  { %v12524_v0 = vld [vmem:[#allocation2 + $0x178] sm:$0xff]  ;;  %1185 = vst.msk [vmem:[#allocation2 + $0x180] sm:$0xf] %vm1088_vm3, %v1080_v50  ;;  %10446 = vmatmul.msk.bf16.gmra.mxu2 %vm1314_vm4, %v14180_v53 }
 0x39f   :  { %3451 = vst.msk [vmem:[#allocation3 + $0x48] sm:$0xff] %vm1683_vm5, %v3435_v29  ;;  %v862_v36 = vpop.f32.mrf.mxu0  ;;  %10712 = vmatmul.msk.bf16.gmra.mxu3 %vm1314_vm4, %v12524_v0  ;;  %10598 = vmatmul.msk.bf16.gmra.mxu1 %vm1314_vm4, %v14516_v17 }
 0x3a0   :  { %v863_v18 = vadd.f32 %v14461_v62, %v862_v36  ;;  %v3493_v7 = vld [vmem:[#allocation4 + $0x18] sm:$0xf]  ;;  %4363 = vmatpush.bf16.msra.mxu2 %v12509_v11 }
 0x3a1   :  { %v3495_v56 = vmax.f32 %v3491_v54, %v3493_v7  ;;  %v3234_v45 = vpop.f32.mrf.mxu2 }
 0x3a2   :  { %v977_v20 = vmax.f32 %v863_v18, 0.0  ;;  %v3235_v53 = vadd.f32 %v3234_v45, %v14249_v47 }
 0x3a3   :  { %v3501_v44 = vadd.f32 %v12826_v8, %v3495_v56 }
 0x3a4   :  { %v1081_v61 = vpack.c.bf16 %v977_v20, %v977_v20  ;;  %v3436_v52 = vadd.f32 %v14386_v13, %v3235_v53  ;;  %v14536_v19 = vpop.f32.mrf.mxu1  ;;  %4364 = vmatpush.bf16.msra.mxu2 %v12508_v15  ;;  %v14545_v13 = vpop.f32.mrf.mxu3 }
 0x3a5   :  { %v3503_v22 = vmax.f32 %v3501_v44, 0.0 }
 0x3a6   :  { %v3462_v55 = vld [vmem:[#allocation3 + $0x40] ss:$2 sm:$0xff]  ;;  %v3470_v3 = vld [vmem:[#allocation3 + $0x41] ss:$2 sm:$0xff]  ;;  %1186 = vst.msk [vmem:[#allocation2 + $0x184] sm:$0xf] %vm1088_vm3, %v1081_v61 }
 0x3a7   :  { %v3478_v57 = vmax.f32 %v3462_v55, %v3470_v3  ;;  %3452 = vst.msk [vmem:[#allocation3 + $0x50] sm:$0xff] %vm1683_vm5, %v3436_v52  ;;  %v865_v47 = vpop.f32.mrf.mxu0  ;;  %v3505_v8 = vpack.c.bf16 %v3503_v22, %v3503_v22 }
 0x3a8   :  { %v866_v34 = vadd.f32 %v14461_v62, %v865_v47  ;;  %4365 = vmatpush.bf16.msra.mxu2 %v12507_v41 }
 0x3a9   :  { %3486 = vst.msk [vmem:[#allocation4 + $0x20] sm:$0xff] %vm1683_vm5, %v3478_v57  ;;  %v3236_v30 = vpop.f32.mrf.mxu2 }
 0x3aa   :  { %v978_v42 = vmax.f32 %v866_v34, 0.0  ;;  %3507 = vst.msk [vmem:[%s16275_s5 + $0x28] sm:$0x3] %vm1765_vm7, %v3505_v8  ;;  %v3237_v4 = vadd.f32 %v3236_v30, %v14271_v49 }
 0x3ac   :  { %v1082_v43 = vpack.c.bf16 %v978_v42, %v978_v42  ;;  %v3437_v50 = vadd.f32 %v14406_v5, %v3237_v4  ;;  %v14556_v29 = vpop.f32.mrf.mxu1  ;;  %v14566_v7 = vpop.f32.mrf.mxu3 }
 0x3ad   :  { %v12513_v0 = vld [vmem:[#allocation2 + $0x180] sm:$0xff] }
 0x3ae   :  { %v12525_v36 = vld [vmem:[#allocation2 + $0x180] sm:$0xff]  ;;  %1187 = vst.msk [vmem:[#allocation2 + $0x188] sm:$0xf] %vm1088_vm3, %v1082_v43  ;;  %10447 = vmatmul.msk.bf16.gmra.mxu2 %vm1314_vm4, %v14216_v59 }
 0x3af   :  { %3453 = vst.msk [vmem:[#allocation3 + $0x58] sm:$0xff] %vm1683_vm5, %v3437_v50  ;;  %v867_v28 = vpop.f32.mrf.mxu0  ;;  %10713 = vmatmul.msk.bf16.gmra.mxu3 %vm1314_vm4, %v12525_v36  ;;  %10599 = vmatmul.msk.bf16.gmra.mxu1 %vm1314_vm4, %v12513_v0 }
 0x3b0   :  { %v868_v49 = vadd.f32 %v14461_v62, %v867_v28 }
 0x3b1   :  { %v3239_v18 = vpop.f32.mrf.mxu2 }
 0x3b2   :  { %v979_v5 = vmax.f32 %v868_v49, 0.0  ;;  %v3240_v54 = vadd.f32 %v3239_v18, %v14299_v25  ;;  %v12499_v49 = vld [vmem:[#allocation2 + $0x140] sm:$0xff]  ;;  %v12827_v18 = vld [vmem:[#allocation9] ss:$0 sm:$0xff] }
 0x3b4   :  { %v1083_v56 = vpack.c.bf16 %v979_v5, %v979_v5  ;;  %v3438_v20 = vadd.f32 %v14427_v37, %v3240_v54  ;;  %v14569_v45 = vpop.f32.mrf.mxu1  ;;  %v14579_v15 = vpop.f32.mrf.mxu3 }
 0x3b6   :  { %v3463_v53 = vld [vmem:[#allocation3 + $0x50] ss:$2 sm:$0xff]  ;;  %v3471_v11 = vld [vmem:[#allocation3 + $0x51] ss:$2 sm:$0xff]  ;;  %1188 = vst.msk [vmem:[#allocation2 + $0x18c] sm:$0xf] %vm1088_vm3, %v1083_v56 }
 0x3b7   :  { %v3479_v59 = vmax.f32 %v3463_v53, %v3471_v11  ;;  %3454 = vst.msk [vmem:[#allocation3 + $0x60] sm:$0xff] %vm1683_vm5, %v3438_v20  ;;  %v870_v44 = vpop.f32.mrf.mxu0 }
 0x3b8   :  { %v871_v61 = vadd.f32 %v14461_v62, %v870_v44 }
 0x3b9   :  { %3487 = vst.msk [vmem:[#allocation4 + $0x28] sm:$0xff] %vm1683_vm5, %v3479_v59  ;;  %v3241_v52 = vpop.f32.mrf.mxu2 }
 0x3ba   :  { %v980_v25 = vmax.f32 %v871_v61, 0.0  ;;  %v3242_v22 = vadd.f32 %v3241_v52, %v14312_v39 }
 0x3bc   :  { %v1084_v55 = vpack.c.bf16 %v980_v25, %v980_v25  ;;  %v3439_v37 = vadd.f32 %v14443_v32, %v3242_v22  ;;  %v14577_v3 = vpop.f32.mrf.mxu1  ;;  %v14594_v0 = vpop.f32.mrf.mxu3 }
 0x3bd   :  { %v12514_v57 = vld [vmem:[#allocation2 + $0x188] sm:$0xff] }
 0x3be   :  { %v12526_v47 = vld [vmem:[#allocation2 + $0x188] sm:$0xff]  ;;  %1189 = vst.msk [vmem:[#allocation2 + $0x190] sm:$0xf] %vm1088_vm3, %v1084_v55  ;;  %10448 = vmatmul.msk.bf16.gmra.mxu2 %vm1314_vm4, %v14251_v48 }
 0x3bf   :  { %3455 = vst.msk [vmem:[#allocation3 + $0x68] sm:$0xff] %vm1683_vm5, %v3439_v37  ;;  %v872_v8 = vpop.f32.mrf.mxu0  ;;  %10714 = vmatmul.msk.bf16.gmra.mxu3 %vm1314_vm4, %v12526_v47  ;;  %10600 = vmatmul.msk.bf16.gmra.mxu1 %vm1314_vm4, %v12514_v57 }
 0x3c0   :  { %v873_v39 = vadd.f32 %v14461_v62, %v872_v8 }
 0x3c1   :  { %v3244_v34 = vpop.f32.mrf.mxu2 }
 0x3c2   :  { %v981_v32 = vmax.f32 %v873_v39, 0.0  ;;  %v3245_v42 = vadd.f32 %v3244_v34, %v14332_v33  ;;  %v12535_v33 = vld [vmem:[%s16270_s0 + $0x1a0] sm:$0xff]  ;;  %v12528_v34 = vld [vmem:[#allocation2 + $0x198] sm:$0xff] }
 0x3c4   :  { %v1085_v30 = vpack.c.bf16 %v981_v32, %v981_v32  ;;  %v3440_v4 = vadd.f32 %v14466_v1, %v3245_v42  ;;  %v14590_v41 = vpop.f32.mrf.mxu1  ;;  %v14608_v20 = vpop.f32.mrf.mxu3  ;;  %v12500_v32 = vld [vmem:[#allocation2 + $0x148] sm:$0xff] }
 0x3c6   :  { %v3464_v43 = vld [vmem:[#allocation3 + $0x60] ss:$2 sm:$0xff]  ;;  %v3472_v50 = vld [vmem:[#allocation3 + $0x61] ss:$2 sm:$0xff]  ;;  %1190 = vst.msk [vmem:[#allocation2 + $0x194] sm:$0xf] %vm1088_vm3, %v1085_v30 }
 0x3c7   :  { %v3480_v48 = vmax.f32 %v3464_v43, %v3472_v50  ;;  %3456 = vst.msk [vmem:[#allocation3 + $0x70] sm:$0xff] %vm1683_vm5, %v3440_v4 }
 0x3c9   :  { %3488 = vst.msk [vmem:[#allocation4 + $0x30] sm:$0xff] %vm1683_vm5, %v3480_v48  ;;  %v3246_v62 = vpop.f32.mrf.mxu2 }
 0x3ca   :  { %v3247_v36 = vadd.f32 %v3246_v62, %v14349_v24  ;;  %v3508_v24 = vld [vmem:[#allocation4 + $0x20] sm:$0xff] }
 0x3cc   :  { %v3441_v1 = vadd.f32 %v14480_v16, %v3247_v36  ;;  %v14602_v28 = vpop.f32.mrf.mxu1 }
 0x3cd   :  { %v12527_v5 = vld [vmem:[#allocation2 + $0x190] sm:$0xff] }
 0x3ce   :  { %3457 = vst.msk [vmem:[#allocation3 + $0x78] sm:$0xff] %vm1683_vm5, %v3441_v1  ;;  %10633 = vmatmul.msk.bf16.vlgmr.msra.gmra.mxu2 %vm1314_vm4, %v12499_v49 }
 0x3cf   :  { %10715 = vmatmul.msk.bf16.gmra.mxu3 %vm1314_vm4, %v12527_v5  ;;  %11037 = vmatmul.msk.bf16.vlgmr.msra.gmra.mxu1 %vm447_vm2, %v12535_v33 }
 0x3d0   :  { %v3510_v54 = vld [vmem:[#allocation4 + $0x30] sm:$0xff] }
 0x3d1   :  { %v3512_v56 = vmax.f32 %v3508_v24, %v3510_v54  ;;  %v3788_v53 = vpop.f32.mrf.mxu2 }
 0x3d2   :  { %v3789_v16 = vadd.f32 %v3788_v53, %v14365_v14  ;;  %v14621_v14 = vpop.f32.mrf.mxu3 }
 0x3d3   :  { %v3518_v11 = vadd.f32 %v12827_v18, %v3512_v56 }
 0x3d4   :  { %v4005_v59 = vadd.f32 %v14499_v60, %v3789_v16  ;;  %v14612_v44 = vpop.f32.mrf.mxu1  ;;  %v12536_v60 = vld [vmem:[%s16270_s0 + $0x1a8] sm:$0xff] }
 0x3d5   :  { %v3520_v61 = vmax.f32 %v3518_v11, 0.0  ;;  %v3465_v25 = vld [vmem:[#allocation3 + $0x70] ss:$2 sm:$0xff]  ;;  %v3473_v52 = vld [vmem:[#allocation3 + $0x71] ss:$2 sm:$0xff] }
 0x3d6   :  { %v3481_v22 = vmax.f32 %v3465_v25, %v3473_v52  ;;  %4021 = vst.msk [vmem:[#allocation3] sm:$0xff] %vm1683_vm5, %v4005_v59 }
 0x3d7   :  { %v3522_v55 = vpack.c.bf16 %v3520_v61, %v3520_v61 }
 0x3d8   :  { %3489 = vst.msk [vmem:[#allocation4 + $0x38] sm:$0xff] %vm1683_vm5, %v3481_v22 }
 0x3d9   :  { %v3526_v37 = vrot.slane %v3522_v55, 6  ;;  %v3790_v57 = vpop.f32.mrf.mxu2 }
 0x3da   :  { %v3791_v47 = vadd.f32 %v3790_v57, %v14380_v46  ;;  %v3509_v46 = vld [vmem:[#allocation4 + $0x28] sm:$0xf]  ;;  %v14637_v36 = vpop.f32.mrf.mxu3 }
 0x3db   :  { %3532 = vst.msk [vmem:[%s16275_s5 + $0x28] sm:$0xc] %vm1794_vm8, %v3526_v37  ;;  %v3527_v24 = vrot.slane %v3526_v37, 4 }
 0x3dc   :  { %v4006_v8 = vadd.f32 %v14526_v2, %v3791_v47  ;;  %v14627_v39 = vpop.f32.mrf.mxu1 }
 0x3de   :  { %4022 = vst.msk [vmem:[#allocation3 + $0x8] sm:$0xff] %vm1683_vm5, %v4006_v8  ;;  %10634 = vmatmul.msk.bf16.gmra.mxu2 %vm1314_vm4, %v12500_v32 }
 0x3df   :  { %10716 = vmatmul.msk.bf16.gmra.mxu3 %vm1314_vm4, %v12528_v34  ;;  %11038 = vmatmul.msk.bf16.gmra.mxu1 %vm447_vm2, %v12536_v60  ;;  %v3511_v42 = vld [vmem:[#allocation4 + $0x38] sm:$0xf] }
 0x3e0   :  { %v3513_v30 = vmax.f32 %v3509_v46, %v3511_v42 }
 0x3e1   :  { %v3793_v4 = vpop.f32.mrf.mxu2 }
 0x3e2   :  { %v3794_v43 = vadd.f32 %v3793_v4, %v14394_v58  ;;  %v3519_v50 = vadd.f32 %v12827_v18, %v3513_v30  ;;  %v12537_v18 = vld [vmem:[%s16270_s0 + $0x1b0] sm:$0xff]  ;;  %v12539_v4 = vld [vmem:[%s16270_s0 + $0x1c0] sm:$0xff] }
 0x3e4   :  { %v4007_v2 = vadd.f32 %v14545_v13, %v3794_v43  ;;  %v14635_v48 = vpop.f32.mrf.mxu1  ;;  %v3521_v62 = vmax.f32 %v3519_v50, 0.0 }
 0x3e5   :  { %v4037_v33 = vld [vmem:[#allocation3] ss:$2 sm:$0xff]  ;;  %v4045_v1 = vld [vmem:[#allocation3 + $0x1] ss:$2 sm:$0xff] }
 0x3e6   :  { %v4053_v49 = vmax.f32 %v4037_v33, %v4045_v1  ;;  %4023 = vst.msk [vmem:[#allocation3 + $0x10] sm:$0xff] %vm1683_vm5, %v4007_v2  ;;  %v3523_v5 = vpack.c.bf16 %v3521_v62, %v3521_v62  ;;  %v12829_v62 = vld [vmem:[#allocation9] ss:$0 sm:$0xff] }
 0x3e8   :  { %4061 = vst.msk [vmem:[#allocation4] sm:$0xff] %vm1683_vm5, %v4053_v49  ;;  %v3528_v54 = vrot.slane %v3523_v5, 6 }
 0x3e9   :  { %v3795_v56 = vpop.f32.mrf.mxu2 }
 0x3ea   :  { %v3796_v58 = vadd.f32 %v3795_v56, %v14409_v26  ;;  %v3529_v13 = vsel %vm13816_vm11, %v3527_v24, %v3528_v54  ;;  %v14657_v26 = vpop.f32.mrf.mxu3 }
 0x3eb   :  { %3533 = vst.msk [vmem:[%s16275_s5 + $0x2c] sm:$0xf] %vm1763_vm6, %v3529_v13 }
 0x3ec   :  { %v4008_v53 = vadd.f32 %v14566_v7, %v3796_v58  ;;  %v14652_v16 = vpop.f32.mrf.mxu1 }
 0x3ee   :  { %4024 = vst.msk [vmem:[#allocation3 + $0x18] sm:$0xff] %vm1683_vm5, %v4008_v53  ;;  %10635 = vmatmul.msk.bf16.gmra.mxu2 %vm1314_vm4, %v14367_v27 }
 0x3ef   :  { %11039 = vmatmul.msk.bf16.gmra.mxu1 %vm447_vm2, %v12537_v18 }
 0x3f1   :  { %v3798_v11 = vpop.f32.mrf.mxu2 }
 0x3f2   :  { %v3799_v59 = vadd.f32 %v3798_v11, %v14423_v9  ;;  %v14666_v55 = vpop.f32.mrf.mxu3  ;;  %v12538_v9 = vld [vmem:[%s16270_s0 + $0x1b8] sm:$0xff]  ;;  %v12609_v11 = vld [vmem:[%s16273_s3 + $0x50] sm:$0xff] }
 0x3f4   :  { %v4009_v61 = vadd.f32 %v14579_v15, %v3799_v59  ;;  %v14662_v25 = vpop.f32.mrf.mxu1 }
 0x3f5   :  { %v4038_v52 = vld [vmem:[#allocation3 + $0x10] ss:$2 sm:$0xff]  ;;  %v4046_v7 = vld [vmem:[#allocation3 + $0x11] ss:$2 sm:$0xff] }
 0x3f6   :  { %v4054_v22 = vmax.f32 %v4038_v52, %v4046_v7  ;;  %4025 = vst.msk [vmem:[#allocation3 + $0x20] sm:$0xff] %vm1683_vm5, %v4009_v61  ;;  %v12540_v61 = vld [vmem:[%s16270_s0 + $0x1c8] sm:$0xff] }
 0x3f8   :  { %4062 = vst.msk [vmem:[#allocation4 + $0x8] sm:$0xff] %vm1683_vm5, %v4054_v22 }
 0x3f9   :  { %v3800_v27 = vpop.f32.mrf.mxu2 }
 0x3fa   :  { %v3801_v37 = vadd.f32 %v3800_v27, %v14439_v23  ;;  %v14680_v8 = vpop.f32.mrf.mxu3 }
 0x3fc   :  { %v4010_v15 = vadd.f32 %v14594_v0, %v3801_v37  ;;  %v14673_v57 = vpop.f32.mrf.mxu1 }
 0x3fe   :  { %4026 = vst.msk [vmem:[#allocation3 + $0x28] sm:$0xff] %vm1683_vm5, %v4010_v15  ;;  %10636 = vmatmul.msk.bf16.gmra.mxu2 %vm1314_vm4, %v14396_v31  ;;  %v12610_v31 = vld [vmem:[%s16273_s3 + $0x58] sm:$0xff] }
 0x3ff   :  { %11040 = vmatmul.msk.bf16.gmra.mxu1 %vm447_vm2, %v12538_v9  ;;  %5962 = vmatpush.bf16.msrb.mxu2 %v12610_v31  ;;  %v4070_v22 = vld [vmem:[#allocation4 + $0x8] sm:$0xf] }
 0x400   :  { %v12608_v31 = vld [vmem:[%s16273_s3 + $0x48] sm:$0xff] }
 0x401   :  { %v3803_v47 = vpop.f32.mrf.mxu2 }
 0x402   :  { %v3804_v60 = vadd.f32 %v3803_v47, %v14452_v51  ;;  %v12602_v51 = vld [vmem:[%s16273_s3 + $0x28] sm:$0xff]  ;;  %v14703_v2 = vpop.f32.mrf.mxu3 }
 0x403   :  { %6063 = vmatpush.bf16.msrb.mxu3 %v12602_v51  ;;  %5963 = vmatpush.bf16.msrb.mxu2 %v12609_v11 }
 0x404   :  { %v4011_v23 = vadd.f32 %v14608_v20, %v3804_v60  ;;  %v14683_v32 = vpop.f32.mrf.mxu1  ;;  %v12619_v20 = vld [vmem:[%s16273_s3 + $0x60] sm:$0xff] }
 0x405   :  { %v4039_v34 = vld [vmem:[#allocation3 + $0x20] ss:$2 sm:$0xff]  ;;  %v4047_v0 = vld [vmem:[#allocation3 + $0x21] ss:$2 sm:$0xff]  ;;  %6245 = vmatpush.bf16.msrb.mxu0 %v12619_v20 }
 0x406   :  { %v4055_v46 = vmax.f32 %v4039_v34, %v4047_v0  ;;  %4027 = vst.msk [vmem:[#allocation3 + $0x30] sm:$0xff] %vm1683_vm5, %v4011_v23 }
 0x407   :  { %5964 = vmatpush.bf16.msrb.mxu2 %v12608_v31 }
 0x408   :  { %4063 = vst.msk [vmem:[#allocation4 + $0x10] sm:$0xff] %vm1683_vm5, %v4055_v46 }
 0x409   :  { %v3805_v42 = vpop.f32.mrf.mxu2 }
 0x40a   :  { %v3806_v30 = vadd.f32 %v3805_v42, %v14470_v10  ;;  %v4069_v10 = vld [vmem:[#allocation4] sm:$0xff]  ;;  %v3997_v53 = vpop.f32.mrf.mxu3  ;;  %v12541_v42 = vld [vmem:[%s16270_s0 + $0x1d0] sm:$0xff] }
 0x40c   :  { %v4012_v43 = vadd.f32 %v14621_v14, %v3806_v30  ;;  %v14701_v50 = vpop.f32.mrf.mxu1 }
 0x40e   :  { %4028 = vst.msk [vmem:[#allocation3 + $0x38] sm:$0xff] %vm1683_vm5, %v4012_v43  ;;  %10637 = vmatmul.msk.bf16.gmra.mxu2 %vm1314_vm4, %v14425_v40 }
 0x40f   :  { %11041 = vmatmul.msk.bf16.gmra.mxu1 %vm447_vm2, %v12539_v4  ;;  %v4071_v33 = vld [vmem:[#allocation4 + $0x10] sm:$0xff] }
 0x410   :  { %v4073_v1 = vmax.f32 %v4069_v10, %v4071_v33 }
 0x411   :  { %v3808_v49 = vpop.f32.mrf.mxu2 }
 0x412   :  { %v3809_v5 = vadd.f32 %v3808_v49, %v14483_v63  ;;  %v4079_v24 = vadd.f32 %v12829_v62, %v4073_v1  ;;  %v12601_v63 = vld [vmem:[%s16273_s3 + $0x20] sm:$0xff]  ;;  %v4000_v37 = vpop.f32.mrf.mxu3 }
 0x413   :  { %6064 = vmatpush.bf16.msrb.mxu3 %v12601_v63 }
 0x414   :  { %v4013_v14 = vadd.f32 %v14637_v36, %v3809_v5  ;;  %v14711_v54 = vpop.f32.mrf.mxu1  ;;  %v4081_v56 = vmax.f32 %v4079_v24, 0.0  ;;  %v12599_v5 = vld [vmem:[%s16273_s3 + $0x10] sm:$0xff]  ;;  %v12598_v24 = vld [vmem:[%s16273_s3 + $0x8] sm:$0xff] }
 0x415   :  { %v4040_v58 = vld [vmem:[#allocation3 + $0x30] ss:$2 sm:$0xff]  ;;  %v4048_v13 = vld [vmem:[#allocation3 + $0x31] ss:$2 sm:$0xff] }
 0x416   :  { %v4056_v18 = vmax.f32 %v4040_v58, %v4048_v13  ;;  %4029 = vst.msk [vmem:[#allocation3 + $0x40] sm:$0xff] %vm1683_vm5, %v4013_v14  ;;  %v4083_v40 = vpack.c.bf16 %v4081_v56, %v4081_v56 }
 0x418   :  { %4064 = vst.msk [vmem:[#allocation4 + $0x18] sm:$0xff] %vm1683_vm5, %v4056_v18 }
 0x419   :  { %v3810_v36 = vpop.f32.mrf.mxu2  ;;  %4085 = vst.msk [vmem:[%s16275_s5 + $0x30] sm:$0xf] %vm1763_vm6, %v4083_v40 }
 0x41a   :  { %v3811_v59 = vadd.f32 %v3810_v36, %v14497_v6  ;;  %v4002_v20 = vpop.f32.mrf.mxu3 }
 0x41c   :  { %v4014_v52 = vadd.f32 %v14657_v26, %v3811_v59  ;;  %v14730_v7 = vpop.f32.mrf.mxu1 }
 0x41e   :  { %4030 = vst.msk [vmem:[#allocation3 + $0x48] sm:$0xff] %vm1683_vm5, %v4014_v52  ;;  %10638 = vmatmul.msk.bf16.gmra.mxu2 %vm1314_vm4, %v14454_v35  ;;  %v14796_v52 = vld [vmem:[#allocation7] ss:$0 sm:$0xff] }
 0x41f   :  { %11042 = vmatmul.msk.bf16.gmra.mxu1 %vm447_vm2, %v12540_v61  ;;  %v4072_v27 = vld [vmem:[#allocation4 + $0x18] sm:$0xf] }
 0x420   :  { %v4074_v6 = vmax.f32 %v4070_v22, %v4072_v27  ;;  %v12543_v22 = vld [vmem:[%s16270_s0 + $0x1e0] sm:$0xff] }
 0x421   :  { %v3813_v9 = vpop.f32.mrf.mxu2 }
 0x422   :  { %v3814_v15 = vadd.f32 %v3813_v9, %v14514_v21  ;;  %v4080_v47 = vadd.f32 %v12829_v62, %v4074_v6  ;;  %v12600_v21 = vld [vmem:[%s16273_s3 + $0x18] sm:$0xff]  ;;  %v4544_v33 = vpop.f32.mrf.mxu3  ;;  %v12830_v9 = vld [vmem:[#allocation9] ss:$0 sm:$0xff] }
 0x423   :  { %6065 = vmatpush.bf16.msrb.mxu3 %v12600_v21 }
 0x424   :  { %v4015_v60 = vadd.f32 %v14666_v55, %v3814_v15  ;;  %v14738_v26 = vpop.f32.mrf.mxu1  ;;  %v4082_v23 = vmax.f32 %v4080_v47, 0.0 }
 0x425   :  { %v4041_v34 = vld [vmem:[#allocation3 + $0x40] ss:$2 sm:$0xff]  ;;  %v4049_v0 = vld [vmem:[#allocation3 + $0x41] ss:$2 sm:$0xff] }
 0x426   :  { %v4057_v46 = vmax.f32 %v4041_v34, %v4049_v0  ;;  %4031 = vst.msk [vmem:[#allocation3 + $0x50] sm:$0xff] %vm1683_vm5, %v4015_v60  ;;  %v4084_v35 = vpack.c.bf16 %v4082_v23, %v4082_v23 }
 0x427   :  { %6066 = vmatpush.bf16.msrb.mxu3 %v12599_v5 }
 0x428   :  { %4065 = vst.msk [vmem:[#allocation4 + $0x20] sm:$0xff] %vm1683_vm5, %v4057_v46 }
 0x429   :  { %v3815_v55 = vpop.f32.mrf.mxu2  ;;  %4086 = vst.msk [vmem:[%s16275_s5 + $0x34] sm:$0x3] %vm1765_vm7, %v4084_v35 }
 0x42a   :  { %v3816_v51 = vadd.f32 %v3815_v55, %v14536_v19  ;;  %v4546_v58 = vpop.f32.mrf.mxu3 }
 0x42b   :  { %6067 = vmatpush.bf16.msrb.mxu3 %v12598_v24  ;;  %v12605_v24 = vld [vmem:[%s16273_s3 + $0x30] sm:$0xff] }
 0x42c   :  { %v4016_v30 = vadd.f32 %v14680_v8, %v3816_v51  ;;  %v14757_v4 = vpop.f32.mrf.mxu1 }
 0x42e   :  { %4032 = vst.msk [vmem:[#allocation3 + $0x58] sm:$0xff] %vm1683_vm5, %v4016_v30  ;;  %10639 = vmatmul.msk.bf16.gmra.mxu2 %vm1314_vm4, %v14485_v12 }
 0x42f   :  { %11043 = vmatmul.msk.bf16.gmra.mxu1 %vm447_vm2, %v12541_v42  ;;  %v4087_v47 = vld [vmem:[#allocation4 + $0x20] sm:$0xff] }
 0x431   :  { %v3818_v43 = vpop.f32.mrf.mxu2 }
 0x432   :  { %v3819_v19 = vadd.f32 %v3818_v43, %v14556_v29  ;;  %v4549_v59 = vpop.f32.mrf.mxu3 }
 0x434   :  { %v4017_v62 = vadd.f32 %v14703_v2, %v3819_v19  ;;  %v14765_v10 = vpop.f32.mrf.mxu1  ;;  %v12542_v2 = vld [vmem:[%s16270_s0 + $0x1d8] sm:$0xff] }
 0x435   :  { %v4042_v1 = vld [vmem:[#allocation3 + $0x50] ss:$2 sm:$0xff]  ;;  %v4050_v49 = vld [vmem:[#allocation3 + $0x51] ss:$2 sm:$0xff] }
 0x436   :  { %v4058_v8 = vmax.f32 %v4042_v1, %v4050_v49  ;;  %4033 = vst.msk [vmem:[#allocation3 + $0x60] sm:$0xff] %vm1683_vm5, %v4017_v62 }
 0x438   :  { %4066 = vst.msk [vmem:[#allocation4 + $0x28] sm:$0xff] %vm1683_vm5, %v4058_v8  ;;  %v12544_v8 = vld [vmem:[%s16270_s0 + $0x1e8] sm:$0xff] }
 0x439   :  { %v3820_v12 = vpop.f32.mrf.mxu2 }
 0x43a   :  { %v3821_v29 = vadd.f32 %v3820_v12, %v14569_v45  ;;  %v12597_v45 = vld [vmem:[%s16273_s3] sm:$0xff]  ;;  %v4551_v35 = vpop.f32.mrf.mxu3 }
 0x43b   :  { %6068 = vmatpush.bf16.msrb.mxu3 %v12597_v45 }
 0x43c   :  { %v4018_v14 = vadd.f32 %v3997_v53, %v3821_v29  ;;  %v14779_v56 = vpop.f32.mrf.mxu1 }
 0x43e   :  { %4034 = vst.msk [vmem:[#allocation3 + $0x68] sm:$0xff] %vm1683_vm5, %v4018_v14  ;;  %10640 = vmatmul.msk.bf16.gmra.mxu2 %vm1314_vm4, %v14516_v17  ;;  %v12607_v17 = vld [vmem:[%s16273_s3 + $0x40] sm:$0xff] }
 0x43f   :  { %11044 = vmatmul.msk.bf16.gmra.mxu1 %vm447_vm2, %v12542_v2  ;;  %5965 = vmatpush.bf16.msrb.mxu2 %v12607_v17  ;;  %v4088_v14 = vld [vmem:[#allocation4 + $0x28] sm:$0xf] }
 0x441   :  { %v3823_v13 = vpop.f32.mrf.mxu2 }
 0x442   :  { %v3824_v18 = vadd.f32 %v3823_v13, %v14577_v3  ;;  %v4554_v29 = vpop.f32.mrf.mxu3 }
 0x444   :  { %v4019_v40 = vadd.f32 %v4000_v37, %v3824_v18  ;;  %v14789_v53 = vpop.f32.mrf.mxu1 }
 0x445   :  { %v4043_v11 = vld [vmem:[#allocation3 + $0x60] ss:$2 sm:$0xff]  ;;  %v4051_v63 = vld [vmem:[#allocation3 + $0x61] ss:$2 sm:$0xff] }
 0x446   :  { %v4059_v36 = vmax.f32 %v4043_v11, %v4051_v63  ;;  %4035 = vst.msk [vmem:[#allocation3 + $0x70] sm:$0xff] %vm1683_vm5, %v4019_v40 }
 0x448   :  { %4067 = vst.msk [vmem:[#allocation4 + $0x30] sm:$0xff] %vm1683_vm5, %v4059_v36 }
 0x449   :  { %v3825_v61 = vpop.f32.mrf.mxu2 }
 0x44a   :  { %v3826_v3 = vadd.f32 %v3825_v61, %v14590_v41 }
 0x44c   :  { %v4020_v27 = vadd.f32 %v4002_v20, %v3826_v3  ;;  %v5244_v6 = vpop.f32.mrf.mxu1 }
 0x44d   :  { %v5245_v37 = vadd.f32 %v14796_v52, %v5244_v6 }
 0x44e   :  { %4036 = vst.msk [vmem:[#allocation3 + $0x78] sm:$0xff] %vm1683_vm5, %v4020_v27 }
 0x44f   :  { %v5504_v15 = vmax.f32 %v5245_v37, 0.0  ;;  %11045 = vmatmul.msk.bf16.gmra.mxu1 %vm447_vm2, %v12543_v22  ;;  %v4089_v60 = vld [vmem:[#allocation4 + $0x30] sm:$0xff] }
 0x450   :  { %v4091_v23 = vmax.f32 %v4087_v47, %v4089_v60 }
 0x451   :  { %v5608_v34 = vpack.c.bf16 %v5504_v15, %v5504_v15  ;;  %v4367_v41 = vpop.f32.mrf.mxu2  ;;  %v4556_v15 = vpop.f32.mrf.mxu3 }
 0x452   :  { %v4368_v0 = vadd.f32 %v4367_v41, %v14602_v28  ;;  %v4097_v46 = vadd.f32 %v12830_v9, %v4091_v23  ;;  %v12606_v28 = vld [vmem:[%s16273_s3 + $0x38] sm:$0xff]  ;;  %v12545_v41 = vld [vmem:[%s16270_s0 + $0x1f0] sm:$0xff] }
 0x453   :  { %5712 = vst.msk [vmem:[#allocation2] sm:$0xf] %vm1088_vm3, %v5608_v34  ;;  %5966 = vmatpush.bf16.msrb.mxu2 %v12606_v28 }
 0x454   :  { %v4584_v31 = vadd.f32 %v4544_v33, %v4368_v0  ;;  %v5246_v21 = vpop.f32.mrf.mxu1  ;;  %v4099_v55 = vmax.f32 %v4097_v46, 0.0 }
 0x455   :  { %v4044_v51 = vld [vmem:[#allocation3 + $0x70] ss:$2 sm:$0xff]  ;;  %v4052_v20 = vld [vmem:[#allocation3 + $0x71] ss:$2 sm:$0xff]  ;;  %v5247_v42 = vadd.f32 %v14796_v52, %v5246_v21 }
 0x456   :  { %v4060_v30 = vmax.f32 %v4044_v51, %v4052_v20  ;;  %4600 = vst.msk [vmem:[#allocation3] sm:$0xff] %vm1683_vm5, %v4584_v31  ;;  %v4101_v43 = vpack.c.bf16 %v4099_v55, %v4099_v55 }
 0x457   :  { %v5505_v19 = vmax.f32 %v5247_v42, 0.0  ;;  %5967 = vmatpush.bf16.msrb.mxu2 %v12605_v24 }
 0x458   :  { %4068 = vst.msk [vmem:[#allocation4 + $0x38] sm:$0xff] %vm1683_vm5, %v4060_v30  ;;  %v4105_v62 = vrot.slane %v4101_v43, 6 }
 0x459   :  { %v5609_v1 = vpack.c.bf16 %v5505_v19, %v5505_v19  ;;  %v4369_v33 = vpop.f32.mrf.mxu2  ;;  %v4559_v21 = vpop.f32.mrf.mxu3 }
 0x45a   :  { %v4370_v49 = vadd.f32 %v4369_v33, %v14612_v44  ;;  %4111 = vst.msk [vmem:[%s16275_s5 + $0x34] sm:$0xc] %vm1794_vm8, %v4105_v62 }
 0x45b   :  { %5713 = vst.msk [vmem:[#allocation2 + $0x4] sm:$0xf] %vm1088_vm3, %v5609_v1 }
 0x45c   :  { %v4585_v5 = vadd.f32 %v4546_v58, %v4370_v49  ;;  %v5249_v12 = vpop.f32.mrf.mxu1 }
 0x45d   :  { %v5250_v2 = vadd.f32 %v14796_v52, %v5249_v12 }
 0x45e   :  { %4601 = vst.msk [vmem:[#allocation3 + $0x8] sm:$0xff] %vm1683_vm5, %v4585_v5  ;;  %v12546_v5 = vld [vmem:[%s16270_s0 + $0x1f8] sm:$0xff] }
 0x45f   :  { %v5506_v44 = vmax.f32 %v5250_v2, 0.0  ;;  %11046 = vmatmul.msk.bf16.gmra.mxu1 %vm447_vm2, %v12544_v8  ;;  %v4090_v45 = vld [vmem:[#allocation4 + $0x38] sm:$0xf] }
 0x460   :  { %v4092_v13 = vmax.f32 %v4088_v14, %v4090_v45 }
 0x461   :  { %v5610_v18 = vpack.c.bf16 %v5506_v44, %v5506_v44  ;;  %v4372_v40 = vpop.f32.mrf.mxu2  ;;  %v4561_v8 = vpop.f32.mrf.mxu3 }
 0x462   :  { %v4373_v58 = vadd.f32 %v4372_v40, %v14627_v39  ;;  %v12589_v11 = vld [vmem:[#allocation2] sm:$0xff]  ;;  %v4098_v63 = vadd.f32 %v12830_v9, %v4092_v13  ;;  %v4106_v39 = vrot.slane %v4105_v62, 4 }
 0x463   :  { %5714 = vst.msk [vmem:[#allocation2 + $0x8] sm:$0xf] %vm1088_vm3, %v5610_v18  ;;  %11197 = vmatmul.msk.bf16.vlgmr.msrb.gmra.mxu3 %vm1314_vm4, %v12589_v11 }
 0x464   :  { %v4586_v36 = vadd.f32 %v4549_v59, %v4373_v58  ;;  %v5251_v17 = vpop.f32.mrf.mxu1  ;;  %v4100_v61 = vmax.f32 %v4098_v63, 0.0 }
 0x465   :  { %v4616_v3 = vld [vmem:[#allocation3] ss:$2 sm:$0xff]  ;;  %v4624_v22 = vld [vmem:[#allocation3 + $0x1] ss:$2 sm:$0xff]  ;;  %v5252_v27 = vadd.f32 %v14796_v52, %v5251_v17 }
 0x466   :  { %v4632_v6 = vmax.f32 %v4616_v3, %v4624_v22  ;;  %4602 = vst.msk [vmem:[#allocation3 + $0x10] sm:$0xff] %vm1683_vm5, %v4586_v36  ;;  %v4102_v37 = vpack.c.bf16 %v4100_v61, %v4100_v61  ;;  %v12638_v61 = vld [vmem:[%s16273_s3 + $0x28] sm:$0xff] }
 0x467   :  { %v5507_v47 = vmax.f32 %v5252_v27, 0.0  ;;  %6643 = vmatpush.bf16.msra.mxu3 %v12638_v61 }
 0x468   :  { %4640 = vst.msk [vmem:[#allocation4] sm:$0xff] %vm1683_vm5, %v4632_v6  ;;  %v4107_v9 = vrot.slane %v4102_v37, 6  ;;  %v12547_v6 = vld [vmem:[%s16270_s0 + $0x200] sm:$0xff]  ;;  %v12660_v37 = vld [vmem:[%s16273_s3 + $0x88] sm:$0xff] }
 0x469   :  { %v5611_v60 = vpack.c.bf16 %v5507_v47, %v5507_v47  ;;  %v4374_v59 = vpop.f32.mrf.mxu2  ;;  %v4564_v40 = vpop.f32.mrf.mxu3  ;;  %6820 = vmatpush.bf16.msra.mxu0 %v12660_v37 }
 0x46a   :  { %v4375_v23 = vadd.f32 %v4374_v59, %v14635_v48  ;;  %v4108_v34 = vsel %vm13816_vm11, %v4106_v39, %v4107_v9 }
 0x46b   :  { %5715 = vst.msk [vmem:[#allocation2 + $0xc] sm:$0xf] %vm1088_vm3, %v5611_v60 }
 0x46c   :  { %v4587_v0 = vadd.f32 %v4551_v35, %v4375_v23  ;;  %v5254_v46 = vpop.f32.mrf.mxu1  ;;  %4112 = vst.msk [vmem:[%s16275_s5 + $0x38] sm:$0xf] %vm1763_vm6, %v4108_v34 }
 0x46d   :  { %v5255_v31 = vadd.f32 %v14796_v52, %v5254_v46 }
 0x46e   :  { %4603 = vst.msk [vmem:[#allocation3 + $0x18] sm:$0xff] %vm1683_vm5, %v4587_v0 }
 0x46f   :  { %v5508_v48 = vmax.f32 %v5255_v31, 0.0  ;;  %11047 = vmatmul.msk.bf16.gmra.mxu1 %vm447_vm2, %v12545_v41  ;;  %v4648_v59 = vld [vmem:[#allocation4] sm:$0xff] }
 0x471   :  { %v5612_v55 = vpack.c.bf16 %v5508_v48, %v5508_v48  ;;  %v4377_v51 = vpop.f32.mrf.mxu2  ;;  %v4566_v9 = vpop.f32.mrf.mxu3 }
 0x472   :  { %v4378_v20 = vadd.f32 %v4377_v51, %v14652_v16  ;;  %v12590_v42 = vld [vmem:[#allocation2 + $0x8] sm:$0xff] }
 0x473   :  { %5716 = vst.msk [vmem:[#allocation2 + $0x10] sm:$0xf] %vm1088_vm3, %v5612_v55  ;;  %11198 = vmatmul.msk.bf16.gmra.mxu3 %vm1314_vm4, %v12590_v42 }
 0x474   :  { %v4588_v35 = vadd.f32 %v4554_v29, %v4378_v20  ;;  %v5256_v30 = vpop.f32.mrf.mxu1 }
 0x475   :  { %v4617_v43 = vld [vmem:[#allocation3 + $0x10] ss:$2 sm:$0xff]  ;;  %v4625_v19 = vld [vmem:[#allocation3 + $0x11] ss:$2 sm:$0xff]  ;;  %v5257_v28 = vadd.f32 %v14796_v52, %v5256_v30 }
 0x476   :  { %v4633_v62 = vmax.f32 %v4617_v43, %v4625_v19  ;;  %4604 = vst.msk [vmem:[#allocation3 + $0x20] sm:$0xff] %vm1683_vm5, %v4588_v35  ;;  %v12645_v19 = vld [vmem:[%s16273_s3 + $0x50] sm:$0xff] }
 0x477   :  { %v5509_v1 = vmax.f32 %v5257_v28, 0.0  ;;  %v12637_v28 = vld [vmem:[%s16273_s3 + $0x20] sm:$0xff] }
 0x478   :  { %4641 = vst.msk [vmem:[#allocation4 + $0x8] sm:$0xff] %vm1683_vm5, %v4633_v62  ;;  %6644 = vmatpush.bf16.msra.mxu3 %v12637_v28  ;;  %v12550_v28 = vld [vmem:[%s16270_s0 + $0x218] sm:$0xff] }
 0x479   :  { %v5613_v33 = vpack.c.bf16 %v5509_v1, %v5509_v1  ;;  %v4379_v49 = vpop.f32.mrf.mxu2  ;;  %v4569_v62 = vpop.f32.mrf.mxu3 }
 0x47a   :  { %v4380_v16 = vadd.f32 %v4379_v49, %v14662_v25 }
 0x47b   :  { %5717 = vst.msk [vmem:[#allocation2 + $0x14] sm:$0xf] %vm1088_vm3, %v5613_v33 }
 0x47c   :  { %v4589_v12 = vadd.f32 %v4556_v15, %v4380_v16  ;;  %v5259_v29 = vpop.f32.mrf.mxu1  ;;  %v12548_v16 = vld [vmem:[%s16270_s0 + $0x208] sm:$0xff] }
 0x47d   :  { %v5260_v2 = vadd.f32 %v14796_v52, %v5259_v29 }
 0x47e   :  { %4605 = vst.msk [vmem:[#allocation3 + $0x28] sm:$0xff] %vm1683_vm5, %v4589_v12 }
 0x47f   :  { %v5510_v44 = vmax.f32 %v5260_v2, 0.0  ;;  %11048 = vmatmul.msk.bf16.gmra.mxu1 %vm447_vm2, %v12546_v5  ;;  %v4649_v2 = vld [vmem:[#allocation4 + $0x8] sm:$0xf] }
 0x481   :  { %v5614_v24 = vpack.c.bf16 %v5510_v44, %v5510_v44  ;;  %v4382_v14 = vpop.f32.mrf.mxu2 }
 0x482   :  { %v4383_v25 = vadd.f32 %v4382_v14, %v14673_v57  ;;  %v12591_v45 = vld [vmem:[#allocation2 + $0x10] sm:$0xff]  ;;  %v12646_v57 = vld [vmem:[%s16273_s3 + $0x58] sm:$0xff] }
 0x483   :  { %5718 = vst.msk [vmem:[#allocation2 + $0x18] sm:$0xf] %vm1088_vm3, %v5614_v24  ;;  %11157 = vmatmul.msk.bf16.vlgmr.msrb.gmra.mxu2 %vm1314_vm4, %v12591_v45  ;;  %11199 = vmatmul.msk.bf16.gmra.mxu3 %vm1314_vm4, %v12591_v45 }
 0x484   :  { %v4590_v13 = vadd.f32 %v4559_v21, %v4383_v25  ;;  %v5261_v18 = vpop.f32.mrf.mxu1  ;;  %6542 = vmatpush.bf16.msra.mxu2 %v12646_v57 }
 0x485   :  { %v4618_v58 = vld [vmem:[#allocation3 + $0x20] ss:$2 sm:$0xff]  ;;  %v4626_v11 = vld [vmem:[#allocation3 + $0x21] ss:$2 sm:$0xff]  ;;  %v5262_v63 = vadd.f32 %v14796_v52, %v5261_v18 }
 0x486   :  { %v4634_v36 = vmax.f32 %v4618_v58, %v4626_v11  ;;  %4606 = vst.msk [vmem:[#allocation3 + $0x30] sm:$0xff] %vm1683_vm5, %v4590_v13 }
 0x487   :  { %v5511_v17 = vmax.f32 %v5262_v63, 0.0 }
 0x488   :  { %4642 = vst.msk [vmem:[#allocation4 + $0x10] sm:$0xff] %vm1683_vm5, %v4634_v36  ;;  %6543 = vmatpush.bf16.msra.mxu2 %v12645_v19 }
 0x489   :  { %v5615_v3 = vpack.c.bf16 %v5511_v17, %v5511_v17  ;;  %v4384_v22 = vpop.f32.mrf.mxu2 }
 0x48a   :  { %v4385_v27 = vadd.f32 %v4384_v22, %v14683_v32  ;;  %v12831_v32 = vld [vmem:[#allocation9] ss:$0 sm:$0xff]  ;;  %v12659_v22 = vld [vmem:[%s16273_s3 + $0x80] sm:$0xff] }
 0x48b   :  { %5719 = vst.msk [vmem:[#allocation2 + $0x1c] sm:$0xf] %vm1088_vm3, %v5615_v3  ;;  %6821 = vmatpush.bf16.msra.mxu0 %v12659_v22 }
 0x48c   :  { %v4591_v15 = vadd.f32 %v4561_v8, %v4385_v27  ;;  %v5264_v47 = vpop.f32.mrf.mxu1 }
 0x48d   :  { %v5265_v39 = vadd.f32 %v14796_v52, %v5264_v47  ;;  %v12644_v47 = vld [vmem:[%s16273_s3 + $0x48] sm:$0xff] }
 0x48e   :  { %4607 = vst.msk [vmem:[#allocation3 + $0x38] sm:$0xff] %vm1683_vm5, %v4591_v15  ;;  %v12549_v15 = vld [vmem:[%s16270_s0 + $0x210] sm:$0xff]  ;;  %6544 = vmatpush.bf16.msra.mxu2 %v12644_v47 }
 0x48f   :  { %v5512_v60 = vmax.f32 %v5265_v39, 0.0  ;;  %11049 = vmatmul.msk.bf16.gmra.mxu1 %vm447_vm2, %v12547_v6  ;;  %v4650_v23 = vld [vmem:[#allocation4 + $0x10] sm:$0xff]  ;;  %v12636_v39 = vld [vmem:[%s16273_s3 + $0x18] sm:$0xff] }
 0x490   :  { %v4652_v34 = vmax.f32 %v4648_v59, %v4650_v23  ;;  %6645 = vmatpush.bf16.msra.mxu3 %v12636_v39 }
 0x491   :  { %v5616_v41 = vpack.c.bf16 %v5512_v60, %v5512_v60  ;;  %v4387_v0 = vpop.f32.mrf.mxu2 }
 0x492   :  { %v4388_v46 = vadd.f32 %v4387_v0, %v14701_v50  ;;  %v12592_v31 = vld [vmem:[#allocation2 + $0x18] sm:$0xff]  ;;  %v4658_v48 = vadd.f32 %v12831_v32, %v4652_v34 }
 0x493   :  { %5720 = vst.msk [vmem:[#allocation2 + $0x20] sm:$0xf] %vm1088_vm3, %v5616_v41  ;;  %11158 = vmatmul.msk.bf16.gmra.mxu2 %vm1314_vm4, %v12592_v31  ;;  %11200 = vmatmul.msk.bf16.gmra.mxu3 %vm1314_vm4, %v12592_v31 }
 0x494   :  { %v4592_v21 = vadd.f32 %v4564_v40, %v4388_v46  ;;  %v5266_v55 = vpop.f32.mrf.mxu1  ;;  %v4660_v51 = vmax.f32 %v4658_v48, 0.0  ;;  %v4571_v40 = vpop.f32.mrf.mxu3 }
 0x495   :  { %v4619_v20 = vld [vmem:[#allocation3 + $0x30] ss:$2 sm:$0xff]  ;;  %v4627_v42 = vld [vmem:[#allocation3 + $0x31] ss:$2 sm:$0xff]  ;;  %v5267_v35 = vadd.f32 %v14796_v52, %v5266_v55 }
 0x496   :  { %v4635_v30 = vmax.f32 %v4619_v20, %v4627_v42  ;;  %4608 = vst.msk [vmem:[#allocation3 + $0x40] sm:$0xff] %vm1683_vm5, %v4592_v21  ;;  %v4662_v43 = vpack.c.bf16 %v4660_v51, %v4660_v51 }
 0x497   :  { %v5513_v50 = vmax.f32 %v5267_v35, 0.0  ;;  %v12658_v35 = vld [vmem:[%s16273_s3 + $0x78] sm:$0xff] }
 0x498   :  { %4643 = vst.msk [vmem:[#allocation4 + $0x18] sm:$0xff] %vm1683_vm5, %v4635_v30  ;;  %v12635_v30 = vld [vmem:[%s16273_s3 + $0x10] sm:$0xff]  ;;  %6822 = vmatpush.bf16.msra.mxu0 %v12658_v35 }
 0x499   :  { %v5617_v1 = vpack.c.bf16 %v5513_v50, %v5513_v50  ;;  %v4389_v33 = vpop.f32.mrf.mxu2  ;;  %4664 = vst.msk [vmem:[%s16275_s5 + $0x3c] sm:$0xf] %vm1763_vm6, %v4662_v43  ;;  %6646 = vmatpush.bf16.msra.mxu3 %v12635_v30  ;;  %v12641_v35 = vld [vmem:[%s16273_s3 + $0x30] sm:$0xff] }
 0x49a   :  { %v4390_v49 = vadd.f32 %v4389_v33, %v14711_v54  ;;  %v12634_v33 = vld [vmem:[%s16273_s3 + $0x8] sm:$0xff] }
 0x49b   :  { %5721 = vst.msk [vmem:[#allocation2 + $0x24] sm:$0xf] %vm1088_vm3, %v5617_v1 }
 0x49c   :  { %v4593_v8 = vadd.f32 %v4566_v9, %v4390_v49  ;;  %v5269_v5 = vpop.f32.mrf.mxu1  ;;  %v4574_v60 = vpop.f32.mrf.mxu3 }
 0x49d   :  { %v5270_v12 = vadd.f32 %v14796_v52, %v5269_v5  ;;  %6647 = vmatpush.bf16.msra.mxu3 %v12634_v33 }
 0x49e   :  { %4609 = vst.msk [vmem:[#allocation3 + $0x48] sm:$0xff] %vm1683_vm5, %v4593_v8 }
 0x49f   :  { %v5514_v29 = vmax.f32 %v5270_v12, 0.0  ;;  %11050 = vmatmul.msk.bf16.gmra.mxu1 %vm447_vm2, %v12548_v16  ;;  %v4651_v44 = vld [vmem:[#allocation4 + $0x18] sm:$0xf]  ;;  %v12633_v16 = vld [vmem:[%s16273_s3] sm:$0xff] }
 0x4a0   :  { %v4653_v54 = vmax.f32 %v4649_v2, %v4651_v44 }
 0x4a1   :  { %v5618_v24 = vpack.c.bf16 %v5514_v29, %v5514_v29  ;;  %v4392_v14 = vpop.f32.mrf.mxu2  ;;  %6648 = vmatpush.bf16.msra.mxu3 %v12633_v16 }
 0x4a2   :  { %v4393_v25 = vadd.f32 %v4392_v14, %v14730_v7  ;;  %v12593_v45 = vld [vmem:[#allocation2 + $0x20] sm:$0xff]  ;;  %v4659_v18 = vadd.f32 %v12831_v32, %v4653_v54 }
 0x4a3   :  { %v12611_v13 = vld [vmem:[#allocation2 + $0x20] sm:$0xff]  ;;  %5722 = vst.msk [vmem:[#allocation2 + $0x28] sm:$0xf] %vm1088_vm3, %v5618_v24  ;;  %11159 = vmatmul.msk.bf16.gmra.mxu2 %vm1314_vm4, %v12593_v45  ;;  %11201 = vmatmul.msk.bf16.gmra.mxu3 %vm1314_vm4, %v12593_v45 }
 0x4a4   :  { %v4594_v58 = vadd.f32 %v4569_v62, %v4393_v25  ;;  %v5271_v11 = vpop.f32.mrf.mxu1  ;;  %v4661_v63 = vmax.f32 %v4659_v18, 0.0  ;;  %11273 = vmatmul.msk.bf16.vlgmr.msrb.gmra.mxu0 %vm1314_vm4, %v12611_v13  ;;  %v12643_v54 = vld [vmem:[%s16273_s3 + $0x40] sm:$0xff] }
 0x4a5   :  { %v4620_v36 = vld [vmem:[#allocation3 + $0x40] ss:$2 sm:$0xff]  ;;  %v4628_v17 = vld [vmem:[#allocation3 + $0x41] ss:$2 sm:$0xff]  ;;  %v5272_v57 = vadd.f32 %v14796_v52, %v5271_v11  ;;  %6545 = vmatpush.bf16.msra.mxu2 %v12643_v54 }
 0x4a6   :  { %v4636_v7 = vmax.f32 %v4620_v36, %v4628_v17  ;;  %4610 = vst.msk [vmem:[#allocation3 + $0x50] sm:$0xff] %vm1683_vm5, %v4594_v58  ;;  %v4663_v61 = vpack.c.bf16 %v4661_v63, %v4661_v63  ;;  %v12551_v36 = vld [vmem:[%s16270_s0 + $0x220] sm:$0xff]  ;;  %v12657_v17 = vld [vmem:[%s16273_s3 + $0x70] sm:$0xff] }
 0x4a7   :  { %v5515_v3 = vmax.f32 %v5272_v57, 0.0  ;;  %6823 = vmatpush.bf16.msra.mxu0 %v12657_v17 }
 0x4a8   :  { %4644 = vst.msk [vmem:[#allocation4 + $0x20] sm:$0xff] %vm1683_vm5, %v4636_v7 }
 0x4a9   :  { %v5619_v27 = vpack.c.bf16 %v5515_v3, %v5515_v3  ;;  %v4394_v6 = vpop.f32.mrf.mxu2  ;;  %4665 = vst.msk [vmem:[%s16275_s5 + $0x40] sm:$0x3] %vm1765_vm7, %v4663_v61  ;;  %v12832_v3 = vld [vmem:[#allocation9] ss:$0 sm:$0xff] }
 0x4aa   :  { %v4395_v37 = vadd.f32 %v4394_v6, %v14738_v26 }
 0x4ab   :  { %5723 = vst.msk [vmem:[#allocation2 + $0x2c] sm:$0xf] %vm1088_vm3, %v5619_v27 }
 0x4ac   :  { %v4595_v32 = vadd.f32 %v4571_v40, %v4395_v37  ;;  %v5274_v9 = vpop.f32.mrf.mxu1 }
 0x4ad   :  { %v5275_v26 = vadd.f32 %v14796_v52, %v5274_v9 }
 0x4ae   :  { %4611 = vst.msk [vmem:[#allocation3 + $0x58] sm:$0xff] %vm1683_vm5, %v4595_v32  ;;  %v12642_v32 = vld [vmem:[%s16273_s3 + $0x38] sm:$0xff] }
 0x4af   :  { %v5516_v59 = vmax.f32 %v5275_v26, 0.0  ;;  %11051 = vmatmul.msk.bf16.gmra.mxu1 %vm447_vm2, %v12549_v15  ;;  %v4666_v22 = vld [vmem:[#allocation4 + $0x20] sm:$0xff]  ;;  %6546 = vmatpush.bf16.msra.mxu2 %v12642_v32 }
 0x4b1   :  { %v5620_v23 = vpack.c.bf16 %v5516_v59, %v5516_v59  ;;  %v4397_v34 = vpop.f32.mrf.mxu2 }
 0x4b2   :  { %v4398_v41 = vadd.f32 %v4397_v34, %v14757_v4  ;;  %v12594_v0 = vld [vmem:[#allocation2 + $0x28] sm:$0xff]  ;;  %v4576_v4 = vpop.f32.mrf.mxu3 }
 0x4b3   :  { %v12612_v46 = vld [vmem:[#allocation2 + $0x28] sm:$0xff]  ;;  %5724 = vst.msk [vmem:[#allocation2 + $0x30] sm:$0xf] %vm1088_vm3, %v5620_v23  ;;  %11160 = vmatmul.msk.bf16.gmra.mxu2 %vm1314_vm4, %v12594_v0  ;;  %11202 = vmatmul.msk.bf16.gmra.mxu3 %vm1314_vm4, %v12594_v0 }
 0x4b4   :  { %v4596_v31 = vadd.f32 %v4574_v60, %v4398_v41  ;;  %v5276_v48 = vpop.f32.mrf.mxu1  ;;  %11274 = vmatmul.msk.bf16.gmra.mxu0 %vm1314_vm4, %v12612_v46  ;;  %6547 = vmatpush.bf16.msra.mxu2 %v12641_v35 }
 0x4b5   :  { %v4621_v21 = vld [vmem:[#allocation3 + $0x50] ss:$2 sm:$0xff]  ;;  %v4629_v55 = vld [vmem:[#allocation3 + $0x51] ss:$2 sm:$0xff]  ;;  %v5277_v51 = vadd.f32 %v14796_v52, %v5276_v48  ;;  %v12552_v48 = vld [vmem:[%s16270_s0 + $0x228] sm:$0xff] }
 0x4b6   :  { %v4637_v20 = vmax.f32 %v4621_v21, %v4629_v55  ;;  %4612 = vst.msk [vmem:[#allocation3 + $0x60] sm:$0xff] %vm1683_vm5, %v4596_v31  ;;  %v12656_v21 = vld [vmem:[%s16273_s3 + $0x68] sm:$0xff] }
 0x4b7   :  { %v5517_v42 = vmax.f32 %v5277_v51, 0.0  ;;  %6824 = vmatpush.bf16.msra.mxu0 %v12656_v21 }
 0x4b8   :  { %4645 = vst.msk [vmem:[#allocation4 + $0x28] sm:$0xff] %vm1683_vm5, %v4637_v20 }
 0x4b9   :  { %v5621_v43 = vpack.c.bf16 %v5517_v42, %v5517_v42  ;;  %v4399_v50 = vpop.f32.mrf.mxu2 }
 0x4ba   :  { %v4400_v19 = vadd.f32 %v4399_v50, %v14765_v10  ;;  %v4579_v8 = vpop.f32.mrf.mxu3 }
 0x4bb   :  { %5725 = vst.msk [vmem:[#allocation2 + $0x34] sm:$0xf] %vm1088_vm3, %v5621_v43 }
 0x4bc   :  { %v4597_v62 = vadd.f32 %v4576_v4, %v4400_v19  ;;  %v5279_v1 = vpop.f32.mrf.mxu1 }
 0x4bd   :  { %v5280_v49 = vadd.f32 %v14796_v52, %v5279_v1 }
 0x4be   :  { %4613 = vst.msk [vmem:[#allocation3 + $0x68] sm:$0xff] %vm1683_vm5, %v4597_v62 }
 0x4bf   :  { %v5518_v10 = vmax.f32 %v5280_v49, 0.0  ;;  %11052 = vmatmul.msk.bf16.gmra.mxu1 %vm447_vm2, %v12550_v28  ;;  %v4667_v4 = vld [vmem:[#allocation4 + $0x28] sm:$0xf] }
 0x4c1   :  { %v5622_v5 = vpack.c.bf16 %v5518_v10, %v5518_v10  ;;  %v4402_v12 = vpop.f32.mrf.mxu2 }
 0x4c2   :  { %v4403_v29 = vadd.f32 %v4402_v12, %v14779_v56  ;;  %v12595_v2 = vld [vmem:[#allocation2 + $0x30] sm:$0xff]  ;;  %v4581_v63 = vpop.f32.mrf.mxu3 }
 0x4c3   :  { %v12613_v44 = vld [vmem:[#allocation2 + $0x30] sm:$0xff]  ;;  %5726 = vst.msk [vmem:[#allocation2 + $0x38] sm:$0xf] %vm1088_vm3, %v5622_v5  ;;  %11161 = vmatmul.msk.bf16.gmra.mxu2 %vm1314_vm4, %v12595_v2  ;;  %11203 = vmatmul.msk.bf16.gmra.mxu3 %vm1314_vm4, %v12595_v2 }
 0x4c4   :  { %v4598_v24 = vadd.f32 %v4579_v8, %v4403_v29  ;;  %v5281_v14 = vpop.f32.mrf.mxu1  ;;  %11275 = vmatmul.msk.bf16.gmra.mxu0 %vm1314_vm4, %v12613_v44  ;;  %v12553_v44 = vld [vmem:[%s16270_s0 + $0x230] sm:$0xff] }
 0x4c5   :  { %v4622_v25 = vld [vmem:[#allocation3 + $0x60] ss:$2 sm:$0xff]  ;;  %v4630_v45 = vld [vmem:[#allocation3 + $0x61] ss:$2 sm:$0xff]  ;;  %v5282_v13 = vadd.f32 %v14796_v52, %v5281_v14 }
 0x4c6   :  { %v4638_v56 = vmax.f32 %v4622_v25, %v4630_v45  ;;  %4614 = vst.msk [vmem:[#allocation3 + $0x70] sm:$0xff] %vm1683_vm5, %v4598_v24 }
 0x4c7   :  { %v5519_v18 = vmax.f32 %v5282_v13, 0.0 }
 0x4c8   :  { %4646 = vst.msk [vmem:[#allocation4 + $0x30] sm:$0xff] %vm1683_vm5, %v4638_v56 }
 0x4c9   :  { %v5623_v40 = vpack.c.bf16 %v5519_v18, %v5519_v18  ;;  %v4404_v58 = vpop.f32.mrf.mxu2 }
 0x4ca   :  { %v4405_v11 = vadd.f32 %v4404_v58, %v14789_v53 }
 0x4cb   :  { %5727 = vst.msk [vmem:[#allocation2 + $0x3c] sm:$0xf] %vm1088_vm3, %v5623_v40  ;;  %v12655_v40 = vld [vmem:[%s16273_s3 + $0x60] sm:$0xff] }
 0x4cc   :  { %v4599_v57 = vadd.f32 %v4581_v63, %v4405_v11  ;;  %v5284_v7 = vpop.f32.mrf.mxu1  ;;  %6825 = vmatpush.bf16.msra.mxu0 %v12655_v40 }
 0x4cd   :  { %v5285_v61 = vadd.f32 %v14796_v52, %v5284_v7 }
 0x4ce   :  { %4615 = vst.msk [vmem:[#allocation3 + $0x78] sm:$0xff] %vm1683_vm5, %v4599_v57  ;;  %v12554_v57 = vld [vmem:[%s16270_s0 + $0x238] sm:$0xff] }
 0x4cf   :  { %v5520_v53 = vmax.f32 %v5285_v61, 0.0  ;;  %11053 = vmatmul.msk.bf16.gmra.mxu1 %vm447_vm2, %v12551_v36  ;;  %v4668_v27 = vld [vmem:[#allocation4 + $0x30] sm:$0xff] }
 0x4d0   :  { %v4670_v6 = vmax.f32 %v4666_v22, %v4668_v27 }
 0x4d1   :  { %v5624_v37 = vpack.c.bf16 %v5520_v53, %v5520_v53 }
 0x4d2   :  { %v12596_v15 = vld [vmem:[#allocation2 + $0x38] sm:$0xff]  ;;  %v4676_v39 = vadd.f32 %v12832_v3, %v4670_v6 }
 0x4d3   :  { %v12614_v47 = vld [vmem:[#allocation2 + $0x38] sm:$0xff]  ;;  %5728 = vst.msk [vmem:[#allocation2 + $0x40] sm:$0xf] %vm1088_vm3, %v5624_v37  ;;  %11162 = vmatmul.msk.bf16.gmra.mxu2 %vm1314_vm4, %v12596_v15  ;;  %11204 = vmatmul.msk.bf16.gmra.mxu3 %vm1314_vm4, %v12596_v15  ;;  %v12674_v15 = vld [vmem:[%s16273_s3 + $0x28] sm:$0xff] }
 0x4d4   :  { %v5286_v9 = vpop.f32.mrf.mxu1  ;;  %v4678_v60 = vmax.f32 %v4676_v39, 0.0  ;;  %11276 = vmatmul.msk.bf16.gmra.mxu0 %vm1314_vm4, %v12614_v47  ;;  %v12682_v37 = vld [vmem:[%s16273_s3 + $0x58] sm:$0xff]  ;;  %7222 = vmatpush.bf16.msrb.mxu3 %v12674_v15 }
 0x4d5   :  { %v4623_v26 = vld [vmem:[#allocation3 + $0x70] ss:$2 sm:$0xff]  ;;  %v4631_v59 = vld [vmem:[#allocation3 + $0x71] ss:$2 sm:$0xff]  ;;  %v5287_v23 = vadd.f32 %v14796_v52, %v5286_v9  ;;  %7121 = vmatpush.bf16.msrb.mxu2 %v12682_v37 }
 0x4d6   :  { %v4639_v34 = vmax.f32 %v4623_v26, %v4631_v59  ;;  %v4680_v41 = vpack.c.bf16 %v4678_v60, %v4678_v60  ;;  %v12555_v59 = vld [vmem:[%s16270_s0 + $0x240] sm:$0xff] }
 0x4d7   :  { %v5521_v0 = vmax.f32 %v5287_v23, 0.0  ;;  %v12696_v23 = vld [vmem:[%s16273_s3 + $0x88] sm:$0xff] }
 0x4d8   :  { %4647 = vst.msk [vmem:[#allocation4 + $0x38] sm:$0xff] %vm1683_vm5, %v4639_v34  ;;  %v4684_v46 = vrot.slane %v4680_v41, 6  ;;  %7399 = vmatpush.bf16.msrb.mxu0 %v12696_v23 }
 0x4d9   :  { %v5625_v31 = vpack.c.bf16 %v5521_v0, %v5521_v0 }
 0x4da   :  { %4690 = vst.msk [vmem:[%s16275_s5 + $0x40] sm:$0xc] %vm1794_vm8, %v4684_v46  ;;  %v4685_v5 = vrot.slane %v4684_v46, 4 }
 0x4db   :  { %5729 = vst.msk [vmem:[#allocation2 + $0x44] sm:$0xf] %vm1088_vm3, %v5625_v31 }
 0x4dc   :  { %v5289_v55 = vpop.f32.mrf.mxu1 }
 0x4dd   :  { %v5290_v51 = vadd.f32 %v14796_v52, %v5289_v55 }
 0x4df   :  { %v5522_v20 = vmax.f32 %v5290_v51, 0.0  ;;  %11054 = vmatmul.msk.bf16.gmra.mxu1 %vm447_vm2, %v12552_v48  ;;  %v4669_v42 = vld [vmem:[#allocation4 + $0x38] sm:$0xf] }
 0x4e0   :  { %v4671_v30 = vmax.f32 %v4667_v4, %v4669_v42 }
 0x4e1   :  { %v5626_v43 = vpack.c.bf16 %v5522_v20, %v5522_v20 }
 0x4e2   :  { %v12603_v50 = vld [vmem:[#allocation2 + $0x40] sm:$0xff]  ;;  %v4677_v62 = vadd.f32 %v12832_v3, %v4671_v30  ;;  %v12681_v30 = vld [vmem:[%s16273_s3 + $0x50] sm:$0xff] }
 0x4e3   :  { %v12615_v19 = vld [vmem:[#allocation2 + $0x40] sm:$0xff]  ;;  %5730 = vst.msk [vmem:[#allocation2 + $0x48] sm:$0xf] %vm1088_vm3, %v5626_v43  ;;  %11163 = vmatmul.msk.bf16.gmra.mxu2 %vm1314_vm4, %v12603_v50 }
 0x4e4   :  { %v12625_v28 = vld [vmem:[#allocation2 + $0x40] sm:$0xff]  ;;  %v5291_v1 = vpop.f32.mrf.mxu1  ;;  %v4679_v33 = vmax.f32 %v4677_v62, 0.0  ;;  %11277 = vmatmul.msk.bf16.gmra.mxu0 %vm1314_vm4, %v12615_v19  ;;  %7122 = vmatpush.bf16.msrb.mxu2 %v12681_v30  ;;  %v12556_v19 = vld [vmem:[%s16270_s0 + $0x248] sm:$0xff] }
 0x4e5   :  { %11393 = vmatmul.msk.bf16.vlgmr.msra.gmra.mxu3 %vm1314_vm4, %v12625_v28  ;;  %v5292_v49 = vadd.f32 %v14796_v52, %v5291_v1  ;;  %v12673_v43 = vld [vmem:[%s16273_s3 + $0x20] sm:$0xff] }
 0x4e6   :  { %v4681_v10 = vpack.c.bf16 %v4679_v33, %v4679_v33  ;;  %v15020_v8 = vpop.f32.mrf.mxu3  ;;  %7223 = vmatpush.bf16.msrb.mxu3 %v12673_v43  ;;  %v12669_v43 = vld [vmem:[%s16273_s3] sm:$0xff] }
 0x4e7   :  { %v5523_v16 = vmax.f32 %v5292_v49, 0.0 }
 0x4e8   :  { %v4686_v12 = vrot.slane %v4681_v10, 6 }
 0x4e9   :  { %v5627_v29 = vpack.c.bf16 %v5523_v16, %v5523_v16 }
 0x4ea   :  { %v4687_v2 = vsel %vm13816_vm11, %v4685_v5, %v4686_v12 }
 0x4eb   :  { %5731 = vst.msk [vmem:[#allocation2 + $0x4c] sm:$0xf] %vm1088_vm3, %v5627_v29 }
 0x4ec   :  { %v5294_v54 = vpop.f32.mrf.mxu1  ;;  %4691 = vst.msk [vmem:[%s16275_s5 + $0x44] sm:$0xf] %vm1763_vm6, %v4687_v2 }
 0x4ed   :  { %v5295_v24 = vadd.f32 %v14796_v52, %v5294_v54 }
 0x4ee   :  { %v15034_v25 = vpop.f32.mrf.mxu3 }
 0x4ef   :  { %v5524_v14 = vmax.f32 %v5295_v24, 0.0  ;;  %11055 = vmatmul.msk.bf16.gmra.mxu1 %vm447_vm2, %v12553_v44 }
 0x4f1   :  { %v5628_v45 = vpack.c.bf16 %v5524_v14, %v5524_v14 }
 0x4f2   :  { %v12604_v13 = vld [vmem:[#allocation2 + $0x48] sm:$0xff] }
 0x4f3   :  { %v12616_v56 = vld [vmem:[#allocation2 + $0x48] sm:$0xff]  ;;  %5732 = vst.msk [vmem:[#allocation2 + $0x50] sm:$0xf] %vm1088_vm3, %v5628_v45  ;;  %11164 = vmatmul.msk.bf16.gmra.mxu2 %vm1314_vm4, %v12604_v13  ;;  %v12695_v45 = vld [vmem:[%s16273_s3 + $0x80] sm:$0xff] }
 0x4f4   :  { %v12626_v18 = vld [vmem:[#allocation2 + $0x48] sm:$0xff]  ;;  %v5296_v58 = vpop.f32.mrf.mxu1  ;;  %11278 = vmatmul.msk.bf16.gmra.mxu0 %vm1314_vm4, %v12616_v56 }
 0x4f5   :  { %11394 = vmatmul.msk.bf16.gmra.mxu3 %vm1314_vm4, %v12626_v18  ;;  %v5297_v11 = vadd.f32 %v14796_v52, %v5296_v58  ;;  %7400 = vmatpush.bf16.msrb.mxu0 %v12695_v45  ;;  %v12557_v58 = vld [vmem:[%s16270_s0 + $0x250] sm:$0xff] }
 0x4f6   :  { %v15044_v36 = vpop.f32.mrf.mxu3 }
 0x4f7   :  { %v5525_v63 = vmax.f32 %v5297_v11, 0.0  ;;  %v12680_v11 = vld [vmem:[%s16273_s3 + $0x48] sm:$0xff] }
 0x4f8   :  { %7123 = vmatpush.bf16.msrb.mxu2 %v12680_v11 }
 0x4f9   :  { %v5629_v17 = vpack.c.bf16 %v5525_v63, %v5525_v63  ;;  %v12672_v63 = vld [vmem:[%s16273_s3 + $0x18] sm:$0xff] }
 0x4fa   :  { %7224 = vmatpush.bf16.msrb.mxu3 %v12672_v63 }
 0x4fb   :  { %5733 = vst.msk [vmem:[#allocation2 + $0x54] sm:$0xf] %vm1088_vm3, %v5629_v17 }
 0x4fc   :  { %v5299_v7 = vpop.f32.mrf.mxu1 }
 0x4fd   :  { %v5300_v61 = vadd.f32 %v14796_v52, %v5299_v7 }
 0x4fe   :  { %v15052_v53 = vpop.f32.mrf.mxu3 }
 0x4ff   :  { %v5526_v3 = vmax.f32 %v5300_v61, 0.0  ;;  %11056 = vmatmul.msk.bf16.gmra.mxu1 %vm447_vm2, %v12554_v57 }
 0x501   :  { %v5630_v22 = vpack.c.bf16 %v5526_v3, %v5526_v3 }
 0x502   :  { %v12617_v27 = vld [vmem:[#allocation2 + $0x50] sm:$0xff] }
 0x503   :  { %v12627_v6 = vld [vmem:[#allocation2 + $0x50] sm:$0xff]  ;;  %5734 = vst.msk [vmem:[#allocation2 + $0x58] sm:$0xf] %vm1088_vm3, %v5630_v22 }
 0x504   :  { %v5301_v47 = vpop.f32.mrf.mxu1  ;;  %11353 = vmatmul.msk.bf16.vlgmr.msra.gmra.mxu2 %vm1314_vm4, %v12627_v6  ;;  %11279 = vmatmul.msk.bf16.gmra.mxu0 %vm1314_vm4, %v12617_v27 }
 0x505   :  { %11395 = vmatmul.msk.bf16.gmra.mxu3 %vm1314_vm4, %v12627_v6  ;;  %v5302_v39 = vadd.f32 %v14796_v52, %v5301_v47 }
 0x506   :  { %v5969_v9 = vpop.f32.mrf.mxu2  ;;  %v15065_v60 = vpop.f32.mrf.mxu3 }
 0x507   :  { %v5527_v32 = vmax.f32 %v5302_v39, 0.0  ;;  %v6071_v10 = vadd.f32 %v15020_v8, %v5969_v9 }
 0x509   :  { %v5631_v26 = vpack.c.bf16 %v5527_v32, %v5527_v32 }
 0x50b   :  { %5735 = vst.msk [vmem:[#allocation2 + $0x5c] sm:$0xf] %vm1088_vm3, %v5631_v26 }
 0x50c   :  { %v5304_v34 = vpop.f32.mrf.mxu1 }
 0x50d   :  { %v5305_v41 = vadd.f32 %v14796_v52, %v5304_v34  ;;  %v12694_v34 = vld [vmem:[%s16273_s3 + $0x78] sm:$0xff] }
 0x50e   :  { %v5971_v46 = vpop.f32.mrf.mxu2  ;;  %v15076_v31 = vpop.f32.mrf.mxu3  ;;  %7401 = vmatpush.bf16.msrb.mxu0 %v12694_v34 }
 0x50f   :  { %v5528_v0 = vmax.f32 %v5305_v41, 0.0  ;;  %11057 = vmatmul.msk.bf16.gmra.mxu1 %vm447_vm2, %v12555_v59  ;;  %v6073_v13 = vadd.f32 %v15034_v25, %v5971_v46  ;;  %v12671_v41 = vld [vmem:[%s16273_s3 + $0x10] sm:$0xff] }
 0x510   :  { %7225 = vmatpush.bf16.msrb.mxu3 %v12671_v41  ;;  %v12560_v41 = vld [vmem:[%s16270_s0 + $0x268] sm:$0xff] }
 0x511   :  { %v5632_v48 = vpack.c.bf16 %v5528_v0, %v5528_v0 }
 0x512   :  { %v12618_v21 = vld [vmem:[#allocation2 + $0x58] sm:$0xff] }
 0x513   :  { %v12628_v55 = vld [vmem:[#allocation2 + $0x58] sm:$0xff]  ;;  %5736 = vst.msk [vmem:[#allocation2 + $0x60] sm:$0xf] %vm1088_vm3, %v5632_v48 }
 0x514   :  { %v5306_v51 = vpop.f32.mrf.mxu1  ;;  %11354 = vmatmul.msk.bf16.gmra.mxu2 %vm1314_vm4, %v12628_v55  ;;  %11280 = vmatmul.msk.bf16.gmra.mxu0 %vm1314_vm4, %v12618_v21  ;;  %v12558_v21 = vld [vmem:[%s16270_s0 + $0x258] sm:$0xff] }
 0x515   :  { %11396 = vmatmul.msk.bf16.gmra.mxu3 %vm1314_vm4, %v12628_v55  ;;  %v5307_v20 = vadd.f32 %v14796_v52, %v5306_v51  ;;  %v12670_v51 = vld [vmem:[%s16273_s3 + $0x8] sm:$0xff] }
 0x516   :  { %v5974_v42 = vpop.f32.mrf.mxu2  ;;  %v15083_v35 = vpop.f32.mrf.mxu3  ;;  %7226 = vmatpush.bf16.msrb.mxu3 %v12670_v51 }
 0x517   :  { %v5529_v4 = vmax.f32 %v5307_v20, 0.0  ;;  %v6076_v3 = vadd.f32 %v15044_v36, %v5974_v42  ;;  %v15154_v20 = vld [vmem:[#allocation7] ss:$0 sm:$0xff] }
 0x519   :  { %v5633_v50 = vpack.c.bf16 %v5529_v4, %v5529_v4 }
 0x51a   :  { %7227 = vmatpush.bf16.msrb.mxu3 %v12669_v43 }
 0x51b   :  { %5737 = vst.msk [vmem:[#allocation2 + $0x64] sm:$0xf] %vm1088_vm3, %v5633_v50 }
 0x51c   :  { %v5309_v28 = vpop.f32.mrf.mxu1 }
 0x51d   :  { %v5310_v62 = vadd.f32 %v14796_v52, %v5309_v28 }
 0x51e   :  { %v5976_v33 = vpop.f32.mrf.mxu2  ;;  %v15097_v49 = vpop.f32.mrf.mxu3 }
 0x51f   :  { %v5530_v1 = vmax.f32 %v5310_v62, 0.0  ;;  %11058 = vmatmul.msk.bf16.gmra.mxu1 %vm447_vm2, %v12556_v19  ;;  %v6078_v0 = vadd.f32 %v15052_v53, %v5976_v33 }
 0x521   :  { %v5634_v16 = vpack.c.bf16 %v5530_v1, %v5530_v1  ;;  %v6247_v5 = vpop.f32.mrf.mxu0 }
 0x522   :  { %v12629_v12 = vld [vmem:[#allocation2 + $0x60] sm:$0xff]  ;;  %v6287_v2 = vadd.f32 %v6247_v5, %v6071_v10 }
 0x523   :  { %v12647_v29 = vld [vmem:[#allocation2 + $0x60] sm:$0xff]  ;;  %5738 = vst.msk [vmem:[#allocation2 + $0x68] sm:$0xf] %vm1088_vm3, %v5634_v16 }
 0x524   :  { %v5311_v44 = vpop.f32.mrf.mxu1  ;;  %11355 = vmatmul.msk.bf16.gmra.mxu2 %vm1314_vm4, %v12629_v12  ;;  %6303 = vst.msk [vmem:[#allocation3] sm:$0xff] %vm1683_vm5, %v6287_v2  ;;  %11469 = vmatmul.msk.bf16.vlgmr.msra.gmra.mxu0 %vm1314_vm4, %v12647_v29 }
 0x525   :  { %11397 = vmatmul.msk.bf16.gmra.mxu3 %vm1314_vm4, %v12629_v12  ;;  %v5312_v54 = vadd.f32 %v14796_v52, %v5311_v44 }
 0x526   :  { %v5979_v8 = vpop.f32.mrf.mxu2  ;;  %v15106_v14 = vpop.f32.mrf.mxu3 }
 0x527   :  { %v5531_v24 = vmax.f32 %v5312_v54, 0.0  ;;  %v6081_v50 = vadd.f32 %v15065_v60, %v5979_v8  ;;  %v12679_v54 = vld [vmem:[%s16273_s3 + $0x40] sm:$0xff] }
 0x528   :  { %7124 = vmatpush.bf16.msrb.mxu2 %v12679_v54 }
 0x529   :  { %v5635_v56 = vpack.c.bf16 %v5531_v24, %v5531_v24  ;;  %v6249_v18 = vpop.f32.mrf.mxu0 }
 0x52a   :  { %v6288_v40 = vadd.f32 %v6249_v18, %v6073_v13  ;;  %v12693_v18 = vld [vmem:[%s16273_s3 + $0x70] sm:$0xff] }
 0x52b   :  { %5739 = vst.msk [vmem:[#allocation2 + $0x6c] sm:$0xf] %vm1088_vm3, %v5635_v56  ;;  %v12559_v56 = vld [vmem:[%s16270_s0 + $0x260] sm:$0xff]  ;;  %7402 = vmatpush.bf16.msrb.mxu0 %v12693_v18 }
 0x52c   :  { %v5314_v17 = vpop.f32.mrf.mxu1  ;;  %6304 = vst.msk [vmem:[#allocation3 + $0x8] sm:$0xff] %vm1683_vm5, %v6288_v40 }
 0x52d   :  { %v5315_v25 = vadd.f32 %v14796_v52, %v5314_v17 }
 0x52e   :  { %v15125_v7 = vpop.f32.mrf.mxu2  ;;  %v15127_v61 = vpop.f32.mrf.mxu3 }
 0x52f   :  { %v5532_v57 = vmax.f32 %v5315_v25, 0.0  ;;  %11059 = vmatmul.msk.bf16.gmra.mxu1 %vm447_vm2, %v12557_v58  ;;  %v6083_v24 = vadd.f32 %v15076_v31, %v15125_v7 }
 0x531   :  { %v5636_v22 = vpack.c.bf16 %v5532_v57, %v5532_v57  ;;  %v6252_v27 = vpop.f32.mrf.mxu0 }
 0x532   :  { %v12630_v6 = vld [vmem:[#allocation2 + $0x68] sm:$0xff]  ;;  %v6289_v15 = vadd.f32 %v6252_v27, %v6076_v3 }
 0x533   :  { %v12648_v37 = vld [vmem:[#allocation2 + $0x68] sm:$0xff]  ;;  %5740 = vst.msk [vmem:[#allocation2 + $0x70] sm:$0xf] %vm1088_vm3, %v5636_v22 }
 0x534   :  { %v6319_v47 = vld [vmem:[#allocation3] ss:$2 sm:$0xff]  ;;  %v6327_v39 = vld [vmem:[#allocation3 + $0x1] ss:$2 sm:$0xff]  ;;  %v5316_v32 = vpop.f32.mrf.mxu1  ;;  %11356 = vmatmul.msk.bf16.gmra.mxu2 %vm1314_vm4, %v12630_v6  ;;  %6305 = vst.msk [vmem:[#allocation3 + $0x10] sm:$0xff] %vm1683_vm5, %v6289_v15  ;;  %11470 = vmatmul.msk.bf16.gmra.mxu0 %vm1314_vm4, %v12648_v37 }
 0x535   :  { %11398 = vmatmul.msk.bf16.gmra.mxu3 %vm1314_vm4, %v12630_v6  ;;  %v6335_v9 = vmax.f32 %v6319_v47, %v6327_v39  ;;  %v5317_v26 = vadd.f32 %v14796_v52, %v5316_v32 }
 0x536   :  { %v5984_v59 = vpop.f32.mrf.mxu2  ;;  %v15137_v23 = vpop.f32.mrf.mxu3 }
 0x537   :  { %6343 = vst.msk [vmem:[#allocation4] sm:$0xff] %vm1683_vm5, %v6335_v9  ;;  %v5533_v36 = vmax.f32 %v5317_v26, 0.0  ;;  %v6086_v17 = vadd.f32 %v15083_v35, %v5984_v59  ;;  %v12678_v9 = vld [vmem:[%s16273_s3 + $0x38] sm:$0xff] }
 0x538   :  { %7125 = vmatpush.bf16.msrb.mxu2 %v12678_v9 }
 0x539   :  { %v5637_v46 = vpack.c.bf16 %v5533_v36, %v5533_v36  ;;  %v6254_v52 = vpop.f32.mrf.mxu0 }
 0x53a   :  { %v6290_v48 = vadd.f32 %v6254_v52, %v6078_v0  ;;  %v12833_v52 = vld [vmem:[#allocation9] ss:$0 sm:$0xff] }
 0x53b   :  { %5741 = vst.msk [vmem:[#allocation2 + $0x74] sm:$0xf] %vm1088_vm3, %v5637_v46 }
 0x53c   :  { %v5319_v55 = vpop.f32.mrf.mxu1  ;;  %6306 = vst.msk [vmem:[#allocation3 + $0x18] sm:$0xff] %vm1683_vm5, %v6290_v48 }
 0x53d   :  { %v5320_v53 = vadd.f32 %v15154_v20, %v5319_v55 }
 0x53e   :  { %v5986_v42 = vpop.f32.mrf.mxu2  ;;  %v15158_v30 = vpop.f32.mrf.mxu3  ;;  %v6351_v48 = vld [vmem:[#allocation4] sm:$0xff] }
 0x53f   :  { %v5534_v4 = vmax.f32 %v5320_v53, 0.0  ;;  %11060 = vmatmul.msk.bf16.gmra.mxu1 %vm447_vm2, %v12558_v21  ;;  %v6088_v26 = vadd.f32 %v15097_v49, %v5986_v42 }
 0x541   :  { %v5638_v19 = vpack.c.bf16 %v5534_v4, %v5534_v4  ;;  %v6257_v28 = vpop.f32.mrf.mxu0  ;;  %v12677_v4 = vld [vmem:[%s16273_s3 + $0x30] sm:$0xff] }
 0x542   :  { %v12631_v62 = vld [vmem:[#allocation2 + $0x70] sm:$0xff]  ;;  %v6291_v33 = vadd.f32 %v6257_v28, %v6081_v50  ;;  %7126 = vmatpush.bf16.msrb.mxu2 %v12677_v4  ;;  %v12562_v4 = vld [vmem:[%s16270_s0 + $0x278] sm:$0xff] }
 0x543   :  { %v12649_v1 = vld [vmem:[#allocation2 + $0x70] sm:$0xff]  ;;  %5742 = vst.msk [vmem:[#allocation2 + $0x78] sm:$0xf] %vm1088_vm3, %v5638_v19 }
 0x544   :  { %v6320_v10 = vld [vmem:[#allocation3 + $0x10] ss:$2 sm:$0xff]  ;;  %v6328_v16 = vld [vmem:[#allocation3 + $0x11] ss:$2 sm:$0xff]  ;;  %v5321_v5 = vpop.f32.mrf.mxu1  ;;  %11357 = vmatmul.msk.bf16.gmra.mxu2 %vm1314_vm4, %v12631_v62  ;;  %6307 = vst.msk [vmem:[#allocation3 + $0x20] sm:$0xff] %vm1683_vm5, %v6291_v33  ;;  %11471 = vmatmul.msk.bf16.gmra.mxu0 %vm1314_vm4, %v12649_v1 }
 0x545   :  { %11399 = vmatmul.msk.bf16.gmra.mxu3 %vm1314_vm4, %v12631_v62  ;;  %v6336_v12 = vmax.f32 %v6320_v10, %v6328_v16  ;;  %v5322_v60 = vadd.f32 %v15154_v20, %v5321_v5 }
 0x546   :  { %v5989_v2 = vpop.f32.mrf.mxu2  ;;  %v15171_v44 = vpop.f32.mrf.mxu3 }
 0x547   :  { %6344 = vst.msk [vmem:[#allocation4 + $0x8] sm:$0xff] %vm1683_vm5, %v6336_v12  ;;  %v5535_v29 = vmax.f32 %v5322_v60, 0.0  ;;  %v6091_v42 = vadd.f32 %v15106_v14, %v5989_v2 }
 0x549   :  { %v5639_v8 = vpack.c.bf16 %v5535_v29, %v5535_v29  ;;  %v6259_v45 = vpop.f32.mrf.mxu0 }
 0x54a   :  { %v6292_v13 = vadd.f32 %v6259_v45, %v6083_v24 }
 0x54b   :  { %5743 = vst.msk [vmem:[#allocation2 + $0x7c] sm:$0xf] %vm1088_vm3, %v5639_v8  ;;  %v12692_v8 = vld [vmem:[%s16273_s3 + $0x68] sm:$0xff] }
 0x54c   :  { %v5324_v40 = vpop.f32.mrf.mxu1  ;;  %6308 = vst.msk [vmem:[#allocation3 + $0x28] sm:$0xff] %vm1683_vm5, %v6292_v13  ;;  %7403 = vmatpush.bf16.msrb.mxu0 %v12692_v8  ;;  %v12710_v8 = vld [vmem:[%s16273_s3 + $0x28] sm:$0xff] }
 0x54d   :  { %v5325_v58 = vadd.f32 %v15154_v20, %v5324_v40  ;;  %v12561_v40 = vld [vmem:[%s16270_s0 + $0x270] sm:$0xff]  ;;  %7801 = vmatpush.bf16.msra.mxu3 %v12710_v8 }
 0x54e   :  { %v15188_v11 = vpop.f32.mrf.mxu2  ;;  %v15190_v63 = vpop.f32.mrf.mxu3 }
 0x54f   :  { %v5536_v31 = vmax.f32 %v5325_v58, 0.0  ;;  %11061 = vmatmul.msk.bf16.gmra.mxu1 %vm447_vm2, %v12559_v56  ;;  %v6093_v45 = vadd.f32 %v15127_v61, %v15188_v11 }
 0x551   :  { %v5640_v25 = vpack.c.bf16 %v5536_v31, %v5536_v31  ;;  %v6262_v57 = vpop.f32.mrf.mxu0 }
 0x552   :  { %v12632_v7 = vld [vmem:[#allocation2 + $0x78] sm:$0xff]  ;;  %v6293_v22 = vadd.f32 %v6262_v57, %v6086_v17  ;;  %v6352_v17 = vld [vmem:[#allocation4 + $0x8] sm:$0xf] }
 0x553   :  { %v12650_v3 = vld [vmem:[#allocation2 + $0x78] sm:$0xff]  ;;  %5744 = vst.msk [vmem:[#allocation2 + $0x80] sm:$0xf] %vm1088_vm3, %v5640_v25  ;;  %v6321_v27 = vld [vmem:[#allocation3 + $0x20] ss:$2 sm:$0xff] }
 0x554   :  { %v6329_v6 = vld [vmem:[#allocation3 + $0x21] ss:$2 sm:$0xff]  ;;  %v5326_v37 = vpop.f32.mrf.mxu1  ;;  %11358 = vmatmul.msk.bf16.gmra.mxu2 %vm1314_vm4, %v12632_v7  ;;  %6309 = vst.msk [vmem:[#allocation3 + $0x30] sm:$0xff] %vm1683_vm5, %v6293_v22  ;;  %11472 = vmatmul.msk.bf16.gmra.mxu0 %vm1314_vm4, %v12650_v3 }
 0x555   :  { %11400 = vmatmul.msk.bf16.gmra.mxu3 %vm1314_vm4, %v12632_v7  ;;  %v6337_v15 = vmax.f32 %v6321_v27, %v6329_v6  ;;  %v5327_v47 = vadd.f32 %v15154_v20, %v5326_v37 }
 0x556   :  { %v15200_v39 = vpop.f32.mrf.mxu2  ;;  %v15202_v32 = vpop.f32.mrf.mxu3 }
 0x557   :  { %6345 = vst.msk [vmem:[#allocation4 + $0x10] sm:$0xff] %vm1683_vm5, %v6337_v15  ;;  %v5537_v35 = vmax.f32 %v5327_v47, 0.0  ;;  %v6096_v3 = vadd.f32 %v15137_v23, %v15200_v39 }
 0x559   :  { %v5641_v36 = vpack.c.bf16 %v5537_v35, %v5537_v35  ;;  %v6264_v59 = vpop.f32.mrf.mxu0 }
 0x55a   :  { %v6294_v34 = vadd.f32 %v6264_v59, %v6088_v26 }
 0x55b   :  { %5745 = vst.msk [vmem:[#allocation2 + $0x84] sm:$0xf] %vm1088_vm3, %v5641_v36 }
 0x55c   :  { %v5329_v0 = vpop.f32.mrf.mxu1  ;;  %6310 = vst.msk [vmem:[#allocation3 + $0x38] sm:$0xff] %vm1683_vm5, %v6294_v34 }
 0x55d   :  { %v5330_v46 = vadd.f32 %v15154_v20, %v5329_v0 }
 0x55e   :  { %v6353_v21 = vld [vmem:[#allocation4 + $0x10] sm:$0xff]  ;;  %v15215_v49 = vpop.f32.mrf.mxu2  ;;  %v15217_v51 = vpop.f32.mrf.mxu3 }
 0x55f   :  { %v5538_v55 = vmax.f32 %v5330_v46, 0.0  ;;  %11062 = vmatmul.msk.bf16.gmra.mxu1 %vm447_vm2, %v12560_v41  ;;  %v6355_v53 = vmax.f32 %v6351_v48, %v6353_v21  ;;  %v6098_v48 = vadd.f32 %v15158_v30, %v15215_v49 }
 0x561   :  { %v5642_v43 = vpack.c.bf16 %v5538_v55, %v5538_v55  ;;  %v6361_v50 = vadd.f32 %v12833_v52, %v6355_v53  ;;  %v6267_v19 = vpop.f32.mrf.mxu0 }
 0x562   :  { %v12639_v28 = vld [vmem:[#allocation2 + $0x80] sm:$0xff]  ;;  %v6295_v33 = vadd.f32 %v6267_v19, %v6091_v42 }
 0x563   :  { %v12651_v62 = vld [vmem:[#allocation2 + $0x80] sm:$0xff]  ;;  %5746 = vst.msk [vmem:[#allocation2 + $0x88] sm:$0xf] %vm1088_vm3, %v5642_v43  ;;  %v6363_v10 = vmax.f32 %v6361_v50, 0.0  ;;  %v6322_v16 = vld [vmem:[#allocation3 + $0x30] ss:$2 sm:$0xff] }
 0x564   :  { %v12661_v1 = vld [vmem:[#allocation2 + $0x80] sm:$0xff]  ;;  %v6330_v5 = vld [vmem:[#allocation3 + $0x31] ss:$2 sm:$0xff]  ;;  %v5331_v12 = vpop.f32.mrf.mxu1  ;;  %11359 = vmatmul.msk.bf16.gmra.mxu2 %vm1314_vm4, %v12639_v28  ;;  %6311 = vst.msk [vmem:[#allocation3 + $0x40] sm:$0xff] %vm1683_vm5, %v6295_v33  ;;  %11473 = vmatmul.msk.bf16.gmra.mxu0 %vm1314_vm4, %v12651_v62 }
 0x565   :  { %11589 = vmatmul.msk.bf16.vlgmr.msrb.gmra.mxu3 %vm1314_vm4, %v12661_v1  ;;  %v6338_v60 = vmax.f32 %v6322_v16, %v6330_v5  ;;  %v5332_v14 = vadd.f32 %v15154_v20, %v5331_v12  ;;  %v6365_v29 = vpack.c.bf16 %v6363_v10, %v6363_v10 }
 0x566   :  { %v5999_v54 = vpop.f32.mrf.mxu2 }
 0x567   :  { %6346 = vst.msk [vmem:[#allocation4 + $0x18] sm:$0xff] %vm1683_vm5, %v6338_v60  ;;  %v5539_v2 = vmax.f32 %v5332_v14, 0.0  ;;  %v6101_v49 = vadd.f32 %v15171_v44, %v5999_v54  ;;  %v12718_v54 = vld [vmem:[%s16273_s3 + $0x58] sm:$0xff] }
 0x568   :  { %v15230_v24 = vpop.f32.mrf.mxu3  ;;  %11281 = vst.msk [vmem:[%s16275_s5 + $0x48] sm:$0xf] %vm1763_vm6, %v6365_v29  ;;  %7700 = vmatpush.bf16.msra.mxu2 %v12718_v54 }
 0x569   :  { %v5643_v13 = vpack.c.bf16 %v5539_v2, %v5539_v2  ;;  %v6269_v56 = vpop.f32.mrf.mxu0 }
 0x56a   :  { %v6296_v18 = vadd.f32 %v6269_v56, %v6093_v45 }
 0x56b   :  { %5747 = vst.msk [vmem:[#allocation2 + $0x8c] sm:$0xf] %vm1088_vm3, %v5643_v13 }
 0x56c   :  { %v5334_v58 = vpop.f32.mrf.mxu1  ;;  %6312 = vst.msk [vmem:[#allocation3 + $0x48] sm:$0xff] %vm1683_vm5, %v6296_v18 }
 0x56d   :  { %v5335_v31 = vadd.f32 %v15154_v20, %v5334_v58  ;;  %v12732_v58 = vld [vmem:[%s16273_s3 + $0x88] sm:$0xff] }
 0x56e   :  { %v6354_v25 = vld [vmem:[#allocation4 + $0x18] sm:$0xf]  ;;  %v15248_v61 = vpop.f32.mrf.mxu2 }
 0x56f   :  { %v5540_v57 = vmax.f32 %v5335_v31, 0.0  ;;  %11063 = vmatmul.msk.bf16.gmra.mxu1 %vm447_vm2, %v12561_v40  ;;  %v6356_v7 = vmax.f32 %v6352_v17, %v6354_v25  ;;  %v6103_v45 = vadd.f32 %v15190_v63, %v15248_v61  ;;  %v12563_v40 = vld [vmem:[%s16270_s0 + $0x280] sm:$0xff] }
 0x570   :  { %v15250_v11 = vpop.f32.mrf.mxu3 }
 0x571   :  { %v5644_v22 = vpack.c.bf16 %v5540_v57, %v5540_v57  ;;  %v6362_v27 = vadd.f32 %v12833_v52, %v6356_v7  ;;  %v6272_v6 = vpop.f32.mrf.mxu0  ;;  %v12691_v52 = vld [vmem:[%s16273_s3 + $0x60] sm:$0xff] }
 0x572   :  { %v12640_v37 = vld [vmem:[#allocation2 + $0x88] sm:$0xff]  ;;  %v6297_v35 = vadd.f32 %v6272_v6, %v6096_v3  ;;  %7404 = vmatpush.bf16.msrb.mxu0 %v12691_v52 }
 0x573   :  { %v12652_v15 = vld [vmem:[#allocation2 + $0x88] sm:$0xff]  ;;  %5748 = vst.msk [vmem:[#allocation2 + $0x90] sm:$0xf] %vm1088_vm3, %v5644_v22  ;;  %v6364_v9 = vmax.f32 %v6362_v27, 0.0 }
 0x574   :  { %v12662_v47 = vld [vmem:[#allocation2 + $0x88] sm:$0xff]  ;;  %v5336_v59 = vpop.f32.mrf.mxu1  ;;  %11360 = vmatmul.msk.bf16.gmra.mxu2 %vm1314_vm4, %v12640_v37  ;;  %6313 = vst.msk [vmem:[#allocation3 + $0x50] sm:$0xff] %vm1683_vm5, %v6297_v35  ;;  %11474 = vmatmul.msk.bf16.gmra.mxu0 %vm1314_vm4, %v12652_v15 }
 0x575   :  { %v6323_v26 = vld [vmem:[#allocation3 + $0x40] ss:$2 sm:$0xff]  ;;  %v6331_v36 = vld [vmem:[#allocation3 + $0x41] ss:$2 sm:$0xff]  ;;  %11590 = vmatmul.msk.bf16.gmra.mxu3 %vm1314_vm4, %v12662_v47  ;;  %v5337_v23 = vadd.f32 %v15154_v20, %v5336_v59  ;;  %v6366_v39 = vpack.c.bf16 %v6364_v9, %v6364_v9 }
 0x576   :  { %v6339_v34 = vmax.f32 %v6323_v26, %v6331_v36  ;;  %v6004_v0 = vpop.f32.mrf.mxu2  ;;  %7978 = vmatpush.bf16.msra.mxu0 %v12732_v58  ;;  %v12565_v58 = vld [vmem:[%s16270_s0 + $0x290] sm:$0xff] }
 0x577   :  { %v5541_v41 = vmax.f32 %v5337_v23, 0.0  ;;  %11282 = vst.msk [vmem:[%s16275_s5 + $0x4c] sm:$0x3] %vm1765_vm7, %v6366_v39  ;;  %v6106_v61 = vadd.f32 %v15202_v32, %v6004_v0 }
 0x578   :  { %6347 = vst.msk [vmem:[#allocation4 + $0x20] sm:$0xff] %vm1683_vm5, %v6339_v34  ;;  %v15261_v46 = vpop.f32.mrf.mxu3 }
 0x579   :  { %v5645_v21 = vpack.c.bf16 %v5541_v41, %v5541_v41  ;;  %v6274_v55 = vpop.f32.mrf.mxu0  ;;  %v12564_v41 = vld [vmem:[%s16270_s0 + $0x288] sm:$0xff] }
 0x57a   :  { %v6298_v53 = vadd.f32 %v6274_v55, %v6098_v48  ;;  %v12717_v48 = vld [vmem:[%s16273_s3 + $0x50] sm:$0xff] }
 0x57b   :  { %5749 = vst.msk [vmem:[#allocation2 + $0x94] sm:$0xf] %vm1088_vm3, %v5645_v21  ;;  %v12835_v21 = vld [vmem:[#allocation9] ss:$0 sm:$0xff]  ;;  %7701 = vmatpush.bf16.msra.mxu2 %v12717_v48 }
 0x57c   :  { %v5339_v42 = vpop.f32.mrf.mxu1  ;;  %6314 = vst.msk [vmem:[#allocation3 + $0x58] sm:$0xff] %vm1683_vm5, %v6298_v53 }
 0x57d   :  { %v5340_v43 = vadd.f32 %v15154_v20, %v5339_v42 }
 0x57e   :  { %v6006_v19 = vpop.f32.mrf.mxu2 }
 0x57f   :  { %v5542_v50 = vmax.f32 %v5340_v43, 0.0  ;;  %11064 = vmatmul.msk.bf16.gmra.mxu1 %vm447_vm2, %v12562_v4  ;;  %v6108_v59 = vadd.f32 %v15217_v51, %v6006_v19  ;;  %v12709_v51 = vld [vmem:[%s16273_s3 + $0x20] sm:$0xff] }
 0x580   :  { %v15279_v30 = vpop.f32.mrf.mxu3  ;;  %v6370_v42 = vld [vmem:[#allocation4 + $0x20] sm:$0xff]  ;;  %7802 = vmatpush.bf16.msra.mxu3 %v12709_v51 }
 0x581   :  { %v5646_v28 = vpack.c.bf16 %v5542_v50, %v5542_v50  ;;  %v6277_v62 = vpop.f32.mrf.mxu0 }
 0x582   :  { %v12653_v1 = vld [vmem:[#allocation2 + $0x90] sm:$0xff]  ;;  %v6299_v10 = vadd.f32 %v6277_v62, %v6101_v49 }
 0x583   :  { %v12663_v33 = vld [vmem:[#allocation2 + $0x90] sm:$0xff]  ;;  %5750 = vst.msk [vmem:[#allocation2 + $0x98] sm:$0xf] %vm1088_vm3, %v5646_v28 }
 0x584   :  { %v6324_v16 = vld [vmem:[#allocation3 + $0x50] ss:$2 sm:$0xff]  ;;  %v6332_v5 = vld [vmem:[#allocation3 + $0x51] ss:$2 sm:$0xff]  ;;  %v5341_v12 = vpop.f32.mrf.mxu1  ;;  %11549 = vmatmul.msk.bf16.vlgmr.msrb.gmra.mxu2 %vm1314_vm4, %v12663_v33  ;;  %6315 = vst.msk [vmem:[#allocation3 + $0x60] sm:$0xff] %vm1683_vm5, %v6299_v10  ;;  %11475 = vmatmul.msk.bf16.gmra.mxu0 %vm1314_vm4, %v12653_v1 }
 0x585   :  { %11591 = vmatmul.msk.bf16.gmra.mxu3 %vm1314_vm4, %v12663_v33  ;;  %v6340_v60 = vmax.f32 %v6324_v16, %v6332_v5  ;;  %v5342_v14 = vadd.f32 %v15154_v20, %v5341_v12 }
 0x587   :  { %6348 = vst.msk [vmem:[#allocation4 + $0x28] sm:$0xff] %vm1683_vm5, %v6340_v60  ;;  %v5543_v44 = vmax.f32 %v5342_v14, 0.0  ;;  %v6549_v29 = vpop.f32.mrf.mxu2 }
 0x588   :  { %v15289_v2 = vpop.f32.mrf.mxu3  ;;  %v6651_v19 = vadd.f32 %v15230_v24, %v6549_v29 }
 0x589   :  { %v5647_v13 = vpack.c.bf16 %v5543_v44, %v5543_v44  ;;  %v6279_v56 = vpop.f32.mrf.mxu0 }
 0x58a   :  { %v6300_v18 = vadd.f32 %v6279_v56, %v6103_v45 }
 0x58b   :  { %5751 = vst.msk [vmem:[#allocation2 + $0x9c] sm:$0xf] %vm1088_vm3, %v5647_v13 }
 0x58c   :  { %v5344_v31 = vpop.f32.mrf.mxu1  ;;  %6316 = vst.msk [vmem:[#allocation3 + $0x68] sm:$0xff] %vm1683_vm5, %v6300_v18 }
 0x58d   :  { %v5345_v63 = vadd.f32 %v15154_v20, %v5344_v31 }
 0x58f   :  { %v5544_v17 = vmax.f32 %v5345_v63, 0.0  ;;  %11065 = vmatmul.msk.bf16.gmra.mxu1 %vm447_vm2, %v12563_v40  ;;  %v15309_v25 = vpop.f32.mrf.mxu2 }
 0x590   :  { %v15311_v57 = vpop.f32.mrf.mxu3  ;;  %v6653_v13 = vadd.f32 %v15250_v11, %v15309_v25  ;;  %v12731_v11 = vld [vmem:[%s16273_s3 + $0x80] sm:$0xff]  ;;  %v12708_v25 = vld [vmem:[%s16273_s3 + $0x18] sm:$0xff] }
 0x591   :  { %v5648_v7 = vpack.c.bf16 %v5544_v17, %v5544_v17  ;;  %v6282_v3 = vpop.f32.mrf.mxu0  ;;  %v12716_v17 = vld [vmem:[%s16273_s3 + $0x48] sm:$0xff]  ;;  %7979 = vmatpush.bf16.msra.mxu0 %v12731_v11  ;;  %7803 = vmatpush.bf16.msra.mxu3 %v12708_v25 }
 0x592   :  { %v12654_v22 = vld [vmem:[#allocation2 + $0x98] sm:$0xff]  ;;  %v6301_v6 = vadd.f32 %v6282_v3, %v6106_v61  ;;  %7702 = vmatpush.bf16.msra.mxu2 %v12716_v17 }
 0x593   :  { %v12664_v27 = vld [vmem:[#allocation2 + $0x98] sm:$0xff]  ;;  %5752 = vst.msk [vmem:[#allocation2 + $0xa0] sm:$0xf] %vm1088_vm3, %v5648_v7  ;;  %v6325_v37 = vld [vmem:[#allocation3 + $0x60] ss:$2 sm:$0xff] }
 0x594   :  { %v6333_v15 = vld [vmem:[#allocation3 + $0x61] ss:$2 sm:$0xff]  ;;  %v5346_v47 = vpop.f32.mrf.mxu1  ;;  %11550 = vmatmul.msk.bf16.gmra.mxu2 %vm1314_vm4, %v12664_v27  ;;  %6317 = vst.msk [vmem:[#allocation3 + $0x70] sm:$0xff] %vm1683_vm5, %v6301_v6  ;;  %11476 = vmatmul.msk.bf16.gmra.mxu0 %vm1314_vm4, %v12654_v22 }
 0x595   :  { %11592 = vmatmul.msk.bf16.gmra.mxu3 %vm1314_vm4, %v12664_v27  ;;  %v6341_v35 = vmax.f32 %v6325_v37, %v6333_v15  ;;  %v5347_v9 = vadd.f32 %v15154_v20, %v5346_v47  ;;  %v6371_v22 = vld [vmem:[#allocation4 + $0x28] sm:$0xf] }
 0x597   :  { %6349 = vst.msk [vmem:[#allocation4 + $0x30] sm:$0xff] %vm1683_vm5, %v6341_v35  ;;  %v5545_v32 = vmax.f32 %v5347_v9, 0.0  ;;  %v15321_v26 = vpop.f32.mrf.mxu2 }
 0x598   :  { %v15323_v36 = vpop.f32.mrf.mxu3  ;;  %v6656_v37 = vadd.f32 %v15261_v46, %v15321_v26 }
 0x599   :  { %v5649_v34 = vpack.c.bf16 %v5545_v32, %v5545_v32  ;;  %v6284_v23 = vpop.f32.mrf.mxu0 }
 0x59a   :  { %v6302_v39 = vadd.f32 %v6284_v23, %v6108_v59 }
 0x59b   :  { %5753 = vst.msk [vmem:[#allocation2 + $0xa4] sm:$0xf] %vm1088_vm3, %v5649_v34 }
 0x59c   :  { %v5349_v0 = vpop.f32.mrf.mxu1  ;;  %6318 = vst.msk [vmem:[#allocation3 + $0x78] sm:$0xff] %vm1683_vm5, %v6302_v39 }
 0x59d   :  { %v5350_v52 = vadd.f32 %v15154_v20, %v5349_v0 }
 0x59e   :  { %v6372_v43 = vld [vmem:[#allocation4 + $0x30] sm:$0xff] }
 0x59f   :  { %v5546_v55 = vmax.f32 %v5350_v52, 0.0  ;;  %11066 = vmatmul.msk.bf16.gmra.mxu1 %vm447_vm2, %v12564_v41  ;;  %v15339_v53 = vpop.f32.mrf.mxu2  ;;  %v6374_v50 = vmax.f32 %v6370_v42, %v6372_v43 }
 0x5a0   :  { %v15341_v4 = vpop.f32.mrf.mxu3  ;;  %v6658_v42 = vadd.f32 %v15279_v30, %v15339_v53  ;;  %v12706_v53 = vld [vmem:[%s16273_s3 + $0x8] sm:$0xff] }
 0x5a1   :  { %v5650_v49 = vpack.c.bf16 %v5546_v55, %v5546_v55  ;;  %v6827_v28 = vpop.f32.mrf.mxu0  ;;  %v6380_v33 = vadd.f32 %v12835_v21, %v6374_v50  ;;  %v12707_v50 = vld [vmem:[%s16273_s3 + $0x10] sm:$0xff] }
 0x5a2   :  { %v12665_v62 = vld [vmem:[#allocation2 + $0xa0] sm:$0xff]  ;;  %v6867_v10 = vadd.f32 %v6827_v28, %v6651_v19  ;;  %7804 = vmatpush.bf16.msra.mxu3 %v12707_v50 }
 0x5a3   :  { %v12683_v1 = vld [vmem:[#allocation2 + $0xa0] sm:$0xff]  ;;  %5754 = vst.msk [vmem:[#allocation2 + $0xa8] sm:$0xf] %vm1088_vm3, %v5650_v49  ;;  %v6326_v16 = vld [vmem:[#allocation3 + $0x70] ss:$2 sm:$0xff]  ;;  %v6382_v60 = vmax.f32 %v6380_v33, 0.0 }
 0x5a4   :  { %v6334_v5 = vld [vmem:[#allocation3 + $0x71] ss:$2 sm:$0xff]  ;;  %v5351_v12 = vpop.f32.mrf.mxu1  ;;  %11551 = vmatmul.msk.bf16.gmra.mxu2 %vm1314_vm4, %v12665_v62  ;;  %6883 = vst.msk [vmem:[#allocation3] sm:$0xff] %vm1683_vm5, %v6867_v10  ;;  %11665 = vmatmul.msk.bf16.vlgmr.msrb.gmra.mxu0 %vm1314_vm4, %v12683_v1 }
 0x5a5   :  { %11593 = vmatmul.msk.bf16.gmra.mxu3 %vm1314_vm4, %v12665_v62  ;;  %v6342_v14 = vmax.f32 %v6326_v16, %v6334_v5  ;;  %v5352_v24 = vadd.f32 %v15154_v20, %v5351_v12  ;;  %v6384_v44 = vpack.c.bf16 %v6382_v60, %v6382_v60  ;;  %v12566_v62 = vld [vmem:[%s16270_s0 + $0x298] sm:$0xff]  ;;  %v12705_v60 = vld [vmem:[%s16273_s3] sm:$0xff] }
 0x5a6   :  { %7805 = vmatpush.bf16.msra.mxu3 %v12706_v53 }
 0x5a7   :  { %6350 = vst.msk [vmem:[#allocation4 + $0x38] sm:$0xff] %vm1683_vm5, %v6342_v14  ;;  %v5547_v29 = vmax.f32 %v5352_v24, 0.0  ;;  %v15351_v54 = vpop.f32.mrf.mxu2  ;;  %v6388_v45 = vrot.slane %v6384_v44, 6 }
 0x5a8   :  { %v15353_v8 = vpop.f32.mrf.mxu3  ;;  %v6661_v5 = vadd.f32 %v15289_v2, %v15351_v54 }
 0x5a9   :  { %v5651_v56 = vpack.c.bf16 %v5547_v29, %v5547_v29  ;;  %v6829_v18 = vpop.f32.mrf.mxu0  ;;  %11283 = vst.msk [vmem:[%s16275_s5 + $0x4c] sm:$0xc] %vm1794_vm8, %v6388_v45 }
 0x5aa   :  { %v6868_v40 = vadd.f32 %v6829_v18, %v6653_v13  ;;  %7806 = vmatpush.bf16.msra.mxu3 %v12705_v60  ;;  %v12713_v60 = vld [vmem:[%s16273_s3 + $0x30] sm:$0xff] }
 0x5ab   :  { %5755 = vst.msk [vmem:[#allocation2 + $0xac] sm:$0xf] %vm1088_vm3, %v5651_v56 }
 0x5ac   :  { %v5354_v31 = vpop.f32.mrf.mxu1  ;;  %6884 = vst.msk [vmem:[#allocation3 + $0x8] sm:$0xff] %vm1683_vm5, %v6868_v40 }
 0x5ad   :  { %v5355_v63 = vadd.f32 %v15154_v20, %v5354_v31  ;;  %v12730_v31 = vld [vmem:[%s16273_s3 + $0x78] sm:$0xff] }
 0x5ae   :  { %v6373_v27 = vld [vmem:[#allocation4 + $0x38] sm:$0xf]  ;;  %7980 = vmatpush.bf16.msra.mxu0 %v12730_v31 }
 0x5af   :  { %v5548_v61 = vmax.f32 %v5355_v63, 0.0  ;;  %11067 = vmatmul.msk.bf16.gmra.mxu1 %vm447_vm2, %v12565_v58  ;;  %v15377_v7 = vpop.f32.mrf.mxu2  ;;  %v6375_v6 = vmax.f32 %v6371_v22, %v6373_v27 }
 0x5b0   :  { %v15379_v3 = vpop.f32.mrf.mxu3  ;;  %v6663_v63 = vadd.f32 %v15311_v57, %v15377_v7 }
 0x5b1   :  { %v5652_v15 = vpack.c.bf16 %v5548_v61, %v5548_v61  ;;  %v6832_v47 = vpop.f32.mrf.mxu0  ;;  %v6381_v32 = vadd.f32 %v12835_v21, %v6375_v6  ;;  %v6389_v21 = vrot.slane %v6388_v45, 4  ;;  %v12567_v61 = vld [vmem:[%s16270_s0 + $0x2a0] sm:$0xff] }
 0x5b2   :  { %v12666_v35 = vld [vmem:[#allocation2 + $0xa8] sm:$0xff]  ;;  %v6869_v59 = vadd.f32 %v6832_v47, %v6656_v37 }
 0x5b3   :  { %v12684_v9 = vld [vmem:[#allocation2 + $0xa8] sm:$0xff]  ;;  %5756 = vst.msk [vmem:[#allocation2 + $0xb0] sm:$0xf] %vm1088_vm3, %v5652_v15  ;;  %v6383_v41 = vmax.f32 %v6381_v32, 0.0 }
 0x5b4   :  { %v6899_v34 = vld [vmem:[#allocation3] ss:$2 sm:$0xff]  ;;  %v6907_v23 = vld [vmem:[#allocation3 + $0x1] ss:$2 sm:$0xff]  ;;  %v5356_v39 = vpop.f32.mrf.mxu1  ;;  %11552 = vmatmul.msk.bf16.gmra.mxu2 %vm1314_vm4, %v12666_v35  ;;  %6885 = vst.msk [vmem:[#allocation3 + $0x10] sm:$0xff] %vm1683_vm5, %v6869_v59  ;;  %11666 = vmatmul.msk.bf16.gmra.mxu0 %vm1314_vm4, %v12684_v9 }
 0x5b5   :  { %11594 = vmatmul.msk.bf16.gmra.mxu3 %vm1314_vm4, %v12666_v35  ;;  %v6915_v0 = vmax.f32 %v6899_v34, %v6907_v23  ;;  %v5357_v46 = vadd.f32 %v15154_v20, %v5356_v39  ;;  %v6385_v26 = vpack.c.bf16 %v6383_v41, %v6383_v41 }
 0x5b7   :  { %6923 = vst.msk [vmem:[#allocation4] sm:$0xff] %vm1683_vm5, %v6915_v0  ;;  %v5549_v52 = vmax.f32 %v5357_v46, 0.0  ;;  %v6564_v48 = vpop.f32.mrf.mxu2  ;;  %v6390_v55 = vrot.slane %v6385_v26, 6  ;;  %v12715_v26 = vld [vmem:[%s16273_s3 + $0x40] sm:$0xff] }
 0x5b8   :  { %v15390_v51 = vpop.f32.mrf.mxu3  ;;  %v6666_v7 = vadd.f32 %v15323_v36, %v6564_v48  ;;  %7703 = vmatpush.bf16.msra.mxu2 %v12715_v26 }
 0x5b9   :  { %v5653_v43 = vpack.c.bf16 %v5549_v52, %v5549_v52  ;;  %v6834_v19 = vpop.f32.mrf.mxu0  ;;  %v6391_v49 = vsel %vm13816_vm11, %v6389_v21, %v6390_v55  ;;  %v12729_v52 = vld [vmem:[%s16273_s3 + $0x70] sm:$0xff] }
 0x5ba   :  { %v6870_v28 = vadd.f32 %v6834_v19, %v6658_v42  ;;  %11284 = vst.msk [vmem:[%s16275_s5 + $0x50] sm:$0xf] %vm1763_vm6, %v6391_v49  ;;  %7981 = vmatpush.bf16.msra.mxu0 %v12729_v52  ;;  %v12834_v19 = vld [vmem:[#allocation9] ss:$0 sm:$0xff] }
 0x5bb   :  { %5757 = vst.msk [vmem:[#allocation2 + $0xb4] sm:$0xf] %vm1088_vm3, %v5653_v43  ;;  %v12568_v43 = vld [vmem:[%s16270_s0 + $0x2a8] sm:$0xff] }
 0x5bc   :  { %v5359_v1 = vpop.f32.mrf.mxu1  ;;  %6886 = vst.msk [vmem:[#allocation3 + $0x18] sm:$0xff] %vm1683_vm5, %v6870_v28 }
 0x5bd   :  { %v5360_v30 = vadd.f32 %v15154_v20, %v5359_v1 }
 0x5be   :  { %v6931_v28 = vld [vmem:[#allocation4] sm:$0xff] }
 0x5bf   :  { %v5550_v33 = vmax.f32 %v5360_v30, 0.0  ;;  %11068 = vmatmul.msk.bf16.gmra.mxu1 %vm447_vm2, %v12566_v62  ;;  %v6566_v10 = vpop.f32.mrf.mxu2 }
 0x5c0   :  { %v15413_v16 = vpop.f32.mrf.mxu3  ;;  %v6668_v48 = vadd.f32 %v15341_v4, %v6566_v10  ;;  %v12714_v4 = vld [vmem:[%s16273_s3 + $0x38] sm:$0xff] }
 0x5c1   :  { %v5654_v12 = vpack.c.bf16 %v5550_v33, %v5550_v33  ;;  %v6837_v14 = vpop.f32.mrf.mxu0  ;;  %7704 = vmatpush.bf16.msra.mxu2 %v12714_v4 }
 0x5c2   :  { %v12667_v24 = vld [vmem:[#allocation2 + $0xb0] sm:$0xff]  ;;  %v6871_v29 = vadd.f32 %v6837_v14, %v6661_v5 }
 0x5c3   :  { %v12685_v44 = vld [vmem:[#allocation2 + $0xb0] sm:$0xff]  ;;  %5758 = vst.msk [vmem:[#allocation2 + $0xb8] sm:$0xf] %vm1088_vm3, %v5654_v12 }
 0x5c4   :  { %v6900_v45 = vld [vmem:[#allocation3 + $0x10] ss:$2 sm:$0xff]  ;;  %v6908_v13 = vld [vmem:[#allocation3 + $0x11] ss:$2 sm:$0xff]  ;;  %v5361_v56 = vpop.f32.mrf.mxu1  ;;  %11553 = vmatmul.msk.bf16.gmra.mxu2 %vm1314_vm4, %v12667_v24  ;;  %6887 = vst.msk [vmem:[#allocation3 + $0x20] sm:$0xff] %vm1683_vm5, %v6871_v29  ;;  %11667 = vmatmul.msk.bf16.gmra.mxu0 %vm1314_vm4, %v12685_v44 }
 0x5c5   :  { %11595 = vmatmul.msk.bf16.gmra.mxu3 %vm1314_vm4, %v12667_v24  ;;  %v6916_v2 = vmax.f32 %v6900_v45, %v6908_v13  ;;  %v5362_v54 = vadd.f32 %v15154_v20, %v5361_v56  ;;  %7705 = vmatpush.bf16.msra.mxu2 %v12713_v60 }
 0x5c7   :  { %6924 = vst.msk [vmem:[#allocation4 + $0x8] sm:$0xff] %vm1683_vm5, %v6916_v2  ;;  %v5551_v18 = vmax.f32 %v5362_v54, 0.0  ;;  %v6569_v40 = vpop.f32.mrf.mxu2 }
 0x5c8   :  { %v15427_v58 = vpop.f32.mrf.mxu3  ;;  %v6671_v10 = vadd.f32 %v15353_v8, %v6569_v40 }
 0x5c9   :  { %v5655_v11 = vpack.c.bf16 %v5551_v18, %v5551_v18  ;;  %v6839_v17 = vpop.f32.mrf.mxu0 }
 0x5ca   :  { %v6872_v25 = vadd.f32 %v6839_v17, %v6663_v63 }
 0x5cb   :  { %5759 = vst.msk [vmem:[#allocation2 + $0xbc] sm:$0xf] %vm1088_vm3, %v5655_v11 }
 0x5cc   :  { %v5364_v22 = vpop.f32.mrf.mxu1  ;;  %6888 = vst.msk [vmem:[#allocation3 + $0x28] sm:$0xff] %vm1683_vm5, %v6872_v25 }
 0x5cd   :  { %v5365_v27 = vadd.f32 %v15154_v20, %v5364_v22 }
 0x5cf   :  { %v5552_v6 = vmax.f32 %v5365_v27, 0.0  ;;  %11069 = vmatmul.msk.bf16.gmra.mxu1 %vm447_vm2, %v12567_v61  ;;  %v15441_v37 = vpop.f32.mrf.mxu2  ;;  %v12569_v27 = vld [vmem:[%s16270_s0 + $0x2b0] sm:$0xff] }
 0x5d0   :  { %v15443_v57 = vpop.f32.mrf.mxu3  ;;  %v6673_v17 = vadd.f32 %v15379_v3, %v15441_v37 }
 0x5d1   :  { %v5656_v15 = vpack.c.bf16 %v5552_v6, %v5552_v6  ;;  %v6842_v47 = vpop.f32.mrf.mxu0 }
 0x5d2   :  { %v12668_v35 = vld [vmem:[#allocation2 + $0xb8] sm:$0xff]  ;;  %v6873_v32 = vadd.f32 %v6842_v47, %v6666_v7  ;;  %v6932_v47 = vld [vmem:[#allocation4 + $0x8] sm:$0xf] }
 0x5d3   :  { %v12686_v9 = vld [vmem:[#allocation2 + $0xb8] sm:$0xff]  ;;  %5760 = vst.msk [vmem:[#allocation2 + $0xc0] sm:$0xf] %vm1088_vm3, %v5656_v15  ;;  %v6901_v59 = vld [vmem:[#allocation3 + $0x20] ss:$2 sm:$0xff] }
 0x5d4   :  { %v6909_v34 = vld [vmem:[#allocation3 + $0x21] ss:$2 sm:$0xff]  ;;  %v5366_v23 = vpop.f32.mrf.mxu1  ;;  %11554 = vmatmul.msk.bf16.gmra.mxu2 %vm1314_vm4, %v12668_v35  ;;  %6889 = vst.msk [vmem:[#allocation3 + $0x30] sm:$0xff] %vm1683_vm5, %v6873_v32  ;;  %11668 = vmatmul.msk.bf16.gmra.mxu0 %vm1314_vm4, %v12686_v9 }
 0x5d5   :  { %11596 = vmatmul.msk.bf16.gmra.mxu3 %vm1314_vm4, %v12668_v35  ;;  %v6917_v39 = vmax.f32 %v6901_v59, %v6909_v34  ;;  %v5367_v41 = vadd.f32 %v15154_v20, %v5366_v23  ;;  %v12728_v15 = vld [vmem:[%s16273_s3 + $0x68] sm:$0xff] }
 0x5d6   :  { %7982 = vmatpush.bf16.msra.mxu0 %v12728_v15 }
 0x5d7   :  { %6925 = vst.msk [vmem:[#allocation4 + $0x10] sm:$0xff] %vm1683_vm5, %v6917_v39  ;;  %v5553_v36 = vmax.f32 %v5367_v41, 0.0  ;;  %v15453_v0 = vpop.f32.mrf.mxu2 }
 0x5d8   :  { %v15455_v46 = vpop.f32.mrf.mxu3  ;;  %v6676_v59 = vadd.f32 %v15390_v51, %v15453_v0 }
 0x5d9   :  { %v5657_v21 = vpack.c.bf16 %v5553_v36, %v5553_v36  ;;  %v6844_v55 = vpop.f32.mrf.mxu0 }
 0x5da   :  { %v6874_v42 = vadd.f32 %v6844_v55, %v6668_v48 }
 0x5db   :  { %5761 = vst.msk [vmem:[#allocation2 + $0xc4] sm:$0xf] %vm1088_vm3, %v5657_v21 }
 0x5dc   :  { %v5369_v50 = vpop.f32.mrf.mxu1  ;;  %6890 = vst.msk [vmem:[#allocation3 + $0x38] sm:$0xff] %vm1683_vm5, %v6874_v42 }
 0x5dd   :  { %v5370_v49 = vadd.f32 %v15154_v20, %v5369_v50 }
 0x5de   :  { %v6933_v62 = vld [vmem:[#allocation4 + $0x10] sm:$0xff] }
 0x5df   :  { %v6935_v1 = vmax.f32 %v6931_v28, %v6933_v62  ;;  %v5554_v30 = vmax.f32 %v5370_v49, 0.0  ;;  %11070 = vmatmul.msk.bf16.gmra.mxu1 %vm447_vm2, %v12568_v43  ;;  %v15474_v53 = vpop.f32.mrf.mxu2 }
 0x5e0   :  { %v15476_v33 = vpop.f32.mrf.mxu3  ;;  %v6678_v4 = vadd.f32 %v15413_v16, %v15474_v53 }
 0x5e1   :  { %v6941_v5 = vadd.f32 %v12834_v19, %v6935_v1  ;;  %v5658_v12 = vpack.c.bf16 %v5554_v30, %v5554_v30  ;;  %v6847_v14 = vpop.f32.mrf.mxu0  ;;  %v12570_v30 = vld [vmem:[%s16270_s0 + $0x2b8] sm:$0xff] }
 0x5e2   :  { %v12675_v24 = vld [vmem:[#allocation2 + $0xc0] sm:$0xff]  ;;  %v6875_v13 = vadd.f32 %v6847_v14, %v6671_v10 }
 0x5e3   :  { %v12687_v44 = vld [vmem:[#allocation2 + $0xc0] sm:$0xff]  ;;  %v6943_v45 = vmax.f32 %v6941_v5, 0.0  ;;  %5762 = vst.msk [vmem:[#allocation2 + $0xc8] sm:$0xf] %vm1088_vm3, %v5658_v12  ;;  %v6902_v56 = vld [vmem:[#allocation3 + $0x30] ss:$2 sm:$0xff] }
 0x5e4   :  { %v12697_v29 = vld [vmem:[#allocation2 + $0xc0] sm:$0xff]  ;;  %v6910_v2 = vld [vmem:[#allocation3 + $0x31] ss:$2 sm:$0xff]  ;;  %v5371_v54 = vpop.f32.mrf.mxu1  ;;  %11555 = vmatmul.msk.bf16.gmra.mxu2 %vm1314_vm4, %v12675_v24  ;;  %6891 = vst.msk [vmem:[#allocation3 + $0x40] sm:$0xff] %vm1683_vm5, %v6875_v13  ;;  %11669 = vmatmul.msk.bf16.gmra.mxu0 %vm1314_vm4, %v12687_v44 }
 0x5e5   :  { %11785 = vmatmul.msk.bf16.vlgmr.msra.gmra.mxu3 %vm1314_vm4, %v12697_v29  ;;  %v6945_v8 = vpack.c.bf16 %v6943_v45, %v6943_v45  ;;  %v6918_v18 = vmax.f32 %v6902_v56, %v6910_v2  ;;  %v5372_v40 = vadd.f32 %v15154_v20, %v5371_v54  ;;  %v12727_v24 = vld [vmem:[%s16273_s3 + $0x60] sm:$0xff]  ;;  %v15545_v54 = vld [vmem:[#allocation7] ss:$0 sm:$0xff] }
 0x5e6   :  { %7983 = vmatpush.bf16.msra.mxu0 %v12727_v24 }
 0x5e7   :  { %11477 = vst.msk [vmem:[%s16275_s5 + $0x54] sm:$0xf] %vm1763_vm6, %v6945_v8  ;;  %v5555_v31 = vmax.f32 %v5372_v40, 0.0  ;;  %v6579_v63 = vpop.f32.mrf.mxu2 }
 0x5e8   :  { %v15492_v11 = vpop.f32.mrf.mxu3  ;;  %6926 = vst.msk [vmem:[#allocation4 + $0x18] sm:$0xff] %vm1683_vm5, %v6918_v18  ;;  %v6681_v16 = vadd.f32 %v15427_v58, %v6579_v63 }
 0x5e9   :  { %v5659_v25 = vpack.c.bf16 %v5555_v31, %v5555_v31  ;;  %v6849_v61 = vpop.f32.mrf.mxu0 }
 0x5ea   :  { %v6876_v22 = vadd.f32 %v6849_v61, %v6673_v17 }
 0x5eb   :  { %5763 = vst.msk [vmem:[#allocation2 + $0xcc] sm:$0xf] %vm1088_vm3, %v5659_v25 }
 0x5ec   :  { %v5374_v6 = vpop.f32.mrf.mxu1  ;;  %6892 = vst.msk [vmem:[#allocation3 + $0x48] sm:$0xff] %vm1683_vm5, %v6876_v22  ;;  %v12571_v22 = vld [vmem:[%s16270_s0 + $0x2c0] sm:$0xff] }
 0x5ed   :  { %v5375_v7 = vadd.f32 %v15154_v20, %v5374_v6 }
 0x5ef   :  { %v6934_v3 = vld [vmem:[#allocation4 + $0x18] sm:$0xf]  ;;  %v5556_v37 = vmax.f32 %v5375_v7, 0.0  ;;  %11071 = vmatmul.msk.bf16.gmra.mxu1 %vm447_vm2, %v12569_v27  ;;  %v15507_v35 = vpop.f32.mrf.mxu2 }
 0x5f0   :  { %v15509_v9 = vpop.f32.mrf.mxu3  ;;  %v6936_v32 = vmax.f32 %v6932_v47, %v6934_v3  ;;  %v6683_v63 = vadd.f32 %v15443_v57, %v15507_v35 }
 0x5f1   :  { %v5660_v34 = vpack.c.bf16 %v5556_v37, %v5556_v37  ;;  %v6852_v39 = vpop.f32.mrf.mxu0 }
 0x5f2   :  { %v6942_v23 = vadd.f32 %v12834_v19, %v6936_v32  ;;  %v12676_v41 = vld [vmem:[#allocation2 + $0xc8] sm:$0xff]  ;;  %v6877_v52 = vadd.f32 %v6852_v39, %v6676_v59 }
 0x5f3   :  { %v12688_v36 = vld [vmem:[#allocation2 + $0xc8] sm:$0xff]  ;;  %5764 = vst.msk [vmem:[#allocation2 + $0xd0] sm:$0xf] %vm1088_vm3, %v5660_v34 }
 0x5f4   :  { %v12698_v26 = vld [vmem:[#allocation2 + $0xc8] sm:$0xff]  ;;  %v6944_v48 = vmax.f32 %v6942_v23, 0.0  ;;  %v5376_v42 = vpop.f32.mrf.mxu1  ;;  %11556 = vmatmul.msk.bf16.gmra.mxu2 %vm1314_vm4, %v12676_v41  ;;  %6893 = vst.msk [vmem:[#allocation3 + $0x50] sm:$0xff] %vm1683_vm5, %v6877_v52  ;;  %11670 = vmatmul.msk.bf16.gmra.mxu0 %vm1314_vm4, %v12688_v36 }
 0x5f5   :  { %v6903_v21 = vld [vmem:[#allocation3 + $0x40] ss:$2 sm:$0xff]  ;;  %v6911_v55 = vld [vmem:[#allocation3 + $0x41] ss:$2 sm:$0xff]  ;;  %11786 = vmatmul.msk.bf16.gmra.mxu3 %vm1314_vm4, %v12698_v26  ;;  %v5377_v51 = vadd.f32 %v15154_v20, %v5376_v42  ;;  %v12754_v42 = vld [vmem:[%s16273_s3 + $0x58] sm:$0xff] }
 0x5f6   :  { %v6919_v43 = vmax.f32 %v6903_v21, %v6911_v55  ;;  %v6946_v0 = vpack.c.bf16 %v6944_v48, %v6944_v48  ;;  %8279 = vmatpush.bf16.msrb.mxu2 %v12754_v42 }
 0x5f7   :  { %v5557_v50 = vmax.f32 %v5377_v51, 0.0  ;;  %v6584_v19 = vpop.f32.mrf.mxu2  ;;  %v12768_v51 = vld [vmem:[%s16273_s3 + $0x88] sm:$0xff] }
 0x5f8   :  { %6927 = vst.msk [vmem:[#allocation4 + $0x20] sm:$0xff] %vm1683_vm5, %v6919_v43  ;;  %v15520_v49 = vpop.f32.mrf.mxu3  ;;  %v6686_v47 = vadd.f32 %v15455_v46, %v6584_v19  ;;  %v12746_v43 = vld [vmem:[%s16273_s3 + $0x28] sm:$0xff]  ;;  %8557 = vmatpush.bf16.msrb.mxu0 %v12768_v51 }
 0x5f9   :  { %11478 = vst.msk [vmem:[%s16275_s5 + $0x58] sm:$0x3] %vm1765_vm7, %v6946_v0  ;;  %v5661_v28 = vpack.c.bf16 %v5557_v50, %v5557_v50  ;;  %v6854_v62 = vpop.f32.mrf.mxu0  ;;  %8380 = vmatpush.bf16.msrb.mxu3 %v12746_v43 }
 0x5fa   :  { %v6878_v1 = vadd.f32 %v6854_v62, %v6678_v4  ;;  %v12836_v4 = vld [vmem:[#allocation9] ss:$0 sm:$0xff] }
 0x5fb   :  { %5765 = vst.msk [vmem:[#allocation2 + $0xd4] sm:$0xf] %vm1088_vm3, %v5661_v28 }
 0x5fc   :  { %v5379_v10 = vpop.f32.mrf.mxu1  ;;  %6894 = vst.msk [vmem:[#allocation3 + $0x58] sm:$0xff] %vm1683_vm5, %v6878_v1  ;;  %v12753_v1 = vld [vmem:[%s16273_s3 + $0x50] sm:$0xff] }
 0x5fd   :  { %v5380_v5 = vadd.f32 %v15154_v20, %v5379_v10  ;;  %8280 = vmatpush.bf16.msrb.mxu2 %v12753_v1 }
 0x5ff   :  { %v5558_v12 = vmax.f32 %v5380_v5, 0.0  ;;  %11072 = vmatmul.msk.bf16.gmra.mxu1 %vm447_vm2, %v12570_v30  ;;  %v6586_v60 = vpop.f32.mrf.mxu2  ;;  %v6949_v19 = vld [vmem:[#allocation4 + $0x20] sm:$0xff] }
 0x600   :  { %v15535_v14 = vpop.f32.mrf.mxu3  ;;  %v6688_v48 = vadd.f32 %v15476_v33, %v6586_v60  ;;  %v12572_v33 = vld [vmem:[%s16270_s0 + $0x2c8] sm:$0xff]  ;;  %v12745_v30 = vld [vmem:[%s16273_s3 + $0x20] sm:$0xff] }
 0x601   :  { %v5662_v53 = vpack.c.bf16 %v5558_v12, %v5558_v12  ;;  %v6857_v44 = vpop.f32.mrf.mxu0  ;;  %8381 = vmatpush.bf16.msrb.mxu3 %v12745_v30 }
 0x602   :  { %v12689_v29 = vld [vmem:[#allocation2 + $0xd0] sm:$0xff]  ;;  %v6879_v13 = vadd.f32 %v6857_v44, %v6681_v16 }
 0x603   :  { %v12699_v45 = vld [vmem:[#allocation2 + $0xd0] sm:$0xff]  ;;  %5766 = vst.msk [vmem:[#allocation2 + $0xd8] sm:$0xf] %vm1088_vm3, %v5662_v53 }
 0x604   :  { %v6904_v20 = vld [vmem:[#allocation3 + $0x50] ss:$2 sm:$0xff]  ;;  %v6912_v56 = vld [vmem:[#allocation3 + $0x51] ss:$2 sm:$0xff]  ;;  %v5381_v2 = vpop.f32.mrf.mxu1  ;;  %11745 = vmatmul.msk.bf16.vlgmr.msra.gmra.mxu2 %vm1314_vm4, %v12699_v45  ;;  %6895 = vst.msk [vmem:[#allocation3 + $0x60] sm:$0xff] %vm1683_vm5, %v6879_v13  ;;  %11671 = vmatmul.msk.bf16.gmra.mxu0 %vm1314_vm4, %v12689_v29 }
 0x605   :  { %11787 = vmatmul.msk.bf16.gmra.mxu3 %vm1314_vm4, %v12699_v45  ;;  %v6920_v58 = vmax.f32 %v6904_v20, %v6912_v56  ;;  %v5382_v8 = vadd.f32 %v15545_v54, %v5381_v2 }
 0x607   :  { %6928 = vst.msk [vmem:[#allocation4 + $0x28] sm:$0xff] %vm1683_vm5, %v6920_v58  ;;  %v5559_v18 = vmax.f32 %v5382_v8, 0.0  ;;  %v7128_v40 = vpop.f32.mrf.mxu2 }
 0x608   :  { %v15550_v31 = vpop.f32.mrf.mxu3  ;;  %v7230_v16 = vadd.f32 %v15492_v11, %v7128_v40 }
 0x609   :  { %v5663_v17 = vpack.c.bf16 %v5559_v18, %v5559_v18  ;;  %v6859_v25 = vpop.f32.mrf.mxu0 }
 0x60a   :  { %v6880_v61 = vadd.f32 %v6859_v25, %v6683_v63 }
 0x60b   :  { %5767 = vst.msk [vmem:[#allocation2 + $0xdc] sm:$0xf] %vm1088_vm3, %v5663_v17 }
 0x60c   :  { %v5384_v27 = vpop.f32.mrf.mxu1  ;;  %6896 = vst.msk [vmem:[#allocation3 + $0x68] sm:$0xff] %vm1683_vm5, %v6880_v61 }
 0x60d   :  { %v5385_v6 = vadd.f32 %v15545_v54, %v5384_v27 }
 0x60f   :  { %v5560_v7 = vmax.f32 %v5385_v6, 0.0  ;;  %11073 = vmatmul.msk.bf16.gmra.mxu1 %vm447_vm2, %v12571_v22  ;;  %v15561_v15 = vpop.f32.mrf.mxu2 }
 0x610   :  { %v15563_v57 = vpop.f32.mrf.mxu3  ;;  %v7232_v61 = vadd.f32 %v15509_v9, %v15561_v15  ;;  %v12767_v9 = vld [vmem:[%s16273_s3 + $0x80] sm:$0xff]  ;;  %v12752_v15 = vld [vmem:[%s16273_s3 + $0x48] sm:$0xff] }
 0x611   :  { %v5664_v3 = vpack.c.bf16 %v5560_v7, %v5560_v7  ;;  %v6862_v37 = vpop.f32.mrf.mxu0  ;;  %v12573_v7 = vld [vmem:[%s16270_s0 + $0x2d0] sm:$0xff]  ;;  %8558 = vmatpush.bf16.msrb.mxu0 %v12767_v9  ;;  %8281 = vmatpush.bf16.msrb.mxu2 %v12752_v15  ;;  %v12575_v15 = vld [vmem:[%s16270_s0 + $0x2e0] sm:$0xff] }
 0x612   :  { %v12690_v35 = vld [vmem:[#allocation2 + $0xd8] sm:$0xff]  ;;  %v6881_v59 = vadd.f32 %v6862_v37, %v6686_v47 }
 0x613   :  { %v12700_v32 = vld [vmem:[#allocation2 + $0xd8] sm:$0xff]  ;;  %5768 = vst.msk [vmem:[#allocation2 + $0xe0] sm:$0xf] %vm1088_vm3, %v5664_v3  ;;  %v6905_v34 = vld [vmem:[#allocation3 + $0x60] ss:$2 sm:$0xff] }
 0x614   :  { %v6913_v23 = vld [vmem:[#allocation3 + $0x61] ss:$2 sm:$0xff]  ;;  %v5386_v39 = vpop.f32.mrf.mxu1  ;;  %11746 = vmatmul.msk.bf16.gmra.mxu2 %vm1314_vm4, %v12700_v32  ;;  %6897 = vst.msk [vmem:[#allocation3 + $0x70] sm:$0xff] %vm1683_vm5, %v6881_v59  ;;  %11672 = vmatmul.msk.bf16.gmra.mxu0 %vm1314_vm4, %v12690_v35 }
 0x615   :  { %11788 = vmatmul.msk.bf16.gmra.mxu3 %vm1314_vm4, %v12700_v32  ;;  %v6921_v41 = vmax.f32 %v6905_v34, %v6913_v23  ;;  %v5387_v36 = vadd.f32 %v15545_v54, %v5386_v39  ;;  %v6950_v3 = vld [vmem:[#allocation4 + $0x28] sm:$0xf]  ;;  %v12744_v39 = vld [vmem:[%s16273_s3 + $0x18] sm:$0xff] }
 0x616   :  { %8382 = vmatpush.bf16.msrb.mxu3 %v12744_v39 }
 0x617   :  { %6929 = vst.msk [vmem:[#allocation4 + $0x30] sm:$0xff] %vm1683_vm5, %v6921_v41  ;;  %v5561_v46 = vmax.f32 %v5387_v36, 0.0  ;;  %v15573_v26 = vpop.f32.mrf.mxu2 }
 0x618   :  { %v15575_v52 = vpop.f32.mrf.mxu3  ;;  %v7235_v41 = vadd.f32 %v15520_v49, %v15573_v26 }
 0x619   :  { %v5665_v21 = vpack.c.bf16 %v5561_v46, %v5561_v46  ;;  %v6864_v55 = vpop.f32.mrf.mxu0 }
 0x61a   :  { %v6882_v0 = vadd.f32 %v6864_v55, %v6688_v48 }
 0x61b   :  { %5769 = vst.msk [vmem:[#allocation2 + $0xe4] sm:$0xf] %vm1088_vm3, %v5665_v21 }
 0x61c   :  { %v5389_v50 = vpop.f32.mrf.mxu1  ;;  %6898 = vst.msk [vmem:[#allocation3 + $0x78] sm:$0xff] %vm1683_vm5, %v6882_v0 }
 0x61d   :  { %v5390_v28 = vadd.f32 %v15545_v54, %v5389_v50 }
 0x61e   :  { %v6951_v62 = vld [vmem:[#allocation4 + $0x30] sm:$0xff] }
 0x61f   :  { %v6953_v10 = vmax.f32 %v6949_v19, %v6951_v62  ;;  %v5562_v5 = vmax.f32 %v5390_v28, 0.0  ;;  %11074 = vmatmul.msk.bf16.gmra.mxu1 %vm447_vm2, %v12572_v33  ;;  %v15600_v12 = vpop.f32.mrf.mxu2 }
 0x620   :  { %v15602_v60 = vpop.f32.mrf.mxu3 }
 0x621   :  { %v6959_v53 = vadd.f32 %v12836_v4, %v6953_v10  ;;  %v5666_v24 = vpack.c.bf16 %v5562_v5, %v5562_v5  ;;  %v7406_v44 = vpop.f32.mrf.mxu0  ;;  %v7237_v10 = vadd.f32 %v15535_v14, %v15600_v12  ;;  %v12742_v12 = vld [vmem:[%s16273_s3 + $0x8] sm:$0xff] }
 0x622   :  { %v12701_v29 = vld [vmem:[#allocation2 + $0xe0] sm:$0xff]  ;;  %v7446_v20 = vadd.f32 %v7406_v44, %v7230_v16  ;;  %v12574_v44 = vld [vmem:[%s16270_s0 + $0x2d8] sm:$0xff] }
 0x623   :  { %v12719_v45 = vld [vmem:[#allocation2 + $0xe0] sm:$0xff]  ;;  %v6961_v13 = vmax.f32 %v6959_v53, 0.0  ;;  %5770 = vst.msk [vmem:[#allocation2 + $0xe8] sm:$0xf] %vm1088_vm3, %v5666_v24  ;;  %v6906_v56 = vld [vmem:[#allocation3 + $0x70] ss:$2 sm:$0xff] }
 0x624   :  { %v6914_v2 = vld [vmem:[#allocation3 + $0x71] ss:$2 sm:$0xff]  ;;  %v5391_v58 = vpop.f32.mrf.mxu1  ;;  %11747 = vmatmul.msk.bf16.gmra.mxu2 %vm1314_vm4, %v12701_v29  ;;  %7462 = vst.msk [vmem:[#allocation3] sm:$0xff] %vm1683_vm5, %v7446_v20  ;;  %11861 = vmatmul.msk.bf16.vlgmr.msra.gmra.mxu0 %vm1314_vm4, %v12719_v45 }
 0x625   :  { %11789 = vmatmul.msk.bf16.gmra.mxu3 %vm1314_vm4, %v12701_v29  ;;  %v6963_v8 = vpack.c.bf16 %v6961_v13, %v6961_v13  ;;  %v6922_v18 = vmax.f32 %v6906_v56, %v6914_v2  ;;  %v5392_v11 = vadd.f32 %v15545_v54, %v5391_v58  ;;  %v12743_v53 = vld [vmem:[%s16273_s3 + $0x10] sm:$0xff] }
 0x626   :  { %8383 = vmatpush.bf16.msrb.mxu3 %v12743_v53 }
 0x627   :  { %v6967_v40 = vrot.slane %v6963_v8, 6  ;;  %6930 = vst.msk [vmem:[#allocation4 + $0x38] sm:$0xff] %vm1683_vm5, %v6922_v18  ;;  %v5563_v63 = vmax.f32 %v5392_v11, 0.0  ;;  %v15612_v17 = vpop.f32.mrf.mxu2  ;;  %v12741_v11 = vld [vmem:[%s16273_s3] sm:$0xff] }
 0x628   :  { %v15614_v25 = vpop.f32.mrf.mxu3  ;;  %v7240_v56 = vadd.f32 %v15550_v31, %v15612_v17 }
 0x629   :  { %11479 = vst.msk [vmem:[%s16275_s5 + $0x58] sm:$0xc] %vm1794_vm8, %v6967_v40  ;;  %v5667_v22 = vpack.c.bf16 %v5563_v63, %v5563_v63  ;;  %v7408_v27 = vpop.f32.mrf.mxu0  ;;  %v6968_v26 = vrot.slane %v6967_v40, 4 }
 0x62a   :  { %v7447_v6 = vadd.f32 %v7408_v27, %v7232_v61  ;;  %8384 = vmatpush.bf16.msrb.mxu3 %v12742_v12 }
 0x62b   :  { %5771 = vst.msk [vmem:[#allocation2 + $0xec] sm:$0xf] %vm1088_vm3, %v5667_v22 }
 0x62c   :  { %v5394_v47 = vpop.f32.mrf.mxu1  ;;  %7463 = vst.msk [vmem:[#allocation3 + $0x8] sm:$0xff] %vm1683_vm5, %v7447_v6 }
 0x62d   :  { %v5395_v37 = vadd.f32 %v15545_v54, %v5394_v47  ;;  %v12766_v47 = vld [vmem:[%s16273_s3 + $0x78] sm:$0xff] }
 0x62e   :  { %v6952_v35 = vld [vmem:[#allocation4 + $0x38] sm:$0xf]  ;;  %8385 = vmatpush.bf16.msrb.mxu3 %v12741_v11  ;;  %8559 = vmatpush.bf16.msrb.mxu0 %v12766_v47 }
 0x62f   :  { %v6954_v32 = vmax.f32 %v6950_v3, %v6952_v35  ;;  %v5564_v59 = vmax.f32 %v5395_v37, 0.0  ;;  %11075 = vmatmul.msk.bf16.gmra.mxu1 %vm447_vm2, %v12573_v7  ;;  %v15635_v34 = vpop.f32.mrf.mxu2 }
 0x630   :  { %v15637_v23 = vpop.f32.mrf.mxu3  ;;  %v7242_v3 = vadd.f32 %v15563_v57, %v15635_v34 }
 0x631   :  { %v6960_v36 = vadd.f32 %v12836_v4, %v6954_v32  ;;  %v5668_v46 = vpack.c.bf16 %v5564_v59, %v5564_v59  ;;  %v7411_v48 = vpop.f32.mrf.mxu0 }
 0x632   :  { %v12702_v21 = vld [vmem:[#allocation2 + $0xe8] sm:$0xff]  ;;  %v7448_v43 = vadd.f32 %v7411_v48, %v7235_v41 }
 0x633   :  { %v12720_v55 = vld [vmem:[#allocation2 + $0xe8] sm:$0xff]  ;;  %v6962_v42 = vmax.f32 %v6960_v36, 0.0  ;;  %5772 = vst.msk [vmem:[#allocation2 + $0xf0] sm:$0xf] %vm1088_vm3, %v5668_v46 }
 0x634   :  { %v7478_v51 = vld [vmem:[#allocation3] ss:$2 sm:$0xff]  ;;  %v7486_v0 = vld [vmem:[#allocation3 + $0x1] ss:$2 sm:$0xff]  ;;  %v5396_v33 = vpop.f32.mrf.mxu1  ;;  %11748 = vmatmul.msk.bf16.gmra.mxu2 %vm1314_vm4, %v12702_v21  ;;  %7464 = vst.msk [vmem:[#allocation3 + $0x10] sm:$0xff] %vm1683_vm5, %v7448_v43  ;;  %11862 = vmatmul.msk.bf16.gmra.mxu0 %vm1314_vm4, %v12720_v55 }
 0x635   :  { %11790 = vmatmul.msk.bf16.gmra.mxu3 %vm1314_vm4, %v12702_v21  ;;  %v6964_v50 = vpack.c.bf16 %v6962_v42, %v6962_v42  ;;  %v7494_v19 = vmax.f32 %v7478_v51, %v7486_v0  ;;  %v5397_v49 = vadd.f32 %v15545_v54, %v5396_v33 }
 0x637   :  { %v6969_v4 = vrot.slane %v6964_v50, 6  ;;  %7502 = vst.msk [vmem:[#allocation4] sm:$0xff] %vm1683_vm5, %v7494_v19  ;;  %v5565_v28 = vmax.f32 %v5397_v49, 0.0  ;;  %v7143_v62 = vpop.f32.mrf.mxu2  ;;  %v12751_v49 = vld [vmem:[%s16273_s3 + $0x40] sm:$0xff] }
 0x638   :  { %v15651_v1 = vpop.f32.mrf.mxu3  ;;  %v7245_v34 = vadd.f32 %v15575_v52, %v7143_v62  ;;  %8282 = vmatpush.bf16.msrb.mxu2 %v12751_v49 }
 0x639   :  { %v6970_v30 = vsel %vm13816_vm11, %v6968_v26, %v6969_v4  ;;  %v5669_v5 = vpack.c.bf16 %v5565_v28, %v5565_v28  ;;  %v7413_v16 = vpop.f32.mrf.mxu0  ;;  %v12765_v26 = vld [vmem:[%s16273_s3 + $0x70] sm:$0xff] }
 0x63a   :  { %11480 = vst.msk [vmem:[%s16275_s5 + $0x5c] sm:$0xf] %vm1763_vm6, %v6970_v30  ;;  %v7449_v24 = vadd.f32 %v7413_v16, %v7237_v10  ;;  %8560 = vmatpush.bf16.msrb.mxu0 %v12765_v26  ;;  %v12576_v10 = vld [vmem:[%s16270_s0 + $0x2e8] sm:$0xff]  ;;  %v12837_v16 = vld [vmem:[#allocation9] ss:$0 sm:$0xff] }
 0x63b   :  { %5773 = vst.msk [vmem:[#allocation2 + $0xf4] sm:$0xf] %vm1088_vm3, %v5669_v5 }
 0x63c   :  { %v5399_v29 = vpop.f32.mrf.mxu1  ;;  %7465 = vst.msk [vmem:[#allocation3 + $0x18] sm:$0xff] %vm1683_vm5, %v7449_v24 }
 0x63d   :  { %v5400_v14 = vadd.f32 %v15545_v54, %v5399_v29 }
 0x63e   :  { %v7510_v24 = vld [vmem:[#allocation4] sm:$0xff] }
 0x63f   :  { %v5566_v45 = vmax.f32 %v5400_v14, 0.0  ;;  %11076 = vmatmul.msk.bf16.gmra.mxu1 %vm447_vm2, %v12574_v44  ;;  %v7145_v13 = vpop.f32.mrf.mxu2 }
 0x640   :  { %v15674_v20 = vpop.f32.mrf.mxu3  ;;  %v7247_v4 = vadd.f32 %v15602_v60, %v7145_v13  ;;  %v12750_v60 = vld [vmem:[%s16273_s3 + $0x38] sm:$0xff] }
 0x641   :  { %v5670_v2 = vpack.c.bf16 %v5566_v45, %v5566_v45  ;;  %v7416_v58 = vpop.f32.mrf.mxu0  ;;  %8283 = vmatpush.bf16.msrb.mxu2 %v12750_v60 }
 0x642   :  { %v12703_v8 = vld [vmem:[#allocation2 + $0xf0] sm:$0xff]  ;;  %v7450_v40 = vadd.f32 %v7416_v58, %v7240_v56 }
 0x643   :  { %v12721_v18 = vld [vmem:[#allocation2 + $0xf0] sm:$0xff]  ;;  %5774 = vst.msk [vmem:[#allocation2 + $0xf8] sm:$0xf] %vm1088_vm3, %v5670_v2 }
 0x644   :  { %v7479_v63 = vld [vmem:[#allocation3 + $0x10] ss:$2 sm:$0xff]  ;;  %v7487_v61 = vld [vmem:[#allocation3 + $0x11] ss:$2 sm:$0xff]  ;;  %v5401_v22 = vpop.f32.mrf.mxu1  ;;  %11749 = vmatmul.msk.bf16.gmra.mxu2 %vm1314_vm4, %v12703_v8  ;;  %7466 = vst.msk [vmem:[#allocation3 + $0x20] sm:$0xff] %vm1683_vm5, %v7450_v40  ;;  %11863 = vmatmul.msk.bf16.gmra.mxu0 %vm1314_vm4, %v12721_v18 }
 0x645   :  { %11791 = vmatmul.msk.bf16.gmra.mxu3 %vm1314_vm4, %v12703_v8  ;;  %v7495_v27 = vmax.f32 %v7479_v63, %v7487_v61  ;;  %v5402_v31 = vadd.f32 %v15545_v54, %v5401_v22  ;;  %v12749_v61 = vld [vmem:[%s16273_s3 + $0x30] sm:$0xff] }
 0x646   :  { %8284 = vmatpush.bf16.msrb.mxu2 %v12749_v61 }
 0x647   :  { %7503 = vst.msk [vmem:[#allocation4 + $0x8] sm:$0xff] %vm1683_vm5, %v7495_v27  ;;  %v5567_v17 = vmax.f32 %v5402_v31, 0.0  ;;  %v7148_v6 = vpop.f32.mrf.mxu2 }
 0x648   :  { %v15688_v7 = vpop.f32.mrf.mxu3  ;;  %v7250_v13 = vadd.f32 %v15614_v25, %v7148_v6 }
 0x649   :  { %v5671_v37 = vpack.c.bf16 %v5567_v17, %v5567_v17  ;;  %v7418_v35 = vpop.f32.mrf.mxu0 }
 0x64a   :  { %v7451_v9 = vadd.f32 %v7418_v35, %v7242_v3 }
 0x64b   :  { %5775 = vst.msk [vmem:[#allocation2 + $0xfc] sm:$0xf] %vm1088_vm3, %v5671_v37 }
 0x64c   :  { %v5404_v32 = vpop.f32.mrf.mxu1  ;;  %7467 = vst.msk [vmem:[#allocation3 + $0x28] sm:$0xff] %vm1683_vm5, %v7451_v9 }
 0x64d   :  { %v5405_v59 = vadd.f32 %v15545_v54, %v5404_v32 }
 0x64f   :  { %v5568_v39 = vmax.f32 %v5405_v59, 0.0  ;;  %11077 = vmatmul.msk.bf16.gmra.mxu1 %vm447_vm2, %v12575_v15  ;;  %v15702_v41 = vpop.f32.mrf.mxu2  ;;  %v12577_v59 = vld [vmem:[%s16270_s0 + $0x2f0] sm:$0xff] }
 0x650   :  { %v15704_v57 = vpop.f32.mrf.mxu3  ;;  %v7252_v35 = vadd.f32 %v15637_v23, %v15702_v41 }
 0x651   :  { %v5672_v36 = vpack.c.bf16 %v5568_v39, %v5568_v39  ;;  %v7421_v46 = vpop.f32.mrf.mxu0 }
 0x652   :  { %v12704_v48 = vld [vmem:[#allocation2 + $0xf8] sm:$0xff]  ;;  %v7452_v55 = vadd.f32 %v7421_v46, %v7245_v34  ;;  %v7511_v46 = vld [vmem:[#allocation4 + $0x8] sm:$0xf] }
 0x653   :  { %v12722_v21 = vld [vmem:[#allocation2 + $0xf8] sm:$0xff]  ;;  %5776 = vst.msk [vmem:[#allocation2 + $0x100] sm:$0xf] %vm1088_vm3, %v5672_v36  ;;  %v7480_v42 = vld [vmem:[#allocation3 + $0x20] ss:$2 sm:$0xff] }
 0x654   :  { %v7488_v43 = vld [vmem:[#allocation3 + $0x21] ss:$2 sm:$0xff]  ;;  %v5406_v51 = vpop.f32.mrf.mxu1  ;;  %11750 = vmatmul.msk.bf16.gmra.mxu2 %vm1314_vm4, %v12704_v48  ;;  %7468 = vst.msk [vmem:[#allocation3 + $0x30] sm:$0xff] %vm1683_vm5, %v7452_v55  ;;  %11864 = vmatmul.msk.bf16.gmra.mxu0 %vm1314_vm4, %v12722_v21 }
 0x655   :  { %11792 = vmatmul.msk.bf16.gmra.mxu3 %vm1314_vm4, %v12704_v48  ;;  %v7496_v0 = vmax.f32 %v7480_v42, %v7488_v43  ;;  %v5407_v33 = vadd.f32 %v15545_v54, %v5406_v51  ;;  %v12764_v36 = vld [vmem:[%s16273_s3 + $0x68] sm:$0xff] }
 0x656   :  { %8561 = vmatpush.bf16.msrb.mxu0 %v12764_v36 }
 0x657   :  { %7504 = vst.msk [vmem:[#allocation4 + $0x10] sm:$0xff] %vm1683_vm5, %v7496_v0  ;;  %v5569_v52 = vmax.f32 %v5407_v33, 0.0  ;;  %v15714_v50 = vpop.f32.mrf.mxu2 }
 0x658   :  { %v15716_v19 = vpop.f32.mrf.mxu3  ;;  %v7255_v42 = vadd.f32 %v15651_v1, %v15714_v50 }
 0x659   :  { %v5673_v28 = vpack.c.bf16 %v5569_v52, %v5569_v52  ;;  %v7423_v62 = vpop.f32.mrf.mxu0 }
 0x65a   :  { %v7453_v30 = vadd.f32 %v7423_v62, %v7247_v4 }
 0x65b   :  { %5777 = vst.msk [vmem:[#allocation2 + $0x104] sm:$0xf] %vm1088_vm3, %v5673_v28 }
 0x65c   :  { %v5409_v5 = vpop.f32.mrf.mxu1  ;;  %7469 = vst.msk [vmem:[#allocation3 + $0x38] sm:$0xff] %vm1683_vm5, %v7453_v30 }
 0x65d   :  { %v5410_v53 = vadd.f32 %v15545_v54, %v5409_v5 }
 0x65e   :  { %v7512_v44 = vld [vmem:[#allocation4 + $0x10] sm:$0xff] }
 0x65f   :  { %v7514_v29 = vmax.f32 %v7510_v24, %v7512_v44  ;;  %v5570_v14 = vmax.f32 %v5410_v53, 0.0  ;;  %11078 = vmatmul.msk.bf16.gmra.mxu1 %vm447_vm2, %v12576_v10  ;;  %v15735_v12 = vpop.f32.mrf.mxu2 }
 0x660   :  { %v15737_v45 = vpop.f32.mrf.mxu3  ;;  %v7257_v24 = vadd.f32 %v15674_v20, %v15735_v12 }
 0x661   :  { %v7520_v56 = vadd.f32 %v12837_v16, %v7514_v29  ;;  %v5674_v2 = vpack.c.bf16 %v5570_v14, %v5570_v14  ;;  %v7426_v58 = vpop.f32.mrf.mxu0  ;;  %v12578_v14 = vld [vmem:[%s16270_s0 + $0x2f8] sm:$0xff] }
 0x662   :  { %v12711_v8 = vld [vmem:[#allocation2 + $0x100] sm:$0xff]  ;;  %v7454_v63 = vadd.f32 %v7426_v58, %v7250_v13 }
 0x663   :  { %v12723_v18 = vld [vmem:[#allocation2 + $0x100] sm:$0xff]  ;;  %v7522_v40 = vmax.f32 %v7520_v56, 0.0  ;;  %5778 = vst.msk [vmem:[#allocation2 + $0x108] sm:$0xf] %vm1088_vm3, %v5674_v2  ;;  %v7481_v22 = vld [vmem:[#allocation3 + $0x30] ss:$2 sm:$0xff] }
 0x664   :  { %v12733_v11 = vld [vmem:[#allocation2 + $0x100] sm:$0xff]  ;;  %v7489_v27 = vld [vmem:[#allocation3 + $0x31] ss:$2 sm:$0xff]  ;;  %v5411_v31 = vpop.f32.mrf.mxu1  ;;  %11751 = vmatmul.msk.bf16.gmra.mxu2 %vm1314_vm4, %v12711_v8  ;;  %7470 = vst.msk [vmem:[#allocation3 + $0x40] sm:$0xff] %vm1683_vm5, %v7454_v63  ;;  %11865 = vmatmul.msk.bf16.gmra.mxu0 %vm1314_vm4, %v12723_v18 }
 0x665   :  { %11981 = vmatmul.msk.bf16.vlgmr.msrb.gmra.mxu3 %vm1314_vm4, %v12733_v11  ;;  %v7524_v25 = vpack.c.bf16 %v7522_v40, %v7522_v40  ;;  %v7497_v17 = vmax.f32 %v7481_v22, %v7489_v27  ;;  %v5412_v6 = vadd.f32 %v15545_v54, %v5411_v31  ;;  %v12763_v63 = vld [vmem:[%s16273_s3 + $0x60] sm:$0xff] }
 0x666   :  { %8562 = vmatpush.bf16.msrb.mxu0 %v12763_v63 }
 0x667   :  { %11673 = vst.msk [vmem:[%s16275_s5 + $0x60] sm:$0xf] %vm1763_vm6, %v7524_v25  ;;  %v5571_v47 = vmax.f32 %v5412_v6, 0.0  ;;  %v7158_v3 = vpop.f32.mrf.mxu2 }
 0x668   :  { %v15753_v37 = vpop.f32.mrf.mxu3  ;;  %7505 = vst.msk [vmem:[#allocation4 + $0x18] sm:$0xff] %vm1683_vm5, %v7497_v17  ;;  %v7260_v20 = vadd.f32 %v15688_v7, %v7158_v3 }
 0x669   :  { %v5675_v9 = vpack.c.bf16 %v5571_v47, %v5571_v47  ;;  %v7428_v15 = vpop.f32.mrf.mxu0 }
 0x66a   :  { %v7455_v32 = vadd.f32 %v7428_v15, %v7252_v35 }
 0x66b   :  { %5779 = vst.msk [vmem:[#allocation2 + $0x10c] sm:$0xf] %vm1088_vm3, %v5675_v9 }
 0x66c   :  { %v5414_v39 = vpop.f32.mrf.mxu1  ;;  %7471 = vst.msk [vmem:[#allocation3 + $0x48] sm:$0xff] %vm1683_vm5, %v7455_v32  ;;  %v12579_v32 = vld [vmem:[%s16270_s0 + $0x300] sm:$0xff] }
 0x66d   :  { %v5415_v34 = vadd.f32 %v15545_v54, %v5414_v39 }
 0x66f   :  { %v7513_v23 = vld [vmem:[#allocation4 + $0x18] sm:$0xf]  ;;  %v5572_v41 = vmax.f32 %v5415_v34, 0.0  ;;  %11079 = vmatmul.msk.bf16.gmra.mxu1 %vm447_vm2, %v12577_v59  ;;  %v15768_v48 = vpop.f32.mrf.mxu2 }
 0x670   :  { %v15770_v21 = vpop.f32.mrf.mxu3  ;;  %v7515_v55 = vmax.f32 %v7511_v46, %v7513_v23  ;;  %v7262_v3 = vadd.f32 %v15704_v57, %v15768_v48 }
 0x671   :  { %v5676_v43 = vpack.c.bf16 %v5572_v41, %v5572_v41  ;;  %v7431_v0 = vpop.f32.mrf.mxu0 }
 0x672   :  { %v7521_v51 = vadd.f32 %v12837_v16, %v7515_v55  ;;  %v12712_v33 = vld [vmem:[#allocation2 + $0x108] sm:$0xff]  ;;  %v7456_v26 = vadd.f32 %v7431_v0, %v7255_v42 }
 0x673   :  { %v12724_v52 = vld [vmem:[#allocation2 + $0x108] sm:$0xff]  ;;  %5780 = vst.msk [vmem:[#allocation2 + $0x110] sm:$0xf] %vm1088_vm3, %v5676_v43 }
 0x674   :  { %v12734_v49 = vld [vmem:[#allocation2 + $0x108] sm:$0xff]  ;;  %v7523_v4 = vmax.f32 %v7521_v51, 0.0  ;;  %v5416_v30 = vpop.f32.mrf.mxu1  ;;  %11752 = vmatmul.msk.bf16.gmra.mxu2 %vm1314_vm4, %v12712_v33  ;;  %7472 = vst.msk [vmem:[#allocation3 + $0x50] sm:$0xff] %vm1683_vm5, %v7456_v26  ;;  %11866 = vmatmul.msk.bf16.gmra.mxu0 %vm1314_vm4, %v12724_v52 }
 0x675   :  { %v7482_v28 = vld [vmem:[#allocation3 + $0x40] ss:$2 sm:$0xff]  ;;  %v7490_v62 = vld [vmem:[#allocation3 + $0x41] ss:$2 sm:$0xff]  ;;  %11982 = vmatmul.msk.bf16.gmra.mxu3 %vm1314_vm4, %v12734_v49  ;;  %v5417_v1 = vadd.f32 %v15545_v54, %v5416_v30  ;;  %v12790_v30 = vld [vmem:[%s16273_s3 + $0x58] sm:$0xff] }
 0x676   :  { %v7498_v10 = vmax.f32 %v7482_v28, %v7490_v62  ;;  %v7525_v50 = vpack.c.bf16 %v7523_v4, %v7523_v4  ;;  %8858 = vmatpush.bf16.msra.mxu2 %v12790_v30 }
 0x677   :  { %v5573_v5 = vmax.f32 %v5417_v1, 0.0  ;;  %v7163_v16 = vpop.f32.mrf.mxu2  ;;  %v12804_v1 = vld [vmem:[%s16273_s3 + $0x88] sm:$0xff] }
 0x678   :  { %7506 = vst.msk [vmem:[#allocation4 + $0x20] sm:$0xff] %vm1683_vm5, %v7498_v10  ;;  %v15781_v53 = vpop.f32.mrf.mxu3  ;;  %v7265_v46 = vadd.f32 %v15716_v19, %v7163_v16  ;;  %v12782_v10 = vld [vmem:[%s16273_s3 + $0x28] sm:$0xff]  ;;  %9136 = vmatpush.bf16.msra.mxu0 %v12804_v1 }
 0x679   :  { %11674 = vst.msk [vmem:[%s16275_s5 + $0x64] sm:$0x3] %vm1765_vm7, %v7525_v50  ;;  %v5677_v44 = vpack.c.bf16 %v5573_v5, %v5573_v5  ;;  %v7433_v60 = vpop.f32.mrf.mxu0  ;;  %8959 = vmatpush.bf16.msra.mxu3 %v12782_v10 }
 0x67a   :  { %v7457_v29 = vadd.f32 %v7433_v60, %v7257_v24  ;;  %v12838_v24 = vld [vmem:[#allocation9] ss:$0 sm:$0xff] }
 0x67b   :  { %5781 = vst.msk [vmem:[#allocation2 + $0x114] sm:$0xf] %vm1088_vm3, %v5677_v44 }
 0x67c   :  { %v5419_v13 = vpop.f32.mrf.mxu1  ;;  %7473 = vst.msk [vmem:[#allocation3 + $0x58] sm:$0xff] %vm1683_vm5, %v7457_v29  ;;  %v12789_v29 = vld [vmem:[%s16273_s3 + $0x50] sm:$0xff] }
 0x67d   :  { %v5420_v56 = vadd.f32 %v15545_v54, %v5419_v13  ;;  %8859 = vmatpush.bf16.msra.mxu2 %v12789_v29 }
 0x67f   :  { %v5574_v2 = vmax.f32 %v5420_v56, 0.0  ;;  %11080 = vmatmul.msk.bf16.gmra.mxu1 %vm447_vm2, %v12578_v14  ;;  %v7165_v58 = vpop.f32.mrf.mxu2  ;;  %v7528_v16 = vld [vmem:[#allocation4 + $0x20] sm:$0xff] }
 0x680   :  { %v15796_v8 = vpop.f32.mrf.mxu3  ;;  %v7267_v4 = vadd.f32 %v15737_v45, %v7165_v58  ;;  %v12580_v45 = vld [vmem:[%s16270_s0 + $0x308] sm:$0xff]  ;;  %v12781_v14 = vld [vmem:[%s16273_s3 + $0x20] sm:$0xff] }
 0x681   :  { %v5678_v12 = vpack.c.bf16 %v5574_v2, %v5574_v2  ;;  %v7436_v18 = vpop.f32.mrf.mxu0  ;;  %8960 = vmatpush.bf16.msra.mxu3 %v12781_v14 }
 0x682   :  { %v12725_v11 = vld [vmem:[#allocation2 + $0x110] sm:$0xff]  ;;  %v7458_v61 = vadd.f32 %v7436_v18, %v7260_v20 }
 0x683   :  { %v12735_v40 = vld [vmem:[#allocation2 + $0x110] sm:$0xff]  ;;  %5782 = vst.msk [vmem:[#allocation2 + $0x118] sm:$0xf] %vm1088_vm3, %v5678_v12 }
 0x684   :  { %v7483_v22 = vld [vmem:[#allocation3 + $0x50] ss:$2 sm:$0xff]  ;;  %v7491_v27 = vld [vmem:[#allocation3 + $0x51] ss:$2 sm:$0xff]  ;;  %v5421_v31 = vpop.f32.mrf.mxu1  ;;  %11941 = vmatmul.msk.bf16.vlgmr.msrb.gmra.mxu2 %vm1314_vm4, %v12735_v40  ;;  %7474 = vst.msk [vmem:[#allocation3 + $0x60] sm:$0xff] %vm1683_vm5, %v7458_v61  ;;  %11867 = vmatmul.msk.bf16.gmra.mxu0 %vm1314_vm4, %v12725_v11 }
 0x685   :  { %11983 = vmatmul.msk.bf16.gmra.mxu3 %vm1314_vm4, %v12735_v40  ;;  %v7499_v25 = vmax.f32 %v7483_v22, %v7491_v27  ;;  %v5422_v7 = vadd.f32 %v15545_v54, %v5421_v31 }
 0x687   :  { %7507 = vst.msk [vmem:[#allocation4 + $0x28] sm:$0xff] %vm1683_vm5, %v7499_v25  ;;  %v5575_v17 = vmax.f32 %v5422_v7, 0.0  ;;  %v7707_v6 = vpop.f32.mrf.mxu2 }
 0x688   :  { %v15809_v47 = vpop.f32.mrf.mxu3  ;;  %v7809_v20 = vadd.f32 %v15753_v37, %v7707_v6 }
 0x689   :  { %v5679_v35 = vpack.c.bf16 %v5575_v17, %v5575_v17  ;;  %v7438_v9 = vpop.f32.mrf.mxu0 }
 0x68a   :  { %v7459_v15 = vadd.f32 %v7438_v9, %v7262_v3 }
 0x68b   :  { %5783 = vst.msk [vmem:[#allocation2 + $0x11c] sm:$0xf] %vm1088_vm3, %v5679_v35 }
 0x68c   :  { %v5424_v59 = vpop.f32.mrf.mxu1  ;;  %7475 = vst.msk [vmem:[#allocation3 + $0x68] sm:$0xff] %vm1683_vm5, %v7459_v15 }
 0x68d   :  { %v5425_v39 = vadd.f32 %v15545_v54, %v5424_v59 }
 0x68f   :  { %v5576_v34 = vmax.f32 %v5425_v39, 0.0  ;;  %11081 = vmatmul.msk.bf16.gmra.mxu1 %vm447_vm2, %v12579_v32  ;;  %v15820_v36 = vpop.f32.mrf.mxu2 }
 0x690   :  { %v15822_v57 = vpop.f32.mrf.mxu3  ;;  %v7811_v15 = vadd.f32 %v15770_v21, %v15820_v36  ;;  %v12803_v21 = vld [vmem:[%s16273_s3 + $0x80] sm:$0xff]  ;;  %v12788_v36 = vld [vmem:[%s16273_s3 + $0x48] sm:$0xff] }
 0x691   :  { %v5680_v23 = vpack.c.bf16 %v5576_v34, %v5576_v34  ;;  %v7441_v41 = vpop.f32.mrf.mxu0  ;;  %v12581_v34 = vld [vmem:[%s16270_s0 + $0x310] sm:$0xff]  ;;  %9137 = vmatpush.bf16.msra.mxu0 %v12803_v21  ;;  %8860 = vmatpush.bf16.msra.mxu2 %v12788_v36  ;;  %v12583_v21 = vld [vmem:[%s16270_s0 + $0x320] sm:$0xff] }
 0x692   :  { %v12726_v48 = vld [vmem:[#allocation2 + $0x118] sm:$0xff]  ;;  %v7460_v42 = vadd.f32 %v7441_v41, %v7265_v46 }
 0x693   :  { %v12736_v55 = vld [vmem:[#allocation2 + $0x118] sm:$0xff]  ;;  %5784 = vst.msk [vmem:[#allocation2 + $0x120] sm:$0xf] %vm1088_vm3, %v5680_v23  ;;  %v7484_v43 = vld [vmem:[#allocation3 + $0x60] ss:$2 sm:$0xff] }
 0x694   :  { %v7492_v51 = vld [vmem:[#allocation3 + $0x61] ss:$2 sm:$0xff]  ;;  %v5426_v0 = vpop.f32.mrf.mxu1  ;;  %11942 = vmatmul.msk.bf16.gmra.mxu2 %vm1314_vm4, %v12736_v55  ;;  %7476 = vst.msk [vmem:[#allocation3 + $0x70] sm:$0xff] %vm1683_vm5, %v7460_v42  ;;  %11868 = vmatmul.msk.bf16.gmra.mxu0 %vm1314_vm4, %v12726_v48 }
 0x695   :  { %11984 = vmatmul.msk.bf16.gmra.mxu3 %vm1314_vm4, %v12736_v55  ;;  %v7500_v33 = vmax.f32 %v7484_v43, %v7492_v51  ;;  %v5427_v52 = vadd.f32 %v15545_v54, %v5426_v0  ;;  %v7529_v23 = vld [vmem:[#allocation4 + $0x28] sm:$0xf]  ;;  %v12780_v0 = vld [vmem:[%s16273_s3 + $0x18] sm:$0xff] }
 0x696   :  { %8961 = vmatpush.bf16.msra.mxu3 %v12780_v0 }
 0x697   :  { %7508 = vst.msk [vmem:[#allocation4 + $0x30] sm:$0xff] %vm1683_vm5, %v7500_v33  ;;  %v5577_v19 = vmax.f32 %v5427_v52, 0.0  ;;  %v15832_v49 = vpop.f32.mrf.mxu2 }
 0x698   :  { %v15834_v26 = vpop.f32.mrf.mxu3  ;;  %v7814_v33 = vadd.f32 %v15781_v53, %v15832_v49 }
 0x699   :  { %v5681_v28 = vpack.c.bf16 %v5577_v19, %v5577_v19  ;;  %v7443_v62 = vpop.f32.mrf.mxu0 }
 0x69a   :  { %v7461_v50 = vadd.f32 %v7443_v62, %v7267_v4 }
 0x69b   :  { %5785 = vst.msk [vmem:[#allocation2 + $0x124] sm:$0xf] %vm1088_vm3, %v5681_v28 }
 0x69c   :  { %v5429_v5 = vpop.f32.mrf.mxu1  ;;  %7477 = vst.msk [vmem:[#allocation3 + $0x78] sm:$0xff] %vm1683_vm5, %v7461_v50 }
 0x69d   :  { %v5430_v44 = vadd.f32 %v15545_v54, %v5429_v5 }
 0x69e   :  { %v7530_v60 = vld [vmem:[#allocation4 + $0x30] sm:$0xff] }
 0x69f   :  { %v7532_v13 = vmax.f32 %v7528_v16, %v7530_v60  ;;  %v5578_v56 = vmax.f32 %v5430_v44, 0.0  ;;  %11082 = vmatmul.msk.bf16.gmra.mxu1 %vm447_vm2, %v12580_v45  ;;  %v15859_v2 = vpop.f32.mrf.mxu2 }
 0x6a0   :  { %v15861_v58 = vpop.f32.mrf.mxu3 }
 0x6a1   :  { %v7538_v12 = vadd.f32 %v12838_v24, %v7532_v13  ;;  %v5682_v18 = vpack.c.bf16 %v5578_v56, %v5578_v56  ;;  %v7985_v11 = vpop.f32.mrf.mxu0  ;;  %v7816_v13 = vadd.f32 %v15796_v8, %v15859_v2  ;;  %v12778_v2 = vld [vmem:[%s16273_s3 + $0x8] sm:$0xff] }
 0x6a2   :  { %v12737_v40 = vld [vmem:[#allocation2 + $0x120] sm:$0xff]  ;;  %v8025_v22 = vadd.f32 %v7985_v11, %v7809_v20  ;;  %v12582_v11 = vld [vmem:[%s16270_s0 + $0x318] sm:$0xff] }
 0x6a3   :  { %v12755_v63 = vld [vmem:[#allocation2 + $0x120] sm:$0xff]  ;;  %v7540_v61 = vmax.f32 %v7538_v12, 0.0  ;;  %5786 = vst.msk [vmem:[#allocation2 + $0x128] sm:$0xf] %vm1088_vm3, %v5682_v18  ;;  %v7485_v27 = vld [vmem:[#allocation3 + $0x70] ss:$2 sm:$0xff] }
 0x6a4   :  { %v7493_v31 = vld [vmem:[#allocation3 + $0x71] ss:$2 sm:$0xff]  ;;  %v5431_v25 = vpop.f32.mrf.mxu1  ;;  %11943 = vmatmul.msk.bf16.gmra.mxu2 %vm1314_vm4, %v12737_v40  ;;  %8041 = vst.msk [vmem:[#allocation3] sm:$0xff] %vm1683_vm5, %v8025_v22  ;;  %12057 = vmatmul.msk.bf16.vlgmr.msrb.gmra.mxu0 %vm1314_vm4, %v12755_v63 }
 0x6a5   :  { %11985 = vmatmul.msk.bf16.gmra.mxu3 %vm1314_vm4, %v12737_v40  ;;  %v7542_v7 = vpack.c.bf16 %v7540_v61, %v7540_v61  ;;  %v7501_v17 = vmax.f32 %v7485_v27, %v7493_v31  ;;  %v5432_v37 = vadd.f32 %v15545_v54, %v5431_v25  ;;  %v12779_v12 = vld [vmem:[%s16273_s3 + $0x10] sm:$0xff] }
 0x6a6   :  { %8962 = vmatpush.bf16.msra.mxu3 %v12779_v12 }
 0x6a7   :  { %v7546_v6 = vrot.slane %v7542_v7, 6  ;;  %7509 = vst.msk [vmem:[#allocation4 + $0x38] sm:$0xff] %vm1683_vm5, %v7501_v17  ;;  %v5579_v3 = vmax.f32 %v5432_v37, 0.0  ;;  %v15871_v35 = vpop.f32.mrf.mxu2  ;;  %v12777_v37 = vld [vmem:[%s16273_s3] sm:$0xff] }
 0x6a8   :  { %v15873_v9 = vpop.f32.mrf.mxu3  ;;  %v7819_v27 = vadd.f32 %v15809_v47, %v15871_v35 }
 0x6a9   :  { %11675 = vst.msk [vmem:[%s16275_s5 + $0x64] sm:$0xc] %vm1794_vm8, %v7546_v6  ;;  %v5683_v32 = vpack.c.bf16 %v5579_v3, %v5579_v3  ;;  %v7987_v59 = vpop.f32.mrf.mxu0  ;;  %v7547_v49 = vrot.slane %v7546_v6, 4 }
 0x6aa   :  { %v8026_v39 = vadd.f32 %v7987_v59, %v7811_v15  ;;  %8963 = vmatpush.bf16.msra.mxu3 %v12778_v2 }
 0x6ab   :  { %5787 = vst.msk [vmem:[#allocation2 + $0x12c] sm:$0xf] %vm1088_vm3, %v5683_v32 }
 0x6ac   :  { %v5434_v46 = vpop.f32.mrf.mxu1  ;;  %8042 = vst.msk [vmem:[#allocation3 + $0x8] sm:$0xff] %vm1683_vm5, %v8026_v39 }
 0x6ad   :  { %v5435_v41 = vadd.f32 %v15545_v54, %v5434_v46  ;;  %v12802_v46 = vld [vmem:[%s16273_s3 + $0x78] sm:$0xff] }
 0x6ae   :  { %v7531_v48 = vld [vmem:[#allocation4 + $0x38] sm:$0xf]  ;;  %8964 = vmatpush.bf16.msra.mxu3 %v12777_v37  ;;  %9138 = vmatpush.bf16.msra.mxu0 %v12802_v46 }
 0x6af   :  { %v7533_v55 = vmax.f32 %v7529_v23, %v7531_v48  ;;  %v5580_v42 = vmax.f32 %v5435_v41, 0.0  ;;  %11083 = vmatmul.msk.bf16.gmra.mxu1 %vm447_vm2, %v12581_v34  ;;  %v15894_v43 = vpop.f32.mrf.mxu2 }
 0x6b0   :  { %v15896_v51 = vpop.f32.mrf.mxu3  ;;  %v7821_v23 = vadd.f32 %v15822_v57, %v15894_v43 }
 0x6b1   :  { %v7539_v52 = vadd.f32 %v12838_v24, %v7533_v55  ;;  %v5684_v19 = vpack.c.bf16 %v5580_v42, %v5580_v42  ;;  %v7990_v4 = vpop.f32.mrf.mxu0  ;;  %v15961_v55 = vld [vmem:[#allocation7] ss:$0 sm:$0xff] }
 0x6b2   :  { %v12738_v28 = vld [vmem:[#allocation2 + $0x128] sm:$0xff]  ;;  %v8027_v10 = vadd.f32 %v7990_v4, %v7814_v33 }
 0x6b3   :  { %v12756_v62 = vld [vmem:[#allocation2 + $0x128] sm:$0xff]  ;;  %v7541_v30 = vmax.f32 %v7539_v52, 0.0  ;;  %5788 = vst.msk [vmem:[#allocation2 + $0x130] sm:$0xf] %vm1088_vm3, %v5684_v19 }
 0x6b4   :  { %v8057_v1 = vld [vmem:[#allocation3] ss:$2 sm:$0xff]  ;;  %v8065_v50 = vld [vmem:[#allocation3 + $0x1] ss:$2 sm:$0xff]  ;;  %v5436_v45 = vpop.f32.mrf.mxu1  ;;  %11944 = vmatmul.msk.bf16.gmra.mxu2 %vm1314_vm4, %v12738_v28  ;;  %8043 = vst.msk [vmem:[#allocation3 + $0x10] sm:$0xff] %vm1683_vm5, %v8027_v10  ;;  %12058 = vmatmul.msk.bf16.gmra.mxu0 %vm1314_vm4, %v12756_v62 }
 0x6b5   :  { %11986 = vmatmul.msk.bf16.gmra.mxu3 %vm1314_vm4, %v12738_v28  ;;  %v7543_v5 = vpack.c.bf16 %v7541_v30, %v7541_v30  ;;  %v8073_v16 = vmax.f32 %v8057_v1, %v8065_v50  ;;  %v5437_v53 = vadd.f32 %v15545_v54, %v5436_v45 }
 0x6b7   :  { %v7548_v24 = vrot.slane %v7543_v5, 6  ;;  %8081 = vst.msk [vmem:[#allocation4] sm:$0xff] %vm1683_vm5, %v8073_v16  ;;  %v5581_v44 = vmax.f32 %v5437_v53, 0.0  ;;  %v7722_v60 = vpop.f32.mrf.mxu2  ;;  %v12787_v53 = vld [vmem:[%s16273_s3 + $0x40] sm:$0xff] }
 0x6b8   :  { %v15910_v29 = vpop.f32.mrf.mxu3  ;;  %v7824_v33 = vadd.f32 %v15834_v26, %v7722_v60  ;;  %8861 = vmatpush.bf16.msra.mxu2 %v12787_v53 }
 0x6b9   :  { %v7549_v14 = vsel %vm13816_vm11, %v7547_v49, %v7548_v24  ;;  %v5685_v56 = vpack.c.bf16 %v5581_v44, %v5581_v44  ;;  %v7992_v20 = vpop.f32.mrf.mxu0  ;;  %v12801_v49 = vld [vmem:[%s16273_s3 + $0x70] sm:$0xff] }
 0x6ba   :  { %11676 = vst.msk [vmem:[%s16275_s5 + $0x68] sm:$0xf] %vm1763_vm6, %v7549_v14  ;;  %v8028_v18 = vadd.f32 %v7992_v20, %v7816_v13  ;;  %9139 = vmatpush.bf16.msra.mxu0 %v12801_v49  ;;  %v12584_v13 = vld [vmem:[%s16270_s0 + $0x328] sm:$0xff]  ;;  %v12839_v20 = vld [vmem:[#allocation9] ss:$0 sm:$0xff] }
 0x6bb   :  { %5789 = vst.msk [vmem:[#allocation2 + $0x134] sm:$0xf] %vm1088_vm3, %v5685_v56 }
 0x6bc   :  { %v5439_v40 = vpop.f32.mrf.mxu1  ;;  %8044 = vst.msk [vmem:[#allocation3 + $0x18] sm:$0xff] %vm1683_vm5, %v8028_v18 }
 0x6bd   :  { %v5440_v8 = vadd.f32 %v15545_v54, %v5439_v40 }
 0x6be   :  { %v8089_v18 = vld [vmem:[#allocation4] sm:$0xff] }
 0x6bf   :  { %v5582_v63 = vmax.f32 %v5440_v8, 0.0  ;;  %11084 = vmatmul.msk.bf16.gmra.mxu1 %vm447_vm2, %v12582_v11  ;;  %v15933_v61 = vpop.f32.mrf.mxu2 }
 0x6c0   :  { %v15935_v22 = vpop.f32.mrf.mxu3  ;;  %v7826_v24 = vadd.f32 %v15861_v58, %v15933_v61  ;;  %v12786_v58 = vld [vmem:[%s16273_s3 + $0x38] sm:$0xff] }
 0x6c1   :  { %v5686_v31 = vpack.c.bf16 %v5582_v63, %v5582_v63  ;;  %v7995_v25 = vpop.f32.mrf.mxu0  ;;  %8862 = vmatpush.bf16.msra.mxu2 %v12786_v58 }
 0x6c2   :  { %v12739_v7 = vld [vmem:[#allocation2 + $0x130] sm:$0xff]  ;;  %v8029_v6 = vadd.f32 %v7995_v25, %v7819_v27 }
 0x6c3   :  { %v12757_v17 = vld [vmem:[#allocation2 + $0x130] sm:$0xff]  ;;  %5790 = vst.msk [vmem:[#allocation2 + $0x138] sm:$0xf] %vm1088_vm3, %v5686_v31 }
 0x6c4   :  { %v8058_v3 = vld [vmem:[#allocation3 + $0x10] ss:$2 sm:$0xff]  ;;  %v8066_v15 = vld [vmem:[#allocation3 + $0x11] ss:$2 sm:$0xff]  ;;  %v5441_v32 = vpop.f32.mrf.mxu1  ;;  %11945 = vmatmul.msk.bf16.gmra.mxu2 %vm1314_vm4, %v12739_v7  ;;  %8045 = vst.msk [vmem:[#allocation3 + $0x20] sm:$0xff] %vm1683_vm5, %v8029_v6  ;;  %12059 = vmatmul.msk.bf16.gmra.mxu0 %vm1314_vm4, %v12757_v17 }
 0x6c5   :  { %11987 = vmatmul.msk.bf16.gmra.mxu3 %vm1314_vm4, %v12739_v7  ;;  %v8074_v59 = vmax.f32 %v8058_v3, %v8066_v15  ;;  %v5442_v47 = vadd.f32 %v15545_v54, %v5441_v32  ;;  %v12785_v15 = vld [vmem:[%s16273_s3 + $0x30] sm:$0xff] }
 0x6c6   :  { %8863 = vmatpush.bf16.msra.mxu2 %v12785_v15 }
 0x6c7   :  { %8082 = vst.msk [vmem:[#allocation4 + $0x8] sm:$0xff] %vm1683_vm5, %v8074_v59  ;;  %v5583_v35 = vmax.f32 %v5442_v47, 0.0  ;;  %v7727_v39 = vpop.f32.mrf.mxu2 }
 0x6c8   :  { %v15949_v34 = vpop.f32.mrf.mxu3  ;;  %v7829_v61 = vadd.f32 %v15873_v9, %v7727_v39 }
 0x6c9   :  { %v5687_v41 = vpack.c.bf16 %v5583_v35, %v5583_v35  ;;  %v7997_v48 = vpop.f32.mrf.mxu0 }
 0x6ca   :  { %v8030_v54 = vadd.f32 %v7997_v48, %v7821_v23 }
 0x6cb   :  { %5791 = vst.msk [vmem:[#allocation2 + $0x13c] sm:$0xf] %vm1088_vm3, %v5687_v41 }
 0x6cc   :  { %v5444_v36 = vpop.f32.mrf.mxu1  ;;  %8046 = vst.msk [vmem:[#allocation3 + $0x28] sm:$0xff] %vm1683_vm5, %v8030_v54 }
 0x6cd   :  { %v5445_v42 = vadd.f32 %v15961_v55, %v5444_v36 }
 0x6cf   :  { %v5584_v0 = vmax.f32 %v5445_v42, 0.0  ;;  %11085 = vmatmul.msk.bf16.gmra.mxu1 %vm447_vm2, %v12583_v21  ;;  %v15965_v57 = vpop.f32.mrf.mxu2  ;;  %v12585_v42 = vld [vmem:[%s16270_s0 + $0x330] sm:$0xff] }
 0x6d0   :  { %v15967_v43 = vpop.f32.mrf.mxu3  ;;  %v7831_v48 = vadd.f32 %v15896_v51, %v15965_v57 }
 0x6d1   :  { %v5688_v52 = vpack.c.bf16 %v5584_v0, %v5584_v0  ;;  %v8000_v19 = vpop.f32.mrf.mxu0 }
 0x6d2   :  { %v12740_v4 = vld [vmem:[#allocation2 + $0x138] sm:$0xff]  ;;  %v8031_v62 = vadd.f32 %v8000_v19, %v7824_v33  ;;  %v8090_v19 = vld [vmem:[#allocation4 + $0x8] sm:$0xf] }
 0x6d3   :  { %v12758_v28 = vld [vmem:[#allocation2 + $0x138] sm:$0xff]  ;;  %5792 = vst.msk [vmem:[#allocation2 + $0x140] sm:$0xf] %vm1088_vm3, %v5688_v52  ;;  %v8059_v30 = vld [vmem:[#allocation3 + $0x20] ss:$2 sm:$0xff] }
 0x6d4   :  { %v8067_v10 = vld [vmem:[#allocation3 + $0x21] ss:$2 sm:$0xff]  ;;  %v5446_v1 = vpop.f32.mrf.mxu1  ;;  %11946 = vmatmul.msk.bf16.gmra.mxu2 %vm1314_vm4, %v12740_v4  ;;  %8047 = vst.msk [vmem:[#allocation3 + $0x30] sm:$0xff] %vm1683_vm5, %v8031_v62  ;;  %12060 = vmatmul.msk.bf16.gmra.mxu0 %vm1314_vm4, %v12758_v28 }
 0x6d5   :  { %11988 = vmatmul.msk.bf16.gmra.mxu3 %vm1314_vm4, %v12740_v4  ;;  %v8075_v50 = vmax.f32 %v8059_v30, %v8067_v10  ;;  %v5447_v45 = vadd.f32 %v15961_v55, %v5446_v1  ;;  %v12800_v52 = vld [vmem:[%s16273_s3 + $0x68] sm:$0xff] }
 0x6d6   :  { %9140 = vmatpush.bf16.msra.mxu0 %v12800_v52 }
 0x6d7   :  { %8083 = vst.msk [vmem:[#allocation4 + $0x10] sm:$0xff] %vm1683_vm5, %v8075_v50  ;;  %v5585_v26 = vmax.f32 %v5447_v45, 0.0  ;;  %v15977_v5 = vpop.f32.mrf.mxu2 }
 0x6d8   :  { %v15979_v16 = vpop.f32.mrf.mxu3  ;;  %v7834_v30 = vadd.f32 %v15910_v29, %v15977_v5 }
 0x6d9   :  { %v5689_v44 = vpack.c.bf16 %v5585_v26, %v5585_v26  ;;  %v8002_v60 = vpop.f32.mrf.mxu0 }
 0x6da   :  { %v8032_v14 = vadd.f32 %v8002_v60, %v7826_v24 }
 0x6db   :  { %5793 = vst.msk [vmem:[#allocation2 + $0x144] sm:$0xf] %vm1088_vm3, %v5689_v44 }
 0x6dc   :  { %v5449_v56 = vpop.f32.mrf.mxu1  ;;  %8048 = vst.msk [vmem:[#allocation3 + $0x38] sm:$0xff] %vm1683_vm5, %v8032_v14 }
 0x6dd   :  { %v5450_v12 = vadd.f32 %v15961_v55, %v5449_v56 }
 0x6de   :  { %v8091_v11 = vld [vmem:[#allocation4 + $0x10] sm:$0xff] }
 0x6df   :  { %v8093_v40 = vmax.f32 %v8089_v18, %v8091_v11  ;;  %v5586_v8 = vmax.f32 %v5450_v12, 0.0  ;;  %11086 = vmatmul.msk.bf16.gmra.mxu1 %vm447_vm2, %v12584_v13  ;;  %v15999_v2 = vpop.f32.mrf.mxu2 }
 0x6e0   :  { %v16001_v63 = vpop.f32.mrf.mxu3  ;;  %v7836_v18 = vadd.f32 %v15935_v22, %v15999_v2 }
 0x6e1   :  { %v8099_v27 = vadd.f32 %v12839_v20, %v8093_v40  ;;  %v5690_v31 = vpack.c.bf16 %v5586_v8, %v5586_v8  ;;  %v8005_v25 = vpop.f32.mrf.mxu0  ;;  %v12586_v8 = vld [vmem:[%s16270_s0 + $0x338] sm:$0xff] }
 0x6e2   :  { %v12747_v7 = vld [vmem:[#allocation2 + $0x140] sm:$0xff]  ;;  %v8033_v3 = vadd.f32 %v8005_v25, %v7829_v61 }
 0x6e3   :  { %v12759_v17 = vld [vmem:[#allocation2 + $0x140] sm:$0xff]  ;;  %v8101_v6 = vmax.f32 %v8099_v27, 0.0  ;;  %5794 = vst.msk [vmem:[#allocation2 + $0x148] sm:$0xf] %vm1088_vm3, %v5690_v31  ;;  %v8060_v32 = vld [vmem:[#allocation3 + $0x30] ss:$2 sm:$0xff] }
 0x6e4   :  { %v12769_v37 = vld [vmem:[#allocation2 + $0x140] sm:$0xff]  ;;  %v8068_v59 = vld [vmem:[#allocation3 + $0x31] ss:$2 sm:$0xff]  ;;  %v5451_v47 = vpop.f32.mrf.mxu1  ;;  %11947 = vmatmul.msk.bf16.gmra.mxu2 %vm1314_vm4, %v12747_v7  ;;  %8049 = vst.msk [vmem:[#allocation3 + $0x40] sm:$0xff] %vm1683_vm5, %v8033_v3  ;;  %12061 = vmatmul.msk.bf16.gmra.mxu0 %vm1314_vm4, %v12759_v17 }
 0x6e5   :  { %12177 = vmatmul.msk.bf16.vlgmr.msra.gmra.mxu3 %vm1314_vm4, %v12769_v37  ;;  %v8103_v9 = vpack.c.bf16 %v8101_v6, %v8101_v6  ;;  %v8076_v35 = vmax.f32 %v8060_v32, %v8068_v59  ;;  %v5452_v39 = vadd.f32 %v15961_v55, %v5451_v47  ;;  %v12799_v3 = vld [vmem:[%s16273_s3 + $0x60] sm:$0xff] }
 0x6e6   :  { %9141 = vmatpush.bf16.msra.mxu0 %v12799_v3 }
 0x6e7   :  { %11869 = vst.msk [vmem:[%s16275_s5 + $0x6c] sm:$0xf] %vm1763_vm6, %v8103_v9  ;;  %v5587_v46 = vmax.f32 %v5452_v39, 0.0  ;;  %v7737_v23 = vpop.f32.mrf.mxu2 }
 0x6e8   :  { %v16017_v41 = vpop.f32.mrf.mxu3  ;;  %8084 = vst.msk [vmem:[#allocation4 + $0x18] sm:$0xff] %vm1683_vm5, %v8076_v35  ;;  %v7839_v22 = vadd.f32 %v15949_v34, %v7737_v23 }
 0x6e9   :  { %v5691_v54 = vpack.c.bf16 %v5587_v46, %v5587_v46  ;;  %v8007_v21 = vpop.f32.mrf.mxu0 }
 0x6ea   :  { %v8034_v36 = vadd.f32 %v8007_v21, %v7831_v48 }
 0x6eb   :  { %5795 = vst.msk [vmem:[#allocation2 + $0x14c] sm:$0xf] %vm1088_vm3, %v5691_v54 }
 0x6ec   :  { %v5454_v0 = vpop.f32.mrf.mxu1  ;;  %8050 = vst.msk [vmem:[#allocation3 + $0x48] sm:$0xff] %vm1683_vm5, %v8034_v36 }
 0x6ed   :  { %v5455_v33 = vadd.f32 %v15961_v55, %v5454_v0 }
 0x6ef   :  { %v8092_v51 = vld [vmem:[#allocation4 + $0x18] sm:$0xf]  ;;  %v5588_v57 = vmax.f32 %v5455_v33, 0.0  ;;  %11087 = vmatmul.msk.bf16.gmra.mxu1 %vm447_vm2, %v12585_v42  ;;  %v16032_v4 = vpop.f32.mrf.mxu2 }
 0x6f0   :  { %v16034_v28 = vpop.f32.mrf.mxu3  ;;  %v8094_v62 = vmax.f32 %v8090_v19, %v8092_v51  ;;  %v7841_v46 = vadd.f32 %v15967_v43, %v16032_v4 }
 0x6f1   :  { %v5692_v10 = vpack.c.bf16 %v5588_v57, %v5588_v57  ;;  %v8010_v50 = vpop.f32.mrf.mxu0 }
 0x6f2   :  { %v8100_v1 = vadd.f32 %v12839_v20, %v8094_v62  ;;  %v12748_v45 = vld [vmem:[#allocation2 + $0x148] sm:$0xff]  ;;  %v8035_v49 = vadd.f32 %v8010_v50, %v7834_v30 }
 0x6f3   :  { %v12760_v26 = vld [vmem:[#allocation2 + $0x148] sm:$0xff]  ;;  %5796 = vst.msk [vmem:[#allocation2 + $0x150] sm:$0xf] %vm1088_vm3, %v5692_v10 }
 0x6f4   :  { %v12770_v53 = vld [vmem:[#allocation2 + $0x148] sm:$0xff]  ;;  %v8102_v24 = vmax.f32 %v8100_v1, 0.0  ;;  %v5456_v14 = vpop.f32.mrf.mxu1  ;;  %11948 = vmatmul.msk.bf16.gmra.mxu2 %vm1314_vm4, %v12748_v45  ;;  %8051 = vst.msk [vmem:[#allocation3 + $0x50] sm:$0xff] %vm1683_vm5, %v8035_v49  ;;  %12062 = vmatmul.msk.bf16.gmra.mxu0 %vm1314_vm4, %v12760_v26 }
 0x6f5   :  { %v8061_v44 = vld [vmem:[#allocation3 + $0x40] ss:$2 sm:$0xff]  ;;  %v8069_v60 = vld [vmem:[#allocation3 + $0x41] ss:$2 sm:$0xff]  ;;  %12178 = vmatmul.msk.bf16.gmra.mxu3 %vm1314_vm4, %v12770_v53  ;;  %v5457_v29 = vadd.f32 %v15961_v55, %v5456_v14  ;;  %v12840_v14 = vld [vmem:[#allocation9] ss:$0 sm:$0xff] }
 0x6f6   :  { %v8077_v13 = vmax.f32 %v8061_v44, %v8069_v60  ;;  %v8104_v5 = vpack.c.bf16 %v8102_v24, %v8102_v24 }
 0x6f7   :  { %v5589_v56 = vmax.f32 %v5457_v29, 0.0  ;;  %v7742_v20 = vpop.f32.mrf.mxu2 }
 0x6f8   :  { %8085 = vst.msk [vmem:[#allocation4 + $0x20] sm:$0xff] %vm1683_vm5, %v8077_v13  ;;  %v16045_v12 = vpop.f32.mrf.mxu3  ;;  %v7844_v52 = vadd.f32 %v15979_v16, %v7742_v20 }
 0x6f9   :  { %11870 = vst.msk [vmem:[%s16275_s5 + $0x70] sm:$0x3] %vm1765_vm7, %v8104_v5  ;;  %v5693_v11 = vpack.c.bf16 %v5589_v56, %v5589_v56  ;;  %v8012_v58 = vpop.f32.mrf.mxu0 }
 0x6fa   :  { %v8036_v40 = vadd.f32 %v8012_v58, %v7836_v18 }
 0x6fb   :  { %5797 = vst.msk [vmem:[#allocation2 + $0x154] sm:$0xf] %vm1088_vm3, %v5693_v11 }
 0x6fc   :  { %v5459_v61 = vpop.f32.mrf.mxu1  ;;  %8052 = vst.msk [vmem:[#allocation3 + $0x58] sm:$0xff] %vm1683_vm5, %v8036_v40 }
 0x6fd   :  { %v5460_v27 = vadd.f32 %v15961_v55, %v5459_v61 }
 0x6ff   :  { %v5590_v31 = vmax.f32 %v5460_v27, 0.0  ;;  %11088 = vmatmul.msk.bf16.gmra.mxu1 %vm447_vm2, %v12586_v8  ;;  %v7744_v25 = vpop.f32.mrf.mxu2  ;;  %v8107_v29 = vld [vmem:[#allocation4 + $0x20] sm:$0xff] }
 0x700   :  { %v16060_v7 = vpop.f32.mrf.mxu3  ;;  %v7846_v53 = vadd.f32 %v16001_v63, %v7744_v25 }
 0x701   :  { %v5694_v2 = vpack.c.bf16 %v5590_v31, %v5590_v31  ;;  %v8015_v17 = vpop.f32.mrf.mxu0 }
 0x702   :  { %v12761_v37 = vld [vmem:[#allocation2 + $0x150] sm:$0xff]  ;;  %v8037_v15 = vadd.f32 %v8015_v17, %v7839_v22 }
 0x703   :  { %v12771_v6 = vld [vmem:[#allocation2 + $0x150] sm:$0xff]  ;;  %5798 = vst.msk [vmem:[#allocation2 + $0x158] sm:$0xf] %vm1088_vm3, %v5694_v2 }
 0x704   :  { %v8062_v32 = vld [vmem:[#allocation3 + $0x50] ss:$2 sm:$0xff]  ;;  %v8070_v59 = vld [vmem:[#allocation3 + $0x51] ss:$2 sm:$0xff]  ;;  %v5461_v47 = vpop.f32.mrf.mxu1  ;;  %12137 = vmatmul.msk.bf16.vlgmr.msra.gmra.mxu2 %vm1314_vm4, %v12771_v6  ;;  %8053 = vst.msk [vmem:[#allocation3 + $0x60] sm:$0xff] %vm1683_vm5, %v8037_v15  ;;  %12063 = vmatmul.msk.bf16.gmra.mxu0 %vm1314_vm4, %v12761_v37 }
 0x705   :  { %12179 = vmatmul.msk.bf16.gmra.mxu3 %vm1314_vm4, %v12771_v6  ;;  %v8078_v9 = vmax.f32 %v8062_v32, %v8070_v59  ;;  %v5462_v34 = vadd.f32 %v15961_v55, %v5461_v47 }
 0x707   :  { %8086 = vst.msk [vmem:[#allocation4 + $0x28] sm:$0xff] %vm1683_vm5, %v8078_v9  ;;  %v5591_v35 = vmax.f32 %v5462_v34, 0.0  ;;  %v8286_v39 = vpop.f32.mrf.mxu2 }
 0x708   :  { %v16075_v48 = vpop.f32.mrf.mxu3  ;;  %v8388_v63 = vadd.f32 %v16017_v41, %v8286_v39 }
 0x709   :  { %v5695_v23 = vpack.c.bf16 %v5591_v35, %v5591_v35  ;;  %v8017_v54 = vpop.f32.mrf.mxu0 }
 0x70a   :  { %v8038_v21 = vadd.f32 %v8017_v54, %v7841_v46 }
 0x70b   :  { %5799 = vst.msk [vmem:[#allocation2 + $0x15c] sm:$0xf] %vm1088_vm3, %v5695_v23 }
 0x70c   :  { %v5464_v36 = vpop.f32.mrf.mxu1  ;;  %8054 = vst.msk [vmem:[#allocation3 + $0x68] sm:$0xff] %vm1683_vm5, %v8038_v21 }
 0x70d   :  { %v5465_v42 = vadd.f32 %v15961_v55, %v5464_v36 }
 0x70e   :  { %v8108_v23 = vld [vmem:[#allocation4 + $0x28] sm:$0xf] }
 0x70f   :  { %v5592_v0 = vmax.f32 %v5465_v42, 0.0  ;;  %v8288_v33 = vpop.f32.mrf.mxu2 }
 0x710   :  { %v16082_v10 = vpop.f32.mrf.mxu3  ;;  %v8390_v47 = vadd.f32 %v16034_v28, %v8288_v33 }
 0x711   :  { %v5696_v19 = vpack.c.bf16 %v5592_v0, %v5592_v0  ;;  %v8020_v51 = vpop.f32.mrf.mxu0 }
 0x712   :  { %v12762_v57 = vld [vmem:[#allocation2 + $0x158] sm:$0xff]  ;;  %v8039_v4 = vadd.f32 %v8020_v51, %v7844_v52 }
 0x713   :  { %v12772_v43 = vld [vmem:[#allocation2 + $0x158] sm:$0xff]  ;;  %5800 = vst.msk [vmem:[#allocation2 + $0x160] sm:$0xf] %vm1088_vm3, %v5696_v19  ;;  %v8063_v62 = vld [vmem:[#allocation3 + $0x60] ss:$2 sm:$0xff] }
 0x714   :  { %v8071_v30 = vld [vmem:[#allocation3 + $0x61] ss:$2 sm:$0xff]  ;;  %v5466_v1 = vpop.f32.mrf.mxu1  ;;  %12138 = vmatmul.msk.bf16.gmra.mxu2 %vm1314_vm4, %v12772_v43  ;;  %8055 = vst.msk [vmem:[#allocation3 + $0x70] sm:$0xff] %vm1683_vm5, %v8039_v4  ;;  %12064 = vmatmul.msk.bf16.gmra.mxu0 %vm1314_vm4, %v12762_v57 }
 0x715   :  { %12180 = vmatmul.msk.bf16.gmra.mxu3 %vm1314_vm4, %v12772_v43  ;;  %v8079_v50 = vmax.f32 %v8063_v62, %v8071_v30  ;;  %v5467_v16 = vadd.f32 %v15961_v55, %v5466_v1 }
 0x717   :  { %8087 = vst.msk [vmem:[#allocation4 + $0x30] sm:$0xff] %vm1683_vm5, %v8079_v50  ;;  %v5593_v45 = vmax.f32 %v5467_v16, 0.0  ;;  %v8291_v26 = vpop.f32.mrf.mxu2 }
 0x718   :  { %v16094_v56 = vpop.f32.mrf.mxu3  ;;  %v8393_v0 = vadd.f32 %v16045_v12, %v8291_v26 }
 0x719   :  { %v5697_v49 = vpack.c.bf16 %v5593_v45, %v5593_v45  ;;  %v8022_v24 = vpop.f32.mrf.mxu0 }
 0x71a   :  { %v8040_v44 = vadd.f32 %v8022_v24, %v7846_v53 }
 0x71b   :  { %5801 = vst.msk [vmem:[#allocation2 + $0x164] sm:$0xf] %vm1088_vm3, %v5697_v49 }
 0x71c   :  { %v5469_v60 = vpop.f32.mrf.mxu1  ;;  %8056 = vst.msk [vmem:[#allocation3 + $0x78] sm:$0xff] %vm1683_vm5, %v8040_v44 }
 0x71d   :  { %v5470_v13 = vadd.f32 %v15961_v55, %v5469_v60 }
 0x71e   :  { %v8109_v5 = vld [vmem:[#allocation4 + $0x30] sm:$0xff] }
 0x71f   :  { %v8111_v20 = vmax.f32 %v8107_v29, %v8109_v5  ;;  %v5594_v18 = vmax.f32 %v5470_v13, 0.0  ;;  %v16096_v11 = vpop.f32.mrf.mxu2 }
 0x720   :  { %v16106_v59 = vpop.f32.mrf.mxu3  ;;  %v8395_v44 = vadd.f32 %v16060_v7, %v16096_v11 }
 0x721   :  { %v8117_v58 = vadd.f32 %v12840_v14, %v8111_v20  ;;  %v5698_v40 = vpack.c.bf16 %v5594_v18, %v5594_v18  ;;  %v8564_v8 = vpop.f32.mrf.mxu0 }
 0x722   :  { %v12773_v61 = vld [vmem:[#allocation2 + $0x160] sm:$0xff]  ;;  %v8604_v25 = vadd.f32 %v8564_v8, %v8388_v63 }
 0x723   :  { %v12791_v27 = vld [vmem:[#allocation2 + $0x160] sm:$0xff]  ;;  %v8119_v31 = vmax.f32 %v8117_v58, 0.0  ;;  %5802 = vst.msk [vmem:[#allocation2 + $0x168] sm:$0xf] %vm1088_vm3, %v5698_v40  ;;  %v8064_v22 = vld [vmem:[#allocation3 + $0x70] ss:$2 sm:$0xff] }
 0x724   :  { %v8072_v2 = vld [vmem:[#allocation3 + $0x71] ss:$2 sm:$0xff]  ;;  %v5471_v17 = vpop.f32.mrf.mxu1  ;;  %12139 = vmatmul.msk.bf16.gmra.mxu2 %vm1314_vm4, %v12773_v61  ;;  %8620 = vst.msk [vmem:[#allocation3] sm:$0xff] %vm1683_vm5, %v8604_v25  ;;  %12253 = vmatmul.msk.bf16.vlgmr.msra.gmra.mxu0 %vm1314_vm4, %v12791_v27 }
 0x725   :  { %12181 = vmatmul.msk.bf16.gmra.mxu3 %vm1314_vm4, %v12773_v61  ;;  %v8121_v37 = vpack.c.bf16 %v8119_v31, %v8119_v31  ;;  %v8080_v6 = vmax.f32 %v8064_v22, %v8072_v2  ;;  %v5472_v41 = vadd.f32 %v15961_v55, %v5471_v17 }
 0x727   :  { %v8125_v3 = vrot.slane %v8121_v37, 6  ;;  %8088 = vst.msk [vmem:[#allocation4 + $0x38] sm:$0xff] %vm1683_vm5, %v8080_v6  ;;  %v5595_v15 = vmax.f32 %v5472_v41, 0.0  ;;  %v8296_v32 = vpop.f32.mrf.mxu2 }
 0x728   :  { %v16117_v28 = vpop.f32.mrf.mxu3  ;;  %v8398_v7 = vadd.f32 %v16075_v48, %v8296_v32 }
 0x729   :  { %11871 = vst.msk [vmem:[%s16275_s5 + $0x70] sm:$0xc] %vm1794_vm8, %v8125_v3  ;;  %v5699_v9 = vpack.c.bf16 %v5595_v15, %v5595_v15  ;;  %v8566_v34 = vpop.f32.mrf.mxu0  ;;  %v8126_v45 = vrot.slane %v8125_v3, 4 }
 0x72a   :  { %v8605_v35 = vadd.f32 %v8566_v34, %v8390_v47 }
 0x72b   :  { %5803 = vst.msk [vmem:[#allocation2 + $0x16c] sm:$0xf] %vm1088_vm3, %v5699_v9 }
 0x72c   :  { %v5474_v39 = vpop.f32.mrf.mxu1  ;;  %8621 = vst.msk [vmem:[#allocation3 + $0x8] sm:$0xff] %vm1683_vm5, %v8605_v35 }
 0x72d   :  { %v5475_v46 = vadd.f32 %v15961_v55, %v5474_v39 }
 0x72e   :  { %v8110_v54 = vld [vmem:[#allocation4 + $0x38] sm:$0xf] }
 0x72f   :  { %v8112_v21 = vmax.f32 %v8108_v23, %v8110_v54  ;;  %v5596_v36 = vmax.f32 %v5475_v46, 0.0  ;;  %v8298_v42 = vpop.f32.mrf.mxu2 }
 0x730   :  { %v16135_v29 = vpop.f32.mrf.mxu3  ;;  %v8400_v6 = vadd.f32 %v16082_v10, %v8298_v42 }
 0x731   :  { %v8118_v52 = vadd.f32 %v12840_v14, %v8112_v21  ;;  %v5700_v19 = vpack.c.bf16 %v5596_v36, %v5596_v36  ;;  %v8569_v33 = vpop.f32.mrf.mxu0 }
 0x732   :  { %v12774_v51 = vld [vmem:[#allocation2 + $0x168] sm:$0xff]  ;;  %v8606_v4 = vadd.f32 %v8569_v33, %v8393_v0 }
 0x733   :  { %v12792_v57 = vld [vmem:[#allocation2 + $0x168] sm:$0xff]  ;;  %v8120_v43 = vmax.f32 %v8118_v52, 0.0  ;;  %5804 = vst.msk [vmem:[#allocation2 + $0x170] sm:$0xf] %vm1088_vm3, %v5700_v19 }
 0x734   :  { %v8636_v62 = vld [vmem:[#allocation3] ss:$2 sm:$0xff]  ;;  %v8644_v30 = vld [vmem:[#allocation3 + $0x1] ss:$2 sm:$0xff]  ;;  %v5476_v1 = vpop.f32.mrf.mxu1  ;;  %12140 = vmatmul.msk.bf16.gmra.mxu2 %vm1314_vm4, %v12774_v51  ;;  %8622 = vst.msk [vmem:[#allocation3 + $0x10] sm:$0xff] %vm1683_vm5, %v8606_v4  ;;  %12254 = vmatmul.msk.bf16.gmra.mxu0 %vm1314_vm4, %v12792_v57 }
 0x735   :  { %12182 = vmatmul.msk.bf16.gmra.mxu3 %vm1314_vm4, %v12774_v51  ;;  %v8122_v50 = vpack.c.bf16 %v8120_v43, %v8120_v43  ;;  %v8652_v12 = vmax.f32 %v8636_v62, %v8644_v30  ;;  %v5477_v16 = vadd.f32 %v15961_v55, %v5476_v1  ;;  %v12841_v1 = vld [vmem:[#allocation9] ss:$0 sm:$0xff] }
 0x737   :  { %v8127_v26 = vrot.slane %v8122_v50, 6  ;;  %8660 = vst.msk [vmem:[#allocation4] sm:$0xff] %vm1683_vm5, %v8652_v12  ;;  %v5597_v53 = vmax.f32 %v5477_v16, 0.0  ;;  %v8301_v49 = vpop.f32.mrf.mxu2 }
 0x738   :  { %v16146_v48 = vpop.f32.mrf.mxu3  ;;  %v8403_v39 = vadd.f32 %v16094_v56, %v8301_v49 }
 0x739   :  { %v8128_v24 = vsel %vm13816_vm11, %v8126_v45, %v8127_v26  ;;  %v5701_v60 = vpack.c.bf16 %v5597_v53, %v5597_v53  ;;  %v8571_v14 = vpop.f32.mrf.mxu0 }
 0x73a   :  { %11872 = vst.msk [vmem:[%s16275_s5 + $0x74] sm:$0xf] %vm1763_vm6, %v8128_v24  ;;  %v8607_v13 = vadd.f32 %v8571_v14, %v8395_v44 }
 0x73b   :  { %5805 = vst.msk [vmem:[#allocation2 + $0x174] sm:$0xf] %vm1088_vm3, %v5701_v60 }
 0x73c   :  { %v5479_v5 = vpop.f32.mrf.mxu1  ;;  %8623 = vst.msk [vmem:[#allocation3 + $0x18] sm:$0xff] %vm1683_vm5, %v8607_v13 }
 0x73d   :  { %v5480_v20 = vadd.f32 %v15961_v55, %v5479_v5 }
 0x73e   :  { %v8668_v12 = vld [vmem:[#allocation4] sm:$0xff] }
 0x73f   :  { %v5598_v18 = vmax.f32 %v5480_v20, 0.0  ;;  %v8303_v63 = vpop.f32.mrf.mxu2 }
 0x740   :  { %v16153_v35 = vpop.f32.mrf.mxu3  ;;  %v8405_v51 = vadd.f32 %v16106_v59, %v8303_v63 }
 0x741   :  { %v5702_v11 = vpack.c.bf16 %v5598_v18, %v5598_v18  ;;  %v8574_v58 = vpop.f32.mrf.mxu0 }
 0x742   :  { %v12775_v40 = vld [vmem:[#allocation2 + $0x170] sm:$0xff]  ;;  %v8608_v61 = vadd.f32 %v8574_v58, %v8398_v7 }
 0x743   :  { %v12793_v8 = vld [vmem:[#allocation2 + $0x170] sm:$0xff]  ;;  %5806 = vst.msk [vmem:[#allocation2 + $0x178] sm:$0xf] %vm1088_vm3, %v5702_v11 }
 0x744   :  { %v8637_v27 = vld [vmem:[#allocation3 + $0x10] ss:$2 sm:$0xff]  ;;  %v8645_v31 = vld [vmem:[#allocation3 + $0x11] ss:$2 sm:$0xff]  ;;  %v5481_v25 = vpop.f32.mrf.mxu1  ;;  %12141 = vmatmul.msk.bf16.gmra.mxu2 %vm1314_vm4, %v12775_v40  ;;  %8624 = vst.msk [vmem:[#allocation3 + $0x20] sm:$0xff] %vm1683_vm5, %v8608_v61  ;;  %12255 = vmatmul.msk.bf16.gmra.mxu0 %vm1314_vm4, %v12793_v8 }
 0x745   :  { %12183 = vmatmul.msk.bf16.gmra.mxu3 %vm1314_vm4, %v12775_v40  ;;  %v8653_v22 = vmax.f32 %v8637_v27, %v8645_v31  ;;  %v5482_v2 = vadd.f32 %v15961_v55, %v5481_v25 }
 0x747   :  { %8661 = vst.msk [vmem:[#allocation4 + $0x8] sm:$0xff] %vm1683_vm5, %v8653_v22  ;;  %v5599_v17 = vmax.f32 %v5482_v2, 0.0  ;;  %v8306_v37 = vpop.f32.mrf.mxu2 }
 0x748   :  { %v16164_v43 = vpop.f32.mrf.mxu3  ;;  %v8408_v59 = vadd.f32 %v16117_v28, %v8306_v37 }
 0x749   :  { %v5703_v41 = vpack.c.bf16 %v5599_v17, %v5599_v17  ;;  %v8576_v3 = vpop.f32.mrf.mxu0 }
 0x74a   :  { %v8609_v15 = vadd.f32 %v8576_v3, %v8400_v6 }
 0x74b   :  { %5807 = vst.msk [vmem:[#allocation2 + $0x17c] sm:$0xf] %vm1088_vm3, %v5703_v41 }
 0x74c   :  { %v5484_v32 = vpop.f32.mrf.mxu1  ;;  %8625 = vst.msk [vmem:[#allocation3 + $0x28] sm:$0xff] %vm1683_vm5, %v8609_v15 }
 0x74d   :  { %v5485_v47 = vadd.f32 %v15961_v55, %v5484_v32 }
 0x74e   :  { %v8669_v37 = vld [vmem:[#allocation4 + $0x8] sm:$0xf] }
 0x74f   :  { %v5600_v9 = vmax.f32 %v5485_v47, 0.0  ;;  %v8308_v34 = vpop.f32.mrf.mxu2 }
 0x750   :  { %v16171_v20 = vpop.f32.mrf.mxu3  ;;  %v8410_v61 = vadd.f32 %v16135_v29, %v8308_v34 }
 0x751   :  { %v5704_v46 = vpack.c.bf16 %v5600_v9, %v5600_v9  ;;  %v8579_v23 = vpop.f32.mrf.mxu0 }
 0x752   :  { %v12776_v54 = vld [vmem:[#allocation2 + $0x178] sm:$0xff]  ;;  %v8610_v21 = vadd.f32 %v8579_v23, %v8403_v39 }
 0x753   :  { %v12794_v10 = vld [vmem:[#allocation2 + $0x178] sm:$0xff]  ;;  %5808 = vst.msk [vmem:[#allocation2 + $0x180] sm:$0xf] %vm1088_vm3, %v5704_v46  ;;  %v8638_v36 = vld [vmem:[#allocation3 + $0x20] ss:$2 sm:$0xff] }
 0x754   :  { %v8646_v42 = vld [vmem:[#allocation3 + $0x21] ss:$2 sm:$0xff]  ;;  %v5486_v0 = vpop.f32.mrf.mxu1  ;;  %12142 = vmatmul.msk.bf16.gmra.mxu2 %vm1314_vm4, %v12776_v54  ;;  %8626 = vst.msk [vmem:[#allocation3 + $0x30] sm:$0xff] %vm1683_vm5, %v8610_v21  ;;  %12256 = vmatmul.msk.bf16.gmra.mxu0 %vm1314_vm4, %v12794_v10 }
 0x755   :  { %12184 = vmatmul.msk.bf16.gmra.mxu3 %vm1314_vm4, %v12776_v54  ;;  %v8654_v52 = vmax.f32 %v8638_v36, %v8646_v42  ;;  %v5487_v19 = vadd.f32 %v15961_v55, %v5486_v0 }
 0x757   :  { %8662 = vst.msk [vmem:[#allocation4 + $0x10] sm:$0xff] %vm1683_vm5, %v8654_v52  ;;  %v5601_v56 = vmax.f32 %v5487_v19, 0.0  ;;  %v8311_v33 = vpop.f32.mrf.mxu2 }
 0x758   :  { %v16186_v17 = vpop.f32.mrf.mxu3  ;;  %v8413_v32 = vadd.f32 %v16146_v48, %v8311_v33 }
 0x759   :  { %v5705_v57 = vpack.c.bf16 %v5601_v56, %v5601_v56  ;;  %v8581_v4 = vpop.f32.mrf.mxu0 }
 0x75a   :  { %v8611_v62 = vadd.f32 %v8581_v4, %v8405_v51 }
 0x75b   :  { %5809 = vst.msk [vmem:[#allocation2 + $0x184] sm:$0xf] %vm1088_vm3, %v5705_v57 }
 0x75c   :  { %v5489_v30 = vpop.f32.mrf.mxu1  ;;  %8627 = vst.msk [vmem:[#allocation3 + $0x38] sm:$0xff] %vm1683_vm5, %v8611_v62 }
 0x75d   :  { %v5490_v50 = vadd.f32 %v15961_v55, %v5489_v30 }
 0x75e   :  { %v8670_v16 = vld [vmem:[#allocation4 + $0x10] sm:$0xff] }
 0x75f   :  { %v8672_v45 = vmax.f32 %v8668_v12, %v8670_v16  ;;  %v5602_v26 = vmax.f32 %v5490_v50, 0.0  ;;  %v8313_v53 = vpop.f32.mrf.mxu2 }
 0x760   :  { %v8424_v19 = vpop.f32.mrf.mxu3  ;;  %v8415_v56 = vadd.f32 %v16153_v35, %v8313_v53 }
 0x761   :  { %v8678_v49 = vadd.f32 %v12841_v1, %v8672_v45  ;;  %v5706_v24 = vpack.c.bf16 %v5602_v26, %v5602_v26  ;;  %v8584_v44 = vpop.f32.mrf.mxu0 }
 0x762   :  { %v12783_v60 = vld [vmem:[#allocation2 + $0x180] sm:$0xff]  ;;  %v8612_v5 = vadd.f32 %v8584_v44, %v8408_v59 }
 0x763   :  { %v12795_v14 = vld [vmem:[#allocation2 + $0x180] sm:$0xff]  ;;  %v8680_v13 = vmax.f32 %v8678_v49, 0.0  ;;  %5810 = vst.msk [vmem:[#allocation2 + $0x188] sm:$0xf] %vm1088_vm3, %v5706_v24  ;;  %v8639_v18 = vld [vmem:[#allocation3 + $0x30] ss:$2 sm:$0xff] }
 0x764   :  { %v8647_v63 = vld [vmem:[#allocation3 + $0x31] ss:$2 sm:$0xff]  ;;  %v5491_v7 = vpop.f32.mrf.mxu1  ;;  %12143 = vmatmul.msk.bf16.gmra.mxu2 %vm1314_vm4, %v12783_v60  ;;  %8628 = vst.msk [vmem:[#allocation3 + $0x40] sm:$0xff] %vm1683_vm5, %v8612_v5  ;;  %12257 = vmatmul.msk.bf16.gmra.mxu0 %vm1314_vm4, %v12795_v14 }
 0x765   :  { %v8682_v11 = vpack.c.bf16 %v8680_v13, %v8680_v13  ;;  %v8655_v58 = vmax.f32 %v8639_v18, %v8647_v63  ;;  %v5492_v28 = vadd.f32 %v15961_v55, %v5491_v7 }
 0x767   :  { %12065 = vst.msk [vmem:[%s16275_s5 + $0x78] sm:$0xf] %vm1763_vm6, %v8682_v11  ;;  %v5603_v40 = vmax.f32 %v5492_v28, 0.0  ;;  %v8316_v8 = vpop.f32.mrf.mxu2 }
 0x768   :  { %8663 = vst.msk [vmem:[#allocation4 + $0x18] sm:$0xff] %vm1683_vm5, %v8655_v58  ;;  %v8418_v50 = vadd.f32 %v16164_v43, %v8316_v8  ;;  %v8966_v16 = vpop.f32.mrf.mxu3 }
 0x769   :  { %v5707_v27 = vpack.c.bf16 %v5603_v40, %v5603_v40  ;;  %v8586_v31 = vpop.f32.mrf.mxu0 }
 0x76a   :  { %v8613_v25 = vadd.f32 %v8586_v31, %v8410_v61 }
 0x76b   :  { %5811 = vst.msk [vmem:[#allocation2 + $0x18c] sm:$0xf] %vm1088_vm3, %v5707_v27 }
 0x76c   :  { %v5494_v22 = vpop.f32.mrf.mxu1  ;;  %8629 = vst.msk [vmem:[#allocation3 + $0x48] sm:$0xff] %vm1683_vm5, %v8613_v25 }
 0x76d   :  { %v5495_v2 = vadd.f32 %v15961_v55, %v5494_v22 }
 0x76f   :  { %v8671_v6 = vld [vmem:[#allocation4 + $0x18] sm:$0xf]  ;;  %v5604_v41 = vmax.f32 %v5495_v2, 0.0  ;;  %v8318_v3 = vpop.f32.mrf.mxu2  ;;  %v12842_v2 = vld [vmem:[#allocation9] ss:$0 sm:$0xff] }
 0x770   :  { %v8673_v15 = vmax.f32 %v8669_v37, %v8671_v6  ;;  %v8420_v14 = vadd.f32 %v16171_v20, %v8318_v3  ;;  %v8968_v63 = vpop.f32.mrf.mxu3 }
 0x771   :  { %v5708_v29 = vpack.c.bf16 %v5604_v41, %v5604_v41  ;;  %v8589_v9 = vpop.f32.mrf.mxu0 }
 0x772   :  { %v8679_v47 = vadd.f32 %v12841_v1, %v8673_v15  ;;  %v12784_v34 = vld [vmem:[#allocation2 + $0x188] sm:$0xff]  ;;  %v8614_v46 = vadd.f32 %v8589_v9, %v8413_v32 }
 0x773   :  { %v12796_v39 = vld [vmem:[#allocation2 + $0x188] sm:$0xff]  ;;  %5812 = vst.msk [vmem:[#allocation2 + $0x190] sm:$0xf] %vm1088_vm3, %v5708_v29 }
 0x774   :  { %v8681_v23 = vmax.f32 %v8679_v47, 0.0  ;;  %v8640_v54 = vld [vmem:[#allocation3 + $0x40] ss:$2 sm:$0xff]  ;;  %v8648_v10 = vld [vmem:[#allocation3 + $0x41] ss:$2 sm:$0xff]  ;;  %v5496_v21 = vpop.f32.mrf.mxu1  ;;  %12144 = vmatmul.msk.bf16.gmra.mxu2 %vm1314_vm4, %v12784_v34  ;;  %8630 = vst.msk [vmem:[#allocation3 + $0x50] sm:$0xff] %vm1683_vm5, %v8614_v46  ;;  %12258 = vmatmul.msk.bf16.gmra.mxu0 %vm1314_vm4, %v12796_v39 }
 0x775   :  { %v8656_v36 = vmax.f32 %v8640_v54, %v8648_v10  ;;  %v5497_v42 = vadd.f32 %v15961_v55, %v5496_v21 }
 0x776   :  { %v8683_v48 = vpack.c.bf16 %v8681_v23, %v8681_v23 }
 0x777   :  { %8664 = vst.msk [vmem:[#allocation4 + $0x20] sm:$0xff] %vm1683_vm5, %v8656_v36  ;;  %v5605_v0 = vmax.f32 %v5497_v42, 0.0  ;;  %v8321_v52 = vpop.f32.mrf.mxu2 }
 0x778   :  { %12066 = vst.msk [vmem:[%s16275_s5 + $0x7c] sm:$0x3] %vm1765_vm7, %v8683_v48  ;;  %v8423_v11 = vadd.f32 %v16186_v17, %v8321_v52  ;;  %v8971_v20 = vpop.f32.mrf.mxu3 }
 0x779   :  { %v5709_v33 = vpack.c.bf16 %v5605_v0, %v5605_v0  ;;  %v8591_v51 = vpop.f32.mrf.mxu0 }
 0x77a   :  { %v8615_v57 = vadd.f32 %v8591_v51, %v8415_v56 }
 0x77b   :  { %5813 = vst.msk [vmem:[#allocation2 + $0x194] sm:$0xf] %vm1088_vm3, %v5709_v33 }
 0x77c   :  { %v5499_v4 = vpop.f32.mrf.mxu1  ;;  %8631 = vst.msk [vmem:[#allocation3 + $0x58] sm:$0xff] %vm1683_vm5, %v8615_v57 }
 0x77d   :  { %v5500_v62 = vadd.f32 %v15961_v55, %v5499_v4 }
 0x77e   :  { %v8686_v17 = vld [vmem:[#allocation4 + $0x20] sm:$0xff] }
 0x77f   :  { %v5606_v30 = vmax.f32 %v5500_v62, 0.0  ;;  %v8323_v1 = vpop.f32.mrf.mxu2 }
 0x780   :  { %v8425_v31 = vadd.f32 %v8424_v19, %v8323_v1  ;;  %v8973_v3 = vpop.f32.mrf.mxu3 }
 0x781   :  { %v5710_v12 = vpack.c.bf16 %v5606_v30, %v5606_v30  ;;  %v8594_v45 = vpop.f32.mrf.mxu0 }
 0x782   :  { %v12797_v26 = vld [vmem:[#allocation2 + $0x190] sm:$0xff]  ;;  %v8616_v35 = vadd.f32 %v8594_v45, %v8418_v50 }
 0x783   :  { %5814 = vst.msk [vmem:[#allocation2 + $0x198] sm:$0xf] %vm1088_vm3, %v5710_v12  ;;  %v8641_v53 = vld [vmem:[#allocation3 + $0x50] ss:$2 sm:$0xff]  ;;  %v8649_v59 = vld [vmem:[#allocation3 + $0x51] ss:$2 sm:$0xff] }
 0x784   :  { %v5501_v49 = vpop.f32.mrf.mxu1  ;;  %v8657_v24 = vmax.f32 %v8641_v53, %v8649_v59  ;;  %8632 = vst.msk [vmem:[#allocation3 + $0x60] sm:$0xff] %vm1683_vm5, %v8616_v35  ;;  %12259 = vmatmul.msk.bf16.gmra.mxu0 %vm1314_vm4, %v12797_v26 }
 0x785   :  { %v5502_v44 = vadd.f32 %v15961_v55, %v5501_v49 }
 0x786   :  { %8665 = vst.msk [vmem:[#allocation4 + $0x28] sm:$0xff] %vm1683_vm5, %v8657_v24 }
 0x787   :  { %v5607_v43 = vmax.f32 %v5502_v44, 0.0  ;;  %v8865_v60 = vpop.f32.mrf.mxu2 }
 0x788   :  { %v8967_v15 = vadd.f32 %v8966_v16, %v8865_v60  ;;  %v8976_v36 = vpop.f32.mrf.mxu3 }
 0x789   :  { %v5711_v13 = vpack.c.bf16 %v5607_v43, %v5607_v43  ;;  %v8596_v5 = vpop.f32.mrf.mxu0 }
 0x78a   :  { %v8617_v18 = vadd.f32 %v8596_v5, %v8420_v14 }
 0x78b   :  { %5815 = vst.msk [vmem:[#allocation2 + $0x19c] sm:$0xf] %vm1088_vm3, %v5711_v13 }
 0x78c   :  { %8633 = vst.msk [vmem:[#allocation3 + $0x68] sm:$0xff] %vm1683_vm5, %v8617_v18 }
 0x78d   :  { %v8687_v0 = vld [vmem:[#allocation4 + $0x28] sm:$0xf] }
 0x78f   :  { %v8867_v7 = vpop.f32.mrf.mxu2 }
 0x790   :  { %v8969_v21 = vadd.f32 %v8968_v63, %v8867_v7  ;;  %v8978_v30 = vpop.f32.mrf.mxu3 }
 0x791   :  { %v8599_v55 = vpop.f32.mrf.mxu0 }
 0x792   :  { %v12798_v58 = vld [vmem:[#allocation2 + $0x198] sm:$0xff]  ;;  %v8618_v28 = vadd.f32 %v8599_v55, %v8423_v11 }
 0x793   :  { %v8642_v40 = vld [vmem:[#allocation3 + $0x60] ss:$2 sm:$0xff]  ;;  %v8650_v8 = vld [vmem:[#allocation3 + $0x61] ss:$2 sm:$0xff] }
 0x794   :  { %v8658_v61 = vmax.f32 %v8642_v40, %v8650_v8  ;;  %8634 = vst.msk [vmem:[#allocation3 + $0x70] sm:$0xff] %vm1683_vm5, %v8618_v28  ;;  %12260 = vmatmul.msk.bf16.gmra.mxu0 %vm1314_vm4, %v12798_v58 }
 0x796   :  { %8666 = vst.msk [vmem:[#allocation4 + $0x30] sm:$0xff] %vm1683_vm5, %v8658_v61 }
 0x797   :  { %v8870_v27 = vpop.f32.mrf.mxu2 }
 0x798   :  { %v8972_v56 = vadd.f32 %v8971_v20, %v8870_v27  ;;  %v8981_v44 = vpop.f32.mrf.mxu3 }
 0x799   :  { %v8601_v25 = vpop.f32.mrf.mxu0 }
 0x79a   :  { %v8619_v22 = vadd.f32 %v8601_v25, %v8425_v31 }
 0x79c   :  { %8635 = vst.msk [vmem:[#allocation3 + $0x78] sm:$0xff] %vm1683_vm5, %v8619_v22 }
 0x79d   :  { %v8688_v37 = vld [vmem:[#allocation4 + $0x30] sm:$0xff] }
 0x79e   :  { %v8690_v6 = vmax.f32 %v8686_v17, %v8688_v37 }
 0x79f   :  { %v8872_v41 = vpop.f32.mrf.mxu2 }
 0x7a0   :  { %v8696_v32 = vadd.f32 %v12842_v2, %v8690_v6  ;;  %v8974_v53 = vadd.f32 %v8973_v3, %v8872_v41  ;;  %v8983_v7 = vpop.f32.mrf.mxu3  ;;  %v12843_v41 = vld [vmem:[#allocation9] ss:$0 sm:$0xff] }
 0x7a1   :  { %v9143_v29 = vpop.f32.mrf.mxu0 }
 0x7a2   :  { %v8698_v47 = vmax.f32 %v8696_v32, 0.0  ;;  %v9183_v9 = vadd.f32 %v9143_v29, %v8967_v15 }
 0x7a3   :  { %v8643_v34 = vld [vmem:[#allocation3 + $0x70] ss:$2 sm:$0xff]  ;;  %v8651_v39 = vld [vmem:[#allocation3 + $0x71] ss:$2 sm:$0xff] }
 0x7a4   :  { %v8700_v46 = vpack.c.bf16 %v8698_v47, %v8698_v47  ;;  %v8659_v23 = vmax.f32 %v8643_v34, %v8651_v39  ;;  %9199 = vst.msk [vmem:[#allocation3] sm:$0xff] %vm1683_vm5, %v9183_v9 }
 0x7a6   :  { %v8704_v54 = vrot.slane %v8700_v46, 6  ;;  %8667 = vst.msk [vmem:[#allocation4 + $0x38] sm:$0xff] %vm1683_vm5, %v8659_v23 }
 0x7a7   :  { %v8875_v10 = vpop.f32.mrf.mxu2 }
 0x7a8   :  { %12067 = vst.msk [vmem:[%s16275_s5 + $0x7c] sm:$0xc] %vm1794_vm8, %v8704_v54  ;;  %v8705_v45 = vrot.slane %v8704_v54, 4  ;;  %v8977_v43 = vadd.f32 %v8976_v36, %v8875_v10  ;;  %v8986_v8 = vpop.f32.mrf.mxu3 }
 0x7a9   :  { %v9145_v42 = vpop.f32.mrf.mxu0 }
 0x7aa   :  { %v9184_v48 = vadd.f32 %v9145_v42, %v8969_v21 }
 0x7ac   :  { %9200 = vst.msk [vmem:[#allocation3 + $0x8] sm:$0xff] %vm1683_vm5, %v9184_v48 }
 0x7ad   :  { %v8689_v52 = vld [vmem:[#allocation4 + $0x38] sm:$0xf] }
 0x7ae   :  { %v8691_v19 = vmax.f32 %v8687_v0, %v8689_v52 }
 0x7af   :  { %v8877_v51 = vpop.f32.mrf.mxu2 }
 0x7b0   :  { %v8697_v33 = vadd.f32 %v12842_v2, %v8691_v19  ;;  %v8979_v11 = vadd.f32 %v8978_v30, %v8877_v51  ;;  %v8988_v6 = vpop.f32.mrf.mxu3 }
 0x7b1   :  { %v9148_v57 = vpop.f32.mrf.mxu0 }
 0x7b2   :  { %v8699_v4 = vmax.f32 %v8697_v33, 0.0  ;;  %v9185_v62 = vadd.f32 %v9148_v57, %v8972_v56 }
 0x7b3   :  { %v9215_v1 = vld [vmem:[#allocation3] ss:$2 sm:$0xff]  ;;  %v9223_v50 = vld [vmem:[#allocation3 + $0x1] ss:$2 sm:$0xff] }
 0x7b4   :  { %v8701_v12 = vpack.c.bf16 %v8699_v4, %v8699_v4  ;;  %v9231_v16 = vmax.f32 %v9215_v1, %v9223_v50  ;;  %9201 = vst.msk [vmem:[#allocation3 + $0x10] sm:$0xff] %vm1683_vm5, %v9185_v62 }
 0x7b6   :  { %v8706_v26 = vrot.slane %v8701_v12, 6  ;;  %9239 = vst.msk [vmem:[#allocation4] sm:$0xff] %vm1683_vm5, %v9231_v16 }
 0x7b7   :  { %v8880_v24 = vpop.f32.mrf.mxu2 }
 0x7b8   :  { %v8707_v35 = vsel %vm13816_vm11, %v8705_v45, %v8706_v26  ;;  %v8982_v40 = vadd.f32 %v8981_v44, %v8880_v24  ;;  %v8991_v36 = vpop.f32.mrf.mxu3 }
 0x7b9   :  { %12068 = vst.msk [vmem:[%s16275_s5 + $0x80] sm:$0xf] %vm1763_vm6, %v8707_v35  ;;  %v9150_v59 = vpop.f32.mrf.mxu0 }
 0x7ba   :  { %v9186_v49 = vadd.f32 %v9150_v59, %v8974_v53 }
 0x7bc   :  { %9202 = vst.msk [vmem:[#allocation3 + $0x18] sm:$0xff] %vm1683_vm5, %v9186_v49 }
 0x7bd   :  { %v9247_v3 = vld [vmem:[#allocation4] sm:$0xff] }
 0x7bf   :  { %v8882_v63 = vpop.f32.mrf.mxu2 }
 0x7c0   :  { %v8984_v22 = vadd.f32 %v8983_v7, %v8882_v63  ;;  %v8993_v33 = vpop.f32.mrf.mxu3 }
 0x7c1   :  { %v9153_v60 = vpop.f32.mrf.mxu0 }
 0x7c2   :  { %v9187_v14 = vadd.f32 %v9153_v60, %v8977_v43 }
 0x7c3   :  { %v9216_v13 = vld [vmem:[#allocation3 + $0x10] ss:$2 sm:$0xff]  ;;  %v9224_v5 = vld [vmem:[#allocation3 + $0x11] ss:$2 sm:$0xff] }
 0x7c4   :  { %v9232_v18 = vmax.f32 %v9216_v13, %v9224_v5  ;;  %9203 = vst.msk [vmem:[#allocation3 + $0x20] sm:$0xff] %vm1683_vm5, %v9187_v14 }
 0x7c6   :  { %9240 = vst.msk [vmem:[#allocation4 + $0x8] sm:$0xff] %vm1683_vm5, %v9232_v18 }
 0x7c7   :  { %v8885_v28 = vpop.f32.mrf.mxu2 }
 0x7c8   :  { %v8987_v29 = vadd.f32 %v8986_v8, %v8885_v28  ;;  %v8996_v53 = vpop.f32.mrf.mxu3 }
 0x7c9   :  { %v9155_v55 = vpop.f32.mrf.mxu0 }
 0x7ca   :  { %v9188_v58 = vadd.f32 %v9155_v55, %v8979_v11 }
 0x7cc   :  { %9204 = vst.msk [vmem:[#allocation3 + $0x28] sm:$0xff] %vm1683_vm5, %v9188_v58 }
 0x7cd   :  { %v9248_v19 = vld [vmem:[#allocation4 + $0x8] sm:$0xf] }
 0x7cf   :  { %v8887_v2 = vpop.f32.mrf.mxu2 }
 0x7d0   :  { %v8989_v42 = vadd.f32 %v8988_v6, %v8887_v2  ;;  %v8998_v14 = vpop.f32.mrf.mxu3 }
 0x7d1   :  { %v9158_v61 = vpop.f32.mrf.mxu0 }
 0x7d2   :  { %v9189_v20 = vadd.f32 %v9158_v61, %v8982_v40 }
 0x7d3   :  { %v9217_v27 = vld [vmem:[#allocation3 + $0x20] ss:$2 sm:$0xff]  ;;  %v9225_v31 = vld [vmem:[#allocation3 + $0x21] ss:$2 sm:$0xff] }
 0x7d4   :  { %v9233_v25 = vmax.f32 %v9217_v27, %v9225_v31  ;;  %9205 = vst.msk [vmem:[#allocation3 + $0x30] sm:$0xff] %vm1683_vm5, %v9189_v20 }
 0x7d6   :  { %9241 = vst.msk [vmem:[#allocation4 + $0x10] sm:$0xff] %vm1683_vm5, %v9233_v25 }
 0x7d7   :  { %v8890_v46 = vpop.f32.mrf.mxu2 }
 0x7d8   :  { %v8992_v57 = vadd.f32 %v8991_v36, %v8890_v46  ;;  %v9001_v58 = vpop.f32.mrf.mxu3 }
 0x7d9   :  { %v9160_v17 = vpop.f32.mrf.mxu0 }
 0x7da   :  { %v9190_v37 = vadd.f32 %v9160_v17, %v8984_v22 }
 0x7dc   :  { %9206 = vst.msk [vmem:[#allocation3 + $0x38] sm:$0xff] %vm1683_vm5, %v9190_v37  ;;  %v12844_v37 = vld [vmem:[#allocation9] ss:$0 sm:$0xff] }
 0x7dd   :  { %v9249_v15 = vld [vmem:[#allocation4 + $0x10] sm:$0xff] }
 0x7de   :  { %v9251_v32 = vmax.f32 %v9247_v3, %v9249_v15 }
 0x7df   :  { %v8892_v52 = vpop.f32.mrf.mxu2 }
 0x7e0   :  { %v9257_v47 = vadd.f32 %v12843_v41, %v9251_v32  ;;  %v8994_v35 = vadd.f32 %v8993_v33, %v8892_v52  ;;  %v9003_v25 = vpop.f32.mrf.mxu3 }
 0x7e1   :  { %v9163_v9 = vpop.f32.mrf.mxu0 }
 0x7e2   :  { %v9259_v34 = vmax.f32 %v9257_v47, 0.0  ;;  %v9191_v39 = vadd.f32 %v9163_v9, %v8987_v29 }
 0x7e3   :  { %v9218_v23 = vld [vmem:[#allocation3 + $0x30] ss:$2 sm:$0xff]  ;;  %v9226_v54 = vld [vmem:[#allocation3 + $0x31] ss:$2 sm:$0xff] }
 0x7e4   :  { %v9261_v10 = vpack.c.bf16 %v9259_v34, %v9259_v34  ;;  %v9234_v21 = vmax.f32 %v9218_v23, %v9226_v54  ;;  %9207 = vst.msk [vmem:[#allocation3 + $0x40] sm:$0xff] %vm1683_vm5, %v9191_v39 }
 0x7e6   :  { %12261 = vst.msk [vmem:[%s16275_s5 + $0x84] sm:$0xf] %vm1763_vm6, %v9261_v10 }
 0x7e7   :  { %9242 = vst.msk [vmem:[#allocation4 + $0x18] sm:$0xff] %vm1683_vm5, %v9234_v21  ;;  %v8895_v26 = vpop.f32.mrf.mxu2 }
 0x7e8   :  { %v8997_v24 = vadd.f32 %v8996_v53, %v8895_v26 }
 0x7e9   :  { %v9165_v48 = vpop.f32.mrf.mxu0 }
 0x7ea   :  { %v9192_v0 = vadd.f32 %v9165_v48, %v8989_v42 }
 0x7ec   :  { %9208 = vst.msk [vmem:[#allocation3 + $0x48] sm:$0xff] %vm1683_vm5, %v9192_v0 }
 0x7ee   :  { %v9250_v56 = vld [vmem:[#allocation4 + $0x18] sm:$0xf] }
 0x7ef   :  { %v9252_v51 = vmax.f32 %v9248_v19, %v9250_v56  ;;  %v8897_v44 = vpop.f32.mrf.mxu2 }
 0x7f0   :  { %v8999_v63 = vadd.f32 %v8998_v14, %v8897_v44 }
 0x7f1   :  { %v9258_v4 = vadd.f32 %v12843_v41, %v9252_v51  ;;  %v9168_v62 = vpop.f32.mrf.mxu0 }
 0x7f2   :  { %v9193_v30 = vadd.f32 %v9168_v62, %v8992_v57 }
 0x7f3   :  { %v9260_v1 = vmax.f32 %v9258_v4, 0.0  ;;  %v9219_v50 = vld [vmem:[#allocation3 + $0x40] ss:$2 sm:$0xff]  ;;  %v9227_v12 = vld [vmem:[#allocation3 + $0x41] ss:$2 sm:$0xff] }
 0x7f4   :  { %v9235_v16 = vmax.f32 %v9219_v50, %v9227_v12  ;;  %9209 = vst.msk [vmem:[#allocation3 + $0x50] sm:$0xff] %vm1683_vm5, %v9193_v30 }
 0x7f5   :  { %v9262_v45 = vpack.c.bf16 %v9260_v1, %v9260_v1 }
 0x7f6   :  { %9243 = vst.msk [vmem:[#allocation4 + $0x20] sm:$0xff] %vm1683_vm5, %v9235_v16 }
 0x7f7   :  { %12262 = vst.msk [vmem:[%s16275_s5 + $0x88] sm:$0x3] %vm1765_vm7, %v9262_v45  ;;  %v8900_v55 = vpop.f32.mrf.mxu2 }
 0x7f8   :  { %v9002_v28 = vadd.f32 %v9001_v58, %v8900_v55 }
 0x7f9   :  { %v9170_v59 = vpop.f32.mrf.mxu0 }
 0x7fa   :  { %v9194_v49 = vadd.f32 %v9170_v59, %v8994_v35 }
 0x7fc   :  { %9210 = vst.msk [vmem:[#allocation3 + $0x58] sm:$0xff] %vm1683_vm5, %v9194_v49 }
 0x7fd   :  { %v9265_v6 = vld [vmem:[#allocation4 + $0x20] sm:$0xff] }
 0x7ff   :  { %v8902_v31 = vpop.f32.mrf.mxu2 }
 0x800   :  { %v9004_v22 = vadd.f32 %v9003_v25, %v8902_v31 }
 0x801   :  { %v9173_v43 = vpop.f32.mrf.mxu0 }
 0x802   :  { %v9195_v60 = vadd.f32 %v9173_v43, %v8997_v24 }
 0x803   :  { %v9220_v13 = vld [vmem:[#allocation3 + $0x50] ss:$2 sm:$0xff]  ;;  %v9228_v5 = vld [vmem:[#allocation3 + $0x51] ss:$2 sm:$0xff] }
 0x804   :  { %v9236_v18 = vmax.f32 %v9220_v13, %v9228_v5  ;;  %9211 = vst.msk [vmem:[#allocation3 + $0x60] sm:$0xff] %vm1683_vm5, %v9195_v60 }
 0x806   :  { %9244 = vst.msk [vmem:[#allocation4 + $0x28] sm:$0xff] %vm1683_vm5, %v9236_v18 }
 0x809   :  { %v9175_v7 = vpop.f32.mrf.mxu0 }
 0x80a   :  { %v9196_v11 = vadd.f32 %v9175_v7, %v8999_v63 }
 0x80c   :  { %9212 = vst.msk [vmem:[#allocation3 + $0x68] sm:$0xff] %vm1683_vm5, %v9196_v11 }
 0x80d   :  { %v9266_v46 = vld [vmem:[#allocation4 + $0x28] sm:$0xf] }
 0x811   :  { %v9178_v40 = vpop.f32.mrf.mxu0 }
 0x812   :  { %v9197_v8 = vadd.f32 %v9178_v40, %v9002_v28 }
 0x813   :  { %v9221_v61 = vld [vmem:[#allocation3 + $0x60] ss:$2 sm:$0xff]  ;;  %v9229_v20 = vld [vmem:[#allocation3 + $0x61] ss:$2 sm:$0xff] }
 0x814   :  { %v9237_v27 = vmax.f32 %v9221_v61, %v9229_v20  ;;  %9213 = vst.msk [vmem:[#allocation3 + $0x70] sm:$0xff] %vm1683_vm5, %v9197_v8 }
 0x816   :  { %9245 = vst.msk [vmem:[#allocation4 + $0x30] sm:$0xff] %vm1683_vm5, %v9237_v27 }
 0x819   :  { %v9180_v2 = vpop.f32.mrf.mxu0 }
 0x81a   :  { %v9198_v17 = vadd.f32 %v9180_v2, %v9004_v22 }
 0x81c   :  { %9214 = vst.msk [vmem:[#allocation3 + $0x78] sm:$0xff] %vm1683_vm5, %v9198_v17 }
 0x81d   :  { %v9267_v41 = vld [vmem:[#allocation4 + $0x30] sm:$0xff] }
 0x81e   :  { %v9269_v3 = vmax.f32 %v9265_v6, %v9267_v41 }
 0x820   :  { %v9275_v15 = vadd.f32 %v12844_v37, %v9269_v3 }
 0x822   :  { %v9277_v32 = vmax.f32 %v9275_v15, 0.0 }
 0x823   :  { %v9222_v29 = vld [vmem:[#allocation3 + $0x70] ss:$2 sm:$0xff]  ;;  %v9230_v47 = vld [vmem:[#allocation3 + $0x71] ss:$2 sm:$0xff] }
 0x824   :  { %v9279_v9 = vpack.c.bf16 %v9277_v32, %v9277_v32  ;;  %v9238_v34 = vmax.f32 %v9222_v29, %v9230_v47 }
 0x826   :  { %v9283_v39 = vrot.slane %v9279_v9, 6  ;;  %9246 = vst.msk [vmem:[#allocation4 + $0x38] sm:$0xff] %vm1683_vm5, %v9238_v34 }
 0x828   :  { %12263 = vst.msk [vmem:[%s16275_s5 + $0x88] sm:$0xc] %vm1794_vm8, %v9283_v39  ;;  %v9284_v42 = vrot.slane %v9283_v39, 4 }
 0x82d   :  { %v9268_v23 = vld [vmem:[#allocation4 + $0x38] sm:$0xf] }
 0x82e   :  { %v9270_v54 = vmax.f32 %v9266_v46, %v9268_v23 }
 0x830   :  { %v9276_v10 = vadd.f32 %v12844_v37, %v9270_v54 }
 0x832   :  { %v9278_v21 = vmax.f32 %v9276_v10, 0.0 }
 0x834   :  { %v9280_v36 = vpack.c.bf16 %v9278_v21, %v9278_v21 }
 0x836   :  { %v9285_v48 = vrot.slane %v9280_v36, 6 }
 0x838   :  { %v9286_v0 = vsel %vm13816_vm11, %v9284_v42, %v9285_v48 }
 0x839   :  { %12264 = vst.msk [vmem:[%s16275_s5 + $0x8c] sm:$0xf] %vm1763_vm6, %v9286_v0 }
 0x83a   :  { %9295 = vsyncpa [#allocation6], 1 }
 0x83b   :  { %9296 = vsyncpa [#allocation8], 1 }

</bundles_post_ra>
